<compile_context>
chip_gen: v5e
topology: v5e:2x2
jax: 0.10.0
libtpu: 0.0.40
codegen_flags: <defaults>
</compile_context>

<pallas_src>
import jax
import jax.numpy as jnp
from jax import lax
from jax.experimental import pallas as pl
from jax.experimental.pallas import tpu as pltpu


N_WIH_CHUNKS = 8   # W_ih streamed HBM->VMEM in this many row-chunks


# ----------------------------------------------------------------------------
# Fused kernel: conv-as-matmul + ReLU, relayout, LSTM projection + recurrence,
# classifier head — one grid-less pallas_call.
# ----------------------------------------------------------------------------
def smol_critic_kernel(patches_ref, wc_ref, bc_ref, wih_hbm_ref, whh_ref,
                       bl_ref, w1_ref, b1_ref, w2_ref, b2_ref, out_ref,
                       stage_ref, wih_vmem_ref, dma_sem):
    # Static dims (trace time).
    seq, feat = stage_ref.shape          # (T, HW*OC); T == LSTM sequence length
    g4 = wih_vmem_ref.shape[1]           # 4*HID
    hid = whh_ref.shape[0]               # HID
    oc = wc_ref.shape[1]                 # conv out channels
    hw = feat // oc                      # Hout*Wout
    ck = feat // N_WIH_CHUNKS            # W_ih rows / feature cols per chunk

    # (1) Issue all W_ih chunk DMAs up front (each chunk has its own sem);
    #     they are consumed chunk-by-chunk in step (4).
    copies = [
        pltpu.make_async_copy(wih_hbm_ref.at[pl.ds(i * ck, ck)],
                              wih_vmem_ref.at[pl.ds(i * ck, ck)],
                              dma_sem.at[i])
        for i in range(N_WIH_CHUNKS)
    ]
    for cp in copies:
        cp.start()

    # (2) Conv2d(k=4, s=2, p=1) as one im2col matmul (bf16 operands, f32 acc)
    #     + bias + ReLU.  Rows ordered (h, w, n).  Kept in vregs (no scratch).
    conv = jnp.dot(patches_ref[...], wc_ref[...],
                   preferred_element_type=jnp.float32)
    conv = jnp.maximum(conv + bc_ref[...], 0.0)            # (HW*T, OC) f32

    # (3) One-time relayout (HW*T, OC) -> (T, HW*OC) through the small VMEM
    #     staging buffer: one (T, OC) block store per spatial position.
    #     Column ordering hw*OC + oc matches the pre-permuted W_ih rows.
    for s in range(hw):
        stage_ref[:, s * oc:(s + 1) * oc] = conv[s * seq:(s + 1) * seq, :]

    # (4) LSTM input projection: gates_x = feat @ W_ih_perm + (b_ih + b_hh),
    #     chunked along the 2048-wide contraction to match the W_ih DMA
    #     chunks.  bf16 MXU operands, f32 accumulation; every W_ih row passes
    #     through the MXU exactly once.
    gx = jnp.zeros((seq, g4), jnp.float32)
    for i in range(N_WIH_CHUNKS):
        copies[i].wait()                                   # chunk i now in VMEM
        lhs = stage_ref[:, i * ck:(i + 1) * ck].astype(jnp.bfloat16)
        gx = gx + jnp.dot(lhs, wih_vmem_ref[i * ck:(i + 1) * ck, :],
                          preferred_element_type=jnp.float32)
    gx = gx + bl_ref[...]                                  # b_ih + b_hh

    # (5) LSTM recurrence (PyTorch gate order i, f, g, o; h0 = c0 = 0).
    #     Only the small h @ W_hh matmul remains in the per-step loop.
    h = jnp.zeros((1, hid), jnp.float32)
    c = jnp.zeros((1, hid), jnp.float32)
    for t in range(seq):
        gates = gx[t:t + 1, :] + jnp.dot(h, whh_ref[...],
                                         preferred_element_type=jnp.float32)
        i_g = jax.nn.sigmoid(gates[:, 0 * hid:1 * hid])
        f_g = jax.nn.sigmoid(gates[:, 1 * hid:2 * hid])
        g_g = jnp.tanh(gates[:, 2 * hid:3 * hid])
        o_g = jax.nn.sigmoid(gates[:, 3 * hid:4 * hid])
        c = f_g * c + i_g * g_g
        h = o_g * jnp.tanh(c)

    # (6) Classifier: ReLU -> Linear(HID, 32) -> ReLU -> Linear(32, 1).
    z = jnp.maximum(h, 0.0)
    z = jnp.dot(z, w1_ref[...], preferred_element_type=jnp.float32) + b1_ref[...]
    z = jnp.maximum(z, 0.0)
    out_ref[...] = (jnp.dot(z, w2_ref[...], preferred_element_type=jnp.float32)
                    + b2_ref[...])


# ----------------------------------------------------------------------------
# One-time parameter preparation (layout permutation + dtype cast).
# ----------------------------------------------------------------------------
def prepare_params(p):
    oc, cin, kh, kw = p["conv_w"].shape
    k = cin * kh * kw
    g4, feat = p["wih"].shape
    hw = feat // oc                                    # Hout*Wout implied

    # Conv weight in torch flatten order (c, kh, kw) -> (K, OC), bf16.
    w_conv = p["conv_w"].reshape(oc, k).T.astype(jnp.bfloat16)

    # Fold the NCHW flatten reorder (torch f = oc*HW + hw) into W_ih once:
    #   wih_perm[hw*OC + oc, g] = wih[g, oc*HW + hw]
    # and store it bf16 to halve the dominant HBM transfer.
    wih_perm = (p["wih"].reshape(g4, oc, hw).transpose(2, 1, 0)
                .reshape(feat, g4).astype(jnp.bfloat16))

    return dict(
        w_conv=w_conv,
        b_conv=p["conv_b"].reshape(1, oc).astype(jnp.float32),
        wih_perm=wih_perm,
        whh_t=p["whh"].T.astype(jnp.float32),          # (HID, 4*HID)
        b_lstm=(p["bih"] + p["bhh"]).reshape(1, g4).astype(jnp.float32),
        w1_t=p["w1"].T.astype(jnp.float32),            # (HID, 32)
        b1=p["b1"].reshape(1, -1).astype(jnp.float32),
        w2_t=p["w2"].T.astype(jnp.float32),            # (32, 1)
        b2=p["b2"].reshape(1, -1).astype(jnp.float32),
    )


# ----------------------------------------------------------------------------
# im2col glue: rows ordered (h, w, n); columns (c, kh, kw); bf16, no K pad.
# ----------------------------------------------------------------------------
def im2col_patches(x, kh, kw, stride, pad):
    n, c, h, w = x.shape
    hout = (h + 2 * pad - kh) // stride + 1
    wout = (w + 2 * pad - kw) // stride + 1
    xp = jnp.pad(x, ((0, 0), (0, 0), (pad, pad), (pad, pad)))
    cols = [xp[:, :, i:i + stride * hout:stride, j:j + stride * wout:stride]
            for i in range(kh) for j in range(kw)]
    patches = jnp.stack(cols, axis=-1)                 # (N, C, Hout, Wout, KH*KW)
    patches = patches.transpose(2, 3, 0, 1, 4)         # (Hout, Wout, N, C, KH*KW)
    patches = patches.reshape(hout * wout * n, c * kh * kw)
    return patches.astype(jnp.bfloat16), hout, wout


# ----------------------------------------------------------------------------
# Full forward (SmolCritic.forward).
# ----------------------------------------------------------------------------
def smol_critic_forward(x, prep):
    oc = prep["b_conv"].shape[1]
    n = x.shape[0]                                     # LSTM sequence length
    patches, hout, wout = im2col_patches(x, 4, 4, 2, 1)
    feat, g4 = prep["wih_perm"].shape
    assert feat == oc * hout * wout, "LSTM input size mismatch"
    assert feat % N_WIH_CHUNKS == 0

    return pl.pallas_call(
        smol_critic_kernel,
        out_shape=jax.ShapeDtypeStruct((1, 1), jnp.float32),
        in_specs=[
            pl.BlockSpec(memory_space=pltpu.MemorySpace.VMEM),   # patches
            pl.BlockSpec(memory_space=pltpu.MemorySpace.VMEM),   # conv weight
            pl.BlockSpec(memory_space=pltpu.MemorySpace.VMEM),   # conv bias
            pl.BlockSpec(memory_space=pl.ANY),                   # W_ih (stays in HBM)
            pl.BlockSpec(memory_space=pltpu.MemorySpace.VMEM),   # W_hh
            pl.BlockSpec(memory_space=pltpu.MemorySpace.VMEM),   # b_ih + b_hh
            pl.BlockSpec(memory_space=pltpu.MemorySpace.VMEM),   # w1
            pl.BlockSpec(memory_space=pltpu.MemorySpace.VMEM),   # b1
            pl.BlockSpec(memory_space=pltpu.MemorySpace.VMEM),   # w2
            pl.BlockSpec(memory_space=pltpu.MemorySpace.VMEM),   # b2
        ],
        out_specs=pl.BlockSpec(memory_space=pltpu.MemorySpace.VMEM),
        scratch_shapes=[
            pltpu.VMEM((n, feat), jnp.float32),                  # (T, HW*OC) stage
            pltpu.VMEM((feat, g4), jnp.bfloat16),                # W_ih landing buf
            pltpu.SemaphoreType.DMA((N_WIH_CHUNKS,)),            # per-chunk sems
        ],
    )(patches, prep["w_conv"], prep["b_conv"], prep["wih_perm"], prep["whh_t"],
      prep["b_lstm"], prep["w1_t"], prep["b1"], prep["w2_t"], prep["b2"])


# ----------------------------------------------------------------------------
# Independent pure-JAX reference (lax.conv + plain matmul LSTM), with the same
# bf16 operand quantization (conv inputs, features, W_ih) and f32 accumulation
# that the kernel uses.
# ----------------------------------------------------------------------------
def smol_critic_reference(x, p):
    conv = lax.conv_general_dilated(
        x.astype(jnp.bfloat16), p["conv_w"].astype(jnp.bfloat16),
        window_strides=(2, 2), padding=((1, 1), (1, 1)),
        dimension_numbers=("NCHW", "OIHW", "NCHW"),
        preferred_element_type=jnp.float32)
    conv = jnp.maximum(conv + p["conv_b"][None, :, None, None], 0.0)
    feat = conv.reshape(x.shape[0], -1)                          # NCHW flatten

    hid = p["whh"].shape[1]
    gates_x = (jnp.dot(feat.astype(jnp.bfloat16),
                       p["wih"].astype(jnp.bfloat16).T,
                       preferred_element_type=jnp.float32)
               + (p["bih"] + p["bhh"])[None, :])

    h = jnp.zeros((1, hid), jnp.float32)
    c = jnp.zeros((1, hid), jnp.float32)
    for t in range(feat.shape[0]):
        gates = gates_x[t:t + 1] + h @ p["whh"].T
        i = jax.nn.sigmoid(gates[:, 0 * hid:1 * hid])
        f = jax.nn.sigmoid(gates[:, 1 * hid:2 * hid])
        g = jnp.tanh(gates[:, 2 * hid:3 * hid])
        o = jax.nn.sigmoid(gates[:, 3 * hid:4 * hid])
        c = f * c + i * g
        h = o * jnp.tanh(c)
    z = jnp.maximum(h, 0.0)
    z = jnp.maximum(z @ p["w1"].T + p["b1"][None, :], 0.0)
    return z @ p["w2"].T + p["b2"][None, :]


if __name__ == "__main__":
    key = jax.random.PRNGKey(0)
    N, C, H, W = 2, 4, 16, 16          # N doubles as the LSTM sequence length
    OC, K = 32, 4
    HOUT = (H + 2 - K) // 2 + 1
    WOUT = (W + 2 - K) // 2 + 1
    F = OC * HOUT * WOUT               # 2048 at these shapes (real model: 38400)
    HID = 128

    keys = jax.random.split(key, 11)

    def uni(k, shape, bound):
        return jax.random.uniform(k, shape, jnp.float32, -bound, bound)

    kc = 1.0 / jnp.sqrt(C * K * K)
    kl = 1.0 / jnp.sqrt(HID)
    params = {
        "conv_w": uni(keys[0], (OC, C, K, K), kc),
        "conv_b": uni(keys[1], (OC,), kc),
        "wih": uni(keys[2], (4 * HID, F), kl),
        "whh": uni(keys[3], (4 * HID, HID), kl),
        "bih": uni(keys[4], (4 * HID,), kl),
        "bhh": uni(keys[5], (4 * HID,), kl),
        "w1": uni(keys[6], (32, HID), kl),
        "b1": uni(keys[7], (32,), kl),
        "w2": uni(keys[8], (1, 32), 1.0 / jnp.sqrt(32.0)),
        "b2": uni(keys[9], (1,), 1.0 / jnp.sqrt(32.0)),
    }
    x = jax.random.normal(keys[10], (N, C, H, W), jnp.float32)

    prep = prepare_params(params)
    fwd = jax.jit(smol_critic_forward)
    out = jax.block_until_ready(fwd(x, prep))
    assert out.shape == (1, 1), out.shape

    ref = jax.block_until_ready(smol_critic_reference(x, params))
    # Tolerance accounts for the deliberate bf16 operand storage (conv inputs,
    # features, W_ih); both kernel and reference quantize identically, f32 acc.
    assert jnp.allclose(out, ref, rtol=2e-3, atol=2e-3), (out, ref)

    print("KERNEL_OK")
</pallas_src>

<mosaic_0001>
module attributes {stable_mosaic.version = 11 : i64} {
  func.func @smol_critic_kernel(%arg0: memref<128x64xbf16, #tpu.memory_space<vmem>>, %arg1: memref<64x32xbf16, #tpu.memory_space<vmem>>, %arg2: memref<1x32xf32, #tpu.memory_space<vmem>>, %arg3: memref<2048x512xbf16, #tpu.memory_space<any>>, %arg4: memref<128x512xf32, #tpu.memory_space<vmem>>, %arg5: memref<1x512xf32, #tpu.memory_space<vmem>>, %arg6: memref<128x32xf32, #tpu.memory_space<vmem>>, %arg7: memref<1x32xf32, #tpu.memory_space<vmem>>, %arg8: memref<32x1xf32, #tpu.memory_space<vmem>>, %arg9: memref<1x1xf32, #tpu.memory_space<vmem>>, %arg10: memref<1x1xf32, #tpu.memory_space<vmem>>, %arg11: memref<2x2048xf32, #tpu.memory_space<vmem>>, %arg12: memref<2048x512xbf16, #tpu.memory_space<vmem>>, %arg13: memref<8x!tpu.dma_semaphore, #tpu.memory_space<semaphore_mem>>) attributes {dimension_semantics = [], scalar_prefetch = 0 : i64, scratch_operands = 3 : i64, tpu.core_type = #tpu.core_type<tc>} {
    %c0_i32 = arith.constant 0 : i32
    %c0_i32_0 = arith.constant 0 : i32
    %c0_i32_1 = arith.constant 0 : i32
    %0 = tpu.memref_slice %arg3[%c0_i32_0, %c0_i32_1] : memref<2048x512xbf16, #tpu.memory_space<any>> -> memref<256x512xbf16, #tpu.memory_space<any>>
    %c0_i32_2 = arith.constant 0 : i32
    %c0_i32_3 = arith.constant 0 : i32
    %1 = tpu.memref_slice %arg12[%c0_i32_2, %c0_i32_3] : memref<2048x512xbf16, #tpu.memory_space<vmem>> -> memref<256x512xbf16, #tpu.memory_space<vmem>>
    %2 = tpu.memref_slice %arg13[%c0_i32] : memref<8x!tpu.dma_semaphore, #tpu.memory_space<semaphore_mem>> -> memref<1x!tpu.dma_semaphore, #tpu.memory_space<semaphore_mem>>
    %3 = tpu.memref_squeeze %2 : memref<1x!tpu.dma_semaphore, #tpu.memory_space<semaphore_mem>> -> memref<!tpu.dma_semaphore, #tpu.memory_space<semaphore_mem>>
    tpu.enqueue_dma source(%0 : memref<256x512xbf16, #tpu.memory_space<any>>) target(%1 : memref<256x512xbf16, #tpu.memory_space<vmem>>) target_semaphore(%3 : memref<!tpu.dma_semaphore, #tpu.memory_space<semaphore_mem>>)
    %c1_i32 = arith.constant 1 : i32
    %c256_i32 = arith.constant 256 : i32
    %c0_i32_4 = arith.constant 0 : i32
    %4 = tpu.memref_slice %arg3[%c256_i32, %c0_i32_4] : memref<2048x512xbf16, #tpu.memory_space<any>> -> memref<256x512xbf16, #tpu.memory_space<any>>
    %c256_i32_5 = arith.constant 256 : i32
    %c0_i32_6 = arith.constant 0 : i32
    %5 = tpu.memref_slice %arg12[%c256_i32_5, %c0_i32_6] : memref<2048x512xbf16, #tpu.memory_space<vmem>> -> memref<256x512xbf16, #tpu.memory_space<vmem>>
    %6 = tpu.memref_slice %arg13[%c1_i32] : memref<8x!tpu.dma_semaphore, #tpu.memory_space<semaphore_mem>> -> memref<1x!tpu.dma_semaphore, #tpu.memory_space<semaphore_mem>>
    %7 = tpu.memref_squeeze %6 : memref<1x!tpu.dma_semaphore, #tpu.memory_space<semaphore_mem>> -> memref<!tpu.dma_semaphore, #tpu.memory_space<semaphore_mem>>
    tpu.enqueue_dma source(%4 : memref<256x512xbf16, #tpu.memory_space<any>>) target(%5 : memref<256x512xbf16, #tpu.memory_space<vmem>>) target_semaphore(%7 : memref<!tpu.dma_semaphore, #tpu.memory_space<semaphore_mem>>)
    %c2_i32 = arith.constant 2 : i32
    %c512_i32 = arith.constant 512 : i32
    %c0_i32_7 = arith.constant 0 : i32
    %8 = tpu.memref_slice %arg3[%c512_i32, %c0_i32_7] : memref<2048x512xbf16, #tpu.memory_space<any>> -> memref<256x512xbf16, #tpu.memory_space<any>>
    %c512_i32_8 = arith.constant 512 : i32
    %c0_i32_9 = arith.constant 0 : i32
    %9 = tpu.memref_slice %arg12[%c512_i32_8, %c0_i32_9] : memref<2048x512xbf16, #tpu.memory_space<vmem>> -> memref<256x512xbf16, #tpu.memory_space<vmem>>
    %10 = tpu.memref_slice %arg13[%c2_i32] : memref<8x!tpu.dma_semaphore, #tpu.memory_space<semaphore_mem>> -> memref<1x!tpu.dma_semaphore, #tpu.memory_space<semaphore_mem>>
    %11 = tpu.memref_squeeze %10 : memref<1x!tpu.dma_semaphore, #tpu.memory_space<semaphore_mem>> -> memref<!tpu.dma_semaphore, #tpu.memory_space<semaphore_mem>>
    tpu.enqueue_dma source(%8 : memref<256x512xbf16, #tpu.memory_space<any>>) target(%9 : memref<256x512xbf16, #tpu.memory_space<vmem>>) target_semaphore(%11 : memref<!tpu.dma_semaphore, #tpu.memory_space<semaphore_mem>>)
    %c3_i32 = arith.constant 3 : i32
    %c768_i32 = arith.constant 768 : i32
    %c0_i32_10 = arith.constant 0 : i32
    %12 = tpu.memref_slice %arg3[%c768_i32, %c0_i32_10] : memref<2048x512xbf16, #tpu.memory_space<any>> -> memref<256x512xbf16, #tpu.memory_space<any>>
    %c768_i32_11 = arith.constant 768 : i32
    %c0_i32_12 = arith.constant 0 : i32
    %13 = tpu.memref_slice %arg12[%c768_i32_11, %c0_i32_12] : memref<2048x512xbf16, #tpu.memory_space<vmem>> -> memref<256x512xbf16, #tpu.memory_space<vmem>>
    %14 = tpu.memref_slice %arg13[%c3_i32] : memref<8x!tpu.dma_semaphore, #tpu.memory_space<semaphore_mem>> -> memref<1x!tpu.dma_semaphore, #tpu.memory_space<semaphore_mem>>
    %15 = tpu.memref_squeeze %14 : memref<1x!tpu.dma_semaphore, #tpu.memory_space<semaphore_mem>> -> memref<!tpu.dma_semaphore, #tpu.memory_space<semaphore_mem>>
    tpu.enqueue_dma source(%12 : memref<256x512xbf16, #tpu.memory_space<any>>) target(%13 : memref<256x512xbf16, #tpu.memory_space<vmem>>) target_semaphore(%15 : memref<!tpu.dma_semaphore, #tpu.memory_space<semaphore_mem>>)
    %c4_i32 = arith.constant 4 : i32
    %c1024_i32 = arith.constant 1024 : i32
    %c0_i32_13 = arith.constant 0 : i32
    %16 = tpu.memref_slice %arg3[%c1024_i32, %c0_i32_13] : memref<2048x512xbf16, #tpu.memory_space<any>> -> memref<256x512xbf16, #tpu.memory_space<any>>
    %c1024_i32_14 = arith.constant 1024 : i32
    %c0_i32_15 = arith.constant 0 : i32
    %17 = tpu.memref_slice %arg12[%c1024_i32_14, %c0_i32_15] : memref<2048x512xbf16, #tpu.memory_space<vmem>> -> memref<256x512xbf16, #tpu.memory_space<vmem>>
    %18 = tpu.memref_slice %arg13[%c4_i32] : memref<8x!tpu.dma_semaphore, #tpu.memory_space<semaphore_mem>> -> memref<1x!tpu.dma_semaphore, #tpu.memory_space<semaphore_mem>>
    %19 = tpu.memref_squeeze %18 : memref<1x!tpu.dma_semaphore, #tpu.memory_space<semaphore_mem>> -> memref<!tpu.dma_semaphore, #tpu.memory_space<semaphore_mem>>
    tpu.enqueue_dma source(%16 : memref<256x512xbf16, #tpu.memory_space<any>>) target(%17 : memref<256x512xbf16, #tpu.memory_space<vmem>>) target_semaphore(%19 : memref<!tpu.dma_semaphore, #tpu.memory_space<semaphore_mem>>)
    %c5_i32 = arith.constant 5 : i32
    %c1280_i32 = arith.constant 1280 : i32
    %c0_i32_16 = arith.constant 0 : i32
    %20 = tpu.memref_slice %arg3[%c1280_i32, %c0_i32_16] : memref<2048x512xbf16, #tpu.memory_space<any>> -> memref<256x512xbf16, #tpu.memory_space<any>>
    %c1280_i32_17 = arith.constant 1280 : i32
    %c0_i32_18 = arith.constant 0 : i32
    %21 = tpu.memref_slice %arg12[%c1280_i32_17, %c0_i32_18] : memref<2048x512xbf16, #tpu.memory_space<vmem>> -> memref<256x512xbf16, #tpu.memory_space<vmem>>
    %22 = tpu.memref_slice %arg13[%c5_i32] : memref<8x!tpu.dma_semaphore, #tpu.memory_space<semaphore_mem>> -> memref<1x!tpu.dma_semaphore, #tpu.memory_space<semaphore_mem>>
    %23 = tpu.memref_squeeze %22 : memref<1x!tpu.dma_semaphore, #tpu.memory_space<semaphore_mem>> -> memref<!tpu.dma_semaphore, #tpu.memory_space<semaphore_mem>>
    tpu.enqueue_dma source(%20 : memref<256x512xbf16, #tpu.memory_space<any>>) target(%21 : memref<256x512xbf16, #tpu.memory_space<vmem>>) target_semaphore(%23 : memref<!tpu.dma_semaphore, #tpu.memory_space<semaphore_mem>>)
    %c6_i32 = arith.constant 6 : i32
    %c1536_i32 = arith.constant 1536 : i32
    %c0_i32_19 = arith.constant 0 : i32
    %24 = tpu.memref_slice %arg3[%c1536_i32, %c0_i32_19] : memref<2048x512xbf16, #tpu.memory_space<any>> -> memref<256x512xbf16, #tpu.memory_space<any>>
    %c1536_i32_20 = arith.constant 1536 : i32
    %c0_i32_21 = arith.constant 0 : i32
    %25 = tpu.memref_slice %arg12[%c1536_i32_20, %c0_i32_21] : memref<2048x512xbf16, #tpu.memory_space<vmem>> -> memref<256x512xbf16, #tpu.memory_space<vmem>>
    %26 = tpu.memref_slice %arg13[%c6_i32] : memref<8x!tpu.dma_semaphore, #tpu.memory_space<semaphore_mem>> -> memref<1x!tpu.dma_semaphore, #tpu.memory_space<semaphore_mem>>
    %27 = tpu.memref_squeeze %26 : memref<1x!tpu.dma_semaphore, #tpu.memory_space<semaphore_mem>> -> memref<!tpu.dma_semaphore, #tpu.memory_space<semaphore_mem>>
    tpu.enqueue_dma source(%24 : memref<256x512xbf16, #tpu.memory_space<any>>) target(%25 : memref<256x512xbf16, #tpu.memory_space<vmem>>) target_semaphore(%27 : memref<!tpu.dma_semaphore, #tpu.memory_space<semaphore_mem>>)
    %c7_i32 = arith.constant 7 : i32
    %c1792_i32 = arith.constant 1792 : i32
    %c0_i32_22 = arith.constant 0 : i32
    %28 = tpu.memref_slice %arg3[%c1792_i32, %c0_i32_22] : memref<2048x512xbf16, #tpu.memory_space<any>> -> memref<256x512xbf16, #tpu.memory_space<any>>
    %c1792_i32_23 = arith.constant 1792 : i32
    %c0_i32_24 = arith.constant 0 : i32
    %29 = tpu.memref_slice %arg12[%c1792_i32_23, %c0_i32_24] : memref<2048x512xbf16, #tpu.memory_space<vmem>> -> memref<256x512xbf16, #tpu.memory_space<vmem>>
    %30 = tpu.memref_slice %arg13[%c7_i32] : memref<8x!tpu.dma_semaphore, #tpu.memory_space<semaphore_mem>> -> memref<1x!tpu.dma_semaphore, #tpu.memory_space<semaphore_mem>>
    %31 = tpu.memref_squeeze %30 : memref<1x!tpu.dma_semaphore, #tpu.memory_space<semaphore_mem>> -> memref<!tpu.dma_semaphore, #tpu.memory_space<semaphore_mem>>
    tpu.enqueue_dma source(%28 : memref<256x512xbf16, #tpu.memory_space<any>>) target(%29 : memref<256x512xbf16, #tpu.memory_space<vmem>>) target_semaphore(%31 : memref<!tpu.dma_semaphore, #tpu.memory_space<semaphore_mem>>)
    %c0 = arith.constant 0 : index
    %c0_25 = arith.constant 0 : index
    %32 = vector.load %arg0[%c0, %c0_25] : memref<128x64xbf16, #tpu.memory_space<vmem>>, vector<128x64xbf16>
    %c0_26 = arith.constant 0 : index
    %c0_27 = arith.constant 0 : index
    %33 = vector.load %arg1[%c0_26, %c0_27] : memref<64x32xbf16, #tpu.memory_space<vmem>>, vector<64x32xbf16>
    %cst = arith.constant dense<0.000000e+00> : vector<128x32xf32>
    %34 = tpu.matmul %32, %33, %cst {dimension_numbers = #tpu.dot_dimension_numbers<[1], [0], [0], [1], [0, 0, 1, 1], [], []>} : vector<128x64xbf16>, vector<64x32xbf16>, vector<128x32xf32> -> vector<128x32xf32>
    %c0_28 = arith.constant 0 : index
    %c0_29 = arith.constant 0 : index
    %35 = vector.load %arg2[%c0_28, %c0_29] : memref<1x32xf32, #tpu.memory_space<vmem>>, vector<1x32xf32>
    %36 = vector.broadcast %35 : vector<1x32xf32> to vector<128x32xf32>
    %37 = arith.addf %34, %36 : vector<128x32xf32>
    %cst_30 = arith.constant 0.000000e+00 : f32
    %38 = vector.broadcast %cst_30 : f32 to vector<128x32xf32>
    %39 = arith.maximumf %37, %38 : vector<128x32xf32>
    %40 = vector.extract_strided_slice %39 {offsets = [0, 0], sizes = [2, 32], strides = [1, 1]} : vector<128x32xf32> to vector<2x32xf32>
    %c0_31 = arith.constant 0 : index
    %c0_32 = arith.constant 0 : index
    %41 = vector.load %arg11[%c0_31, %c0_32] : memref<2x2048xf32, #tpu.memory_space<vmem>>, vector<2x32xf32>
    tpu.vector_store %arg11[%c0_31, %c0_32], %40 {strides = array<i32>} : memref<2x2048xf32, #tpu.memory_space<vmem>>, vector<2x32xf32>,
    %42 = vector.extract_strided_slice %39 {offsets = [2, 0], sizes = [2, 32], strides = [1, 1]} : vector<128x32xf32> to vector<2x32xf32>
    %c0_33 = arith.constant 0 : index
    %c32 = arith.constant 32 : index
    %43 = vector.load %arg11[%c0_33, %c32] : memref<2x2048xf32, #tpu.memory_space<vmem>>, vector<2x32xf32>
    tpu.vector_store %arg11[%c0_33, %c32], %42 {strides = array<i32>} : memref<2x2048xf32, #tpu.memory_space<vmem>>, vector<2x32xf32>,
    %44 = vector.extract_strided_slice %39 {offsets = [4, 0], sizes = [2, 32], strides = [1, 1]} : vector<128x32xf32> to vector<2x32xf32>
    %c0_34 = arith.constant 0 : index
    %c64 = arith.constant 64 : index
    %45 = vector.load %arg11[%c0_34, %c64] : memref<2x2048xf32, #tpu.memory_space<vmem>>, vector<2x32xf32>
    tpu.vector_store %arg11[%c0_34, %c64], %44 {strides = array<i32>} : memref<2x2048xf32, #tpu.memory_space<vmem>>, vector<2x32xf32>,
    %46 = vector.extract_strided_slice %39 {offsets = [6, 0], sizes = [2, 32], strides = [1, 1]} : vector<128x32xf32> to vector<2x32xf32>
    %c0_35 = arith.constant 0 : index
    %c96 = arith.constant 96 : index
    %47 = vector.load %arg11[%c0_35, %c96] : memref<2x2048xf32, #tpu.memory_space<vmem>>, vector<2x32xf32>
    tpu.vector_store %arg11[%c0_35, %c96], %46 {strides = array<i32>} : memref<2x2048xf32, #tpu.memory_space<vmem>>, vector<2x32xf32>,
    %48 = vector.extract_strided_slice %39 {offsets = [8, 0], sizes = [2, 32], strides = [1, 1]} : vector<128x32xf32> to vector<2x32xf32>
    %c0_36 = arith.constant 0 : index
    %c128 = arith.constant 128 : index
    %49 = vector.load %arg11[%c0_36, %c128] : memref<2x2048xf32, #tpu.memory_space<vmem>>, vector<2x32xf32>
    tpu.vector_store %arg11[%c0_36, %c128], %48 {strides = array<i32>} : memref<2x2048xf32, #tpu.memory_space<vmem>>, vector<2x32xf32>,
    %50 = vector.extract_strided_slice %39 {offsets = [10, 0], sizes = [2, 32], strides = [1, 1]} : vector<128x32xf32> to vector<2x32xf32>
    %c0_37 = arith.constant 0 : index
    %c160 = arith.constant 160 : index
    %51 = vector.load %arg11[%c0_37, %c160] : memref<2x2048xf32, #tpu.memory_space<vmem>>, vector<2x32xf32>
    tpu.vector_store %arg11[%c0_37, %c160], %50 {strides = array<i32>} : memref<2x2048xf32, #tpu.memory_space<vmem>>, vector<2x32xf32>,
    %52 = vector.extract_strided_slice %39 {offsets = [12, 0], sizes = [2, 32], strides = [1, 1]} : vector<128x32xf32> to vector<2x32xf32>
    %c0_38 = arith.constant 0 : index
    %c192 = arith.constant 192 : index
    %53 = vector.load %arg11[%c0_38, %c192] : memref<2x2048xf32, #tpu.memory_space<vmem>>, vector<2x32xf32>
    tpu.vector_store %arg11[%c0_38, %c192], %52 {strides = array<i32>} : memref<2x2048xf32, #tpu.memory_space<vmem>>, vector<2x32xf32>,
    %54 = vector.extract_strided_slice %39 {offsets = [14, 0], sizes = [2, 32], strides = [1, 1]} : vector<128x32xf32> to vector<2x32xf32>
    %c0_39 = arith.constant 0 : index
    %c224 = arith.constant 224 : index
    %55 = vector.load %arg11[%c0_39, %c224] : memref<2x2048xf32, #tpu.memory_space<vmem>>, vector<2x32xf32>
    tpu.vector_store %arg11[%c0_39, %c224], %54 {strides = array<i32>} : memref<2x2048xf32, #tpu.memory_space<vmem>>, vector<2x32xf32>,
    %56 = vector.extract_strided_slice %39 {offsets = [16, 0], sizes = [2, 32], strides = [1, 1]} : vector<128x32xf32> to vector<2x32xf32>
    %c0_40 = arith.constant 0 : index
    %c256 = arith.constant 256 : index
    %57 = vector.load %arg11[%c0_40, %c256] : memref<2x2048xf32, #tpu.memory_space<vmem>>, vector<2x32xf32>
    tpu.vector_store %arg11[%c0_40, %c256], %56 {strides = array<i32>} : memref<2x2048xf32, #tpu.memory_space<vmem>>, vector<2x32xf32>,
    %58 = vector.extract_strided_slice %39 {offsets = [18, 0], sizes = [2, 32], strides = [1, 1]} : vector<128x32xf32> to vector<2x32xf32>
    %c0_41 = arith.constant 0 : index
    %c288 = arith.constant 288 : index
    %59 = vector.load %arg11[%c0_41, %c288] : memref<2x2048xf32, #tpu.memory_space<vmem>>, vector<2x32xf32>
    tpu.vector_store %arg11[%c0_41, %c288], %58 {strides = array<i32>} : memref<2x2048xf32, #tpu.memory_space<vmem>>, vector<2x32xf32>,
    %60 = vector.extract_strided_slice %39 {offsets = [20, 0], sizes = [2, 32], strides = [1, 1]} : vector<128x32xf32> to vector<2x32xf32>
    %c0_42 = arith.constant 0 : index
    %c320 = arith.constant 320 : index
    %61 = vector.load %arg11[%c0_42, %c320] : memref<2x2048xf32, #tpu.memory_space<vmem>>, vector<2x32xf32>
    tpu.vector_store %arg11[%c0_42, %c320], %60 {strides = array<i32>} : memref<2x2048xf32, #tpu.memory_space<vmem>>, vector<2x32xf32>,
    %62 = vector.extract_strided_slice %39 {offsets = [22, 0], sizes = [2, 32], strides = [1, 1]} : vector<128x32xf32> to vector<2x32xf32>
    %c0_43 = arith.constant 0 : index
    %c352 = arith.constant 352 : index
    %63 = vector.load %arg11[%c0_43, %c352] : memref<2x2048xf32, #tpu.memory_space<vmem>>, vector<2x32xf32>
    tpu.vector_store %arg11[%c0_43, %c352], %62 {strides = array<i32>} : memref<2x2048xf32, #tpu.memory_space<vmem>>, vector<2x32xf32>,
    %64 = vector.extract_strided_slice %39 {offsets = [24, 0], sizes = [2, 32], strides = [1, 1]} : vector<128x32xf32> to vector<2x32xf32>
    %c0_44 = arith.constant 0 : index
    %c384 = arith.constant 384 : index
    %65 = vector.load %arg11[%c0_44, %c384] : memref<2x2048xf32, #tpu.memory_space<vmem>>, vector<2x32xf32>
    tpu.vector_store %arg11[%c0_44, %c384], %64 {strides = array<i32>} : memref<2x2048xf32, #tpu.memory_space<vmem>>, vector<2x32xf32>,
    %66 = vector.extract_strided_slice %39 {offsets = [26, 0], sizes = [2, 32], strides = [1, 1]} : vector<128x32xf32> to vector<2x32xf32>
    %c0_45 = arith.constant 0 : index
    %c416 = arith.constant 416 : index
    %67 = vector.load %arg11[%c0_45, %c416] : memref<2x2048xf32, #tpu.memory_space<vmem>>, vector<2x32xf32>
    tpu.vector_store %arg11[%c0_45, %c416], %66 {strides = array<i32>} : memref<2x2048xf32, #tpu.memory_space<vmem>>, vector<2x32xf32>,
    %68 = vector.extract_strided_slice %39 {offsets = [28, 0], sizes = [2, 32], strides = [1, 1]} : vector<128x32xf32> to vector<2x32xf32>
    %c0_46 = arith.constant 0 : index
    %c448 = arith.constant 448 : index
    %69 = vector.load %arg11[%c0_46, %c448] : memref<2x2048xf32, #tpu.memory_space<vmem>>, vector<2x32xf32>
    tpu.vector_store %arg11[%c0_46, %c448], %68 {strides = array<i32>} : memref<2x2048xf32, #tpu.memory_space<vmem>>, vector<2x32xf32>,
    %70 = vector.extract_strided_slice %39 {offsets = [30, 0], sizes = [2, 32], strides = [1, 1]} : vector<128x32xf32> to vector<2x32xf32>
    %c0_47 = arith.constant 0 : index
    %c480 = arith.constant 480 : index
    %71 = vector.load %arg11[%c0_47, %c480] : memref<2x2048xf32, #tpu.memory_space<vmem>>, vector<2x32xf32>
    tpu.vector_store %arg11[%c0_47, %c480], %70 {strides = array<i32>} : memref<2x2048xf32, #tpu.memory_space<vmem>>, vector<2x32xf32>,
    %72 = vector.extract_strided_slice %39 {offsets = [32, 0], sizes = [2, 32], strides = [1, 1]} : vector<128x32xf32> to vector<2x32xf32>
    %c0_48 = arith.constant 0 : index
    %c512 = arith.constant 512 : index
    %73 = vector.load %arg11[%c0_48, %c512] : memref<2x2048xf32, #tpu.memory_space<vmem>>, vector<2x32xf32>
    tpu.vector_store %arg11[%c0_48, %c512], %72 {strides = array<i32>} : memref<2x2048xf32, #tpu.memory_space<vmem>>, vector<2x32xf32>,
    %74 = vector.extract_strided_slice %39 {offsets = [34, 0], sizes = [2, 32], strides = [1, 1]} : vector<128x32xf32> to vector<2x32xf32>
    %c0_49 = arith.constant 0 : index
    %c544 = arith.constant 544 : index
    %75 = vector.load %arg11[%c0_49, %c544] : memref<2x2048xf32, #tpu.memory_space<vmem>>, vector<2x32xf32>
    tpu.vector_store %arg11[%c0_49, %c544], %74 {strides = array<i32>} : memref<2x2048xf32, #tpu.memory_space<vmem>>, vector<2x32xf32>,
    %76 = vector.extract_strided_slice %39 {offsets = [36, 0], sizes = [2, 32], strides = [1, 1]} : vector<128x32xf32> to vector<2x32xf32>
    %c0_50 = arith.constant 0 : index
    %c576 = arith.constant 576 : index
    %77 = vector.load %arg11[%c0_50, %c576] : memref<2x2048xf32, #tpu.memory_space<vmem>>, vector<2x32xf32>
    tpu.vector_store %arg11[%c0_50, %c576], %76 {strides = array<i32>} : memref<2x2048xf32, #tpu.memory_space<vmem>>, vector<2x32xf32>,
    %78 = vector.extract_strided_slice %39 {offsets = [38, 0], sizes = [2, 32], strides = [1, 1]} : vector<128x32xf32> to vector<2x32xf32>
    %c0_51 = arith.constant 0 : index
    %c608 = arith.constant 608 : index
    %79 = vector.load %arg11[%c0_51, %c608] : memref<2x2048xf32, #tpu.memory_space<vmem>>, vector<2x32xf32>
    tpu.vector_store %arg11[%c0_51, %c608], %78 {strides = array<i32>} : memref<2x2048xf32, #tpu.memory_space<vmem>>, vector<2x32xf32>,
    %80 = vector.extract_strided_slice %39 {offsets = [40, 0], sizes = [2, 32], strides = [1, 1]} : vector<128x32xf32> to vector<2x32xf32>
    %c0_52 = arith.constant 0 : index
    %c640 = arith.constant 640 : index
    %81 = vector.load %arg11[%c0_52, %c640] : memref<2x2048xf32, #tpu.memory_space<vmem>>, vector<2x32xf32>
    tpu.vector_store %arg11[%c0_52, %c640], %80 {strides = array<i32>} : memref<2x2048xf32, #tpu.memory_space<vmem>>, vector<2x32xf32>,
    %82 = vector.extract_strided_slice %39 {offsets = [42, 0], sizes = [2, 32], strides = [1, 1]} : vector<128x32xf32> to vector<2x32xf32>
    %c0_53 = arith.constant 0 : index
    %c672 = arith.constant 672 : index
    %83 = vector.load %arg11[%c0_53, %c672] : memref<2x2048xf32, #tpu.memory_space<vmem>>, vector<2x32xf32>
    tpu.vector_store %arg11[%c0_53, %c672], %82 {strides = array<i32>} : memref<2x2048xf32, #tpu.memory_space<vmem>>, vector<2x32xf32>,
    %84 = vector.extract_strided_slice %39 {offsets = [44, 0], sizes = [2, 32], strides = [1, 1]} : vector<128x32xf32> to vector<2x32xf32>
    %c0_54 = arith.constant 0 : index
    %c704 = arith.constant 704 : index
    %85 = vector.load %arg11[%c0_54, %c704] : memref<2x2048xf32, #tpu.memory_space<vmem>>, vector<2x32xf32>
    tpu.vector_store %arg11[%c0_54, %c704], %84 {strides = array<i32>} : memref<2x2048xf32, #tpu.memory_space<vmem>>, vector<2x32xf32>,
    %86 = vector.extract_strided_slice %39 {offsets = [46, 0], sizes = [2, 32], strides = [1, 1]} : vector<128x32xf32> to vector<2x32xf32>
    %c0_55 = arith.constant 0 : index
    %c736 = arith.constant 736 : index
    %87 = vector.load %arg11[%c0_55, %c736] : memref<2x2048xf32, #tpu.memory_space<vmem>>, vector<2x32xf32>
    tpu.vector_store %arg11[%c0_55, %c736], %86 {strides = array<i32>} : memref<2x2048xf32, #tpu.memory_space<vmem>>, vector<2x32xf32>,
    %88 = vector.extract_strided_slice %39 {offsets = [48, 0], sizes = [2, 32], strides = [1, 1]} : vector<128x32xf32> to vector<2x32xf32>
    %c0_56 = arith.constant 0 : index
    %c768 = arith.constant 768 : index
    %89 = vector.load %arg11[%c0_56, %c768] : memref<2x2048xf32, #tpu.memory_space<vmem>>, vector<2x32xf32>
    tpu.vector_store %arg11[%c0_56, %c768], %88 {strides = array<i32>} : memref<2x2048xf32, #tpu.memory_space<vmem>>, vector<2x32xf32>,
    %90 = vector.extract_strided_slice %39 {offsets = [50, 0], sizes = [2, 32], strides = [1, 1]} : vector<128x32xf32> to vector<2x32xf32>
    %c0_57 = arith.constant 0 : index
    %c800 = arith.constant 800 : index
    %91 = vector.load %arg11[%c0_57, %c800] : memref<2x2048xf32, #tpu.memory_space<vmem>>, vector<2x32xf32>
    tpu.vector_store %arg11[%c0_57, %c800], %90 {strides = array<i32>} : memref<2x2048xf32, #tpu.memory_space<vmem>>, vector<2x32xf32>,
    %92 = vector.extract_strided_slice %39 {offsets = [52, 0], sizes = [2, 32], strides = [1, 1]} : vector<128x32xf32> to vector<2x32xf32>
    %c0_58 = arith.constant 0 : index
    %c832 = arith.constant 832 : index
    %93 = vector.load %arg11[%c0_58, %c832] : memref<2x2048xf32, #tpu.memory_space<vmem>>, vector<2x32xf32>
    tpu.vector_store %arg11[%c0_58, %c832], %92 {strides = array<i32>} : memref<2x2048xf32, #tpu.memory_space<vmem>>, vector<2x32xf32>,
    %94 = vector.extract_strided_slice %39 {offsets = [54, 0], sizes = [2, 32], strides = [1, 1]} : vector<128x32xf32> to vector<2x32xf32>
    %c0_59 = arith.constant 0 : index
    %c864 = arith.constant 864 : index
    %95 = vector.load %arg11[%c0_59, %c864] : memref<2x2048xf32, #tpu.memory_space<vmem>>, vector<2x32xf32>
    tpu.vector_store %arg11[%c0_59, %c864], %94 {strides = array<i32>} : memref<2x2048xf32, #tpu.memory_space<vmem>>, vector<2x32xf32>,
    %96 = vector.extract_strided_slice %39 {offsets = [56, 0], sizes = [2, 32], strides = [1, 1]} : vector<128x32xf32> to vector<2x32xf32>
    %c0_60 = arith.constant 0 : index
    %c896 = arith.constant 896 : index
    %97 = vector.load %arg11[%c0_60, %c896] : memref<2x2048xf32, #tpu.memory_space<vmem>>, vector<2x32xf32>
    tpu.vector_store %arg11[%c0_60, %c896], %96 {strides = array<i32>} : memref<2x2048xf32, #tpu.memory_space<vmem>>, vector<2x32xf32>,
    %98 = vector.extract_strided_slice %39 {offsets = [58, 0], sizes = [2, 32], strides = [1, 1]} : vector<128x32xf32> to vector<2x32xf32>
    %c0_61 = arith.constant 0 : index
    %c928 = arith.constant 928 : index
    %99 = vector.load %arg11[%c0_61, %c928] : memref<2x2048xf32, #tpu.memory_space<vmem>>, vector<2x32xf32>
    tpu.vector_store %arg11[%c0_61, %c928], %98 {strides = array<i32>} : memref<2x2048xf32, #tpu.memory_space<vmem>>, vector<2x32xf32>,
    %100 = vector.extract_strided_slice %39 {offsets = [60, 0], sizes = [2, 32], strides = [1, 1]} : vector<128x32xf32> to vector<2x32xf32>
    %c0_62 = arith.constant 0 : index
    %c960 = arith.constant 960 : index
    %101 = vector.load %arg11[%c0_62, %c960] : memref<2x2048xf32, #tpu.memory_space<vmem>>, vector<2x32xf32>
    tpu.vector_store %arg11[%c0_62, %c960], %100 {strides = array<i32>} : memref<2x2048xf32, #tpu.memory_space<vmem>>, vector<2x32xf32>,
    %102 = vector.extract_strided_slice %39 {offsets = [62, 0], sizes = [2, 32], strides = [1, 1]} : vector<128x32xf32> to vector<2x32xf32>
    %c0_63 = arith.constant 0 : index
    %c992 = arith.constant 992 : index
    %103 = vector.load %arg11[%c0_63, %c992] : memref<2x2048xf32, #tpu.memory_space<vmem>>, vector<2x32xf32>
    tpu.vector_store %arg11[%c0_63, %c992], %102 {strides = array<i32>} : memref<2x2048xf32, #tpu.memory_space<vmem>>, vector<2x32xf32>,
    %104 = vector.extract_strided_slice %39 {offsets = [64, 0], sizes = [2, 32], strides = [1, 1]} : vector<128x32xf32> to vector<2x32xf32>
    %c0_64 = arith.constant 0 : index
    %c1024 = arith.constant 1024 : index
    %105 = vector.load %arg11[%c0_64, %c1024] : memref<2x2048xf32, #tpu.memory_space<vmem>>, vector<2x32xf32>
    tpu.vector_store %arg11[%c0_64, %c1024], %104 {strides = array<i32>} : memref<2x2048xf32, #tpu.memory_space<vmem>>, vector<2x32xf32>,
    %106 = vector.extract_strided_slice %39 {offsets = [66, 0], sizes = [2, 32], strides = [1, 1]} : vector<128x32xf32> to vector<2x32xf32>
    %c0_65 = arith.constant 0 : index
    %c1056 = arith.constant 1056 : index
    %107 = vector.load %arg11[%c0_65, %c1056] : memref<2x2048xf32, #tpu.memory_space<vmem>>, vector<2x32xf32>
    tpu.vector_store %arg11[%c0_65, %c1056], %106 {strides = array<i32>} : memref<2x2048xf32, #tpu.memory_space<vmem>>, vector<2x32xf32>,
    %108 = vector.extract_strided_slice %39 {offsets = [68, 0], sizes = [2, 32], strides = [1, 1]} : vector<128x32xf32> to vector<2x32xf32>
    %c0_66 = arith.constant 0 : index
    %c1088 = arith.constant 1088 : index
    %109 = vector.load %arg11[%c0_66, %c1088] : memref<2x2048xf32, #tpu.memory_space<vmem>>, vector<2x32xf32>
    tpu.vector_store %arg11[%c0_66, %c1088], %108 {strides = array<i32>} : memref<2x2048xf32, #tpu.memory_space<vmem>>, vector<2x32xf32>,
    %110 = vector.extract_strided_slice %39 {offsets = [70, 0], sizes = [2, 32], strides = [1, 1]} : vector<128x32xf32> to vector<2x32xf32>
    %c0_67 = arith.constant 0 : index
    %c1120 = arith.constant 1120 : index
    %111 = vector.load %arg11[%c0_67, %c1120] : memref<2x2048xf32, #tpu.memory_space<vmem>>, vector<2x32xf32>
    tpu.vector_store %arg11[%c0_67, %c1120], %110 {strides = array<i32>} : memref<2x2048xf32, #tpu.memory_space<vmem>>, vector<2x32xf32>,
    %112 = vector.extract_strided_slice %39 {offsets = [72, 0], sizes = [2, 32], strides = [1, 1]} : vector<128x32xf32> to vector<2x32xf32>
    %c0_68 = arith.constant 0 : index
    %c1152 = arith.constant 1152 : index
    %113 = vector.load %arg11[%c0_68, %c1152] : memref<2x2048xf32, #tpu.memory_space<vmem>>, vector<2x32xf32>
    tpu.vector_store %arg11[%c0_68, %c1152], %112 {strides = array<i32>} : memref<2x2048xf32, #tpu.memory_space<vmem>>, vector<2x32xf32>,
    %114 = vector.extract_strided_slice %39 {offsets = [74, 0], sizes = [2, 32], strides = [1, 1]} : vector<128x32xf32> to vector<2x32xf32>
    %c0_69 = arith.constant 0 : index
    %c1184 = arith.constant 1184 : index
    %115 = vector.load %arg11[%c0_69, %c1184] : memref<2x2048xf32, #tpu.memory_space<vmem>>, vector<2x32xf32>
    tpu.vector_store %arg11[%c0_69, %c1184], %114 {strides = array<i32>} : memref<2x2048xf32, #tpu.memory_space<vmem>>, vector<2x32xf32>,
    %116 = vector.extract_strided_slice %39 {offsets = [76, 0], sizes = [2, 32], strides = [1, 1]} : vector<128x32xf32> to vector<2x32xf32>
    %c0_70 = arith.constant 0 : index
    %c1216 = arith.constant 1216 : index
    %117 = vector.load %arg11[%c0_70, %c1216] : memref<2x2048xf32, #tpu.memory_space<vmem>>, vector<2x32xf32>
    tpu.vector_store %arg11[%c0_70, %c1216], %116 {strides = array<i32>} : memref<2x2048xf32, #tpu.memory_space<vmem>>, vector<2x32xf32>,
    %118 = vector.extract_strided_slice %39 {offsets = [78, 0], sizes = [2, 32], strides = [1, 1]} : vector<128x32xf32> to vector<2x32xf32>
    %c0_71 = arith.constant 0 : index
    %c1248 = arith.constant 1248 : index
    %119 = vector.load %arg11[%c0_71, %c1248] : memref<2x2048xf32, #tpu.memory_space<vmem>>, vector<2x32xf32>
    tpu.vector_store %arg11[%c0_71, %c1248], %118 {strides = array<i32>} : memref<2x2048xf32, #tpu.memory_space<vmem>>, vector<2x32xf32>,
    %120 = vector.extract_strided_slice %39 {offsets = [80, 0], sizes = [2, 32], strides = [1, 1]} : vector<128x32xf32> to vector<2x32xf32>
    %c0_72 = arith.constant 0 : index
    %c1280 = arith.constant 1280 : index
    %121 = vector.load %arg11[%c0_72, %c1280] : memref<2x2048xf32, #tpu.memory_space<vmem>>, vector<2x32xf32>
    tpu.vector_store %arg11[%c0_72, %c1280], %120 {strides = array<i32>} : memref<2x2048xf32, #tpu.memory_space<vmem>>, vector<2x32xf32>,
    %122 = vector.extract_strided_slice %39 {offsets = [82, 0], sizes = [2, 32], strides = [1, 1]} : vector<128x32xf32> to vector<2x32xf32>
    %c0_73 = arith.constant 0 : index
    %c1312 = arith.constant 1312 : index
    %123 = vector.load %arg11[%c0_73, %c1312] : memref<2x2048xf32, #tpu.memory_space<vmem>>, vector<2x32xf32>
    tpu.vector_store %arg11[%c0_73, %c1312], %122 {strides = array<i32>} : memref<2x2048xf32, #tpu.memory_space<vmem>>, vector<2x32xf32>,
    %124 = vector.extract_strided_slice %39 {offsets = [84, 0], sizes = [2, 32], strides = [1, 1]} : vector<128x32xf32> to vector<2x32xf32>
    %c0_74 = arith.constant 0 : index
    %c1344 = arith.constant 1344 : index
    %125 = vector.load %arg11[%c0_74, %c1344] : memref<2x2048xf32, #tpu.memory_space<vmem>>, vector<2x32xf32>
    tpu.vector_store %arg11[%c0_74, %c1344], %124 {strides = array<i32>} : memref<2x2048xf32, #tpu.memory_space<vmem>>, vector<2x32xf32>,
    %126 = vector.extract_strided_slice %39 {offsets = [86, 0], sizes = [2, 32], strides = [1, 1]} : vector<128x32xf32> to vector<2x32xf32>
    %c0_75 = arith.constant 0 : index
    %c1376 = arith.constant 1376 : index
    %127 = vector.load %arg11[%c0_75, %c1376] : memref<2x2048xf32, #tpu.memory_space<vmem>>, vector<2x32xf32>
    tpu.vector_store %arg11[%c0_75, %c1376], %126 {strides = array<i32>} : memref<2x2048xf32, #tpu.memory_space<vmem>>, vector<2x32xf32>,
    %128 = vector.extract_strided_slice %39 {offsets = [88, 0], sizes = [2, 32], strides = [1, 1]} : vector<128x32xf32> to vector<2x32xf32>
    %c0_76 = arith.constant 0 : index
    %c1408 = arith.constant 1408 : index
    %129 = vector.load %arg11[%c0_76, %c1408] : memref<2x2048xf32, #tpu.memory_space<vmem>>, vector<2x32xf32>
    tpu.vector_store %arg11[%c0_76, %c1408], %128 {strides = array<i32>} : memref<2x2048xf32, #tpu.memory_space<vmem>>, vector<2x32xf32>,
    %130 = vector.extract_strided_slice %39 {offsets = [90, 0], sizes = [2, 32], strides = [1, 1]} : vector<128x32xf32> to vector<2x32xf32>
    %c0_77 = arith.constant 0 : index
    %c1440 = arith.constant 1440 : index
    %131 = vector.load %arg11[%c0_77, %c1440] : memref<2x2048xf32, #tpu.memory_space<vmem>>, vector<2x32xf32>
    tpu.vector_store %arg11[%c0_77, %c1440], %130 {strides = array<i32>} : memref<2x2048xf32, #tpu.memory_space<vmem>>, vector<2x32xf32>,
    %132 = vector.extract_strided_slice %39 {offsets = [92, 0], sizes = [2, 32], strides = [1, 1]} : vector<128x32xf32> to vector<2x32xf32>
    %c0_78 = arith.constant 0 : index
    %c1472 = arith.constant 1472 : index
    %133 = vector.load %arg11[%c0_78, %c1472] : memref<2x2048xf32, #tpu.memory_space<vmem>>, vector<2x32xf32>
    tpu.vector_store %arg11[%c0_78, %c1472], %132 {strides = array<i32>} : memref<2x2048xf32, #tpu.memory_space<vmem>>, vector<2x32xf32>,
    %134 = vector.extract_strided_slice %39 {offsets = [94, 0], sizes = [2, 32], strides = [1, 1]} : vector<128x32xf32> to vector<2x32xf32>
    %c0_79 = arith.constant 0 : index
    %c1504 = arith.constant 1504 : index
    %135 = vector.load %arg11[%c0_79, %c1504] : memref<2x2048xf32, #tpu.memory_space<vmem>>, vector<2x32xf32>
    tpu.vector_store %arg11[%c0_79, %c1504], %134 {strides = array<i32>} : memref<2x2048xf32, #tpu.memory_space<vmem>>, vector<2x32xf32>,
    %136 = vector.extract_strided_slice %39 {offsets = [96, 0], sizes = [2, 32], strides = [1, 1]} : vector<128x32xf32> to vector<2x32xf32>
    %c0_80 = arith.constant 0 : index
    %c1536 = arith.constant 1536 : index
    %137 = vector.load %arg11[%c0_80, %c1536] : memref<2x2048xf32, #tpu.memory_space<vmem>>, vector<2x32xf32>
    tpu.vector_store %arg11[%c0_80, %c1536], %136 {strides = array<i32>} : memref<2x2048xf32, #tpu.memory_space<vmem>>, vector<2x32xf32>,
    %138 = vector.extract_strided_slice %39 {offsets = [98, 0], sizes = [2, 32], strides = [1, 1]} : vector<128x32xf32> to vector<2x32xf32>
    %c0_81 = arith.constant 0 : index
    %c1568 = arith.constant 1568 : index
    %139 = vector.load %arg11[%c0_81, %c1568] : memref<2x2048xf32, #tpu.memory_space<vmem>>, vector<2x32xf32>
    tpu.vector_store %arg11[%c0_81, %c1568], %138 {strides = array<i32>} : memref<2x2048xf32, #tpu.memory_space<vmem>>, vector<2x32xf32>,
    %140 = vector.extract_strided_slice %39 {offsets = [100, 0], sizes = [2, 32], strides = [1, 1]} : vector<128x32xf32> to vector<2x32xf32>
    %c0_82 = arith.constant 0 : index
    %c1600 = arith.constant 1600 : index
    %141 = vector.load %arg11[%c0_82, %c1600] : memref<2x2048xf32, #tpu.memory_space<vmem>>, vector<2x32xf32>
    tpu.vector_store %arg11[%c0_82, %c1600], %140 {strides = array<i32>} : memref<2x2048xf32, #tpu.memory_space<vmem>>, vector<2x32xf32>,
    %142 = vector.extract_strided_slice %39 {offsets = [102, 0], sizes = [2, 32], strides = [1, 1]} : vector<128x32xf32> to vector<2x32xf32>
    %c0_83 = arith.constant 0 : index
    %c1632 = arith.constant 1632 : index
    %143 = vector.load %arg11[%c0_83, %c1632] : memref<2x2048xf32, #tpu.memory_space<vmem>>, vector<2x32xf32>
    tpu.vector_store %arg11[%c0_83, %c1632], %142 {strides = array<i32>} : memref<2x2048xf32, #tpu.memory_space<vmem>>, vector<2x32xf32>,
    %144 = vector.extract_strided_slice %39 {offsets = [104, 0], sizes = [2, 32], strides = [1, 1]} : vector<128x32xf32> to vector<2x32xf32>
    %c0_84 = arith.constant 0 : index
    %c1664 = arith.constant 1664 : index
    %145 = vector.load %arg11[%c0_84, %c1664] : memref<2x2048xf32, #tpu.memory_space<vmem>>, vector<2x32xf32>
    tpu.vector_store %arg11[%c0_84, %c1664], %144 {strides = array<i32>} : memref<2x2048xf32, #tpu.memory_space<vmem>>, vector<2x32xf32>,
    %146 = vector.extract_strided_slice %39 {offsets = [106, 0], sizes = [2, 32], strides = [1, 1]} : vector<128x32xf32> to vector<2x32xf32>
    %c0_85 = arith.constant 0 : index
    %c1696 = arith.constant 1696 : index
    %147 = vector.load %arg11[%c0_85, %c1696] : memref<2x2048xf32, #tpu.memory_space<vmem>>, vector<2x32xf32>
    tpu.vector_store %arg11[%c0_85, %c1696], %146 {strides = array<i32>} : memref<2x2048xf32, #tpu.memory_space<vmem>>, vector<2x32xf32>,
    %148 = vector.extract_strided_slice %39 {offsets = [108, 0], sizes = [2, 32], strides = [1, 1]} : vector<128x32xf32> to vector<2x32xf32>
    %c0_86 = arith.constant 0 : index
    %c1728 = arith.constant 1728 : index
    %149 = vector.load %arg11[%c0_86, %c1728] : memref<2x2048xf32, #tpu.memory_space<vmem>>, vector<2x32xf32>
    tpu.vector_store %arg11[%c0_86, %c1728], %148 {strides = array<i32>} : memref<2x2048xf32, #tpu.memory_space<vmem>>, vector<2x32xf32>,
    %150 = vector.extract_strided_slice %39 {offsets = [110, 0], sizes = [2, 32], strides = [1, 1]} : vector<128x32xf32> to vector<2x32xf32>
    %c0_87 = arith.constant 0 : index
    %c1760 = arith.constant 1760 : index
    %151 = vector.load %arg11[%c0_87, %c1760] : memref<2x2048xf32, #tpu.memory_space<vmem>>, vector<2x32xf32>
    tpu.vector_store %arg11[%c0_87, %c1760], %150 {strides = array<i32>} : memref<2x2048xf32, #tpu.memory_space<vmem>>, vector<2x32xf32>,
    %152 = vector.extract_strided_slice %39 {offsets = [112, 0], sizes = [2, 32], strides = [1, 1]} : vector<128x32xf32> to vector<2x32xf32>
    %c0_88 = arith.constant 0 : index
    %c1792 = arith.constant 1792 : index
    %153 = vector.load %arg11[%c0_88, %c1792] : memref<2x2048xf32, #tpu.memory_space<vmem>>, vector<2x32xf32>
    tpu.vector_store %arg11[%c0_88, %c1792], %152 {strides = array<i32>} : memref<2x2048xf32, #tpu.memory_space<vmem>>, vector<2x32xf32>,
    %154 = vector.extract_strided_slice %39 {offsets = [114, 0], sizes = [2, 32], strides = [1, 1]} : vector<128x32xf32> to vector<2x32xf32>
    %c0_89 = arith.constant 0 : index
    %c1824 = arith.constant 1824 : index
    %155 = vector.load %arg11[%c0_89, %c1824] : memref<2x2048xf32, #tpu.memory_space<vmem>>, vector<2x32xf32>
    tpu.vector_store %arg11[%c0_89, %c1824], %154 {strides = array<i32>} : memref<2x2048xf32, #tpu.memory_space<vmem>>, vector<2x32xf32>,
    %156 = vector.extract_strided_slice %39 {offsets = [116, 0], sizes = [2, 32], strides = [1, 1]} : vector<128x32xf32> to vector<2x32xf32>
    %c0_90 = arith.constant 0 : index
    %c1856 = arith.constant 1856 : index
    %157 = vector.load %arg11[%c0_90, %c1856] : memref<2x2048xf32, #tpu.memory_space<vmem>>, vector<2x32xf32>
    tpu.vector_store %arg11[%c0_90, %c1856], %156 {strides = array<i32>} : memref<2x2048xf32, #tpu.memory_space<vmem>>, vector<2x32xf32>,
    %158 = vector.extract_strided_slice %39 {offsets = [118, 0], sizes = [2, 32], strides = [1, 1]} : vector<128x32xf32> to vector<2x32xf32>
    %c0_91 = arith.constant 0 : index
    %c1888 = arith.constant 1888 : index
    %159 = vector.load %arg11[%c0_91, %c1888] : memref<2x2048xf32, #tpu.memory_space<vmem>>, vector<2x32xf32>
    tpu.vector_store %arg11[%c0_91, %c1888], %158 {strides = array<i32>} : memref<2x2048xf32, #tpu.memory_space<vmem>>, vector<2x32xf32>,
    %160 = vector.extract_strided_slice %39 {offsets = [120, 0], sizes = [2, 32], strides = [1, 1]} : vector<128x32xf32> to vector<2x32xf32>
    %c0_92 = arith.constant 0 : index
    %c1920 = arith.constant 1920 : index
    %161 = vector.load %arg11[%c0_92, %c1920] : memref<2x2048xf32, #tpu.memory_space<vmem>>, vector<2x32xf32>
    tpu.vector_store %arg11[%c0_92, %c1920], %160 {strides = array<i32>} : memref<2x2048xf32, #tpu.memory_space<vmem>>, vector<2x32xf32>,
    %162 = vector.extract_strided_slice %39 {offsets = [122, 0], sizes = [2, 32], strides = [1, 1]} : vector<128x32xf32> to vector<2x32xf32>
    %c0_93 = arith.constant 0 : index
    %c1952 = arith.constant 1952 : index
    %163 = vector.load %arg11[%c0_93, %c1952] : memref<2x2048xf32, #tpu.memory_space<vmem>>, vector<2x32xf32>
    tpu.vector_store %arg11[%c0_93, %c1952], %162 {strides = array<i32>} : memref<2x2048xf32, #tpu.memory_space<vmem>>, vector<2x32xf32>,
    %164 = vector.extract_strided_slice %39 {offsets = [124, 0], sizes = [2, 32], strides = [1, 1]} : vector<128x32xf32> to vector<2x32xf32>
    %c0_94 = arith.constant 0 : index
    %c1984 = arith.constant 1984 : index
    %165 = vector.load %arg11[%c0_94, %c1984] : memref<2x2048xf32, #tpu.memory_space<vmem>>, vector<2x32xf32>
    tpu.vector_store %arg11[%c0_94, %c1984], %164 {strides = array<i32>} : memref<2x2048xf32, #tpu.memory_space<vmem>>, vector<2x32xf32>,
    %166 = vector.extract_strided_slice %39 {offsets = [126, 0], sizes = [2, 32], strides = [1, 1]} : vector<128x32xf32> to vector<2x32xf32>
    %c0_95 = arith.constant 0 : index
    %c2016 = arith.constant 2016 : index
    %167 = vector.load %arg11[%c0_95, %c2016] : memref<2x2048xf32, #tpu.memory_space<vmem>>, vector<2x32xf32>
    tpu.vector_store %arg11[%c0_95, %c2016], %166 {strides = array<i32>} : memref<2x2048xf32, #tpu.memory_space<vmem>>, vector<2x32xf32>,
    %cst_96 = arith.constant 0.000000e+00 : f32
    %168 = vector.broadcast %cst_96 : f32 to vector<2x512xf32>
    %c0_i32_97 = arith.constant 0 : i32
    %c0_i32_98 = arith.constant 0 : i32
    %c0_i32_99 = arith.constant 0 : i32
    %169 = tpu.memref_slice %arg3[%c0_i32_98, %c0_i32_99] : memref<2048x512xbf16, #tpu.memory_space<any>> -> memref<256x512xbf16, #tpu.memory_space<any>>
    %c0_i32_100 = arith.constant 0 : i32
    %c0_i32_101 = arith.constant 0 : i32
    %170 = tpu.memref_slice %arg12[%c0_i32_100, %c0_i32_101] : memref<2048x512xbf16, #tpu.memory_space<vmem>> -> memref<256x512xbf16, #tpu.memory_space<vmem>>
    %171 = tpu.memref_slice %arg13[%c0_i32_97] : memref<8x!tpu.dma_semaphore, #tpu.memory_space<semaphore_mem>> -> memref<1x!tpu.dma_semaphore, #tpu.memory_space<semaphore_mem>>
    %172 = tpu.memref_squeeze %171 : memref<1x!tpu.dma_semaphore, #tpu.memory_space<semaphore_mem>> -> memref<!tpu.dma_semaphore, #tpu.memory_space<semaphore_mem>>
    tpu.wait_dma2 semaphore(%172 : memref<!tpu.dma_semaphore, #tpu.memory_space<semaphore_mem>>) src(%169 : memref<256x512xbf16, #tpu.memory_space<any>>) dst(%170 : memref<256x512xbf16, #tpu.memory_space<vmem>>)
    %c0_102 = arith.constant 0 : index
    %c0_103 = arith.constant 0 : index
    %173 = vector.load %arg11[%c0_102, %c0_103] : memref<2x2048xf32, #tpu.memory_space<vmem>>, vector<2x256xf32>
    %174 = arith.truncf %173 : vector<2x256xf32> to vector<2x256xbf16>
    %c0_104 = arith.constant 0 : index
    %c0_105 = arith.constant 0 : index
    %175 = vector.load %arg12[%c0_104, %c0_105] : memref<2048x512xbf16, #tpu.memory_space<vmem>>, vector<256x512xbf16>
    %cst_106 = arith.constant dense<0.000000e+00> : vector<2x512xf32>
    %176 = tpu.matmul %174, %175, %cst_106 {dimension_numbers = #tpu.dot_dimension_numbers<[1], [0], [0], [1], [0, 0, 1, 1], [], []>} : vector<2x256xbf16>, vector<256x512xbf16>, vector<2x512xf32> -> vector<2x512xf32>
    %177 = arith.addf %168, %176 : vector<2x512xf32>
    %c1_i32_107 = arith.constant 1 : i32
    %c256_i32_108 = arith.constant 256 : i32
    %c0_i32_109 = arith.constant 0 : i32
    %178 = tpu.memref_slice %arg3[%c256_i32_108, %c0_i32_109] : memref<2048x512xbf16, #tpu.memory_space<any>> -> memref<256x512xbf16, #tpu.memory_space<any>>
    %c256_i32_110 = arith.constant 256 : i32
    %c0_i32_111 = arith.constant 0 : i32
    %179 = tpu.memref_slice %arg12[%c256_i32_110, %c0_i32_111] : memref<2048x512xbf16, #tpu.memory_space<vmem>> -> memref<256x512xbf16, #tpu.memory_space<vmem>>
    %180 = tpu.memref_slice %arg13[%c1_i32_107] : memref<8x!tpu.dma_semaphore, #tpu.memory_space<semaphore_mem>> -> memref<1x!tpu.dma_semaphore, #tpu.memory_space<semaphore_mem>>
    %181 = tpu.memref_squeeze %180 : memref<1x!tpu.dma_semaphore, #tpu.memory_space<semaphore_mem>> -> memref<!tpu.dma_semaphore, #tpu.memory_space<semaphore_mem>>
    tpu.wait_dma2 semaphore(%181 : memref<!tpu.dma_semaphore, #tpu.memory_space<semaphore_mem>>) src(%178 : memref<256x512xbf16, #tpu.memory_space<any>>) dst(%179 : memref<256x512xbf16, #tpu.memory_space<vmem>>)
    %c0_112 = arith.constant 0 : index
    %c256_113 = arith.constant 256 : index
    %182 = vector.load %arg11[%c0_112, %c256_113] : memref<2x2048xf32, #tpu.memory_space<vmem>>, vector<2x256xf32>
    %183 = arith.truncf %182 : vector<2x256xf32> to vector<2x256xbf16>
    %c256_114 = arith.constant 256 : index
    %c0_115 = arith.constant 0 : index
    %184 = vector.load %arg12[%c256_114, %c0_115] : memref<2048x512xbf16, #tpu.memory_space<vmem>>, vector<256x512xbf16>
    %cst_116 = arith.constant dense<0.000000e+00> : vector<2x512xf32>
    %185 = tpu.matmul %183, %184, %cst_116 {dimension_numbers = #tpu.dot_dimension_numbers<[1], [0], [0], [1], [0, 0, 1, 1], [], []>} : vector<2x256xbf16>, vector<256x512xbf16>, vector<2x512xf32> -> vector<2x512xf32>
    %186 = arith.addf %177, %185 : vector<2x512xf32>
    %c2_i32_117 = arith.constant 2 : i32
    %c512_i32_118 = arith.constant 512 : i32
    %c0_i32_119 = arith.constant 0 : i32
    %187 = tpu.memref_slice %arg3[%c512_i32_118, %c0_i32_119] : memref<2048x512xbf16, #tpu.memory_space<any>> -> memref<256x512xbf16, #tpu.memory_space<any>>
    %c512_i32_120 = arith.constant 512 : i32
    %c0_i32_121 = arith.constant 0 : i32
    %188 = tpu.memref_slice %arg12[%c512_i32_120, %c0_i32_121] : memref<2048x512xbf16, #tpu.memory_space<vmem>> -> memref<256x512xbf16, #tpu.memory_space<vmem>>
    %189 = tpu.memref_slice %arg13[%c2_i32_117] : memref<8x!tpu.dma_semaphore, #tpu.memory_space<semaphore_mem>> -> memref<1x!tpu.dma_semaphore, #tpu.memory_space<semaphore_mem>>
    %190 = tpu.memref_squeeze %189 : memref<1x!tpu.dma_semaphore, #tpu.memory_space<semaphore_mem>> -> memref<!tpu.dma_semaphore, #tpu.memory_space<semaphore_mem>>
    tpu.wait_dma2 semaphore(%190 : memref<!tpu.dma_semaphore, #tpu.memory_space<semaphore_mem>>) src(%187 : memref<256x512xbf16, #tpu.memory_space<any>>) dst(%188 : memref<256x512xbf16, #tpu.memory_space<vmem>>)
    %c0_122 = arith.constant 0 : index
    %c512_123 = arith.constant 512 : index
    %191 = vector.load %arg11[%c0_122, %c512_123] : memref<2x2048xf32, #tpu.memory_space<vmem>>, vector<2x256xf32>
    %192 = arith.truncf %191 : vector<2x256xf32> to vector<2x256xbf16>
    %c512_124 = arith.constant 512 : index
    %c0_125 = arith.constant 0 : index
    %193 = vector.load %arg12[%c512_124, %c0_125] : memref<2048x512xbf16, #tpu.memory_space<vmem>>, vector<256x512xbf16>
    %cst_126 = arith.constant dense<0.000000e+00> : vector<2x512xf32>
    %194 = tpu.matmul %192, %193, %cst_126 {dimension_numbers = #tpu.dot_dimension_numbers<[1], [0], [0], [1], [0, 0, 1, 1], [], []>} : vector<2x256xbf16>, vector<256x512xbf16>, vector<2x512xf32> -> vector<2x512xf32>
    %195 = arith.addf %186, %194 : vector<2x512xf32>
    %c3_i32_127 = arith.constant 3 : i32
    %c768_i32_128 = arith.constant 768 : i32
    %c0_i32_129 = arith.constant 0 : i32
    %196 = tpu.memref_slice %arg3[%c768_i32_128, %c0_i32_129] : memref<2048x512xbf16, #tpu.memory_space<any>> -> memref<256x512xbf16, #tpu.memory_space<any>>
    %c768_i32_130 = arith.constant 768 : i32
    %c0_i32_131 = arith.constant 0 : i32
    %197 = tpu.memref_slice %arg12[%c768_i32_130, %c0_i32_131] : memref<2048x512xbf16, #tpu.memory_space<vmem>> -> memref<256x512xbf16, #tpu.memory_space<vmem>>
    %198 = tpu.memref_slice %arg13[%c3_i32_127] : memref<8x!tpu.dma_semaphore, #tpu.memory_space<semaphore_mem>> -> memref<1x!tpu.dma_semaphore, #tpu.memory_space<semaphore_mem>>
    %199 = tpu.memref_squeeze %198 : memref<1x!tpu.dma_semaphore, #tpu.memory_space<semaphore_mem>> -> memref<!tpu.dma_semaphore, #tpu.memory_space<semaphore_mem>>
    tpu.wait_dma2 semaphore(%199 : memref<!tpu.dma_semaphore, #tpu.memory_space<semaphore_mem>>) src(%196 : memref<256x512xbf16, #tpu.memory_space<any>>) dst(%197 : memref<256x512xbf16, #tpu.memory_space<vmem>>)
    %c0_132 = arith.constant 0 : index
    %c768_133 = arith.constant 768 : index
    %200 = vector.load %arg11[%c0_132, %c768_133] : memref<2x2048xf32, #tpu.memory_space<vmem>>, vector<2x256xf32>
    %201 = arith.truncf %200 : vector<2x256xf32> to vector<2x256xbf16>
    %c768_134 = arith.constant 768 : index
    %c0_135 = arith.constant 0 : index
    %202 = vector.load %arg12[%c768_134, %c0_135] : memref<2048x512xbf16, #tpu.memory_space<vmem>>, vector<256x512xbf16>
    %cst_136 = arith.constant dense<0.000000e+00> : vector<2x512xf32>
    %203 = tpu.matmul %201, %202, %cst_136 {dimension_numbers = #tpu.dot_dimension_numbers<[1], [0], [0], [1], [0, 0, 1, 1], [], []>} : vector<2x256xbf16>, vector<256x512xbf16>, vector<2x512xf32> -> vector<2x512xf32>
    %204 = arith.addf %195, %203 : vector<2x512xf32>
    %c4_i32_137 = arith.constant 4 : i32
    %c1024_i32_138 = arith.constant 1024 : i32
    %c0_i32_139 = arith.constant 0 : i32
    %205 = tpu.memref_slice %arg3[%c1024_i32_138, %c0_i32_139] : memref<2048x512xbf16, #tpu.memory_space<any>> -> memref<256x512xbf16, #tpu.memory_space<any>>
    %c1024_i32_140 = arith.constant 1024 : i32
    %c0_i32_141 = arith.constant 0 : i32
    %206 = tpu.memref_slice %arg12[%c1024_i32_140, %c0_i32_141] : memref<2048x512xbf16, #tpu.memory_space<vmem>> -> memref<256x512xbf16, #tpu.memory_space<vmem>>
    %207 = tpu.memref_slice %arg13[%c4_i32_137] : memref<8x!tpu.dma_semaphore, #tpu.memory_space<semaphore_mem>> -> memref<1x!tpu.dma_semaphore, #tpu.memory_space<semaphore_mem>>
    %208 = tpu.memref_squeeze %207 : memref<1x!tpu.dma_semaphore, #tpu.memory_space<semaphore_mem>> -> memref<!tpu.dma_semaphore, #tpu.memory_space<semaphore_mem>>
    tpu.wait_dma2 semaphore(%208 : memref<!tpu.dma_semaphore, #tpu.memory_space<semaphore_mem>>) src(%205 : memref<256x512xbf16, #tpu.memory_space<any>>) dst(%206 : memref<256x512xbf16, #tpu.memory_space<vmem>>)
    %c0_142 = arith.constant 0 : index
    %c1024_143 = arith.constant 1024 : index
    %209 = vector.load %arg11[%c0_142, %c1024_143] : memref<2x2048xf32, #tpu.memory_space<vmem>>, vector<2x256xf32>
    %210 = arith.truncf %209 : vector<2x256xf32> to vector<2x256xbf16>
    %c1024_144 = arith.constant 1024 : index
    %c0_145 = arith.constant 0 : index
    %211 = vector.load %arg12[%c1024_144, %c0_145] : memref<2048x512xbf16, #tpu.memory_space<vmem>>, vector<256x512xbf16>
    %cst_146 = arith.constant dense<0.000000e+00> : vector<2x512xf32>
    %212 = tpu.matmul %210, %211, %cst_146 {dimension_numbers = #tpu.dot_dimension_numbers<[1], [0], [0], [1], [0, 0, 1, 1], [], []>} : vector<2x256xbf16>, vector<256x512xbf16>, vector<2x512xf32> -> vector<2x512xf32>
    %213 = arith.addf %204, %212 : vector<2x512xf32>
    %c5_i32_147 = arith.constant 5 : i32
    %c1280_i32_148 = arith.constant 1280 : i32
    %c0_i32_149 = arith.constant 0 : i32
    %214 = tpu.memref_slice %arg3[%c1280_i32_148, %c0_i32_149] : memref<2048x512xbf16, #tpu.memory_space<any>> -> memref<256x512xbf16, #tpu.memory_space<any>>
    %c1280_i32_150 = arith.constant 1280 : i32
    %c0_i32_151 = arith.constant 0 : i32
    %215 = tpu.memref_slice %arg12[%c1280_i32_150, %c0_i32_151] : memref<2048x512xbf16, #tpu.memory_space<vmem>> -> memref<256x512xbf16, #tpu.memory_space<vmem>>
    %216 = tpu.memref_slice %arg13[%c5_i32_147] : memref<8x!tpu.dma_semaphore, #tpu.memory_space<semaphore_mem>> -> memref<1x!tpu.dma_semaphore, #tpu.memory_space<semaphore_mem>>
    %217 = tpu.memref_squeeze %216 : memref<1x!tpu.dma_semaphore, #tpu.memory_space<semaphore_mem>> -> memref<!tpu.dma_semaphore, #tpu.memory_space<semaphore_mem>>
    tpu.wait_dma2 semaphore(%217 : memref<!tpu.dma_semaphore, #tpu.memory_space<semaphore_mem>>) src(%214 : memref<256x512xbf16, #tpu.memory_space<any>>) dst(%215 : memref<256x512xbf16, #tpu.memory_space<vmem>>)
    %c0_152 = arith.constant 0 : index
    %c1280_153 = arith.constant 1280 : index
    %218 = vector.load %arg11[%c0_152, %c1280_153] : memref<2x2048xf32, #tpu.memory_space<vmem>>, vector<2x256xf32>
    %219 = arith.truncf %218 : vector<2x256xf32> to vector<2x256xbf16>
    %c1280_154 = arith.constant 1280 : index
    %c0_155 = arith.constant 0 : index
    %220 = vector.load %arg12[%c1280_154, %c0_155] : memref<2048x512xbf16, #tpu.memory_space<vmem>>, vector<256x512xbf16>
    %cst_156 = arith.constant dense<0.000000e+00> : vector<2x512xf32>
    %221 = tpu.matmul %219, %220, %cst_156 {dimension_numbers = #tpu.dot_dimension_numbers<[1], [0], [0], [1], [0, 0, 1, 1], [], []>} : vector<2x256xbf16>, vector<256x512xbf16>, vector<2x512xf32> -> vector<2x512xf32>
    %222 = arith.addf %213, %221 : vector<2x512xf32>
    %c6_i32_157 = arith.constant 6 : i32
    %c1536_i32_158 = arith.constant 1536 : i32
    %c0_i32_159 = arith.constant 0 : i32
    %223 = tpu.memref_slice %arg3[%c1536_i32_158, %c0_i32_159] : memref<2048x512xbf16, #tpu.memory_space<any>> -> memref<256x512xbf16, #tpu.memory_space<any>>
    %c1536_i32_160 = arith.constant 1536 : i32
    %c0_i32_161 = arith.constant 0 : i32
    %224 = tpu.memref_slice %arg12[%c1536_i32_160, %c0_i32_161] : memref<2048x512xbf16, #tpu.memory_space<vmem>> -> memref<256x512xbf16, #tpu.memory_space<vmem>>
    %225 = tpu.memref_slice %arg13[%c6_i32_157] : memref<8x!tpu.dma_semaphore, #tpu.memory_space<semaphore_mem>> -> memref<1x!tpu.dma_semaphore, #tpu.memory_space<semaphore_mem>>
    %226 = tpu.memref_squeeze %225 : memref<1x!tpu.dma_semaphore, #tpu.memory_space<semaphore_mem>> -> memref<!tpu.dma_semaphore, #tpu.memory_space<semaphore_mem>>
    tpu.wait_dma2 semaphore(%226 : memref<!tpu.dma_semaphore, #tpu.memory_space<semaphore_mem>>) src(%223 : memref<256x512xbf16, #tpu.memory_space<any>>) dst(%224 : memref<256x512xbf16, #tpu.memory_space<vmem>>)
    %c0_162 = arith.constant 0 : index
    %c1536_163 = arith.constant 1536 : index
    %227 = vector.load %arg11[%c0_162, %c1536_163] : memref<2x2048xf32, #tpu.memory_space<vmem>>, vector<2x256xf32>
    %228 = arith.truncf %227 : vector<2x256xf32> to vector<2x256xbf16>
    %c1536_164 = arith.constant 1536 : index
    %c0_165 = arith.constant 0 : index
    %229 = vector.load %arg12[%c1536_164, %c0_165] : memref<2048x512xbf16, #tpu.memory_space<vmem>>, vector<256x512xbf16>
    %cst_166 = arith.constant dense<0.000000e+00> : vector<2x512xf32>
    %230 = tpu.matmul %228, %229, %cst_166 {dimension_numbers = #tpu.dot_dimension_numbers<[1], [0], [0], [1], [0, 0, 1, 1], [], []>} : vector<2x256xbf16>, vector<256x512xbf16>, vector<2x512xf32> -> vector<2x512xf32>
    %231 = arith.addf %222, %230 : vector<2x512xf32>
    %c7_i32_167 = arith.constant 7 : i32
    %c1792_i32_168 = arith.constant 1792 : i32
    %c0_i32_169 = arith.constant 0 : i32
    %232 = tpu.memref_slice %arg3[%c1792_i32_168, %c0_i32_169] : memref<2048x512xbf16, #tpu.memory_space<any>> -> memref<256x512xbf16, #tpu.memory_space<any>>
    %c1792_i32_170 = arith.constant 1792 : i32
    %c0_i32_171 = arith.constant 0 : i32
    %233 = tpu.memref_slice %arg12[%c1792_i32_170, %c0_i32_171] : memref<2048x512xbf16, #tpu.memory_space<vmem>> -> memref<256x512xbf16, #tpu.memory_space<vmem>>
    %234 = tpu.memref_slice %arg13[%c7_i32_167] : memref<8x!tpu.dma_semaphore, #tpu.memory_space<semaphore_mem>> -> memref<1x!tpu.dma_semaphore, #tpu.memory_space<semaphore_mem>>
    %235 = tpu.memref_squeeze %234 : memref<1x!tpu.dma_semaphore, #tpu.memory_space<semaphore_mem>> -> memref<!tpu.dma_semaphore, #tpu.memory_space<semaphore_mem>>
    tpu.wait_dma2 semaphore(%235 : memref<!tpu.dma_semaphore, #tpu.memory_space<semaphore_mem>>) src(%232 : memref<256x512xbf16, #tpu.memory_space<any>>) dst(%233 : memref<256x512xbf16, #tpu.memory_space<vmem>>)
    %c0_172 = arith.constant 0 : index
    %c1792_173 = arith.constant 1792 : index
    %236 = vector.load %arg11[%c0_172, %c1792_173] : memref<2x2048xf32, #tpu.memory_space<vmem>>, vector<2x256xf32>
    %237 = arith.truncf %236 : vector<2x256xf32> to vector<2x256xbf16>
    %c1792_174 = arith.constant 1792 : index
    %c0_175 = arith.constant 0 : index
    %238 = vector.load %arg12[%c1792_174, %c0_175] : memref<2048x512xbf16, #tpu.memory_space<vmem>>, vector<256x512xbf16>
    %cst_176 = arith.constant dense<0.000000e+00> : vector<2x512xf32>
    %239 = tpu.matmul %237, %238, %cst_176 {dimension_numbers = #tpu.dot_dimension_numbers<[1], [0], [0], [1], [0, 0, 1, 1], [], []>} : vector<2x256xbf16>, vector<256x512xbf16>, vector<2x512xf32> -> vector<2x512xf32>
    %240 = arith.addf %231, %239 : vector<2x512xf32>
    %c0_177 = arith.constant 0 : index
    %c0_178 = arith.constant 0 : index
    %241 = vector.load %arg5[%c0_177, %c0_178] : memref<1x512xf32, #tpu.memory_space<vmem>>, vector<1x512xf32>
    %242 = vector.broadcast %241 : vector<1x512xf32> to vector<2x512xf32>
    %243 = arith.addf %240, %242 : vector<2x512xf32>
    %cst_179 = arith.constant 0.000000e+00 : f32
    %244 = vector.broadcast %cst_179 : f32 to vector<1x128xf32>
    %cst_180 = arith.constant 0.000000e+00 : f32
    %245 = vector.broadcast %cst_180 : f32 to vector<1x128xf32>
    %246 = vector.extract_strided_slice %243 {offsets = [0, 0], sizes = [1, 512], strides = [1, 1]} : vector<2x512xf32> to vector<1x512xf32>
    %c0_181 = arith.constant 0 : index
    %c0_182 = arith.constant 0 : index
    %247 = vector.load %arg4[%c0_181, %c0_182] : memref<128x512xf32, #tpu.memory_space<vmem>>, vector<128x512xf32>
    %cst_183 = arith.constant dense<0.000000e+00> : vector<1x512xf32>
    %248 = tpu.matmul %244, %247, %cst_183 {dimension_numbers = #tpu.dot_dimension_numbers<[1], [0], [0], [1], [0, 0, 1, 1], [], []>} : vector<1x128xf32>, vector<128x512xf32>, vector<1x512xf32> -> vector<1x512xf32>
    %249 = arith.addf %246, %248 : vector<1x512xf32>
    %250 = vector.extract_strided_slice %249 {offsets = [0, 0], sizes = [1, 128], strides = [1, 1]} : vector<1x512xf32> to vector<1x128xf32>
    %251 = arith.negf %250 : vector<1x128xf32>
    %252 = math.exp %251 : vector<1x128xf32>
    %cst_184 = arith.constant 1.000000e+00 : f32
    %253 = vector.broadcast %cst_184 : f32 to vector<1x128xf32>
    %254 = arith.addf %253, %252 : vector<1x128xf32>
    %255 = arith.divf %253, %254 : vector<1x128xf32>
    %256 = vector.extract_strided_slice %249 {offsets = [0, 128], sizes = [1, 128], strides = [1, 1]} : vector<1x512xf32> to vector<1x128xf32>
    %257 = arith.negf %256 : vector<1x128xf32>
    %258 = math.exp %257 : vector<1x128xf32>
    %cst_185 = arith.constant 1.000000e+00 : f32
    %259 = vector.broadcast %cst_185 : f32 to vector<1x128xf32>
    %260 = arith.addf %259, %258 : vector<1x128xf32>
    %261 = arith.divf %259, %260 : vector<1x128xf32>
    %262 = vector.extract_strided_slice %249 {offsets = [0, 256], sizes = [1, 128], strides = [1, 1]} : vector<1x512xf32> to vector<1x128xf32>
    %263 = math.tanh %262 : vector<1x128xf32>
    %264 = vector.extract_strided_slice %249 {offsets = [0, 384], sizes = [1, 128], strides = [1, 1]} : vector<1x512xf32> to vector<1x128xf32>
    %265 = arith.negf %264 : vector<1x128xf32>
    %266 = math.exp %265 : vector<1x128xf32>
    %cst_186 = arith.constant 1.000000e+00 : f32
    %267 = vector.broadcast %cst_186 : f32 to vector<1x128xf32>
    %268 = arith.addf %267, %266 : vector<1x128xf32>
    %269 = arith.divf %267, %268 : vector<1x128xf32>
    %270 = arith.mulf %261, %245 : vector<1x128xf32>
    %271 = arith.mulf %255, %263 : vector<1x128xf32>
    %272 = arith.addf %270, %271 : vector<1x128xf32>
    %273 = math.tanh %272 : vector<1x128xf32>
    %274 = arith.mulf %269, %273 : vector<1x128xf32>
    %275 = vector.extract_strided_slice %243 {offsets = [1, 0], sizes = [1, 512], strides = [1, 1]} : vector<2x512xf32> to vector<1x512xf32>
    %c0_187 = arith.constant 0 : index
    %c0_188 = arith.constant 0 : index
    %276 = vector.load %arg4[%c0_187, %c0_188] : memref<128x512xf32, #tpu.memory_space<vmem>>, vector<128x512xf32>
    %cst_189 = arith.constant dense<0.000000e+00> : vector<1x512xf32>
    %277 = tpu.matmul %274, %276, %cst_189 {dimension_numbers = #tpu.dot_dimension_numbers<[1], [0], [0], [1], [0, 0, 1, 1], [], []>} : vector<1x128xf32>, vector<128x512xf32>, vector<1x512xf32> -> vector<1x512xf32>
    %278 = arith.addf %275, %277 : vector<1x512xf32>
    %279 = vector.extract_strided_slice %278 {offsets = [0, 0], sizes = [1, 128], strides = [1, 1]} : vector<1x512xf32> to vector<1x128xf32>
    %280 = arith.negf %279 : vector<1x128xf32>
    %281 = math.exp %280 : vector<1x128xf32>
    %cst_190 = arith.constant 1.000000e+00 : f32
    %282 = vector.broadcast %cst_190 : f32 to vector<1x128xf32>
    %283 = arith.addf %282, %281 : vector<1x128xf32>
    %284 = arith.divf %282, %283 : vector<1x128xf32>
    %285 = vector.extract_strided_slice %278 {offsets = [0, 128], sizes = [1, 128], strides = [1, 1]} : vector<1x512xf32> to vector<1x128xf32>
    %286 = arith.negf %285 : vector<1x128xf32>
    %287 = math.exp %286 : vector<1x128xf32>
    %cst_191 = arith.constant 1.000000e+00 : f32
    %288 = vector.broadcast %cst_191 : f32 to vector<1x128xf32>
    %289 = arith.addf %288, %287 : vector<1x128xf32>
    %290 = arith.divf %288, %289 : vector<1x128xf32>
    %291 = vector.extract_strided_slice %278 {offsets = [0, 256], sizes = [1, 128], strides = [1, 1]} : vector<1x512xf32> to vector<1x128xf32>
    %292 = math.tanh %291 : vector<1x128xf32>
    %293 = vector.extract_strided_slice %278 {offsets = [0, 384], sizes = [1, 128], strides = [1, 1]} : vector<1x512xf32> to vector<1x128xf32>
    %294 = arith.negf %293 : vector<1x128xf32>
    %295 = math.exp %294 : vector<1x128xf32>
    %cst_192 = arith.constant 1.000000e+00 : f32
    %296 = vector.broadcast %cst_192 : f32 to vector<1x128xf32>
    %297 = arith.addf %296, %295 : vector<1x128xf32>
    %298 = arith.divf %296, %297 : vector<1x128xf32>
    %299 = arith.mulf %290, %272 : vector<1x128xf32>
    %300 = arith.mulf %284, %292 : vector<1x128xf32>
    %301 = arith.addf %299, %300 : vector<1x128xf32>
    %302 = math.tanh %301 : vector<1x128xf32>
    %303 = arith.mulf %298, %302 : vector<1x128xf32>
    %cst_193 = arith.constant 0.000000e+00 : f32
    %304 = vector.broadcast %cst_193 : f32 to vector<1x128xf32>
    %305 = arith.maximumf %303, %304 : vector<1x128xf32>
    %c0_194 = arith.constant 0 : index
    %c0_195 = arith.constant 0 : index
    %306 = vector.load %arg6[%c0_194, %c0_195] : memref<128x32xf32, #tpu.memory_space<vmem>>, vector<128x32xf32>
    %cst_196 = arith.constant dense<0.000000e+00> : vector<1x32xf32>
    %307 = tpu.matmul %305, %306, %cst_196 {dimension_numbers = #tpu.dot_dimension_numbers<[1], [0], [0], [1], [0, 0, 1, 1], [], []>} : vector<1x128xf32>, vector<128x32xf32>, vector<1x32xf32> -> vector<1x32xf32>
    %c0_197 = arith.constant 0 : index
    %c0_198 = arith.constant 0 : index
    %308 = vector.load %arg7[%c0_197, %c0_198] : memref<1x32xf32, #tpu.memory_space<vmem>>, vector<1x32xf32>
    %309 = arith.addf %307, %308 : vector<1x32xf32>
    %cst_199 = arith.constant 0.000000e+00 : f32
    %310 = vector.broadcast %cst_199 : f32 to vector<1x32xf32>
    %311 = arith.maximumf %309, %310 : vector<1x32xf32>
    %c0_200 = arith.constant 0 : index
    %c0_201 = arith.constant 0 : index
    %312 = vector.load %arg8[%c0_200, %c0_201] : memref<32x1xf32, #tpu.memory_space<vmem>>, vector<32x1xf32>
    %cst_202 = arith.constant dense<0.000000e+00> : vector<1x1xf32>
    %313 = tpu.matmul %311, %312, %cst_202 {dimension_numbers = #tpu.dot_dimension_numbers<[1], [0], [0], [1], [0, 0, 1, 1], [], []>} : vector<1x32xf32>, vector<32x1xf32>, vector<1x1xf32> -> vector<1x1xf32>
    %c0_203 = arith.constant 0 : index
    %c0_204 = arith.constant 0 : index
    %314 = vector.load %arg9[%c0_203, %c0_204] : memref<1x1xf32, #tpu.memory_space<vmem>>, vector<1x1xf32>
    %315 = arith.addf %313, %314 : vector<1x1xf32>
    %c0_205 = arith.constant 0 : index
    %c0_206 = arith.constant 0 : index
    %316 = vector.load %arg10[%c0_205, %c0_206] : memref<1x1xf32, #tpu.memory_space<vmem>>, vector<1x1xf32>
    tpu.vector_store %arg10[%c0_205, %c0_206], %315 {strides = array<i32>} : memref<1x1xf32, #tpu.memory_space<vmem>>, vector<1x1xf32>,
    return
  }
}

</mosaic_0001>

<bundles_post_ra>
// kernel: smol_critic_forward.1
= control target key start
LH: loop header
LB: loop body
LE: loop exit
PB: predicated region body
PF: predicated region fallthrough
CT: control target
= control target key end

     0   :  { %s9548_s0 = inlined_call_operand.vmem [shape: bf16[128,64], index: 0, kind: input, shape index: {}]   ;;  %s9549_s1 = inlined_call_operand.vmem [shape: bf16[64,32], index: 1, kind: input, shape index: {}]   ;;  %s9550_s2 = inlined_call_operand.hbm [shape: f32[1,32], index: 2, kind: input, shape index: {}]   ;;  %s9551_s3 = inlined_call_operand.hbm [shape: bf16[2048,512], index: 3, kind: input, shape index: {}]   ;;  %s9552_s4 = inlined_call_operand.hbm [shape: f32[128,512], index: 4, kind: input, shape index: {}]   ;;  %s9553_s5 = inlined_call_operand.hbm [shape: f32[1,512], index: 5, kind: input, shape index: {}]   ;;  %s9554_s6 = inlined_call_operand.vmem [shape: f32[128,32], index: 6, kind: input, shape index: {}]   ;;  %s9555_s7 = inlined_call_operand.hbm [shape: f32[1,32], index: 7, kind: input, shape index: {}]   ;;  %s9556_s8 = inlined_call_operand.vmem [shape: f32[32,1], index: 8, kind: input, shape index: {}]   ;;  %s9557_s9 = inlined_call_operand.<no memory space> [shape: f32[1,1], index: 9, kind: input, shape index: {}]   ;;  %s9558_s10 = inlined_call_operand.hbm [shape: f32[1,1], index: 10, kind: output, shape index: {}]  }
   0x1   :  { %v15_v0 = vstv %s9557_s9 }
   0x2   :  { %16 = vst [vmem:[#allocation5] sm:$0x1] %v15_v0 }
   0x3   :  { %17 = vsyncpa [#allocation7], 0 }
   0x4   :  { %18 = vsyncpa [#allocation10], 0 }
   0x5   :  { %19 = vsyncpa [#allocation13], 0  ;;  %s40_s17 = sshll.u32 %s9552_s4, 4  ;;  %s41_s17 = int_to_ptr.hbm [resolvable:$true] %s40_s17 }
   0x6   :  { %20 = vsyncpa [#allocation8], 0  ;;  %s8355_s18 = smov [#allocation9]   ;;  %s30_s22 = sshll.u32 %s9550_s2, 4  ;;  %s31_s22 = int_to_ptr.hbm [resolvable:$true] %s30_s22 }
   0x7   :  { %s42_s19 = sshll.u32 %s8355_s18, 4  ;;  %s8356_s23 = smov 512   ;;  %s43_s19 = int_to_ptr.vmem [resolvable:$true] %s42_s19 }
   0x8   :  { %s8357_s24 = smov 32   ;;  %s8358_s9 = smov [#allocation6]  }
   0x9   :  { %48 = dma.hbm_to_vmem [thread:$0]  %s41_s17, 8192, %s43_s19, [#allocation10], %s8356_s23, %s8356_s23, %s8357_s24  }
   0xa   :  { %s32_s25 = sshll.u32 %s8358_s9, 4  ;;  %s54_s4 = sshll.u32 %s9553_s5, 4  ;;  %s33_s25 = int_to_ptr.vmem [resolvable:$true] %s32_s25  ;;  %s55_s4 = int_to_ptr.hbm [resolvable:$true] %s54_s4 }
   0xb   :  { %35 = dma.hbm_to_vmem [thread:$0]  %s31_s22, 16, %s33_s25, [#allocation7]  }
   0xc   :  { %s67_s30 = sshll.u32 %s9555_s7, 4  ;;  %s8359_s11 = smov [#allocation11]   ;;  %s68_s30 = int_to_ptr.hbm [resolvable:$true] %s67_s30 }
   0xd   :  { %s56_s2 = sshll.u32 %s8359_s11, 4  ;;  %s8360_s12 = smov [#allocation12]   ;;  %s57_s2 = int_to_ptr.vmem [resolvable:$true] %s56_s2 }
   0xe   :  { %59 = dma.hbm_to_vmem [thread:$0]  %s55_s4, 64, %s57_s2, [#allocation10]  }
   0xf   :  { %s69_s13 = sshll.u32 %s8360_s12, 4  ;;  %s70_s13 = int_to_ptr.vmem [resolvable:$true] %s69_s13 }
  0x10   :  { %72 = dma.hbm_to_vmem [thread:$0]  %s68_s30, 16, %s70_s13, [#allocation13]  }
  0x11   :  { %8331 = dma.done.wait [#allocation7], 16  }
  0x12   :  { %8332 = vsyncadd [#allocation7], 4294967280 }
  0x13   :  { %8333 = dma.done.wait [#allocation10], 8256  }
  0x14   :  { %8334 = vsyncadd [#allocation10], 4294959040 }
  0x15   :  { %8335 = dma.done.wait [#allocation13], 16  }
  0x16   :  { %8336 = vsyncadd [#allocation13], 4294967280  ;;  %v7455_v1 = vld [vmem:[%s9549_s1 + $0x18] sm:$0xff]  ;;  %v7454_v2 = vld [vmem:[%s9549_s1 + $0x10] sm:$0xff]  ;;  %vm311_vm0 = vcmask 523264   ;;  %vm401_vm1 = vcmask 254976  }
  0x17   :  { %340 = vmatpush.bf16.msra.mxu0 %v7455_v1  ;;  %v7453_v3 = vld [vmem:[%s9549_s1 + $0x8] sm:$0xff]  ;;  %v7452_v4 = vld [vmem:[%s9549_s1] sm:$0xff]  ;;  %v7446_v7 = vld [vmem:[%s9548_s0 + $0x10] sm:$0xff]  ;;  %s8361_s27 = smov 64   ;;  %s8362_s29 = smov 96   ;;  %vm410_vm2 = vcmask 517376  }
  0x18   :  { %v7444_v5 = vld [vmem:[%s9548_s0] sm:$0xff]  ;;  %v7445_v6 = vld [vmem:[%s9548_s0 + $0x8] sm:$0xff]  ;;  %v7447_v8 = vld [vmem:[%s9548_s0 + $0x18] sm:$0xff]  ;;  %vm418_vm3 = vcmask 779776   ;;  %vm426_vm4 = vcmask 1042176   ;;  %s101_s7 = sshll.u32 %s9551_s3, 4  ;;  %s102_s7 = int_to_ptr.hbm [resolvable:$true] %s101_s7 }
  0x19   :  { %v8472_v9 = vld [vmem:[#allocation6] ss:$0 sm:$0xff]  ;;  %v7448_v23 = vld [vmem:[%s9548_s0 + $0x20] sm:$0xff]  ;;  %v7450_v50 = vld [vmem:[%s9548_s0 + $0x30] sm:$0xff]  ;;  %s8363_s15 = smov [#allocation3]   ;;  %s107_s19 = scalar_lea.hbm %s9551_s3, 512 }
  0x1a   :  { %v7449_v37 = vld [vmem:[%s9548_s0 + $0x28] sm:$0xff]  ;;  %s103_s16 = sshll.u32 %s8363_s15, 4  ;;  %s117_s20 = sshll.u32 %s107_s19, 4  ;;  %s104_s16 = int_to_ptr.vmem [resolvable:$true] %s103_s16  ;;  %s118_s20 = int_to_ptr.hbm [resolvable:$true] %s117_s20 }
  0x1b   :  { %341 = vmatpush.bf16.msra.mxu0 %v7454_v2  ;;  %106 = dma.hbm_to_vmem [thread:$0]  %s102_s7, 8192, %s104_s16, [#allocation4] }
  0x1c   :  { %s8364_s21 = smov [#allocation3 + $0x200]   ;;  %s123_s25 = scalar_lea.hbm %s9551_s3, 1024 }
  0x1d   :  { %s119_s22 = sshll.u32 %s8364_s21, 4  ;;  %s133_s1 = sshll.u32 %s123_s25, 4  ;;  %s120_s22 = int_to_ptr.vmem [resolvable:$true] %s119_s22  ;;  %s134_s1 = int_to_ptr.hbm [resolvable:$true] %s133_s1 }
  0x1e   :  { %122 = dma.hbm_to_vmem [thread:$0]  %s118_s20, 8192, %s120_s22, [#allocation4 + $0x1] }
  0x1f   :  { %342 = vmatpush.bf16.msra.mxu0 %v7453_v3  ;;  %s139_s30 = scalar_lea.hbm %s9551_s3, 1536  ;;  %s8366_s2 = smov [#allocation3 + $0x600]  }
  0x20   :  { %s149_s11 = sshll.u32 %s139_s30, 4  ;;  %s151_s12 = sshll.u32 %s8366_s2, 4  ;;  %s150_s11 = int_to_ptr.hbm [resolvable:$true] %s149_s11  ;;  %s152_s12 = int_to_ptr.vmem [resolvable:$true] %s151_s12 }
  0x21   :  { %s8367_s7 = smov [#allocation3 + $0x800]   ;;  %s171_s17 = scalar_lea.hbm %s9551_s3, 2560 }
  0x22   :  { %s167_s15 = sshll.u32 %s8367_s7, 4  ;;  %s181_s18 = sshll.u32 %s171_s17, 4  ;;  %s168_s15 = int_to_ptr.vmem [resolvable:$true] %s167_s15  ;;  %s182_s18 = int_to_ptr.hbm [resolvable:$true] %s181_s18 }
  0x23   :  { %343 = vmatpush.bf16.msra.mxu0 %v7452_v4  ;;  %s8368_s19 = smov [#allocation3 + $0xa00]   ;;  %s187_s23 = scalar_lea.hbm %s9551_s3, 3072 }
  0x24   :  { %s183_s20 = sshll.u32 %s8368_s19, 4  ;;  %s197_s9 = sshll.u32 %s187_s23, 4  ;;  %s184_s20 = int_to_ptr.vmem [resolvable:$true] %s183_s20  ;;  %s198_s9 = int_to_ptr.hbm [resolvable:$true] %s197_s9 }
  0x25   :  { %s8369_s25 = smov [#allocation3 + $0xc00]   ;;  %s8370_s28 = smov [#allocation3 + $0xe00]  }
  0x26   :  { %5373 = vmatmul.msk.bf16.vlgmr.msra.gmra.mxu0 %vm311_vm0, %v7444_v5  ;;  %v7451_v5 = vld [vmem:[%s9548_s0 + $0x38] sm:$0xff]  ;;  %s155_s0 = scalar_lea.hbm %s9551_s3, 2048  ;;  %s215_s30 = sshll.u32 %s8370_s28, 4  ;;  %s216_s30 = int_to_ptr.vmem [resolvable:$true] %s215_s30 }
  0x27   :  { %s165_s14 = sshll.u32 %s155_s0, 4  ;;  %s166_s14 = int_to_ptr.hbm [resolvable:$true] %s165_s14 }
  0x36   :  { %5374 = vmatmul.msk.bf16.gmra.mxu0 %vm311_vm0, %v7445_v6 }
  0x46   :  { %5375 = vmatmul.msk.bf16.gmra.mxu0 %vm311_vm0, %v7446_v7 }
  0x56   :  { %5376 = vmatmul.msk.bf16.gmra.mxu0 %vm311_vm0, %v7447_v8 }
  0x66   :  { %5377 = vmatmul.msk.bf16.gmra.mxu0 %vm311_vm0, %v7448_v23 }
  0x76   :  { %5378 = vmatmul.msk.bf16.gmra.mxu0 %vm311_vm0, %v7449_v37 }
  0x86   :  { %5379 = vmatmul.msk.bf16.gmra.mxu0 %vm311_vm0, %v7450_v50 }
  0x96   :  { %5380 = vmatmul.msk.bf16.gmra.mxu0 %vm311_vm0, %v7451_v5 }
  0xa3   :  { %v345_v10 = vpop.f32.mrf.mxu0 }
  0xa4   :  { %v346_v11 = vadd.f32 %v8472_v9, %v345_v10 }
  0xa6   :  { %v385_v12 = vmax.f32 %v346_v11, 0.0 }
  0xa8   :  { %404 = vst.sshfl [vmem:[#allocation1] sm:$0xff pattern:$0x73625140] %v385_v12 }
  0xa9   :  { %402 = vst.msk [vmem:[#allocation2] sm:$0x3] %vm401_vm1, %v385_v12 }
  0xab   :  { %v347_v13 = vpop.f32.mrf.mxu0 }
  0xac   :  { %v348_v14 = vadd.f32 %v8472_v9, %v347_v13 }
  0xae   :  { %v386_v15 = vmax.f32 %v348_v14, 0.0 }
  0xaf   :  { %v406_v16 = vld [vmem:[#allocation1 + $0x1] ss:$4 sm:$0xff] }
  0xb0   :  { %412 = vst.sshfl [vmem:[#allocation1] sm:$0xff pattern:$0x73625140] %v385_v12  ;;  %407 = vrot.lane.b32.xlu0 %v406_v16, %s8357_s24 }
  0xb1   :  { %428 = vst.msk [vmem:[#allocation2 + $0x2] sm:$0x3] %vm401_vm1, %v386_v15 }
  0xb3   :  { %v350_v17 = vpop.f32.mrf.mxu0 }
  0xb4   :  { %v351_v18 = vadd.f32 %v8472_v9, %v350_v17 }
  0xb6   :  { %v387_v19 = vmax.f32 %v351_v18, 0.0 }
  0xb7   :  { %v414_v20 = vld [vmem:[#allocation1 + $0x2] ss:$4 sm:$0xff] }
  0xb8   :  { %420 = vst.sshfl [vmem:[#allocation1] sm:$0xff pattern:$0x73625140] %v385_v12  ;;  %415 = vrot.lane.b32.xlu0 %v414_v20, %s8361_s27 }
  0xb9   :  { %451 = vst.msk [vmem:[#allocation2 + $0x4] sm:$0x3] %vm401_vm1, %v387_v19 }
  0xbb   :  { %v352_v21 = vpop.f32.mrf.mxu0 }
  0xbc   :  { %v353_v22 = vadd.f32 %v8472_v9, %v352_v21 }
  0xbe   :  { %v388_v24 = vmax.f32 %v353_v22, 0.0 }
  0xbf   :  { %v422_v25 = vld [vmem:[#allocation1 + $0x3] ss:$4 sm:$0xff] }
  0xc0   :  { %430 = vst.sshfl [vmem:[#allocation1] sm:$0xff pattern:$0x73625140] %v386_v15  ;;  %423 = vrot.lane.b32.xlu1 %v422_v25, %s8362_s29 }
  0xc1   :  { %474 = vst.msk [vmem:[#allocation2 + $0x6] sm:$0x3] %vm401_vm1, %v388_v24 }
  0xc3   :  { %v355_v29 = vpop.f32.mrf.mxu0 }
  0xc4   :  { %v356_v32 = vadd.f32 %v8472_v9, %v355_v29 }
  0xc6   :  { %v389_v34 = vmax.f32 %v356_v32, 0.0 }
  0xc7   :  { %v432_v26 = vld [vmem:[#allocation1 + $0x1] ss:$4 sm:$0xff] }
  0xc8   :  { %437 = vst.sshfl [vmem:[#allocation1] sm:$0xff pattern:$0x73625140] %v386_v15  ;;  %433 = vrot.lane.b32.xlu1 %v432_v26, %s8357_s24 }
  0xc9   :  { %497 = vst.msk [vmem:[#allocation2 + $0x8] sm:$0x3] %vm401_vm1, %v389_v34 }
  0xcb   :  { %v357_v31 = vpop.f32.mrf.mxu0 }
  0xcc   :  { %v358_v33 = vadd.f32 %v8472_v9, %v357_v31 }
  0xce   :  { %v390_v35 = vmax.f32 %v358_v33, 0.0 }
  0xcf   :  { %v439_v27 = vld [vmem:[#allocation1 + $0x2] ss:$4 sm:$0xff] }
  0xd0   :  { %444 = vst.sshfl [vmem:[#allocation1] sm:$0xff pattern:$0x73625140] %v386_v15  ;;  %440 = vrot.lane.b32.xlu2 %v439_v27, %s8361_s27 }
  0xd1   :  { %520 = vst.msk [vmem:[#allocation2 + $0xa] sm:$0x3] %vm401_vm1, %v390_v35 }
  0xd3   :  { %v360_v42 = vpop.f32.mrf.mxu0 }
  0xd4   :  { %v361_v45 = vadd.f32 %v8472_v9, %v360_v42 }
  0xd6   :  { %v391_v48 = vmax.f32 %v361_v45, 0.0 }
  0xd7   :  { %v446_v28 = vld [vmem:[#allocation1 + $0x3] ss:$4 sm:$0xff] }
  0xd8   :  { %453 = vst.sshfl [vmem:[#allocation1] sm:$0xff pattern:$0x73625140] %v387_v19  ;;  %447 = vrot.lane.b32.xlu2 %v446_v28, %s8362_s29 }
  0xd9   :  { %543 = vst.msk [vmem:[#allocation2 + $0xc] sm:$0x3] %vm401_vm1, %v391_v48 }
  0xdb   :  { %v362_v44 = vpop.f32.mrf.mxu0 }
  0xdc   :  { %v363_v46 = vadd.f32 %v8472_v9, %v362_v44 }
  0xde   :  { %v8509_v49 = vmax.f32 %v363_v46, 0.0 }
  0xdf   :  { %v455_v30 = vld [vmem:[#allocation1 + $0x1] ss:$4 sm:$0xff] }
  0xe0   :  { %460 = vst.sshfl [vmem:[#allocation1] sm:$0xff pattern:$0x73625140] %v387_v19  ;;  %456 = vrot.lane.b32.xlu0 %v455_v30, %s8357_s24 }
  0xe1   :  { %566 = vst.msk [vmem:[#allocation2 + $0xe] sm:$0x3] %vm401_vm1, %v8509_v49 }
  0xe3   :  { %v365_v61 = vpop.f32.mrf.mxu0 }
  0xe4   :  { %v366_v62 = vadd.f32 %v8472_v9, %v365_v61 }
  0xe6   :  { %v393_v0 = vmax.f32 %v366_v62, 0.0 }
  0xe7   :  { %v462_v36 = vld [vmem:[#allocation1 + $0x2] ss:$4 sm:$0xff] }
  0xe8   :  { %467 = vst.sshfl [vmem:[#allocation1] sm:$0xff pattern:$0x73625140] %v387_v19  ;;  %463 = vrot.lane.b32.xlu1 %v462_v36, %s8361_s27 }
  0xe9   :  { %589 = vst.msk [vmem:[#allocation2 + $0x10] sm:$0x3] %vm401_vm1, %v393_v0 }
  0xeb   :  { %v367_v1 = vpop.f32.mrf.mxu0 }
  0xec   :  { %v368_v2 = vadd.f32 %v8472_v9, %v367_v1 }
  0xee   :  { %v394_v4 = vmax.f32 %v368_v2, 0.0 }
  0xef   :  { %v469_v38 = vld [vmem:[#allocation1 + $0x3] ss:$4 sm:$0xff] }
  0xf0   :  { %476 = vst.sshfl [vmem:[#allocation1] sm:$0xff pattern:$0x73625140] %v388_v24  ;;  %470 = vrot.lane.b32.xlu2 %v469_v38, %s8362_s29 }
  0xf1   :  { %612 = vst.msk [vmem:[#allocation2 + $0x12] sm:$0x3] %vm401_vm1, %v394_v4 }
  0xf3   :  { %v370_v15 = vpop.f32.mrf.mxu0 }
  0xf4   :  { %v371_v16 = vadd.f32 %v8472_v9, %v370_v15 }
  0xf6   :  { %v395_v18 = vmax.f32 %v371_v16, 0.0 }
  0xf7   :  { %v478_v39 = vld [vmem:[#allocation1 + $0x1] ss:$4 sm:$0xff] }
  0xf8   :  { %483 = vst.sshfl [vmem:[#allocation1] sm:$0xff pattern:$0x73625140] %v388_v24  ;;  %479 = vrot.lane.b32.xlu0 %v478_v39, %s8357_s24 }
  0xf9   :  { %635 = vst.msk [vmem:[#allocation2 + $0x14] sm:$0x3] %vm401_vm1, %v395_v18 }
  0xfb   :  { %v372_v21 = vpop.f32.mrf.mxu0 }
  0xfc   :  { %v373_v22 = vadd.f32 %v8472_v9, %v372_v21 }
  0xff   :  { %v485_v40 = vld [vmem:[#allocation1 + $0x2] ss:$4 sm:$0xff] }
 0x100   :  { %490 = vst.sshfl [vmem:[#allocation1] sm:$0xff pattern:$0x73625140] %v388_v24  ;;  %486 = vrot.lane.b32.xlu1 %v485_v40, %s8361_s27  ;;  %v396_v24 = vmax.f32 %v373_v22, 0.0 }
 0x102   :  { %658 = vst.msk [vmem:[#allocation2 + $0x16] sm:$0x3] %vm401_vm1, %v396_v24 }
 0x103   :  { %v375_v33 = vpop.f32.mrf.mxu0 }
 0x107   :  { %v492_v41 = vld [vmem:[#allocation1 + $0x3] ss:$4 sm:$0xff] }
 0x108   :  { %499 = vst.sshfl [vmem:[#allocation1] sm:$0xff pattern:$0x73625140] %v389_v34  ;;  %493 = vrot.lane.b32.xlu2 %v492_v41, %s8362_s29 }
 0x10b   :  { %v377_v39 = vpop.f32.mrf.mxu0 }
 0x10c   :  { %v378_v40 = vadd.f32 %v8472_v9, %v377_v39 }
 0x10e   :  { %v398_v42 = vmax.f32 %v378_v40, 0.0 }
 0x10f   :  { %v501_v43 = vld [vmem:[#allocation1 + $0x1] ss:$4 sm:$0xff] }
 0x110   :  { %506 = vst.sshfl [vmem:[#allocation1] sm:$0xff pattern:$0x73625140] %v389_v34  ;;  %502 = vrot.lane.b32.xlu0 %v501_v43, %s8357_s24 }
 0x111   :  { %704 = vst.msk [vmem:[#allocation2 + $0x1a] sm:$0x3] %vm401_vm1, %v398_v42 }
 0x117   :  { %v508_v47 = vld [vmem:[#allocation1 + $0x2] ss:$4 sm:$0xff] }
 0x118   :  { %513 = vst.sshfl [vmem:[#allocation1] sm:$0xff pattern:$0x73625140] %v389_v34  ;;  %509 = vrot.lane.b32.xlu1 %v508_v47, %s8361_s27  ;;  %v376_v34 = vadd.f32 %v8472_v9, %v375_v33 }
 0x11a   :  { %v397_v36 = vmax.f32 %v376_v34, 0.0 }
 0x11c   :  { %681 = vst.msk [vmem:[#allocation2 + $0x18] sm:$0x3] %vm401_vm1, %v397_v36 }
 0x11f   :  { %v515_v51 = vld [vmem:[#allocation1 + $0x3] ss:$4 sm:$0xff] }
 0x120   :  { %522 = vst.sshfl [vmem:[#allocation1] sm:$0xff pattern:$0x73625140] %v390_v35  ;;  %516 = vrot.lane.b32.xlu2 %v515_v51, %s8362_s29  ;;  %v380_v51 = vpop.f32.mrf.mxu0 }
 0x122   :  { %v408_v52 = vpop.permute.xlu0 %407 }
 0x123   :  { %411 = vst.msk [vmem:[#allocation2] sm:$0x3] %vm410_vm2, %v408_v52  ;;  %v381_v52 = vadd.f32 %v8472_v9, %v380_v51 }
 0x127   :  { %v524_v53 = vld [vmem:[#allocation1 + $0x1] ss:$4 sm:$0xff] }
 0x128   :  { %529 = vst.sshfl [vmem:[#allocation1] sm:$0xff pattern:$0x73625140] %v390_v35  ;;  %525 = vrot.lane.b32.xlu0 %v524_v53, %s8357_s24 }
 0x12a   :  { %v416_v54 = vpop.permute.xlu0 %415  ;;  %v441_v56 = vpop.permute.xlu2 %440 }
 0x12b   :  { %419 = vst.msk [vmem:[#allocation2] sm:$0x3] %vm418_vm3, %v416_v54  ;;  %v399_v54 = vmax.f32 %v381_v52, 0.0 }
 0x12d   :  { %727 = vst.msk [vmem:[#allocation2 + $0x1c] sm:$0x3] %vm401_vm1, %v399_v54 }
 0x12f   :  { %v531_v55 = vld [vmem:[#allocation1 + $0x2] ss:$4 sm:$0xff] }
 0x130   :  { %536 = vst.sshfl [vmem:[#allocation1] sm:$0xff pattern:$0x73625140] %v390_v35  ;;  %532 = vrot.lane.b32.xlu1 %v531_v55, %s8361_s27 }
 0x132   :  { %v424_v57 = vpop.permute.xlu1 %423  ;;  %v448_v60 = vpop.permute.xlu2 %447 }
 0x133   :  { %427 = vst.msk [vmem:[#allocation2] sm:$0x3] %vm426_vm4, %v424_v57  ;;  %v382_v57 = vpop.f32.mrf.mxu0 }
 0x137   :  { %v538_v58 = vld [vmem:[#allocation1 + $0x3] ss:$4 sm:$0xff] }
 0x138   :  { %545 = vst.sshfl [vmem:[#allocation1] sm:$0xff pattern:$0x73625140] %v391_v48  ;;  %539 = vrot.lane.b32.xlu2 %v538_v58, %s8362_s29  ;;  %v383_v58 = vadd.f32 %v8472_v9, %v382_v57 }
 0x13a   :  { %v434_v59 = vpop.permute.xlu1 %433 }
 0x13b   :  { %436 = vst.msk [vmem:[#allocation2 + $0x2] sm:$0x3] %vm410_vm2, %v434_v59 }
 0x13c   :  { %443 = vst.msk [vmem:[#allocation2 + $0x2] sm:$0x3] %vm418_vm3, %v441_v56 }
 0x13d   :  { %450 = vst.msk [vmem:[#allocation2 + $0x2] sm:$0x3] %vm426_vm4, %v448_v60  ;;  %v8588_v60 = vmax.f32 %v383_v58, 0.0 }
 0x13f   :  { %v547_v63 = vld [vmem:[#allocation1 + $0x1] ss:$4 sm:$0xff]  ;;  %750 = vst.msk [vmem:[#allocation2 + $0x1e] sm:$0x3] %vm401_vm1, %v8588_v60 }
 0x140   :  { %548 = vrot.lane.b32.xlu0 %v547_v63, %s8357_s24  ;;  %552 = vst.sshfl [vmem:[#allocation1] sm:$0xff pattern:$0x73625140] %v391_v48 }
 0x147   :  { %v554_v3 = vld [vmem:[#allocation1 + $0x2] ss:$4 sm:$0xff] }
 0x148   :  { %555 = vrot.lane.b32.xlu1 %v554_v3, %s8361_s27  ;;  %559 = vst.sshfl [vmem:[#allocation1] sm:$0xff pattern:$0x73625140] %v391_v48 }
 0x14a   :  { %v471_v11 = vpop.permute.xlu2 %470 }
 0x14f   :  { %v561_v6 = vld [vmem:[#allocation1 + $0x3] ss:$4 sm:$0xff] }
 0x150   :  { %562 = vrot.lane.b32.xlu2 %v561_v6, %s8362_s29  ;;  %568 = vst.sshfl [vmem:[#allocation1] sm:$0xff pattern:$0x73625140] %v8509_v49 }
 0x152   :  { %v457_v7 = vpop.permute.xlu0 %456 }
 0x153   :  { %459 = vst.msk [vmem:[#allocation2 + $0x4] sm:$0x3] %vm410_vm2, %v457_v7 }
 0x157   :  { %v570_v8 = vld [vmem:[#allocation1 + $0x1] ss:$4 sm:$0xff] }
 0x158   :  { %571 = vrot.lane.b32.xlu0 %v570_v8, %s8357_s24  ;;  %575 = vst.sshfl [vmem:[#allocation1] sm:$0xff pattern:$0x73625140] %v8509_v49 }
 0x15a   :  { %v464_v10 = vpop.permute.xlu1 %463 }
 0x15b   :  { %466 = vst.msk [vmem:[#allocation2 + $0x4] sm:$0x3] %vm418_vm3, %v464_v10 }
 0x15c   :  { %473 = vst.msk [vmem:[#allocation2 + $0x4] sm:$0x3] %vm426_vm4, %v471_v11 }
 0x15f   :  { %v577_v12 = vld [vmem:[#allocation1 + $0x2] ss:$4 sm:$0xff] }
 0x160   :  { %578 = vrot.lane.b32.xlu1 %v577_v12, %s8361_s27  ;;  %582 = vst.sshfl [vmem:[#allocation1] sm:$0xff pattern:$0x73625140] %v8509_v49 }
 0x162   :  { %v494_v20 = vpop.permute.xlu2 %493 }
 0x167   :  { %v584_v13 = vld [vmem:[#allocation1 + $0x3] ss:$4 sm:$0xff] }
 0x168   :  { %585 = vrot.lane.b32.xlu2 %v584_v13, %s8362_s29  ;;  %591 = vst.sshfl [vmem:[#allocation1] sm:$0xff pattern:$0x73625140] %v393_v0 }
 0x16a   :  { %v480_v14 = vpop.permute.xlu0 %479 }
 0x16b   :  { %482 = vst.msk [vmem:[#allocation2 + $0x6] sm:$0x3] %vm410_vm2, %v480_v14 }
 0x16f   :  { %v593_v17 = vld [vmem:[#allocation1 + $0x1] ss:$4 sm:$0xff] }
 0x170   :  { %594 = vrot.lane.b32.xlu0 %v593_v17, %s8357_s24  ;;  %598 = vst.sshfl [vmem:[#allocation1] sm:$0xff pattern:$0x73625140] %v393_v0 }
 0x172   :  { %v487_v19 = vpop.permute.xlu1 %486 }
 0x173   :  { %489 = vst.msk [vmem:[#allocation2 + $0x6] sm:$0x3] %vm418_vm3, %v487_v19 }
 0x174   :  { %496 = vst.msk [vmem:[#allocation2 + $0x6] sm:$0x3] %vm426_vm4, %v494_v20 }
 0x177   :  { %v600_v23 = vld [vmem:[#allocation1 + $0x2] ss:$4 sm:$0xff] }
 0x178   :  { %601 = vrot.lane.b32.xlu1 %v600_v23, %s8361_s27  ;;  %605 = vst.sshfl [vmem:[#allocation1] sm:$0xff pattern:$0x73625140] %v393_v0 }
 0x17a   :  { %v517_v29 = vpop.permute.xlu2 %516 }
 0x17f   :  { %v607_v25 = vld [vmem:[#allocation1 + $0x3] ss:$4 sm:$0xff] }
 0x180   :  { %608 = vrot.lane.b32.xlu2 %v607_v25, %s8362_s29  ;;  %614 = vst.sshfl [vmem:[#allocation1] sm:$0xff pattern:$0x73625140] %v394_v4 }
 0x182   :  { %v503_v26 = vpop.permute.xlu0 %502 }
 0x183   :  { %505 = vst.msk [vmem:[#allocation2 + $0x8] sm:$0x3] %vm410_vm2, %v503_v26 }
 0x187   :  { %v616_v27 = vld [vmem:[#allocation1 + $0x1] ss:$4 sm:$0xff] }
 0x188   :  { %617 = vrot.lane.b32.xlu0 %v616_v27, %s8357_s24  ;;  %621 = vst.sshfl [vmem:[#allocation1] sm:$0xff pattern:$0x73625140] %v394_v4 }
 0x18a   :  { %v510_v28 = vpop.permute.xlu1 %509 }
 0x18b   :  { %512 = vst.msk [vmem:[#allocation2 + $0x8] sm:$0x3] %vm418_vm3, %v510_v28 }
 0x18c   :  { %519 = vst.msk [vmem:[#allocation2 + $0x8] sm:$0x3] %vm426_vm4, %v517_v29 }
 0x18f   :  { %v623_v30 = vld [vmem:[#allocation1 + $0x2] ss:$4 sm:$0xff] }
 0x190   :  { %624 = vrot.lane.b32.xlu1 %v623_v30, %s8361_s27  ;;  %628 = vst.sshfl [vmem:[#allocation1] sm:$0xff pattern:$0x73625140] %v394_v4 }
 0x192   :  { %v540_v38 = vpop.permute.xlu2 %539 }
 0x197   :  { %v630_v31 = vld [vmem:[#allocation1 + $0x3] ss:$4 sm:$0xff] }
 0x198   :  { %631 = vrot.lane.b32.xlu2 %v630_v31, %s8362_s29  ;;  %637 = vst.sshfl [vmem:[#allocation1] sm:$0xff pattern:$0x73625140] %v395_v18 }
 0x19a   :  { %v526_v32 = vpop.permute.xlu0 %525 }
 0x19b   :  { %528 = vst.msk [vmem:[#allocation2 + $0xa] sm:$0x3] %vm410_vm2, %v526_v32 }
 0x19f   :  { %v639_v35 = vld [vmem:[#allocation1 + $0x1] ss:$4 sm:$0xff] }
 0x1a0   :  { %640 = vrot.lane.b32.xlu0 %v639_v35, %s8357_s24  ;;  %644 = vst.sshfl [vmem:[#allocation1] sm:$0xff pattern:$0x73625140] %v395_v18 }
 0x1a2   :  { %v533_v37 = vpop.permute.xlu1 %532 }
 0x1a3   :  { %535 = vst.msk [vmem:[#allocation2 + $0xa] sm:$0x3] %vm418_vm3, %v533_v37 }
 0x1a4   :  { %542 = vst.msk [vmem:[#allocation2 + $0xa] sm:$0x3] %vm426_vm4, %v540_v38 }
 0x1a7   :  { %v646_v41 = vld [vmem:[#allocation1 + $0x2] ss:$4 sm:$0xff] }
 0x1a8   :  { %647 = vrot.lane.b32.xlu1 %v646_v41, %s8361_s27  ;;  %651 = vst.sshfl [vmem:[#allocation1] sm:$0xff pattern:$0x73625140] %v395_v18 }
 0x1aa   :  { %v563_v47 = vpop.permute.xlu2 %562 }
 0x1af   :  { %v653_v43 = vld [vmem:[#allocation1 + $0x3] ss:$4 sm:$0xff] }
 0x1b0   :  { %654 = vrot.lane.b32.xlu2 %v653_v43, %s8362_s29  ;;  %660 = vst.sshfl [vmem:[#allocation1] sm:$0xff pattern:$0x73625140] %v396_v24 }
 0x1b2   :  { %v549_v44 = vpop.permute.xlu0 %548 }
 0x1b3   :  { %551 = vst.msk [vmem:[#allocation2 + $0xc] sm:$0x3] %vm410_vm2, %v549_v44 }
 0x1b7   :  { %v662_v45 = vld [vmem:[#allocation1 + $0x1] ss:$4 sm:$0xff] }
 0x1b8   :  { %663 = vrot.lane.b32.xlu0 %v662_v45, %s8357_s24  ;;  %667 = vst.sshfl [vmem:[#allocation1] sm:$0xff pattern:$0x73625140] %v396_v24 }
 0x1ba   :  { %v556_v46 = vpop.permute.xlu1 %555 }
 0x1bb   :  { %558 = vst.msk [vmem:[#allocation2 + $0xc] sm:$0x3] %vm418_vm3, %v556_v46 }
 0x1bc   :  { %565 = vst.msk [vmem:[#allocation2 + $0xc] sm:$0x3] %vm426_vm4, %v563_v47 }
 0x1bf   :  { %v669_v48 = vld [vmem:[#allocation1 + $0x2] ss:$4 sm:$0xff] }
 0x1c0   :  { %670 = vrot.lane.b32.xlu1 %v669_v48, %s8361_s27  ;;  %674 = vst.sshfl [vmem:[#allocation1] sm:$0xff pattern:$0x73625140] %v396_v24 }
 0x1c2   :  { %v586_v56 = vpop.permute.xlu2 %585 }
 0x1c7   :  { %v676_v49 = vld [vmem:[#allocation1 + $0x3] ss:$4 sm:$0xff] }
 0x1c8   :  { %677 = vrot.lane.b32.xlu1 %v676_v49, %s8362_s29  ;;  %683 = vst.sshfl [vmem:[#allocation1] sm:$0xff pattern:$0x73625140] %v397_v36 }
 0x1ca   :  { %v572_v50 = vpop.permute.xlu0 %571 }
 0x1cb   :  { %574 = vst.msk [vmem:[#allocation2 + $0xe] sm:$0x3] %vm410_vm2, %v572_v50 }
 0x1cf   :  { %v685_v53 = vld [vmem:[#allocation1 + $0x1] ss:$4 sm:$0xff] }
 0x1d0   :  { %686 = vrot.lane.b32.xlu2 %v685_v53, %s8357_s24  ;;  %690 = vst.sshfl [vmem:[#allocation1] sm:$0xff pattern:$0x73625140] %v397_v36 }
 0x1d2   :  { %v579_v55 = vpop.permute.xlu1 %578 }
 0x1d3   :  { %581 = vst.msk [vmem:[#allocation2 + $0xe] sm:$0x3] %vm418_vm3, %v579_v55 }
 0x1d4   :  { %588 = vst.msk [vmem:[#allocation2 + $0xe] sm:$0x3] %vm426_vm4, %v586_v56 }
 0x1d7   :  { %v692_v59 = vld [vmem:[#allocation1 + $0x2] ss:$4 sm:$0xff] }
 0x1d8   :  { %693 = vrot.lane.b32.xlu0 %v692_v59, %s8361_s27  ;;  %697 = vst.sshfl [vmem:[#allocation1] sm:$0xff pattern:$0x73625140] %v397_v36 }
 0x1da   :  { %v609_v0 = vpop.permute.xlu2 %608 }
 0x1df   :  { %v699_v61 = vld [vmem:[#allocation1 + $0x3] ss:$4 sm:$0xff] }
 0x1e0   :  { %700 = vrot.lane.b32.xlu2 %v699_v61, %s8362_s29  ;;  %706 = vst.sshfl [vmem:[#allocation1] sm:$0xff pattern:$0x73625140] %v398_v42 }
 0x1e2   :  { %v595_v62 = vpop.permute.xlu0 %594 }
 0x1e3   :  { %597 = vst.msk [vmem:[#allocation2 + $0x10] sm:$0x3] %vm410_vm2, %v595_v62 }
 0x1e7   :  { %v708_v63 = vld [vmem:[#allocation1 + $0x1] ss:$4 sm:$0xff] }
 0x1e8   :  { %709 = vrot.lane.b32.xlu0 %v708_v63, %s8357_s24  ;;  %713 = vst.sshfl [vmem:[#allocation1] sm:$0xff pattern:$0x73625140] %v398_v42 }
 0x1ea   :  { %v602_v9 = vpop.permute.xlu1 %601 }
 0x1eb   :  { %604 = vst.msk [vmem:[#allocation2 + $0x10] sm:$0x3] %vm418_vm3, %v602_v9 }
 0x1ec   :  { %611 = vst.msk [vmem:[#allocation2 + $0x10] sm:$0x3] %vm426_vm4, %v609_v0 }
 0x1ef   :  { %v715_v1 = vld [vmem:[#allocation1 + $0x2] ss:$4 sm:$0xff] }
 0x1f0   :  { %716 = vrot.lane.b32.xlu1 %v715_v1, %s8361_s27  ;;  %720 = vst.sshfl [vmem:[#allocation1] sm:$0xff pattern:$0x73625140] %v398_v42 }
 0x1f2   :  { %v632_v6 = vpop.permute.xlu2 %631 }
 0x1f7   :  { %v8599_v2 = vld [vmem:[#allocation1 + $0x3] ss:$4 sm:$0xff] }
 0x1f8   :  { %729 = vst.sshfl [vmem:[#allocation1] sm:$0xff pattern:$0x73625140] %v399_v54 }
 0x1fa   :  { %v618_v3 = vpop.permute.xlu0 %617 }
 0x1fb   :  { %620 = vst.msk [vmem:[#allocation2 + $0x12] sm:$0x3] %vm410_vm2, %v618_v3 }
 0x1ff   :  { %v731_v4 = vld [vmem:[#allocation1 + $0x1] ss:$4 sm:$0xff] }
 0x200   :  { %732 = vrot.lane.b32.xlu1 %v731_v4, %s8357_s24  ;;  %736 = vst.sshfl [vmem:[#allocation1] sm:$0xff pattern:$0x73625140] %v399_v54 }
 0x202   :  { %v625_v5 = vpop.permute.xlu1 %624 }
 0x203   :  { %627 = vst.msk [vmem:[#allocation2 + $0x12] sm:$0x3] %vm418_vm3, %v625_v5 }
 0x204   :  { %634 = vst.msk [vmem:[#allocation2 + $0x12] sm:$0x3] %vm426_vm4, %v632_v6 }
 0x207   :  { %v738_v7 = vld [vmem:[#allocation1 + $0x2] ss:$4 sm:$0xff] }
 0x208   :  { %739 = vrot.lane.b32.xlu2 %v738_v7, %s8361_s27  ;;  %743 = vst.sshfl [vmem:[#allocation1] sm:$0xff pattern:$0x73625140] %v399_v54 }
 0x20a   :  { %v655_v13 = vpop.permute.xlu2 %654 }
 0x20f   :  { %v745_v8 = vld [vmem:[#allocation1 + $0x3] ss:$4 sm:$0xff] }
 0x210   :  { %746 = vrot.lane.b32.xlu1 %v745_v8, %s8362_s29  ;;  %752 = vst.sshfl [vmem:[#allocation1] sm:$0xff pattern:$0x73625140] %v8588_v60 }
 0x212   :  { %v641_v10 = vpop.permute.xlu0 %640 }
 0x213   :  { %643 = vst.msk [vmem:[#allocation2 + $0x14] sm:$0x3] %vm410_vm2, %v641_v10 }
 0x217   :  { %v754_v11 = vld [vmem:[#allocation1 + $0x1] ss:$4 sm:$0xff] }
 0x218   :  { %755 = vrot.lane.b32.xlu2 %v754_v11, %s8357_s24  ;;  %759 = vst.sshfl [vmem:[#allocation1] sm:$0xff pattern:$0x73625140] %v8588_v60  ;;  %s8365_s24 = smov [#allocation3 + $0x400]  }
 0x219   :  { %s135_s26 = sshll.u32 %s8365_s24, 4  ;;  %s136_s26 = int_to_ptr.vmem [resolvable:$true] %s135_s26 }
 0x21a   :  { %v648_v12 = vpop.permute.xlu1 %647  ;;  %138 = dma.hbm_to_vmem [thread:$0]  %s134_s1, 8192, %s136_s26, [#allocation4 + $0x2] }
 0x21b   :  { %650 = vst.msk [vmem:[#allocation2 + $0x14] sm:$0x3] %vm418_vm3, %v648_v12  ;;  %154 = dma.hbm_to_vmem [thread:$0]  %s150_s11, 8192, %s152_s12, [#allocation4 + $0x3] }
 0x21c   :  { %657 = vst.msk [vmem:[#allocation2 + $0x14] sm:$0x3] %vm426_vm4, %v655_v13  ;;  %170 = dma.hbm_to_vmem [thread:$0]  %s166_s14, 8192, %s168_s15, [#allocation4 + $0x4] }
 0x21d   :  { %186 = dma.hbm_to_vmem [thread:$0]  %s182_s18, 8192, %s184_s20, [#allocation4 + $0x5] }
 0x21e   :  { %s199_s1 = sshll.u32 %s8369_s25, 4  ;;  %s203_s26 = scalar_lea.hbm %s9551_s3, 3584  ;;  %s200_s1 = int_to_ptr.vmem [resolvable:$true] %s199_s1 }
 0x21f   :  { %v761_v14 = vld [vmem:[#allocation1 + $0x2] ss:$4 sm:$0xff]  ;;  %202 = dma.hbm_to_vmem [thread:$0]  %s198_s9, 8192, %s200_s1, [#allocation4 + $0x6] }
 0x220   :  { %762 = vrot.lane.b32.xlu0 %v761_v14, %s8361_s27  ;;  %766 = vst.sshfl [vmem:[#allocation1] sm:$0xff pattern:$0x73625140] %v8588_v60  ;;  %s213_s4 = sshll.u32 %s203_s26, 4  ;;  %s214_s4 = int_to_ptr.hbm [resolvable:$true] %s213_s4 }
 0x221   :  { %218 = dma.hbm_to_vmem [thread:$0]  %s214_s4, 8192, %s216_s30, [#allocation4 + $0x7] }
 0x227   :  { %v768_v15 = vld [vmem:[#allocation1 + $0x3] ss:$4 sm:$0xff] }
 0x228   :  { %723 = vrot.lane.b32.xlu0 %v8599_v2, %s8362_s29  ;;  %769 = vrot.lane.b32.xlu2 %v768_v15, %s8362_s29 }
 0x22a   :  { %v664_v16 = vpop.permute.xlu0 %663  ;;  %v687_v17 = vpop.permute.xlu2 %686 }
 0x22b   :  { %666 = vst.msk [vmem:[#allocation2 + $0x16] sm:$0x3] %vm410_vm2, %v664_v16 }
 0x22c   :  { %689 = vst.msk [vmem:[#allocation2 + $0x18] sm:$0x3] %vm410_vm2, %v687_v17 }
 0x232   :  { %v671_v18 = vpop.permute.xlu1 %670 }
 0x233   :  { %673 = vst.msk [vmem:[#allocation2 + $0x16] sm:$0x3] %vm418_vm3, %v671_v18 }
 0x23a   :  { %v678_v19 = vpop.permute.xlu1 %677  ;;  %v701_v21 = vpop.permute.xlu2 %700 }
 0x23b   :  { %680 = vst.msk [vmem:[#allocation2 + $0x16] sm:$0x3] %vm426_vm4, %v678_v19 }
 0x24a   :  { %v694_v20 = vpop.permute.xlu0 %693 }
 0x24b   :  { %696 = vst.msk [vmem:[#allocation2 + $0x18] sm:$0x3] %vm418_vm3, %v694_v20 }
 0x24c   :  { %703 = vst.msk [vmem:[#allocation2 + $0x18] sm:$0x3] %vm426_vm4, %v701_v21 }
 0x25a   :  { %v710_v22 = vpop.permute.xlu0 %709 }
 0x25b   :  { %712 = vst.msk [vmem:[#allocation2 + $0x1a] sm:$0x3] %vm410_vm2, %v710_v22 }
 0x262   :  { %v717_v23 = vpop.permute.xlu1 %716  ;;  %v740_v24 = vpop.permute.xlu2 %739 }
 0x263   :  { %719 = vst.msk [vmem:[#allocation2 + $0x1a] sm:$0x3] %vm418_vm3, %v717_v23 }
 0x272   :  { %v733_v25 = vpop.permute.xlu1 %732  ;;  %v756_v26 = vpop.permute.xlu2 %755 }
 0x273   :  { %735 = vst.msk [vmem:[#allocation2 + $0x1c] sm:$0x3] %vm410_vm2, %v733_v25 }
 0x274   :  { %742 = vst.msk [vmem:[#allocation2 + $0x1c] sm:$0x3] %vm418_vm3, %v740_v24 }
 0x275   :  { %758 = vst.msk [vmem:[#allocation2 + $0x1e] sm:$0x3] %vm410_vm2, %v756_v26 }
 0x282   :  { %v747_v27 = vpop.permute.xlu1 %746  ;;  %v770_v29 = vpop.permute.xlu2 %769 }
 0x283   :  { %749 = vst.msk [vmem:[#allocation2 + $0x1c] sm:$0x3] %vm426_vm4, %v747_v27 }
 0x292   :  { %v763_v28 = vpop.permute.xlu0 %762 }
 0x293   :  { %765 = vst.msk [vmem:[#allocation2 + $0x1e] sm:$0x3] %vm418_vm3, %v763_v28 }
 0x294   :  { %772 = vst.msk [vmem:[#allocation2 + $0x1e] sm:$0x3] %vm426_vm4, %v770_v29 }
 0x29a   :  { %v724_v30 = vpop.permute.xlu0 %723 }
 0x29b   :  { %726 = vst.msk [vmem:[#allocation2 + $0x1a] sm:$0x3] %vm426_vm4, %v724_v30 }
 0x29c   :  { %8337 = dma.done.wait [#allocation4], 8192 }
 0x29d   :  { %8338 = vsyncadd [#allocation4], 4294959104  ;;  %v777_v31 = vld [vmem:[#allocation2] sm:$0xf]  ;;  %v8657_v32 = vld [vmem:[#allocation3 + $0x4] sm:$0xf] }
 0x29e   :  { %9561 = vst [vmem:[#allocation45_spill] sm:$0xff] %v8657_v32  ;;  %v8659_v33 = vld [vmem:[#allocation3] sm:$0xf]  ;;  %v8661_v34 = vld [vmem:[#allocation3 + $0xc] sm:$0xf] }
 0x29f   :  { %779 = vst [vmem:[#allocation1] ss:$4 sm:$0xff] %v777_v31  ;;  %v8663_v35 = vld [vmem:[#allocation3 + $0x8] sm:$0xf]  ;;  %v8665_v36 = vld [vmem:[#allocation3 + $0x10] sm:$0xf0] }
 0x2a0   :  { %9562 = vst [vmem:[#allocation46_spill] sm:$0xff] %v8661_v34  ;;  %v8667_v37 = vld [vmem:[#allocation3 + $0xc] sm:$0xf0]  ;;  %v8669_v38 = vld [vmem:[#allocation3 + $0x18] sm:$0xf0] }
 0x2a1   :  { %9563 = vst [vmem:[#allocation47_spill] sm:$0xff] %v8665_v36  ;;  %v8671_v39 = vld [vmem:[#allocation3 + $0x14] sm:$0xf0]  ;;  %v8673_v40 = vld [vmem:[#allocation3 + $0x24] sm:$0xf] }
 0x2a2   :  { %9564 = vst [vmem:[#allocation48_spill] sm:$0xff] %v8669_v38  ;;  %v8675_v41 = vld [vmem:[#allocation3 + $0x20] sm:$0xf]  ;;  %v8677_v42 = vld [vmem:[#allocation3 + $0x2c] sm:$0xf] }
 0x2a3   :  { %9565 = vst [vmem:[#allocation49_spill] sm:$0xff] %v8673_v40  ;;  %v8679_v43 = vld [vmem:[#allocation3 + $0x28] sm:$0xf]  ;;  %v8681_v44 = vld [vmem:[#allocation3 + $0x30] sm:$0xf0] }
 0x2a4   :  { %9566 = vst [vmem:[#allocation50_spill] sm:$0xff] %v8677_v42  ;;  %v8683_v45 = vld [vmem:[#allocation3 + $0x2c] sm:$0xf0]  ;;  %v8685_v46 = vld [vmem:[#allocation3 + $0x38] sm:$0xf0] }
 0x2a5   :  { %9567 = vst [vmem:[#allocation51_spill] sm:$0xff] %v8681_v44  ;;  %v8687_v47 = vld [vmem:[#allocation3 + $0x34] sm:$0xf0]  ;;  %v8689_v48 = vld [vmem:[#allocation3 + $0x44] sm:$0xf] }
 0x2a6   :  { %9568 = vst [vmem:[#allocation52_spill] sm:$0xff] %v8685_v46  ;;  %v8691_v49 = vld [vmem:[#allocation3 + $0x40] sm:$0xf]  ;;  %v8693_v50 = vld [vmem:[#allocation3 + $0x4c] sm:$0xf] }
 0x2a7   :  { %9569 = vst [vmem:[#allocation53_spill] sm:$0xff] %v8689_v48  ;;  %v8695_v51 = vld [vmem:[#allocation3 + $0x48] sm:$0xf]  ;;  %v8697_v52 = vld [vmem:[#allocation3 + $0x50] sm:$0xf0] }
 0x2a8   :  { %9570 = vst [vmem:[#allocation54_spill] sm:$0xff] %v8693_v50  ;;  %v8699_v53 = vld [vmem:[#allocation3 + $0x4c] sm:$0xf0]  ;;  %v780_v54 = vld.sshfl [vmem:[#allocation1] sm:$0xff pattern:$0x73625140] }
 0x2a9   :  { %9571 = vst [vmem:[#allocation55_spill] sm:$0xff] %v8697_v52  ;;  %v781_v55 = vld.sshfl [vmem:[#allocation1 + $0x8] sm:$0xff pattern:$0x73625140]  ;;  %v8701_v56 = vpack.c.bf16 %v780_v54, %v780_v54  ;;  %v8705_v58 = vld [vmem:[#allocation3 + $0x58] sm:$0xf0] }
 0x2aa   :  { %v8703_v57 = vpack.c.bf16 %v781_v55, %v781_v55  ;;  %9573 = vst [vmem:[#allocation57_spill] sm:$0xff] %v8705_v58  ;;  %v8707_v59 = vld [vmem:[#allocation3 + $0x54] sm:$0xf0]  ;;  %v8709_v60 = vld [vmem:[#allocation3 + $0x64] sm:$0xf] }
 0x2ab   :  { %9574 = vst [vmem:[#allocation58_spill] sm:$0xff] %v8709_v60  ;;  %v8711_v61 = vld [vmem:[#allocation3 + $0x60] sm:$0xf]  ;;  %v8713_v62 = vld [vmem:[#allocation3 + $0x6c] sm:$0xf] }
 0x2ac   :  { %9572 = vst [vmem:[#allocation56_spill] sm:$0xff] %v8703_v57  ;;  %v8715_v63 = vld [vmem:[#allocation3 + $0x68] sm:$0xf]  ;;  %v8717_v9 = vld [vmem:[#allocation3 + $0x70] sm:$0xf0] }
 0x2ad   :  { %9575 = vst [vmem:[#allocation59_spill] sm:$0xff] %v8713_v62  ;;  %v8719_v0 = vld [vmem:[#allocation3 + $0x6c] sm:$0xf0]  ;;  %v8721_v1 = vld [vmem:[#allocation3 + $0x78] sm:$0xf0] }
 0x2ae   :  { %9576 = vst [vmem:[#allocation60_spill] sm:$0xff] %v8717_v9  ;;  %v8723_v2 = vld [vmem:[#allocation3 + $0x74] sm:$0xf0]  ;;  %v8725_v3 = vld [vmem:[#allocation3 + $0x84] sm:$0xf] }
 0x2af   :  { %9577 = vst [vmem:[#allocation61_spill] sm:$0xff] %v8721_v1  ;;  %v8727_v4 = vld [vmem:[#allocation3 + $0x80] sm:$0xf]  ;;  %v8729_v5 = vld [vmem:[#allocation3 + $0x8c] sm:$0xf] }
 0x2b0   :  { %9578 = vst [vmem:[#allocation62_spill] sm:$0xff] %v8725_v3  ;;  %v8731_v6 = vld [vmem:[#allocation3 + $0x88] sm:$0xf]  ;;  %v8733_v7 = vld [vmem:[#allocation3 + $0x90] sm:$0xf0] }
 0x2b1   :  { %9579 = vst [vmem:[#allocation63_spill] sm:$0xff] %v8729_v5  ;;  %v8735_v8 = vld [vmem:[#allocation3 + $0x8c] sm:$0xf0]  ;;  %v8737_v10 = vld [vmem:[#allocation3 + $0x98] sm:$0xf0] }
 0x2b2   :  { %9580 = vst [vmem:[#allocation64_spill] sm:$0xff] %v8733_v7  ;;  %v8739_v11 = vld [vmem:[#allocation3 + $0x94] sm:$0xf0]  ;;  %v8741_v12 = vld [vmem:[#allocation3 + $0xa4] sm:$0xf] }
 0x2b3   :  { %9581 = vst [vmem:[#allocation65_spill] sm:$0xff] %v8737_v10  ;;  %v8743_v13 = vld [vmem:[#allocation3 + $0xa0] sm:$0xf]  ;;  %v8745_v14 = vld [vmem:[#allocation3 + $0xac] sm:$0xf] }
 0x2b4   :  { %9582 = vst [vmem:[#allocation66_spill] sm:$0xff] %v8741_v12  ;;  %v8747_v15 = vld [vmem:[#allocation3 + $0xa8] sm:$0xf]  ;;  %v8749_v16 = vld [vmem:[#allocation3 + $0xb0] sm:$0xf0] }
 0x2b5   :  { %9583 = vst [vmem:[#allocation67_spill] sm:$0xff] %v8745_v14  ;;  %v8751_v17 = vld [vmem:[#allocation3 + $0xac] sm:$0xf0]  ;;  %v8753_v18 = vld [vmem:[#allocation3 + $0xb8] sm:$0xf0] }
 0x2b6   :  { %9584 = vst [vmem:[#allocation68_spill] sm:$0xff] %v8749_v16  ;;  %v8755_v19 = vld [vmem:[#allocation3 + $0xb4] sm:$0xf0]  ;;  %v8757_v20 = vld [vmem:[#allocation3 + $0xc4] sm:$0xf] }
 0x2b7   :  { %9585 = vst [vmem:[#allocation69_spill] sm:$0xff] %v8753_v18  ;;  %v8759_v21 = vld [vmem:[#allocation3 + $0xc0] sm:$0xf]  ;;  %v8761_v22 = vld [vmem:[#allocation3 + $0xcc] sm:$0xf] }
 0x2b8   :  { %9586 = vst [vmem:[#allocation70_spill] sm:$0xff] %v8757_v20  ;;  %v8763_v23 = vld [vmem:[#allocation3 + $0xc8] sm:$0xf]  ;;  %v8765_v24 = vld [vmem:[#allocation3 + $0xd0] sm:$0xf0] }
 0x2b9   :  { %9587 = vst [vmem:[#allocation71_spill] sm:$0xff] %v8761_v22  ;;  %v8767_v25 = vld [vmem:[#allocation3 + $0xcc] sm:$0xf0]  ;;  %v8769_v26 = vld [vmem:[#allocation3 + $0xd8] sm:$0xf0] }
 0x2ba   :  { %9588 = vst [vmem:[#allocation72_spill] sm:$0xff] %v8765_v24  ;;  %v8771_v27 = vld [vmem:[#allocation3 + $0xd4] sm:$0xf0]  ;;  %v8773_v28 = vld [vmem:[#allocation3 + $0xe4] sm:$0xf] }
 0x2bb   :  { %9589 = vst [vmem:[#allocation73_spill] sm:$0xff] %v8769_v26  ;;  %v8775_v29 = vld [vmem:[#allocation3 + $0xe0] sm:$0xf]  ;;  %v8777_v30 = vld [vmem:[#allocation3 + $0xec] sm:$0xf] }
 0x2bc   :  { %9590 = vst [vmem:[#allocation74_spill] sm:$0xff] %v8773_v28  ;;  %v8779_v31 = vld [vmem:[#allocation3 + $0xe8] sm:$0xf]  ;;  %v8781_v54 = vld [vmem:[#allocation3 + $0xf0] sm:$0xf0] }
 0x2bd   :  { %9591 = vst [vmem:[#allocation75_spill] sm:$0xff] %v8777_v30  ;;  %v8783_v55 = vld [vmem:[#allocation3 + $0xec] sm:$0xf0]  ;;  %v8785_v34 = vld [vmem:[#allocation3 + $0xf8] sm:$0xf0] }
 0x2be   :  { %9592 = vst [vmem:[#allocation76_spill] sm:$0xff] %v8785_v34  ;;  %v8787_v38 = vld [vmem:[#allocation3 + $0xf4] sm:$0xf0]  ;;  %v8789_v42 = vld [vmem:[#allocation3 + $0x104] sm:$0xf] }
 0x2bf   :  { %9593 = vst [vmem:[#allocation77_spill] sm:$0xff] %v8789_v42  ;;  %v8791_v46 = vld [vmem:[#allocation3 + $0x100] sm:$0xf]  ;;  %v8793_v50 = vld [vmem:[#allocation3 + $0x10c] sm:$0xf] }
 0x2c0   :  { %9594 = vst [vmem:[#allocation78_spill] sm:$0xff] %v8791_v46  ;;  %v8795_v58 = vld [vmem:[#allocation3 + $0x108] sm:$0xf]  ;;  %v8797_v62 = vld [vmem:[#allocation3 + $0x110] sm:$0xf0] }
 0x2c1   :  { %9595 = vst [vmem:[#allocation79_spill] sm:$0xff] %v8793_v50  ;;  %v8799_v1 = vld [vmem:[#allocation3 + $0x10c] sm:$0xf0]  ;;  %v8801_v5 = vld [vmem:[#allocation3 + $0x118] sm:$0xf0] }
 0x2c2   :  { %9596 = vst [vmem:[#allocation80_spill] sm:$0xff] %v8795_v58  ;;  %v8803_v10 = vld [vmem:[#allocation3 + $0x114] sm:$0xf0]  ;;  %v8805_v14 = vld [vmem:[#allocation3 + $0x124] sm:$0xf] }
 0x2c3   :  { %9597 = vst [vmem:[#allocation81_spill] sm:$0xff] %v8797_v62  ;;  %v8807_v18 = vld [vmem:[#allocation3 + $0x120] sm:$0xf]  ;;  %v8809_v57 = vld [vmem:[#allocation3 + $0x12c] sm:$0xf] }
 0x2c4   :  { %9598 = vst [vmem:[#allocation82_spill] sm:$0xff] %v8799_v1  ;;  %v8811_v22 = vld [vmem:[#allocation3 + $0x128] sm:$0xf]  ;;  %v8813_v26 = vld [vmem:[#allocation3 + $0x130] sm:$0xf0] }
 0x2c5   :  { %9599 = vst [vmem:[#allocation83_spill] sm:$0xff] %v8801_v5  ;;  %v8815_v50 = vld [vmem:[#allocation3 + $0x12c] sm:$0xf0]  ;;  %v8817_v58 = vld [vmem:[#allocation3 + $0x138] sm:$0xf0] }
 0x2c6   :  { %9600 = vst [vmem:[#allocation84_spill] sm:$0xff] %v8803_v10  ;;  %v8819_v30 = vld [vmem:[#allocation3 + $0x134] sm:$0xf0]  ;;  %v8821_v34 = vld [vmem:[#allocation3 + $0x144] sm:$0xf] }
 0x2c7   :  { %9601 = vst [vmem:[#allocation85_spill] sm:$0xff] %v8805_v14  ;;  %v8823_v5 = vld [vmem:[#allocation3 + $0x140] sm:$0xf]  ;;  %v8825_v10 = vld [vmem:[#allocation3 + $0x14c] sm:$0xf] }
 0x2c8   :  { %9602 = vst [vmem:[#allocation86_spill] sm:$0xff] %v8807_v18  ;;  %v8827_v42 = vld [vmem:[#allocation3 + $0x148] sm:$0xf]  ;;  %v8829_v62 = vld [vmem:[#allocation3 + $0x150] sm:$0xf0] }
 0x2c9   :  { %9603 = vst [vmem:[#allocation87_spill] sm:$0xff] %v8809_v57  ;;  %v8831_v57 = vld [vmem:[#allocation3 + $0x14c] sm:$0xf0]  ;;  %v8835_v32 = vld [vmem:[#allocation3 + $0x154] sm:$0xf0] }
 0x2ca   :  { %9604 = vst [vmem:[#allocation88_spill] sm:$0xff] %v8811_v22  ;;  %v8833_v22 = vld [vmem:[#allocation3 + $0x158] sm:$0xf0]  ;;  %v8837_v36 = vld [vmem:[#allocation3 + $0x164] sm:$0xf] }
 0x2cb   :  { %9605 = vst [vmem:[#allocation89_spill] sm:$0xff] %v8813_v26  ;;  %v8843_v1 = vld [vmem:[#allocation3 + $0x168] sm:$0xf]  ;;  %v8845_v46 = vld [vmem:[#allocation3 + $0x170] sm:$0xf0] }
 0x2cc   :  { %9606 = vst [vmem:[#allocation90_spill] sm:$0xff] %v8815_v50  ;;  %v8851_v14 = vld [vmem:[#allocation3 + $0x174] sm:$0xf0]  ;;  %v8853_v26 = vld [vmem:[#allocation3 + $0x184] sm:$0xf] }
 0x2cd   :  { %9607 = vst [vmem:[#allocation91_spill] sm:$0xff] %v8817_v58  ;;  %v8839_v58 = vld [vmem:[#allocation3 + $0x160] sm:$0xf]  ;;  %v8859_v40 = vld [vmem:[#allocation3 + $0x188] sm:$0xf] }
 0x2ce   :  { %9608 = vst [vmem:[#allocation92_spill] sm:$0xff] %v8819_v30  ;;  %v8841_v30 = vld [vmem:[#allocation3 + $0x16c] sm:$0xf]  ;;  %v8861_v44 = vld [vmem:[#allocation3 + $0x190] sm:$0xf0] }
 0x2cf   :  { %9609 = vst [vmem:[#allocation93_spill] sm:$0xff] %v8821_v34  ;;  %v8867_v50 = vld [vmem:[#allocation3 + $0x194] sm:$0xf0]  ;;  %v8869_v18 = vld [vmem:[#allocation3 + $0x1a4] sm:$0xf] }
 0x2d0   :  { %9610 = vst [vmem:[#allocation94_spill] sm:$0xff] %v8823_v5  ;;  %v8875_v34 = vld [vmem:[#allocation3 + $0x1a8] sm:$0xf]  ;;  %v8883_v48 = vld [vmem:[#allocation3 + $0x1b4] sm:$0xf0] }
 0x2d1   :  { %9611 = vst [vmem:[#allocation95_spill] sm:$0xff] %v8825_v10  ;;  %v8847_v10 = vld [vmem:[#allocation3 + $0x16c] sm:$0xf0]  ;;  %v8885_v52 = vld [vmem:[#allocation3 + $0x1c4] sm:$0xf] }
 0x2d2   :  { %9612 = vst [vmem:[#allocation96_spill] sm:$0xff] %v8827_v42  ;;  %v8849_v42 = vld [vmem:[#allocation3 + $0x178] sm:$0xf0]  ;;  %v8893_v5 = vld [vmem:[#allocation3 + $0x1d0] sm:$0xf0] }
 0x2d3   :  { %9613 = vst [vmem:[#allocation97_spill] sm:$0xff] %v8829_v62  ;;  %v8877_v62 = vld [vmem:[#allocation3 + $0x1b0] sm:$0xf0]  ;;  %v8907_v60 = vld [vmem:[#allocation3 + $0x1e8] sm:$0xf] }
 0x2d4   :  { %9614 = vst [vmem:[#allocation98_spill] sm:$0xff] %v8831_v57  ;;  %v8891_v57 = vld [vmem:[#allocation3 + $0x1c8] sm:$0xf]  ;;  %v8909_v9 = vld [vmem:[#allocation3 + $0x1f0] sm:$0xf0] }
 0x2d5   :  { %9615 = vst [vmem:[#allocation99_spill] sm:$0xff] %v8833_v22  ;;  %v8855_v22 = vld [vmem:[#allocation3 + $0x180] sm:$0xf] }
 0x2d6   :  { %9616 = vst [vmem:[#allocation100_spill] sm:$0xff] %v8835_v32  ;;  %v8857_v32 = vld [vmem:[#allocation3 + $0x18c] sm:$0xf] }
 0x2d7   :  { %9617 = vst [vmem:[#allocation101_spill] sm:$0xff] %v8837_v36  ;;  %v8899_v36 = vld [vmem:[#allocation3 + $0x1d4] sm:$0xf0] }
 0x2d8   :  { %9618 = vst [vmem:[#allocation102_spill] sm:$0xff] %v8839_v58 }
 0x2d9   :  { %9619 = vst [vmem:[#allocation103_spill] sm:$0xff] %v8841_v30  ;;  %v8863_v30 = vld [vmem:[#allocation3 + $0x18c] sm:$0xf0] }
 0x2da   :  { %9620 = vst [vmem:[#allocation104_spill] sm:$0xff] %v8843_v1  ;;  %v8865_v1 = vld [vmem:[#allocation3 + $0x198] sm:$0xf0] }
 0x2db   :  { %9621 = vst [vmem:[#allocation105_spill] sm:$0xff] %v8845_v46  ;;  %v8901_v46 = vld [vmem:[#allocation3 + $0x1e4] sm:$0xf] }
 0x2dc   :  { %9622 = vst [vmem:[#allocation106_spill] sm:$0xff] %v8847_v10  ;;  %v8915_v10 = vld [vmem:[#allocation3 + $0x1f4] sm:$0xf0] }
 0x2dd   :  { %9623 = vst [vmem:[#allocation107_spill] sm:$0xff] %v8849_v42  ;;  %v8871_v42 = vld [vmem:[#allocation3 + $0x1a0] sm:$0xf] }
 0x2de   :  { %9624 = vst [vmem:[#allocation108_spill] sm:$0xff] %v8851_v14  ;;  %v8873_v14 = vld [vmem:[#allocation3 + $0x1ac] sm:$0xf] }
 0x2df   :  { %9625 = vst [vmem:[#allocation109_spill] sm:$0xff] %v8853_v26 }
 0x2e0   :  { %9626 = vst [vmem:[#allocation110_spill] sm:$0xff] %v8855_v22 }
 0x2e1   :  { %9627 = vst [vmem:[#allocation111_spill] sm:$0xff] %v8857_v32  ;;  %v8879_v32 = vld [vmem:[#allocation3 + $0x1ac] sm:$0xf0] }
 0x2e2   :  { %9628 = vst [vmem:[#allocation112_spill] sm:$0xff] %v8859_v40  ;;  %v8881_v40 = vld [vmem:[#allocation3 + $0x1b8] sm:$0xf0] }
 0x2e3   :  { %9629 = vst [vmem:[#allocation113_spill] sm:$0xff] %v8861_v44 }
 0x2e4   :  { %9630 = vst [vmem:[#allocation114_spill] sm:$0xff] %v8863_v30 }
 0x2e5   :  { %9631 = vst [vmem:[#allocation115_spill] sm:$0xff] %v8865_v1  ;;  %v8887_v1 = vld [vmem:[#allocation3 + $0x1c0] sm:$0xf] }
 0x2e6   :  { %9632 = vst [vmem:[#allocation116_spill] sm:$0xff] %v8867_v50  ;;  %v8889_v50 = vld [vmem:[#allocation3 + $0x1cc] sm:$0xf] }
 0x2e7   :  { %9633 = vst [vmem:[#allocation117_spill] sm:$0xff] %v8869_v18 }
 0x2e8   :  { %9634 = vst [vmem:[#allocation118_spill] sm:$0xff] %v8871_v42 }
 0x2e9   :  { %9635 = vst [vmem:[#allocation119_spill] sm:$0xff] %v8873_v14  ;;  %v8895_v14 = vld [vmem:[#allocation3 + $0x1cc] sm:$0xf0] }
 0x2ea   :  { %9636 = vst [vmem:[#allocation120_spill] sm:$0xff] %v8875_v34  ;;  %v8897_v34 = vld [vmem:[#allocation3 + $0x1d8] sm:$0xf0] }
 0x2eb   :  { %9637 = vst [vmem:[#allocation121_spill] sm:$0xff] %v8877_v62 }
 0x2ec   :  { %9638 = vst [vmem:[#allocation122_spill] sm:$0xff] %v8879_v32 }
 0x2ed   :  { %9639 = vst [vmem:[#allocation123_spill] sm:$0xff] %v8881_v40  ;;  %v8903_v40 = vld [vmem:[#allocation3 + $0x1e0] sm:$0xf] }
 0x2ee   :  { %9640 = vst [vmem:[#allocation124_spill] sm:$0xff] %v8883_v48  ;;  %v8905_v48 = vld [vmem:[#allocation3 + $0x1ec] sm:$0xf] }
 0x2ef   :  { %9641 = vst [vmem:[#allocation125_spill] sm:$0xff] %v8885_v52 }
 0x2f0   :  { %9642 = vst [vmem:[#allocation126_spill] sm:$0xff] %v8887_v1 }
 0x2f1   :  { %9643 = vst [vmem:[#allocation127_spill] sm:$0xff] %v8889_v50  ;;  %v8911_v50 = vld [vmem:[#allocation3 + $0x1ec] sm:$0xf0] }
 0x2f2   :  { %9644 = vst [vmem:[#allocation128_spill] sm:$0xff] %v8891_v57  ;;  %v8913_v57 = vld [vmem:[#allocation3 + $0x1f8] sm:$0xf0] }
 0x2f3   :  { %9645 = vst [vmem:[#allocation129_spill] sm:$0xff] %v8893_v5 }
 0x2f4   :  { %9646 = vst [vmem:[#allocation130_spill] sm:$0xff] %v8895_v14 }
 0x2f5   :  { %9647 = vst [vmem:[#allocation131_spill] sm:$0xff] %v8897_v34 }
 0x2f6   :  { %9648 = vst [vmem:[#allocation132_spill] sm:$0xff] %v8899_v36 }
 0x2f7   :  { %9649 = vst [vmem:[#allocation133_spill] sm:$0xff] %v8901_v46 }
 0x2f8   :  { %9650 = vst [vmem:[#allocation134_spill] sm:$0xff] %v8905_v48 }
 0x2f9   :  { %9651 = vst [vmem:[#allocation135_spill] sm:$0xff] %v8907_v60 }
 0x2fa   :  { %9652 = vst [vmem:[#allocation136_spill] sm:$0xff] %v8909_v9 }
 0x2fb   :  { %9653 = vst [vmem:[#allocation137_spill] sm:$0xff] %v8913_v57 }
 0x2fc   :  { %9654 = vst [vmem:[#allocation138_spill] sm:$0xff] %v8915_v10 }
 0x2fd   :  { %8339 = dma.done.wait [#allocation4 + $0x1], 8192 }
 0x2fe   :  { %8340 = vsyncadd [#allocation4 + $0x1], 4294959104  ;;  %v5495_v34 = vld [vmem:[#allocation3 + $0x2e0] sm:$0xf]  ;;  %v7550_v36 = vld [vmem:[#allocation3 + $0x2ec] sm:$0xf0] }
 0x2ff   :  { %v5623_v58 = vld [vmem:[#allocation3 + $0x3e0] sm:$0xf]  ;;  %v5496_v26 = vor.u32 %v7550_v36, %v5495_v34  ;;  %v7582_v44 = vld [vmem:[#allocation3 + $0x3ec] sm:$0xf0]  ;;  %v7548_v3 = vld [vmem:[#allocation3 + $0x2e4] sm:$0xf] }
 0x300   :  { %v5497_v7 = vld [vmem:[#allocation3 + $0x2f0] sm:$0xf0]  ;;  %v5624_v48 = vor.u32 %v7582_v44, %v5623_v58  ;;  %v5479_v60 = vld [vmem:[#allocation3 + $0x2c0] sm:$0xf]  ;;  %v7546_v22 = vld [vmem:[#allocation3 + $0x2cc] sm:$0xf0] }
 0x301   :  { %v5500_v30 = vor.u32 %v7548_v3, %v5497_v7  ;;  %v5607_v18 = vld [vmem:[#allocation3 + $0x3c0] sm:$0xf]  ;;  %1245 = vmatpush.bf16.msra.mxu1 %v5496_v26  ;;  %v5480_v62 = vor.u32 %v7546_v22, %v5479_v60  ;;  %v7578_v12 = vld [vmem:[#allocation3 + $0x3cc] sm:$0xf0]  ;;  %v7544_v57 = vld [vmem:[#allocation3 + $0x2c4] sm:$0xf] }
 0x302   :  { %v5481_v16 = vld [vmem:[#allocation3 + $0x2d0] sm:$0xf0]  ;;  %1258 = vmatpush.bf16.msra.mxu2 %v5624_v48  ;;  %v5608_v10 = vor.u32 %v7578_v12, %v5607_v18  ;;  %v5463_v42 = vld [vmem:[#allocation3 + $0x2a0] sm:$0xf]  ;;  %v7542_v52 = vld [vmem:[#allocation3 + $0x2ac] sm:$0xf0] }
 0x303   :  { %1271 = vmatpush.bf16.msra.mxu3 %v5500_v30  ;;  %v5484_v32 = vor.u32 %v7544_v57, %v5481_v16  ;;  %v5591_v34 = vld [vmem:[#allocation3 + $0x3a0] sm:$0xf]  ;;  %v7574_v36 = vld [vmem:[#allocation3 + $0x3ac] sm:$0xf0]  ;;  %v7540_v5 = vld [vmem:[#allocation3 + $0x2a4] sm:$0xf]  ;;  %v5464_v44 = vor.u32 %v7542_v52, %v5463_v42 }
 0x304   :  { %v5465_v20 = vld [vmem:[#allocation3 + $0x2b0] sm:$0xf0]  ;;  %v5592_v58 = vor.u32 %v7574_v36, %v5591_v34  ;;  %v5447_v60 = vld [vmem:[#allocation3 + $0x280] sm:$0xf]  ;;  %v7538_v7 = vld [vmem:[#allocation3 + $0x28c] sm:$0xf0] }
 0x305   :  { %1246 = vmatpush.bf16.msra.mxu1 %v5480_v62  ;;  %v5468_v3 = vor.u32 %v7540_v5, %v5465_v20  ;;  %v5575_v22 = vld [vmem:[#allocation3 + $0x380] sm:$0xf]  ;;  %v7570_v26 = vld [vmem:[#allocation3 + $0x38c] sm:$0xf0]  ;;  %v7536_v48 = vld [vmem:[#allocation3 + $0x284] sm:$0xf]  ;;  %v5448_v57 = vor.u32 %v7538_v7, %v5447_v60 }
 0x306   :  { %1259 = vmatpush.bf16.msra.mxu2 %v5608_v10  ;;  %v5449_v30 = vld [vmem:[#allocation3 + $0x290] sm:$0xf0]  ;;  %v5576_v12 = vor.u32 %v7570_v26, %v5575_v22  ;;  %v5431_v18 = vld [vmem:[#allocation3 + $0x260] sm:$0xf]  ;;  %v7534_v24 = vld [vmem:[#allocation3 + $0x26c] sm:$0xf0] }
 0x307   :  { %1272 = vmatpush.bf16.msra.mxu3 %v5484_v32  ;;  %v5452_v16 = vor.u32 %v7536_v48, %v5449_v30  ;;  %v5559_v62 = vld [vmem:[#allocation3 + $0x360] sm:$0xf]  ;;  %v7566_v42 = vld [vmem:[#allocation3 + $0x36c] sm:$0xf0]  ;;  %v7532_v52 = vld [vmem:[#allocation3 + $0x264] sm:$0xf]  ;;  %v5432_v5 = vor.u32 %v7534_v24, %v5431_v18 }
 0x308   :  { %v5433_v32 = vld [vmem:[#allocation3 + $0x270] sm:$0xf0]  ;;  %v5560_v10 = vor.u32 %v7566_v42, %v5559_v62  ;;  %v5415_v34 = vld [vmem:[#allocation3 + $0x240] sm:$0xf]  ;;  %v7530_v36 = vld [vmem:[#allocation3 + $0x24c] sm:$0xf0] }
 0x309   :  { %1247 = vmatpush.bf16.msra.mxu1 %v5464_v44  ;;  %v5436_v20 = vor.u32 %v7532_v52, %v5433_v32  ;;  %v5543_v44 = vld [vmem:[#allocation3 + $0x340] sm:$0xf]  ;;  %v7562_v60 = vld [vmem:[#allocation3 + $0x34c] sm:$0xf0]  ;;  %v5416_v7 = vor.u32 %v7530_v36, %v5415_v34  ;;  %v7580_v36 = vld [vmem:[#allocation3 + $0x3e4] sm:$0xf] }
 0x30a   :  { %1260 = vmatpush.bf16.msra.mxu2 %v5592_v58  ;;  %v7528_v58 = vld [vmem:[#allocation3 + $0x244] sm:$0xf]  ;;  %v5544_v22 = vor.u32 %v7562_v60, %v5543_v44  ;;  %v5399_v48 = vld [vmem:[#allocation3 + $0x220] sm:$0xf]  ;;  %v7526_v30 = vld [vmem:[#allocation3 + $0x22c] sm:$0xf0] }
 0x30b   :  { %1273 = vmatpush.bf16.msra.mxu3 %v5468_v3  ;;  %v5417_v3 = vld [vmem:[#allocation3 + $0x250] sm:$0xf0]  ;;  %v7558_v24 = vld [vmem:[#allocation3 + $0x32c] sm:$0xf0]  ;;  %v5400_v18 = vor.u32 %v7526_v30, %v5399_v48  ;;  %v5383_v62 = vld [vmem:[#allocation3 + $0x200] sm:$0xf] }
 0x30c   :  { %v5420_v26 = vor.u32 %v7528_v58, %v5417_v3  ;;  %v7522_v42 = vld [vmem:[#allocation3 + $0x20c] sm:$0xf0]  ;;  %v5625_v44 = vld [vmem:[#allocation3 + $0x3f0] sm:$0xf0]  ;;  %v5503_v60 = vld [vmem:[#allocation3 + $0x2e8] sm:$0xf] }
 0x30d   :  { %1248 = vmatpush.bf16.msra.mxu1 %v5448_v57  ;;  %v5527_v57 = vld [vmem:[#allocation3 + $0x320] sm:$0xf]  ;;  %v7554_v34 = vld [vmem:[#allocation3 + $0x30c] sm:$0xf0]  ;;  %v7551_v58 = vld [vmem:[#allocation3 + $0x2f4] sm:$0xf0]  ;;  %v5384_v14 = vor.u32 %v7522_v42, %v5383_v62  ;;  %v5628_v48 = vor.u32 %v7580_v36, %v5625_v44 }
 0x30e   :  { %1261 = vmatpush.bf16.msra.mxu2 %v5576_v12  ;;  %v7524_v12 = vld [vmem:[#allocation3 + $0x224] sm:$0xf]  ;;  %v5528_v52 = vor.u32 %v7558_v24, %v5527_v57  ;;  %v5631_v1 = vld [vmem:[#allocation3 + $0x3e8] sm:$0xf]  ;;  %v5504_v30 = vor.u32 %v7551_v58, %v5503_v60  ;;  %v7547_v46 = vld [vmem:[#allocation3 + $0x2d4] sm:$0xf0]  ;;  %v5760_v60 = vor.u32 %v8787_v38, %v8779_v31  ;;  %v5744_v38 = vor.u32 %v8771_v27, %v8763_v23 }
 0x30f   :  { %1274 = vmatpush.bf16.msra.mxu3 %v5452_v16  ;;  %v5401_v16 = vld [vmem:[#allocation3 + $0x230] sm:$0xf0]  ;;  %v852_v3 = vld [vmem:[#allocation2 + $0x4] sm:$0xf]  ;;  %v5615_v9 = vld [vmem:[#allocation3 + $0x3c8] sm:$0xf] }
 0x310   :  { %v5404_v32 = vor.u32 %v7524_v12, %v5401_v16  ;;  %854 = vst [vmem:[#allocation1] ss:$4 sm:$0xff] %v852_v3  ;;  %v7576_v57 = vld [vmem:[#allocation3 + $0x3c4] sm:$0xf]  ;;  %v5609_v12 = vld [vmem:[#allocation3 + $0x3d0] sm:$0xf0]  ;;  %1721 = vmatpush.bf16.msrb.mxu0 %v5760_v60  ;;  %v5712_v60 = vor.u32 %v8739_v11, %v8731_v6 }
 0x311   :  { %1249 = vmatpush.bf16.msra.mxu1 %v5432_v5  ;;  %v5511_v5 = vld [vmem:[#allocation3 + $0x300] sm:$0xf]  ;;  %v5487_v16 = vld [vmem:[#allocation3 + $0x2c8] sm:$0xf]  ;;  %v7579_v28 = vld [vmem:[#allocation3 + $0x3d4] sm:$0xf0]  ;;  %v5612_v62 = vor.u32 %v7576_v57, %v5609_v12 }
 0x312   :  { %1262 = vmatpush.bf16.msra.mxu2 %v5560_v10  ;;  %v7520_v10 = vld [vmem:[#allocation3 + $0x204] sm:$0xf]  ;;  %v5488_v42 = vor.u32 %v7547_v46, %v5487_v16  ;;  %v7575_v36 = vld [vmem:[#allocation3 + $0x3b4] sm:$0xf0]  ;;  %v5561_v12 = vld [vmem:[#allocation3 + $0x370] sm:$0xf0] }
 0x313   :  { %1275 = vmatpush.bf16.msra.mxu3 %v5436_v20  ;;  %v5385_v20 = vld [vmem:[#allocation3 + $0x210] sm:$0xf0]  ;;  %v7568_v3 = vld [vmem:[#allocation3 + $0x384] sm:$0xf]  ;;  %v5439_v16 = vld [vmem:[#allocation3 + $0x268] sm:$0xf] }
 0x314   :  { %v7564_v57 = vld [vmem:[#allocation3 + $0x364] sm:$0xf]  ;;  %1722 = vmatpush.bf16.msrb.mxu0 %v5744_v38  ;;  %v5513_v38 = vld [vmem:[#allocation3 + $0x310] sm:$0xf0] }
 0x315   :  { %1250 = vmatpush.bf16.msra.mxu1 %v5416_v7  ;;  %v7583_v7 = vld [vmem:[#allocation3 + $0x3f4] sm:$0xf0]  ;;  %v7560_v27 = vld [vmem:[#allocation3 + $0x344] sm:$0xf] }
 0x316   :  { %1263 = vmatpush.bf16.msra.mxu2 %v5544_v22  ;;  %v5512_v22 = vor.u32 %v7554_v34, %v5511_v5  ;;  %v5632_v24 = vor.u32 %v7583_v7, %v5631_v1  ;;  %v7543_v5 = vld [vmem:[#allocation3 + $0x2b4] sm:$0xf0]  ;;  %v5616_v34 = vor.u32 %v7579_v28, %v5615_v9  ;;  %v5455_v9 = vld [vmem:[#allocation3 + $0x288] sm:$0xf]  ;;  %v7552_v11 = vld [vmem:[#allocation3 + $0x304] sm:$0xf] }
 0x317   :  { %1276 = vmatpush.bf16.msra.mxu3 %v5420_v26  ;;  %v5388_v26 = vor.u32 %v7520_v10, %v5385_v20  ;;  %v855_v10 = vld.sshfl [vmem:[#allocation1] sm:$0xff pattern:$0x73625140]  ;;  %v856_v1 = vld.sshfl [vmem:[#allocation1 + $0x8] sm:$0xff pattern:$0x73625140] }
 0x318   :  { %v5599_v20 = vld [vmem:[#allocation3 + $0x3a8] sm:$0xf]  ;;  %v8917_v44 = vpack.c.bf16 %v855_v10, %v855_v10  ;;  %v7539_v28 = vld [vmem:[#allocation3 + $0x294] sm:$0xf0] }
 0x319   :  { %1251 = vmatpush.bf16.msra.mxu1 %v5400_v18  ;;  %v7572_v18 = vld [vmem:[#allocation3 + $0x3a4] sm:$0xf]  ;;  %v5600_v7 = vor.u32 %v7575_v36, %v5599_v20  ;;  %v5423_v10 = vld [vmem:[#allocation3 + $0x248] sm:$0xf]  ;;  %v7563_v36 = vld [vmem:[#allocation3 + $0x354] sm:$0xf0] }
 0x31a   :  { %1264 = vmatpush.bf16.msra.mxu2 %v5528_v52  ;;  %v5593_v52 = vld [vmem:[#allocation3 + $0x3b0] sm:$0xf0]  ;;  %v5551_v20 = vld [vmem:[#allocation3 + $0x348] sm:$0xf] }
 0x31b   :  { %1277 = vmatpush.bf16.msra.mxu3 %v5404_v32  ;;  %v5471_v32 = vld [vmem:[#allocation3 + $0x2a8] sm:$0xf]  ;;  %v5596_v58 = vor.u32 %v7572_v18, %v5593_v52  ;;  %v7535_v18 = vld [vmem:[#allocation3 + $0x274] sm:$0xf0]  ;;  %v5728_v52 = vor.u32 %v8755_v19, %v8747_v15  ;;  %v7556_v19 = vld [vmem:[#allocation3 + $0x324] sm:$0xf] }
 0x31c   :  { %v5472_v46 = vor.u32 %v7543_v5, %v5471_v32  ;;  %v5564_v32 = vor.u32 %v7564_v57, %v5561_v12  ;;  %v5440_v23 = vor.u32 %v7535_v18, %v5439_v16  ;;  %v7523_v57 = vld [vmem:[#allocation3 + $0x214] sm:$0xf0]  ;;  %v7549_v16 = vld [vmem:[#allocation3 + $0x2ec] sm:$0xf]  ;;  %v5505_v18 = vld [vmem:[#allocation3 + $0x2f8] sm:$0xf0] }
 0x31d   :  { %1252 = vmatpush.bf16.msra.mxu1 %v5384_v14  ;;  %v8919_v14 = vpack.c.bf16 %v856_v1, %v856_v1  ;;  %v7531_v1 = vld [vmem:[#allocation3 + $0x254] sm:$0xf0]  ;;  %1723 = vmatpush.bf16.msrb.mxu0 %v5728_v52 }
 0x31e   :  { %1265 = vmatpush.bf16.msra.mxu2 %v5512_v22  ;;  %v5577_v22 = vld [vmem:[#allocation3 + $0x390] sm:$0xf0]  ;;  %v5424_v15 = vor.u32 %v7531_v1, %v5423_v10  ;;  %v7555_v12 = vld [vmem:[#allocation3 + $0x314] sm:$0xf0]  ;;  %v5489_v10 = vld [vmem:[#allocation3 + $0x2d8] sm:$0xf0] }
 0x31f   :  { %1278 = vmatpush.bf16.msra.mxu3 %v5388_v26  ;;  %v5583_v26 = vld [vmem:[#allocation3 + $0x388] sm:$0xf]  ;;  %v5580_v31 = vor.u32 %v7568_v3, %v5577_v22  ;;  %v5529_v3 = vld [vmem:[#allocation3 + $0x330] sm:$0xf0]  ;;  %v7527_v22 = vld [vmem:[#allocation3 + $0x234] sm:$0xf0] }
 0x320   :  { %1253 = vmatmul.bf16.vlgmr.msra.gmra.mxu1 %v8917_v44  ;;  %v7577_v1 = vld [vmem:[#allocation3 + $0x3cc] sm:$0xf] }
 0x321   :  { %1284 = vmatpush.bf16.msrb.mxu1 %v5628_v48  ;;  %v7571_v48 = vld [vmem:[#allocation3 + $0x394] sm:$0xf0]  ;;  %1266 = vmatmul.bf16.vlgmr.msra.gmra.mxu2 %v8919_v14 }
 0x322   :  { %1297 = vmatpush.bf16.msrb.mxu2 %v5504_v30  ;;  %1279 = vmatmul.bf16.vlgmr.msra.gmra.mxu3 %v8917_v44  ;;  %v5456_v30 = vor.u32 %v7539_v28, %v5455_v9  ;;  %v5535_v9 = vld [vmem:[#allocation3 + $0x328] sm:$0xf]  ;;  %v7559_v28 = vld [vmem:[#allocation3 + $0x334] sm:$0xf0] }
 0x323   :  { %1310 = vmatpush.bf16.msrb.mxu3 %v5632_v24  ;;  %v5584_v24 = vor.u32 %v7571_v48, %v5583_v26  ;;  %1724 = vmatpush.bf16.msrb.mxu0 %v5712_v60  ;;  %v5696_v26 = vor.u32 %v8723_v2, %v8715_v63  ;;  %v5532_v48 = vor.u32 %v7556_v19, %v5529_v3  ;;  %v7569_v3 = vld [vmem:[#allocation3 + $0x38c] sm:$0xf] }
 0x324   :  { %v5680_v63 = vor.u32 %v8707_v59, %v8695_v51  ;;  %v5516_v2 = vor.u32 %v7552_v11, %v5513_v38  ;;  %v5664_v51 = vor.u32 %v8687_v47, %v8679_v43  ;;  %v5736_v60 = vor.u32 %v8767_v25, %v8759_v21  ;;  %v7537_v25 = vld [vmem:[#allocation3 + $0x28c] sm:$0xf]  ;;  %v5425_v38 = vld [vmem:[#allocation3 + $0x258] sm:$0xf0] }
 0x325   :  { %1285 = vmatpush.bf16.msrb.mxu1 %v5612_v62  ;;  %v5567_v62 = vld [vmem:[#allocation3 + $0x368] sm:$0xf]  ;;  %v5648_v43 = vor.u32 %v8671_v39, %v8663_v35  ;;  %v5720_v21 = vor.u32 %v8751_v17, %v8743_v13  ;;  %v5704_v35 = vor.u32 %v8735_v8, %v8727_v4  ;;  %v7533_v39 = vld [vmem:[#allocation3 + $0x26c] sm:$0xf] }
 0x326   :  { %1298 = vmatpush.bf16.msrb.mxu2 %v5488_v42  ;;  %v7567_v42 = vld [vmem:[#allocation3 + $0x374] sm:$0xf0]  ;;  %v7529_v11 = vld [vmem:[#allocation3 + $0x24c] sm:$0xf] }
 0x327   :  { %1311 = vmatpush.bf16.msrb.mxu3 %v5616_v34  ;;  %v5568_v5 = vor.u32 %v7567_v42, %v5567_v62  ;;  %v5545_v34 = vld [vmem:[#allocation3 + $0x350] sm:$0xf0]  ;;  %v7581_v62 = vld [vmem:[#allocation3 + $0x3ec] sm:$0xf]  ;;  %v5633_v42 = vld [vmem:[#allocation3 + $0x3f8] sm:$0xf0]  ;;  %1725 = vmatpush.bf16.msrb.mxu0 %v5696_v26  ;;  %v5428_v4 = vor.u32 %v7529_v11, %v5425_v38 }
 0x328   :  { %v7565_v26 = vld [vmem:[#allocation3 + $0x36c] sm:$0xf]  ;;  %v9682_v11 = vld [vmem:[#allocation94_spill] sm:$0xff] }
 0x329   :  { %1286 = vmatpush.bf16.msrb.mxu1 %v5596_v58  ;;  %v5548_v58 = vor.u32 %v7560_v27, %v5545_v34  ;;  %v5636_v27 = vor.u32 %v7581_v62, %v5633_v42  ;;  %v7545_v34 = vld [vmem:[#allocation3 + $0x2cc] sm:$0xf]  ;;  %v9683_v38 = vld [vmem:[#allocation98_spill] sm:$0xff] }
 0x32a   :  { %1299 = vmatpush.bf16.msrb.mxu2 %v5472_v46  ;;  %v5552_v46 = vor.u32 %v7563_v36, %v5551_v20  ;;  %v5617_v20 = vld [vmem:[#allocation3 + $0x3d8] sm:$0xf0]  ;;  %v5492_v59 = vor.u32 %v7545_v34, %v5489_v10  ;;  %v7521_v42 = vld [vmem:[#allocation3 + $0x20c] sm:$0xf]  ;;  %v9656_v34 = vld [vmem:[#allocation136_spill] sm:$0xff] }
 0x32b   :  { %1312 = vmatpush.bf16.msrb.mxu3 %v5600_v7  ;;  %v5407_v7 = vld [vmem:[#allocation3 + $0x228] sm:$0xf]  ;;  %1726 = vmatpush.bf16.msrb.mxu0 %v5680_v63  ;;  %v5620_v36 = vor.u32 %v7577_v1, %v5617_v20  ;;  %v5393_v63 = vld [vmem:[#allocation3 + $0x218] sm:$0xf0]  ;;  %v9658_v10 = vld [vmem:[#allocation126_spill] sm:$0xff] }
 0x32c   :  { %v5408_v6 = vor.u32 %v7527_v22, %v5407_v7  ;;  %v5585_v7 = vld [vmem:[#allocation3 + $0x398] sm:$0xf0]  ;;  %v9659_v1 = vld [vmem:[#allocation130_spill] sm:$0xff] }
 0x32d   :  { %1287 = vmatpush.bf16.msrb.mxu1 %v5580_v31  ;;  %v5536_v31 = vor.u32 %v7559_v28, %v5535_v9  ;;  %v5588_v9 = vor.u32 %v7569_v3, %v5585_v7  ;;  %v5441_v28 = vld [vmem:[#allocation3 + $0x278] sm:$0xf0]  ;;  %v5864_v20 = vor.u32 %v9659_v1, %v9658_v10  ;;  %v9674_v3 = vld [vmem:[#allocation113_spill] sm:$0xff]  ;;  %v9701_v1 = vld [vmem:[#allocation138_spill] sm:$0xff] }
 0x32e   :  { %1300 = vmatpush.bf16.msrb.mxu2 %v5456_v30  ;;  %v5391_v30 = vld [vmem:[#allocation3 + $0x208] sm:$0xf]  ;;  %v5444_v13 = vor.u32 %v7533_v39, %v5441_v28  ;;  %v9700_v10 = vld [vmem:[#allocation135_spill] sm:$0xff] }
 0x32f   :  { %1313 = vmatpush.bf16.msrb.mxu3 %v5584_v24  ;;  %v5519_v24 = vld [vmem:[#allocation3 + $0x308] sm:$0xf]  ;;  %v5392_v52 = vor.u32 %v7523_v57, %v5391_v30  ;;  %1727 = vmatpush.bf16.msrb.mxu0 %v5664_v51  ;;  %v5553_v30 = vld [vmem:[#allocation3 + $0x358] sm:$0xf0]  ;;  %v5672_v57 = vor.u32 %v8699_v53, %v8691_v49  ;;  %v5640_v53 = vor.u32 %v8667_v37, %v8659_v33 }
 0x330   :  { %v9660_v51 = vld [vmem:[#allocation72_spill] sm:$0xff]  ;;  %v9662_v37 = vld [vmem:[#allocation129_spill] sm:$0xff] }
 0x331   :  { %1288 = vmatpush.bf16.msrb.mxu1 %v5564_v32  ;;  %v5520_v32 = vor.u32 %v7555_v12, %v5519_v24  ;;  %v7525_v24 = vld [vmem:[#allocation3 + $0x22c] sm:$0xf]  ;;  %v5409_v12 = vld [vmem:[#allocation3 + $0x238] sm:$0xf0]  ;;  %v9678_v28 = vld [vmem:[#allocation60_spill] sm:$0xff] }
 0x332   :  { %1301 = vmatpush.bf16.msrb.mxu2 %v5440_v23  ;;  %v5508_v23 = vor.u32 %v7549_v16, %v5505_v18  ;;  %v7557_v16 = vld [vmem:[#allocation3 + $0x32c] sm:$0xf]  ;;  %v5537_v18 = vld [vmem:[#allocation3 + $0x338] sm:$0xf0]  ;;  %v5412_v62 = vor.u32 %v7525_v24, %v5409_v12 }
 0x333   :  { %1314 = vmatpush.bf16.msrb.mxu3 %v5568_v5  ;;  %v5752_v5 = vor.u32 %v8783_v55, %v8775_v29  ;;  %v7541_v29 = vld [vmem:[#allocation3 + $0x2ac] sm:$0xf]  ;;  %v5473_v55 = vld [vmem:[#allocation3 + $0x2b8] sm:$0xf0]  ;;  %1728 = vmatpush.bf16.msrb.mxu0 %v5648_v43 }
 0x334   :  { %v5476_v47 = vor.u32 %v7541_v29, %v5473_v55  ;;  %v9666_v29 = vld [vmem:[#allocation68_spill] sm:$0xff]  ;;  %v9667_v55 = vld [vmem:[#allocation66_spill] sm:$0xff]  ;;  %v9669_v43 = vld [vmem:[#allocation117_spill] sm:$0xff] }
 0x335   :  { %1289 = vmatpush.bf16.msrb.mxu1 %v5548_v58  ;;  %v7573_v58 = vld [vmem:[#allocation3 + $0x3ac] sm:$0xf] }
 0x336   :  { %1302 = vmatpush.bf16.msrb.mxu2 %v5424_v15  ;;  %v5601_v15 = vld [vmem:[#allocation3 + $0x3b8] sm:$0xf0]  ;;  %1729 = vmatmul.bf16.vlgmr.msrb.gmra.mxu0 %v8701_v56  ;;  %v9675_v7 = vld [vmem:[#allocation109_spill] sm:$0xff] }
 0x337   :  { %1315 = vmatpush.bf16.msrb.mxu3 %v5552_v46  ;;  %v5604_v19 = vor.u32 %v7573_v58, %v5601_v15  ;;  %v5457_v46 = vld [vmem:[#allocation3 + $0x298] sm:$0xf0]  ;;  %v5724_v58 = vor.u32 %v9667_v55, %v9666_v29  ;;  %v9668_v15 = vld [vmem:[#allocation121_spill] sm:$0xff] }
 0x338   :  { %v5460_v22 = vor.u32 %v7537_v25, %v5457_v46  ;;  %v9672_v25 = vld [vmem:[#allocation64_spill] sm:$0xff]  ;;  %v9673_v46 = vld [vmem:[#allocation62_spill] sm:$0xff]  ;;  %v9687_v24 = vld [vmem:[#allocation93_spill] sm:$0xff] }
 0x339   :  { %1290 = vmatpush.bf16.msrb.mxu1 %v5532_v48  ;;  %v5569_v48 = vld [vmem:[#allocation3 + $0x378] sm:$0xf0]  ;;  %v9708_v29 = vld [vmem:[#allocation73_spill] sm:$0xff] }
 0x33a   :  { %1303 = vmatpush.bf16.msrb.mxu2 %v5408_v6  ;;  %v5572_v17 = vor.u32 %v7565_v26, %v5569_v48  ;;  %v5688_v6 = vor.u32 %v8719_v0, %v8711_v61  ;;  %v5540_v61 = vor.u32 %v7557_v16, %v5537_v18  ;;  %v5656_v0 = vor.u32 %v8683_v45, %v8675_v41  ;;  %v9657_v41 = vld [vmem:[#allocation133_spill] sm:$0xff]  ;;  %v9679_v26 = vld [vmem:[#allocation58_spill] sm:$0xff]  ;;  %v9709_v55 = vld [vmem:[#allocation71_spill] sm:$0xff] }
 0x33b   :  { %1316 = vmatpush.bf16.msrb.mxu3 %v5536_v31  ;;  %v7561_v31 = vld [vmem:[#allocation3 + $0x34c] sm:$0xf]  ;;  %v5884_v45 = vor.u32 %v9657_v41, %v9656_v34  ;;  %v5692_v48 = vor.u32 %v9679_v26, %v9678_v28  ;;  %v9688_v16 = vld [vmem:[#allocation86_spill] sm:$0xff] }
 0x33c   :  { %v5556_v8 = vor.u32 %v7561_v31, %v5553_v30  ;;  %v5800_v31 = vor.u32 %v9683_v38, %v9682_v11  ;;  %v9684_v30 = vld [vmem:[#allocation55_spill] sm:$0xff]  ;;  %v9689_v18 = vld [vmem:[#allocation90_spill] sm:$0xff]  ;;  %v9698_v34 = vld [vmem:[#allocation81_spill] sm:$0xff] }
 0x33d   :  { %1291 = vmatpush.bf16.msrb.mxu1 %v5516_v2  ;;  %v7553_v2 = vld [vmem:[#allocation3 + $0x30c] sm:$0xf]  ;;  %v9725_v38 = vld [vmem:[#allocation104_spill] sm:$0xff] }
 0x33e   :  { %1304 = vmatpush.bf16.msrb.mxu2 %v5392_v52  ;;  %v5521_v52 = vld [vmem:[#allocation3 + $0x318] sm:$0xf0]  ;;  %v9699_v41 = vld [vmem:[#allocation77_spill] sm:$0xff] }
 0x33f   :  { %1317 = vmatpush.bf16.msrb.mxu3 %v5520_v32  ;;  %v5396_v32 = vor.u32 %v7521_v42, %v5393_v63  ;;  %v5524_v49 = vor.u32 %v7553_v2, %v5521_v52  ;;  %v9692_v63 = vld [vmem:[#allocation89_spill] sm:$0xff] }
 0x340   :  { %1292 = vmatmul.bf16.vlgmr.msrb.gmra.mxu1 %v8919_v14  ;;  %v9693_v2 = vld [vmem:[#allocation85_spill] sm:$0xff] }
 0x341   :  { %1323 = vmatpush.bf16.msra.mxu1 %v5508_v23  ;;  %1305 = vmatmul.bf16.vlgmr.msrb.gmra.mxu2 %v8917_v44  ;;  %v5880_v23 = vor.u32 %v8911_v50, %v8903_v40  ;;  %v9663_v40 = vld [vmem:[#allocation125_spill] sm:$0xff]  ;;  %v5788_v52 = vor.u32 %v9693_v2, %v9692_v63  ;;  %v9735_v2 = vld [vmem:[#allocation99_spill] sm:$0xff] }
 0x342   :  { %1336 = vmatpush.bf16.msra.mxu2 %v5636_v27  ;;  %1318 = vmatmul.bf16.vlgmr.msrb.gmra.mxu3 %v8919_v14  ;;  %v9655_v27 = vld [vmem:[#allocation74_spill] sm:$0xff]  ;;  %v5868_v50 = vor.u32 %v9663_v40, %v9662_v37  ;;  %v9704_v37 = vld [vmem:[#allocation137_spill] sm:$0xff] }
 0x343   :  { %1669 = vmatpush.bf16.msra.mxu3 %v5752_v5  ;;  %v5756_v5 = vor.u32 %v9655_v27, %v8781_v54  ;;  %v9664_v54 = vld [vmem:[#allocation118_spill] sm:$0xff]  ;;  %v9697_v27 = vld [vmem:[#allocation45_spill] sm:$0xff] }
 0x344   :  { %v9705_v40 = vld [vmem:[#allocation134_spill] sm:$0xff]  ;;  %v9721_v26 = vld [vmem:[#allocation65_spill] sm:$0xff] }
 0x345   :  { %1324 = vmatpush.bf16.msra.mxu1 %v5492_v59  ;;  %v9661_v59 = vld [vmem:[#allocation70_spill] sm:$0xff] }
 0x346   :  { %1337 = vmatpush.bf16.msra.mxu2 %v5620_v36  ;;  %v5740_v33 = vor.u32 %v9661_v59, %v9660_v51  ;;  %v9665_v36 = vld [vmem:[#allocation122_spill] sm:$0xff]  ;;  %v9702_v51 = vld [vmem:[#allocation76_spill] sm:$0xff]  ;;  %v9703_v59 = vld [vmem:[#allocation75_spill] sm:$0xff] }
 0x347   :  { %1670 = vmatpush.bf16.msra.mxu3 %v5736_v60  ;;  %v5848_v60 = vor.u32 %v9665_v36, %v9664_v54  ;;  %v9706_v54 = vld [vmem:[#allocation128_spill] sm:$0xff] }
 0x348   :  { %v9707_v36 = vld [vmem:[#allocation132_spill] sm:$0xff] }
 0x349   :  { %1325 = vmatpush.bf16.msra.mxu1 %v5476_v47  ;;  %v5852_v47 = vor.u32 %v9669_v43, %v9668_v15  ;;  %v9710_v15 = vld [vmem:[#allocation131_spill] sm:$0xff] }
 0x34a   :  { %1338 = vmatpush.bf16.msra.mxu2 %v5604_v19  ;;  %v9670_v19 = vld [vmem:[#allocation110_spill] sm:$0xff]  ;;  %v9711_v43 = vld [vmem:[#allocation127_spill] sm:$0xff] }
 0x34b   :  { %1671 = vmatpush.bf16.msra.mxu3 %v5720_v21 }
 0x34d   :  { %1326 = vmatpush.bf16.msra.mxu1 %v5460_v22  ;;  %v5836_v22 = vor.u32 %v9675_v7, %v9674_v3  ;;  %v9717_v7 = vld [vmem:[#allocation123_spill] sm:$0xff] }
 0x34e   :  { %1339 = vmatpush.bf16.msra.mxu2 %v5588_v9  ;;  %v9676_v9 = vld [vmem:[#allocation102_spill] sm:$0xff] }
 0x34f   :  { %1672 = vmatpush.bf16.msra.mxu3 %v5704_v35  ;;  %v9677_v35 = vld [vmem:[#allocation106_spill] sm:$0xff] }
 0x350   :  { %v5816_v39 = vor.u32 %v9677_v35, %v9676_v9  ;;  %v9719_v35 = vld [vmem:[#allocation112_spill] sm:$0xff] }
 0x351   :  { %1327 = vmatpush.bf16.msra.mxu1 %v5444_v13  ;;  %v9680_v13 = vld [vmem:[#allocation105_spill] sm:$0xff] }
 0x352   :  { %1340 = vmatpush.bf16.msra.mxu2 %v5572_v17  ;;  %v9681_v17 = vld [vmem:[#allocation101_spill] sm:$0xff] }
 0x353   :  { %1673 = vmatpush.bf16.msra.mxu3 %v5688_v6  ;;  %v5820_v6 = vor.u32 %v9681_v17, %v9680_v13  ;;  %v9723_v17 = vld [vmem:[#allocation115_spill] sm:$0xff] }
 0x355   :  { %1328 = vmatpush.bf16.msra.mxu1 %v5428_v4  ;;  %v9685_v4 = vld [vmem:[#allocation53_spill] sm:$0xff] }
 0x356   :  { %1341 = vmatpush.bf16.msra.mxu2 %v5556_v8  ;;  %v5676_v8 = vor.u32 %v9685_v4, %v9684_v30  ;;  %v9727_v4 = vld [vmem:[#allocation61_spill] sm:$0xff] }
 0x357   :  { %1674 = vmatpush.bf16.msra.mxu3 %v5672_v57  ;;  %v9686_v57 = vld [vmem:[#allocation97_spill] sm:$0xff] }
 0x358   :  { %v5804_v12 = vor.u32 %v9687_v24, %v9686_v57  ;;  %v9729_v24 = vld [vmem:[#allocation107_spill] sm:$0xff] }
 0x359   :  { %1329 = vmatpush.bf16.msra.mxu1 %v5412_v62  ;;  %v5784_v62 = vor.u32 %v9689_v18, %v9688_v16  ;;  %v9731_v18 = vld [vmem:[#allocation96_spill] sm:$0xff] }
 0x35a   :  { %1342 = vmatpush.bf16.msra.mxu2 %v5540_v61  ;;  %v9690_v61 = vld [vmem:[#allocation51_spill] sm:$0xff] }
 0x35b   :  { %1675 = vmatpush.bf16.msra.mxu3 %v5656_v0  ;;  %v9691_v0 = vld [vmem:[#allocation49_spill] sm:$0xff] }
 0x35c   :  { %v5660_v42 = vor.u32 %v9691_v0, %v9690_v61  ;;  %v9733_v0 = vld [vmem:[#allocation57_spill] sm:$0xff] }
 0x35d   :  { %1330 = vmatpush.bf16.msra.mxu1 %v5396_v32  ;;  %v9694_v32 = vld [vmem:[#allocation78_spill] sm:$0xff] }
 0x35e   :  { %1343 = vmatpush.bf16.msra.mxu2 %v5524_v49  ;;  %v9695_v49 = vld [vmem:[#allocation82_spill] sm:$0xff] }
 0x35f   :  { %1676 = vmatpush.bf16.msra.mxu3 %v5640_v53  ;;  %v5768_v53 = vor.u32 %v9695_v49, %v9694_v32  ;;  %v9737_v49 = vld [vmem:[#allocation88_spill] sm:$0xff] }
 0x360   :  { %1331 = vmatmul.bf16.vlgmr.msra.gmra.mxu1 %v8917_v44  ;;  %v9671_v44 = vld [vmem:[#allocation114_spill] sm:$0xff] }
 0x361   :  { %1682 = vmatpush.bf16.msrb.mxu1 %v5880_v23  ;;  %1344 = vmatmul.bf16.vlgmr.msra.gmra.mxu2 %v8919_v14  ;;  %v5832_v21 = vor.u32 %v9671_v44, %v9670_v19  ;;  %v5708_v14 = vor.u32 %v9673_v46, %v9672_v25  ;;  %v9696_v23 = vld [vmem:[#allocation47_spill] sm:$0xff]  ;;  %v9712_v19 = vld [vmem:[#allocation56_spill] sm:$0xff]  ;;  %v9715_v46 = vld [vmem:[#allocation69_spill] sm:$0xff] }
 0x362   :  { %1695 = vmatpush.bf16.msrb.mxu2 %v5756_v5  ;;  %1677 = vmatmul.bf16.vlgmr.msra.gmra.mxu3 %v8701_v56  ;;  %v5644_v5 = vor.u32 %v9697_v27, %v9696_v23  ;;  %v9713_v44 = vld [vmem:[#allocation120_spill] sm:$0xff] }
 0x363   :  { %1708 = vmatpush.bf16.msrb.mxu3 %v5884_v45  ;;  %v5772_v45 = vor.u32 %v9699_v41, %v9698_v34  ;;  %v9739_v27 = vld [vmem:[#allocation52_spill] sm:$0xff]  ;;  %v9741_v41 = vld [vmem:[#allocation91_spill] sm:$0xff] }
 0x365   :  { %1683 = vmatpush.bf16.msrb.mxu1 %v5864_v20  ;;  %v5888_v20 = vor.u32 %v9701_v1, %v9700_v10  ;;  %v9743_v1 = vld [vmem:[#allocation80_spill] sm:$0xff] }
 0x366   :  { %1696 = vmatpush.bf16.msrb.mxu2 %v5740_v33  ;;  %v5764_v33 = vor.u32 %v9703_v59, %v9702_v51  ;;  %v9745_v59 = vld [vmem:[#allocation48_spill] sm:$0xff] }
 0x367   :  { %1709 = vmatpush.bf16.msrb.mxu3 %v5868_v50  ;;  %v5892_v50 = vor.u32 %v9705_v40, %v9704_v37  ;;  %v9747_v40 = vld [vmem:[#allocation83_spill] sm:$0xff] }
 0x369   :  { %1684 = vmatpush.bf16.msrb.mxu1 %v5848_v60  ;;  %v5872_v60 = vor.u32 %v9707_v36, %v9706_v54 }
 0x36a   :  { %1697 = vmatpush.bf16.msrb.mxu2 %v5724_v58  ;;  %v5748_v58 = vor.u32 %v9709_v55, %v9708_v29 }
 0x36b   :  { %1710 = vmatpush.bf16.msrb.mxu3 %v5852_v47  ;;  %v5876_v47 = vor.u32 %v9711_v43, %v9710_v15 }
 0x36d   :  { %1685 = vmatpush.bf16.msrb.mxu1 %v5832_v21  ;;  %v9714_v21 = vld [vmem:[#allocation124_spill] sm:$0xff] }
 0x36e   :  { %1698 = vmatpush.bf16.msrb.mxu2 %v5708_v14  ;;  %v5856_v25 = vor.u32 %v9714_v21, %v9713_v44  ;;  %v9716_v14 = vld [vmem:[#allocation67_spill] sm:$0xff] }
 0x36f   :  { %1711 = vmatpush.bf16.msrb.mxu3 %v5836_v22  ;;  %v5732_v3 = vor.u32 %v9716_v14, %v9715_v46  ;;  %v9718_v22 = vld [vmem:[#allocation119_spill] sm:$0xff] }
 0x370   :  { %v5860_v9 = vor.u32 %v9718_v22, %v9717_v7 }
 0x371   :  { %1686 = vmatpush.bf16.msrb.mxu1 %v5816_v39  ;;  %v9720_v39 = vld [vmem:[#allocation116_spill] sm:$0xff] }
 0x372   :  { %1699 = vmatpush.bf16.msrb.mxu2 %v5692_v48  ;;  %v5840_v28 = vor.u32 %v9720_v39, %v9719_v35  ;;  %v9722_v48 = vld [vmem:[#allocation63_spill] sm:$0xff] }
 0x373   :  { %1712 = vmatpush.bf16.msrb.mxu3 %v5820_v6  ;;  %v5716_v13 = vor.u32 %v9722_v48, %v9721_v26  ;;  %v9724_v6 = vld [vmem:[#allocation111_spill] sm:$0xff] }
 0x374   :  { %v5844_v11 = vor.u32 %v9724_v6, %v9723_v17 }
 0x375   :  { %1687 = vmatpush.bf16.msrb.mxu1 %v5800_v31  ;;  %v9726_v31 = vld [vmem:[#allocation108_spill] sm:$0xff] }
 0x376   :  { %1700 = vmatpush.bf16.msrb.mxu2 %v5676_v8  ;;  %v5824_v30 = vor.u32 %v9726_v31, %v9725_v38  ;;  %v9728_v8 = vld [vmem:[#allocation59_spill] sm:$0xff] }
 0x377   :  { %1713 = vmatpush.bf16.msrb.mxu3 %v5804_v12  ;;  %v5700_v57 = vor.u32 %v9728_v8, %v9727_v4  ;;  %v9730_v12 = vld [vmem:[#allocation103_spill] sm:$0xff] }
 0x378   :  { %v5828_v16 = vor.u32 %v9730_v12, %v9729_v24 }
 0x379   :  { %1688 = vmatpush.bf16.msrb.mxu1 %v5784_v62  ;;  %v9732_v62 = vld [vmem:[#allocation100_spill] sm:$0xff] }
 0x37a   :  { %1701 = vmatpush.bf16.msrb.mxu2 %v5660_v42  ;;  %v5808_v61 = vor.u32 %v9732_v62, %v9731_v18  ;;  %v9734_v42 = vld [vmem:[#allocation54_spill] sm:$0xff] }
 0x37b   :  { %1714 = vmatpush.bf16.msrb.mxu3 %v5788_v52  ;;  %v5684_v63 = vor.u32 %v9734_v42, %v9733_v0  ;;  %v9736_v52 = vld [vmem:[#allocation95_spill] sm:$0xff] }
 0x37c   :  { %v5812_v32 = vor.u32 %v9736_v52, %v9735_v2 }
 0x37d   :  { %1689 = vmatpush.bf16.msrb.mxu1 %v5768_v53  ;;  %v9738_v53 = vld [vmem:[#allocation92_spill] sm:$0xff] }
 0x37e   :  { %1702 = vmatpush.bf16.msrb.mxu2 %v5644_v5  ;;  %v5792_v23 = vor.u32 %v9738_v53, %v9737_v49  ;;  %v9740_v5 = vld [vmem:[#allocation50_spill] sm:$0xff] }
 0x37f   :  { %1715 = vmatpush.bf16.msrb.mxu3 %v5772_v45  ;;  %v5668_v34 = vor.u32 %v9740_v5, %v9739_v27  ;;  %v9742_v45 = vld [vmem:[#allocation87_spill] sm:$0xff] }
 0x380   :  { %1690 = vmatmul.bf16.vlgmr.msrb.gmra.mxu1 %v9712_v19  ;;  %v5796_v10 = vor.u32 %v9742_v45, %v9741_v41 }
 0x381   :  { %1734 = vmatpush.bf16.msra.mxu1 %v5888_v20  ;;  %1703 = vmatmul.bf16.vlgmr.msrb.gmra.mxu2 %v8701_v56  ;;  %v9744_v20 = vld [vmem:[#allocation84_spill] sm:$0xff] }
 0x382   :  { %1747 = vmatpush.bf16.msra.mxu2 %v5764_v33  ;;  %1716 = vmatmul.bf16.vlgmr.msrb.gmra.mxu3 %v9712_v19  ;;  %v5776_v51 = vor.u32 %v9744_v20, %v9743_v1  ;;  %v9746_v33 = vld [vmem:[#allocation46_spill] sm:$0xff] }
 0x383   :  { %1760 = vmatpush.bf16.msra.mxu3 %v5892_v50  ;;  %v5652_v37 = vor.u32 %v9746_v33, %v9745_v59  ;;  %v9748_v50 = vld [vmem:[#allocation79_spill] sm:$0xff] }
 0x384   :  { %v5780_v54 = vor.u32 %v9748_v50, %v9747_v40 }
 0x385   :  { %1735 = vmatpush.bf16.msra.mxu1 %v5872_v60 }
 0x386   :  { %1748 = vmatpush.bf16.msra.mxu2 %v5748_v58 }
 0x387   :  { %1761 = vmatpush.bf16.msra.mxu3 %v5876_v47 }
 0x389   :  { %1736 = vmatpush.bf16.msra.mxu1 %v5856_v25 }
 0x38a   :  { %1749 = vmatpush.bf16.msra.mxu2 %v5732_v3 }
 0x38b   :  { %1762 = vmatpush.bf16.msra.mxu3 %v5860_v9 }
 0x38d   :  { %1737 = vmatpush.bf16.msra.mxu1 %v5840_v28 }
 0x38e   :  { %1750 = vmatpush.bf16.msra.mxu2 %v5716_v13 }
 0x38f   :  { %1763 = vmatpush.bf16.msra.mxu3 %v5844_v11 }
 0x391   :  { %1738 = vmatpush.bf16.msra.mxu1 %v5824_v30 }
 0x392   :  { %1751 = vmatpush.bf16.msra.mxu2 %v5700_v57 }
 0x393   :  { %1764 = vmatpush.bf16.msra.mxu3 %v5828_v16 }
 0x395   :  { %1739 = vmatpush.bf16.msra.mxu1 %v5808_v61 }
 0x396   :  { %1752 = vmatpush.bf16.msra.mxu2 %v5684_v63 }
 0x397   :  { %1765 = vmatpush.bf16.msra.mxu3 %v5812_v32 }
 0x399   :  { %1740 = vmatpush.bf16.msra.mxu1 %v5792_v23 }
 0x39a   :  { %1753 = vmatpush.bf16.msra.mxu2 %v5668_v34 }
 0x39b   :  { %1766 = vmatpush.bf16.msra.mxu3 %v5796_v10 }
 0x39d   :  { %1741 = vmatpush.bf16.msra.mxu1 %v5776_v51  ;;  %v1254_v36 = vpop.f32.mrf.mxu1 }
 0x39e   :  { %1754 = vmatpush.bf16.msra.mxu2 %v5652_v37 }
 0x39f   :  { %1767 = vmatpush.bf16.msra.mxu3 %v5780_v54 }
 0x3a0   :  { %1742 = vmatmul.bf16.vlgmr.msra.gmra.mxu1 %v9712_v19 }
 0x3a1   :  { %1755 = vmatmul.bf16.vlgmr.msra.gmra.mxu2 %v8701_v56 }
 0x3a2   :  { %1768 = vmatmul.bf16.vlgmr.msra.gmra.mxu3 %v9712_v19 }
 0x3a4   :  { %v1267_v60 = vpop.f32.mrf.mxu2 }
 0x3a5   :  { %v1280_v29 = vpop.f32.mrf.mxu3  ;;  %v1256_v55 = vpop.f32.mrf.mxu1  ;;  %v1268_v58 = vadd.f32 %v1267_v60, %v1254_v36 }
 0x3ac   :  { %v1269_v15 = vpop.f32.mrf.mxu2 }
 0x3ad   :  { %v1282_v43 = vpop.f32.mrf.mxu3 }
 0x3b3   :  { %v1730_v3 = vpop.f32.mrf.mxu0 }
 0x3bb   :  { %v1732_v56 = vpop.f32.mrf.mxu0 }
 0x3bd   :  { %v1293_v47 = vpop.f32.mrf.mxu1 }
 0x3be   :  { %v1294_v44 = vadd.f32 %v1293_v47, %v1280_v29 }
 0x3c4   :  { %v1306_v21 = vpop.f32.mrf.mxu2 }
 0x3c5   :  { %v1319_v25 = vpop.f32.mrf.mxu3  ;;  %v1295_v14 = vpop.f32.mrf.mxu1 }
 0x3c6   :  { %v1320_v46 = vadd.f32 %v1319_v25, %v1306_v21 }
 0x3c8   :  { %v1731_v7 = vadd.f32 %v1730_v3, %v1320_v46 }
 0x3cc   :  { %v1308_v22 = vpop.f32.mrf.mxu2 }
 0x3cd   :  { %v1321_v9 = vpop.f32.mrf.mxu3 }
 0x3dd   :  { %v1332_v35 = vpop.f32.mrf.mxu1 }
 0x3e4   :  { %v1345_v39 = vpop.f32.mrf.mxu2 }
 0x3e5   :  { %v1678_v19 = vpop.f32.mrf.mxu3  ;;  %v1334_v26 = vpop.f32.mrf.mxu1  ;;  %v1346_v16 = vadd.f32 %v1345_v39, %v1332_v35 }
 0x3e6   :  { %v1679_v28 = vadd.f32 %v1678_v19, %v1268_v58 }
 0x3ec   :  { %v1347_v48 = vpop.f32.mrf.mxu2 }
 0x3ed   :  { %v1680_v13 = vpop.f32.mrf.mxu3 }
 0x3fd   :  { %v1691_v17 = vpop.f32.mrf.mxu1 }
 0x3fe   :  { %v9065_v6 = vadd.f32 %v1691_v17, %v1679_v28 }
 0x404   :  { %v1704_v11 = vpop.f32.mrf.mxu2 }
 0x405   :  { %v1705_v38 = vadd.f32 %v1704_v11, %v1294_v44  ;;  %v1717_v31 = vpop.f32.mrf.mxu3  ;;  %v1693_v30 = vpop.f32.mrf.mxu1 }
 0x407   :  { %v9067_v4 = vadd.f32 %v1717_v31, %v1705_v38 }
 0x40c   :  { %v1706_v8 = vpop.f32.mrf.mxu2 }
 0x40d   :  { %v1719_v57 = vpop.f32.mrf.mxu3 }
 0x41d   :  { %v1743_v24 = vpop.f32.mrf.mxu1 }
 0x41e   :  { %v9069_v12 = vadd.f32 %v1743_v24, %v1731_v7 }
 0x424   :  { %v1756_v18 = vpop.f32.mrf.mxu2 }
 0x425   :  { %v1769_v62 = vpop.f32.mrf.mxu3  ;;  %v1757_v61 = vadd.f32 %v1756_v18, %v1346_v16  ;;  %v1745_v0 = vpop.f32.mrf.mxu1 }
 0x427   :  { %v9071_v42 = vadd.f32 %v1769_v62, %v1757_v61 }
 0x42c   :  { %v1758_v63 = vpop.f32.mrf.mxu2 }
 0x42d   :  { %v1771_v2 = vpop.f32.mrf.mxu3 }
 0x42e   :  { %8341 = dma.done.wait [#allocation4 + $0x2], 8192 }
 0x42f   :  { %8342 = vsyncadd [#allocation4 + $0x2], 4294959104  ;;  %v6007_v52 = vld [vmem:[#allocation3 + $0x4e0] sm:$0xf]  ;;  %v7614_v32 = vld [vmem:[#allocation3 + $0x4ec] sm:$0xf0] }
 0x430   :  { %v6135_v49 = vld [vmem:[#allocation3 + $0x5e0] sm:$0xf]  ;;  %v6008_v53 = vor.u32 %v7614_v32, %v6007_v52  ;;  %v7646_v23 = vld [vmem:[#allocation3 + $0x5ec] sm:$0xf0]  ;;  %v7612_v27 = vld [vmem:[#allocation3 + $0x4e4] sm:$0xf] }
 0x431   :  { %v6009_v5 = vld [vmem:[#allocation3 + $0x4f0] sm:$0xf0]  ;;  %v6136_v34 = vor.u32 %v7646_v23, %v6135_v49  ;;  %v7644_v45 = vld [vmem:[#allocation3 + $0x5e4] sm:$0xf]  ;;  %v5991_v1 = vld [vmem:[#allocation3 + $0x4c0] sm:$0xf] }
 0x432   :  { %v6012_v41 = vor.u32 %v7612_v27, %v6009_v5  ;;  %v6137_v10 = vld [vmem:[#allocation3 + $0x5f0] sm:$0xf0]  ;;  %2168 = vmatpush.bf16.msra.mxu0 %v6008_v53  ;;  %v7610_v51 = vld [vmem:[#allocation3 + $0x4cc] sm:$0xf0]  ;;  %v6119_v59 = vld [vmem:[#allocation3 + $0x5c0] sm:$0xf] }
 0x433   :  { %v6140_v20 = vor.u32 %v7644_v45, %v6137_v10  ;;  %v7642_v33 = vld [vmem:[#allocation3 + $0x5cc] sm:$0xf0]  ;;  %2181 = vmatpush.bf16.msrb.mxu1 %v6136_v34  ;;  %v5992_v37 = vor.u32 %v7610_v51, %v5991_v1  ;;  %v7608_v50 = vld [vmem:[#allocation3 + $0x4c4] sm:$0xf]  ;;  %v5993_v54 = vld [vmem:[#allocation3 + $0x4d0] sm:$0xf0] }
 0x434   :  { %2194 = vmatpush.bf16.msrb.mxu2 %v6012_v41  ;;  %v6120_v40 = vor.u32 %v7642_v33, %v6119_v59  ;;  %v7640_v36 = vld [vmem:[#allocation3 + $0x5c4] sm:$0xf]  ;;  %v5996_v60 = vor.u32 %v7608_v50, %v5993_v54  ;;  %v6121_v29 = vld [vmem:[#allocation3 + $0x5d0] sm:$0xf0]  ;;  %v5975_v55 = vld [vmem:[#allocation3 + $0x4a0] sm:$0xf] }
 0x435   :  { %2207 = vmatpush.bf16.msrb.mxu3 %v6140_v20  ;;  %v7606_v58 = vld [vmem:[#allocation3 + $0x4ac] sm:$0xf0]  ;;  %v6124_v15 = vor.u32 %v7640_v36, %v6121_v29  ;;  %v6103_v43 = vld [vmem:[#allocation3 + $0x5a0] sm:$0xf]  ;;  %v7604_v44 = vld [vmem:[#allocation3 + $0x4a4] sm:$0xf] }
 0x436   :  { %v7638_v47 = vld [vmem:[#allocation3 + $0x5ac] sm:$0xf0]  ;;  %2169 = vmatpush.bf16.msra.mxu0 %v5992_v37  ;;  %v5976_v21 = vor.u32 %v7606_v58, %v5975_v55  ;;  %v5977_v25 = vld [vmem:[#allocation3 + $0x4b0] sm:$0xf0]  ;;  %v7636_v46 = vld [vmem:[#allocation3 + $0x5a4] sm:$0xf] }
 0x437   :  { %v6105_v14 = vld [vmem:[#allocation3 + $0x5b0] sm:$0xf0]  ;;  %2182 = vmatpush.bf16.msrb.mxu1 %v6120_v40  ;;  %v6104_v3 = vor.u32 %v7638_v47, %v6103_v43  ;;  %v5980_v7 = vor.u32 %v7604_v44, %v5977_v25  ;;  %v5959_v22 = vld [vmem:[#allocation3 + $0x480] sm:$0xf]  ;;  %v7602_v9 = vld [vmem:[#allocation3 + $0x48c] sm:$0xf0] }
 0x438   :  { %2195 = vmatpush.bf16.msrb.mxu2 %v5996_v60  ;;  %v6087_v56 = vld [vmem:[#allocation3 + $0x580] sm:$0xf]  ;;  %v6108_v35 = vor.u32 %v7636_v46, %v6105_v14  ;;  %v7634_v19 = vld [vmem:[#allocation3 + $0x58c] sm:$0xf0]  ;;  %v7600_v39 = vld [vmem:[#allocation3 + $0x484] sm:$0xf]  ;;  %v5960_v13 = vor.u32 %v7602_v9, %v5959_v22 }
 0x439   :  { %2208 = vmatpush.bf16.msrb.mxu3 %v6124_v15  ;;  %v5961_v28 = vld [vmem:[#allocation3 + $0x490] sm:$0xf0]  ;;  %v7632_v26 = vld [vmem:[#allocation3 + $0x584] sm:$0xf]  ;;  %v6088_v17 = vor.u32 %v7634_v19, %v6087_v56  ;;  %v5943_v38 = vld [vmem:[#allocation3 + $0x460] sm:$0xf] }
 0x43a   :  { %v6089_v48 = vld [vmem:[#allocation3 + $0x590] sm:$0xf0]  ;;  %2170 = vmatpush.bf16.msra.mxu0 %v5976_v21  ;;  %v5964_v11 = vor.u32 %v7600_v39, %v5961_v28  ;;  %v7598_v31 = vld [vmem:[#allocation3 + $0x46c] sm:$0xf0]  ;;  %v6071_v30 = vld [vmem:[#allocation3 + $0x560] sm:$0xf] }
 0x43b   :  { %2183 = vmatpush.bf16.msrb.mxu1 %v6104_v3  ;;  %v6092_v8 = vor.u32 %v7632_v26, %v6089_v48  ;;  %v7630_v57 = vld [vmem:[#allocation3 + $0x56c] sm:$0xf0]  ;;  %v7596_v24 = vld [vmem:[#allocation3 + $0x464] sm:$0xf]  ;;  %v5945_v16 = vld [vmem:[#allocation3 + $0x470] sm:$0xf0]  ;;  %v5944_v61 = vor.u32 %v7598_v31, %v5943_v38 }
 0x43c   :  { %2196 = vmatpush.bf16.msrb.mxu2 %v5980_v7  ;;  %v7628_v18 = vld [vmem:[#allocation3 + $0x564] sm:$0xf]  ;;  %v6073_v62 = vld [vmem:[#allocation3 + $0x570] sm:$0xf0]  ;;  %v6072_v0 = vor.u32 %v7630_v57, %v6071_v30  ;;  %v5948_v63 = vor.u32 %v7596_v24, %v5945_v16  ;;  %v5927_v2 = vld [vmem:[#allocation3 + $0x440] sm:$0xf] }
 0x43d   :  { %2209 = vmatpush.bf16.msrb.mxu3 %v6108_v35  ;;  %v7594_v52 = vld [vmem:[#allocation3 + $0x44c] sm:$0xf0]  ;;  %v6055_v32 = vld [vmem:[#allocation3 + $0x540] sm:$0xf]  ;;  %v6076_v49 = vor.u32 %v7628_v18, %v6073_v62  ;;  %v7592_v23 = vld [vmem:[#allocation3 + $0x444] sm:$0xf] }
 0x43e   :  { %2171 = vmatpush.bf16.msra.mxu0 %v5960_v13  ;;  %v7626_v53 = vld [vmem:[#allocation3 + $0x54c] sm:$0xf0]  ;;  %v5929_v27 = vld [vmem:[#allocation3 + $0x450] sm:$0xf0]  ;;  %v7624_v5 = vld [vmem:[#allocation3 + $0x544] sm:$0xf]  ;;  %v5928_v41 = vor.u32 %v7594_v52, %v5927_v2 }
 0x43f   :  { %2184 = vmatpush.bf16.msrb.mxu1 %v6088_v17  ;;  %v6057_v34 = vld [vmem:[#allocation3 + $0x550] sm:$0xf0]  ;;  %v6056_v45 = vor.u32 %v7626_v53, %v6055_v32  ;;  %v5932_v10 = vor.u32 %v7592_v23, %v5929_v27  ;;  %v5911_v1 = vld [vmem:[#allocation3 + $0x420] sm:$0xf]  ;;  %v7590_v20 = vld [vmem:[#allocation3 + $0x42c] sm:$0xf0] }
 0x440   :  { %2197 = vmatpush.bf16.msrb.mxu2 %v5964_v11  ;;  %v6039_v51 = vld [vmem:[#allocation3 + $0x520] sm:$0xf]  ;;  %v6060_v59 = vor.u32 %v7624_v5, %v6057_v34  ;;  %v7622_v33 = vld [vmem:[#allocation3 + $0x52c] sm:$0xf0]  ;;  %v7588_v37 = vld [vmem:[#allocation3 + $0x424] sm:$0xf]  ;;  %v5912_v60 = vor.u32 %v7590_v20, %v5911_v1 }
 0x441   :  { %2210 = vmatpush.bf16.msrb.mxu3 %v6092_v8  ;;  %v5913_v40 = vld [vmem:[#allocation3 + $0x430] sm:$0xf0]  ;;  %v7620_v50 = vld [vmem:[#allocation3 + $0x524] sm:$0xf]  ;;  %v5895_v36 = vld [vmem:[#allocation3 + $0x400] sm:$0xf]  ;;  %v6040_v15 = vor.u32 %v7622_v33, %v6039_v51 }
 0x442   :  { %2172 = vmatpush.bf16.msra.mxu0 %v5944_v61  ;;  %v6041_v54 = vld [vmem:[#allocation3 + $0x530] sm:$0xf0]  ;;  %v7586_v29 = vld [vmem:[#allocation3 + $0x40c] sm:$0xf0]  ;;  %v6023_v55 = vld [vmem:[#allocation3 + $0x500] sm:$0xf]  ;;  %v5916_v43 = vor.u32 %v7588_v37, %v5913_v40 }
 0x443   :  { %2185 = vmatpush.bf16.msrb.mxu1 %v6072_v0  ;;  %v7618_v58 = vld [vmem:[#allocation3 + $0x50c] sm:$0xf0]  ;;  %v7584_v47 = vld [vmem:[#allocation3 + $0x404] sm:$0xf]  ;;  %v5897_v44 = vld [vmem:[#allocation3 + $0x410] sm:$0xf0]  ;;  %v6044_v25 = vor.u32 %v7620_v50, %v6041_v54  ;;  %v5896_v56 = vor.u32 %v7586_v29, %v5895_v36 }
 0x444   :  { %2198 = vmatpush.bf16.msrb.mxu2 %v5948_v63  ;;  %v7616_v21 = vld [vmem:[#allocation3 + $0x504] sm:$0xf]  ;;  %v6025_v46 = vld [vmem:[#allocation3 + $0x510] sm:$0xf0]  ;;  %v6015_v14 = vld [vmem:[#allocation3 + $0x4e8] sm:$0xf]  ;;  %v6024_v39 = vor.u32 %v7618_v58, %v6023_v55  ;;  %v5900_v28 = vor.u32 %v7584_v47, %v5897_v44 }
 0x445   :  { %2211 = vmatpush.bf16.msrb.mxu3 %v6076_v49  ;;  %v7615_v3 = vld [vmem:[#allocation3 + $0x4f4] sm:$0xf0]  ;;  %v6143_v7 = vld [vmem:[#allocation3 + $0x5e8] sm:$0xf]  ;;  %v7613_v35 = vld [vmem:[#allocation3 + $0x4ec] sm:$0xf]  ;;  %v6028_v13 = vor.u32 %v7616_v21, %v6025_v46 }
 0x446   :  { %2173 = vmatpush.bf16.msra.mxu0 %v5928_v41  ;;  %v7647_v22 = vld [vmem:[#allocation3 + $0x5f4] sm:$0xf0]  ;;  %v1775_v9 = vld [vmem:[#allocation2 + $0x8] sm:$0xf]  ;;  %v6017_v19 = vld [vmem:[#allocation3 + $0x4f8] sm:$0xf0]  ;;  %v6016_v17 = vor.u32 %v7615_v3, %v6015_v14 }
 0x447   :  { %2186 = vmatpush.bf16.msrb.mxu1 %v6056_v45  ;;  %1777 = vst [vmem:[#allocation1] ss:$4 sm:$0xff] %v1775_v9  ;;  %v7645_v26 = vld [vmem:[#allocation3 + $0x5ec] sm:$0xf]  ;;  %v6145_v48 = vld [vmem:[#allocation3 + $0x5f8] sm:$0xf0]  ;;  %v6144_v11 = vor.u32 %v7647_v22, %v6143_v7  ;;  %v6020_v38 = vor.u32 %v7613_v35, %v6017_v19 }
 0x448   :  { %2199 = vmatpush.bf16.msrb.mxu2 %v5932_v10  ;;  %v5999_v31 = vld [vmem:[#allocation3 + $0x4c8] sm:$0xf]  ;;  %v7611_v30 = vld [vmem:[#allocation3 + $0x4d4] sm:$0xf0]  ;;  %v6148_v57 = vor.u32 %v7645_v26, %v6145_v48  ;;  %v7609_v16 = vld [vmem:[#allocation3 + $0x4cc] sm:$0xf] }
 0x449   :  { %2212 = vmatpush.bf16.msrb.mxu3 %v6060_v59  ;;  %v6127_v8 = vld [vmem:[#allocation3 + $0x5c8] sm:$0xf]  ;;  %v7643_v24 = vld [vmem:[#allocation3 + $0x5d4] sm:$0xf0]  ;;  %v6001_v18 = vld [vmem:[#allocation3 + $0x4d8] sm:$0xf0]  ;;  %v6000_v0 = vor.u32 %v7611_v30, %v5999_v31 }
 0x44a   :  { %2174 = vmatpush.bf16.msra.mxu0 %v5912_v60  ;;  %v7641_v62 = vld [vmem:[#allocation3 + $0x5cc] sm:$0xf]  ;;  %v6129_v61 = vld [vmem:[#allocation3 + $0x5d8] sm:$0xf0]  ;;  %v5983_v63 = vld [vmem:[#allocation3 + $0x4a8] sm:$0xf]  ;;  %v6128_v32 = vor.u32 %v7643_v24, %v6127_v8  ;;  %v6004_v49 = vor.u32 %v7609_v16, %v6001_v18 }
 0x44b   :  { %2187 = vmatpush.bf16.msrb.mxu1 %v6040_v15  ;;  %v7607_v2 = vld [vmem:[#allocation3 + $0x4b4] sm:$0xf0]  ;;  %v6111_v52 = vld [vmem:[#allocation3 + $0x5a8] sm:$0xf]  ;;  %v6132_v27 = vor.u32 %v7641_v62, %v6129_v61  ;;  %v7605_v41 = vld [vmem:[#allocation3 + $0x4ac] sm:$0xf] }
 0x44c   :  { %2200 = vmatpush.bf16.msrb.mxu2 %v5916_v43  ;;  %v7639_v34 = vld [vmem:[#allocation3 + $0x5b4] sm:$0xf0]  ;;  %v5985_v45 = vld [vmem:[#allocation3 + $0x4b8] sm:$0xf0]  ;;  %v7637_v1 = vld [vmem:[#allocation3 + $0x5ac] sm:$0xf]  ;;  %v5984_v51 = vor.u32 %v7607_v2, %v5983_v63 }
 0x44d   :  { %2213 = vmatpush.bf16.msrb.mxu3 %v6044_v25  ;;  %v6113_v20 = vld [vmem:[#allocation3 + $0x5b8] sm:$0xf0]  ;;  %v6112_v59 = vor.u32 %v7639_v34, %v6111_v52  ;;  %v5988_v33 = vor.u32 %v7605_v41, %v5985_v45  ;;  %v5967_v37 = vld [vmem:[#allocation3 + $0x488] sm:$0xf]  ;;  %v7603_v40 = vld [vmem:[#allocation3 + $0x494] sm:$0xf0] }
 0x44e   :  { %2175 = vmatpush.bf16.msra.mxu0 %v5896_v56  ;;  %v1778_v53 = vld.sshfl [vmem:[#allocation1] sm:$0xff pattern:$0x73625140]  ;;  %v1779_v23 = vld.sshfl [vmem:[#allocation1 + $0x8] sm:$0xff pattern:$0x73625140]  ;;  %v6116_v54 = vor.u32 %v7637_v1, %v6113_v20  ;;  %v5968_v15 = vor.u32 %v7603_v40, %v5967_v37 }
 0x44f   :  { %2188 = vmatpush.bf16.msrb.mxu1 %v6024_v39  ;;  %v9073_v5 = vpack.c.bf16 %v1778_v53, %v1778_v53  ;;  %v9075_v10 = vpack.c.bf16 %v1779_v23, %v1779_v23  ;;  %v6095_v50 = vld [vmem:[#allocation3 + $0x588] sm:$0xf]  ;;  %v7635_v36 = vld [vmem:[#allocation3 + $0x594] sm:$0xf0]  ;;  %v7601_v60 = vld [vmem:[#allocation3 + $0x48c] sm:$0xf] }
 0x450   :  { %2201 = vmatpush.bf16.msrb.mxu2 %v5900_v28  ;;  %v5969_v29 = vld [vmem:[#allocation3 + $0x498] sm:$0xf0]  ;;  %v7633_v55 = vld [vmem:[#allocation3 + $0x58c] sm:$0xf]  ;;  %v6096_v43 = vor.u32 %v7635_v36, %v6095_v50  ;;  %v5951_v44 = vld [vmem:[#allocation3 + $0x468] sm:$0xf] }
 0x451   :  { %2214 = vmatpush.bf16.msrb.mxu3 %v6028_v13  ;;  %2176 = vmatmul.bf16.vlgmr.msra.gmra.mxu0 %v9073_v5  ;;  %v6097_v58 = vld [vmem:[#allocation3 + $0x598] sm:$0xf0]  ;;  %v5972_v47 = vor.u32 %v7601_v60, %v5969_v29  ;;  %v7599_v21 = vld [vmem:[#allocation3 + $0x474] sm:$0xf0]  ;;  %v6079_v25 = vld [vmem:[#allocation3 + $0x568] sm:$0xf] }
 0x452   :  { %2220 = vmatpush.bf16.msrb.mxu0 %v6016_v17  ;;  %2189 = vmatmul.bf16.vlgmr.msrb.gmra.mxu1 %v9075_v10  ;;  %v6100_v46 = vor.u32 %v7633_v55, %v6097_v58  ;;  %v7631_v14 = vld [vmem:[#allocation3 + $0x574] sm:$0xf0]  ;;  %v7597_v3 = vld [vmem:[#allocation3 + $0x46c] sm:$0xf]  ;;  %v5953_v7 = vld [vmem:[#allocation3 + $0x478] sm:$0xf0]  ;;  %v5952_v56 = vor.u32 %v7599_v21, %v5951_v44 }
 0x453   :  { %2233 = vmatpush.bf16.msra.mxu1 %v6144_v11  ;;  %2202 = vmatmul.bf16.vlgmr.msrb.gmra.mxu2 %v9073_v5  ;;  %v7629_v22 = vld [vmem:[#allocation3 + $0x56c] sm:$0xf]  ;;  %v6081_v9 = vld [vmem:[#allocation3 + $0x578] sm:$0xf0]  ;;  %v6080_v35 = vor.u32 %v7631_v14, %v6079_v25  ;;  %v5956_v19 = vor.u32 %v7597_v3, %v5953_v7  ;;  %v5935_v39 = vld [vmem:[#allocation3 + $0x448] sm:$0xf] }
 0x454   :  { %2246 = vmatpush.bf16.msra.mxu2 %v6020_v38  ;;  %2215 = vmatmul.bf16.vlgmr.msrb.gmra.mxu3 %v9075_v10  ;;  %v7595_v28 = vld [vmem:[#allocation3 + $0x454] sm:$0xf0]  ;;  %v6063_v26 = vld [vmem:[#allocation3 + $0x548] sm:$0xf]  ;;  %v6084_v48 = vor.u32 %v7629_v22, %v6081_v9  ;;  %v7593_v17 = vld [vmem:[#allocation3 + $0x44c] sm:$0xf] }
 0x455   :  { %2259 = vmatpush.bf16.msra.mxu3 %v6148_v57  ;;  %v7627_v13 = vld [vmem:[#allocation3 + $0x554] sm:$0xf0]  ;;  %v5937_v11 = vld [vmem:[#allocation3 + $0x458] sm:$0xf0]  ;;  %v7625_v38 = vld [vmem:[#allocation3 + $0x54c] sm:$0xf]  ;;  %v5936_v30 = vor.u32 %v7595_v28, %v5935_v39 }
 0x456   :  { %2221 = vmatpush.bf16.msrb.mxu0 %v6000_v0  ;;  %v6065_v31 = vld [vmem:[#allocation3 + $0x558] sm:$0xf0]  ;;  %v6064_v8 = vor.u32 %v7627_v13, %v6063_v26  ;;  %v5940_v57 = vor.u32 %v7593_v17, %v5937_v11  ;;  %v5919_v24 = vld [vmem:[#allocation3 + $0x428] sm:$0xf]  ;;  %v7591_v16 = vld [vmem:[#allocation3 + $0x434] sm:$0xf0] }
 0x457   :  { %2234 = vmatpush.bf16.msra.mxu1 %v6128_v32  ;;  %v6047_v18 = vld [vmem:[#allocation3 + $0x528] sm:$0xf]  ;;  %v6068_v62 = vor.u32 %v7625_v38, %v6065_v31  ;;  %v7623_v61 = vld [vmem:[#allocation3 + $0x534] sm:$0xf0]  ;;  %v7589_v0 = vld [vmem:[#allocation3 + $0x42c] sm:$0xf]  ;;  %v5920_v32 = vor.u32 %v7591_v16, %v5919_v24 }
 0x458   :  { %2247 = vmatpush.bf16.msra.mxu2 %v6004_v49  ;;  %v5921_v63 = vld [vmem:[#allocation3 + $0x438] sm:$0xf0]  ;;  %v7621_v2 = vld [vmem:[#allocation3 + $0x52c] sm:$0xf]  ;;  %v6048_v49 = vor.u32 %v7623_v61, %v6047_v18  ;;  %v5903_v23 = vld [vmem:[#allocation3 + $0x408] sm:$0xf] }
 0x459   :  { %2260 = vmatpush.bf16.msra.mxu3 %v6132_v27  ;;  %v6049_v52 = vld [vmem:[#allocation3 + $0x538] sm:$0xf0]  ;;  %v5924_v53 = vor.u32 %v7589_v0, %v5921_v63  ;;  %v7587_v27 = vld [vmem:[#allocation3 + $0x414] sm:$0xf0]  ;;  %v6031_v34 = vld [vmem:[#allocation3 + $0x508] sm:$0xf] }
 0x45a   :  { %2222 = vmatpush.bf16.msrb.mxu0 %v5984_v51  ;;  %v6052_v41 = vor.u32 %v7621_v2, %v6049_v52  ;;  %v7619_v45 = vld [vmem:[#allocation3 + $0x514] sm:$0xf0]  ;;  %v7585_v1 = vld [vmem:[#allocation3 + $0x40c] sm:$0xf]  ;;  %v5905_v20 = vld [vmem:[#allocation3 + $0x418] sm:$0xf0] }
 0x45b   :  { %2235 = vmatpush.bf16.msra.mxu1 %v6112_v59  ;;  %v7617_v51 = vld [vmem:[#allocation3 + $0x50c] sm:$0xf]  ;;  %v6033_v59 = vld [vmem:[#allocation3 + $0x518] sm:$0xf0]  ;;  %v6032_v37 = vor.u32 %v7619_v45, %v6031_v34  ;;  %v5908_v40 = vor.u32 %v7585_v1, %v5905_v20 }
 0x45c   :  { %2248 = vmatpush.bf16.msra.mxu2 %v5988_v33  ;;  %v5904_v33 = vor.u32 %v7587_v27, %v5903_v23  ;;  %v6036_v50 = vor.u32 %v7617_v51, %v6033_v59 }
 0x45d   :  { %2261 = vmatpush.bf16.msra.mxu3 %v6116_v54 }
 0x45e   :  { %2223 = vmatpush.bf16.msrb.mxu0 %v5968_v15 }
 0x45f   :  { %2236 = vmatpush.bf16.msra.mxu1 %v6096_v43 }
 0x460   :  { %2249 = vmatpush.bf16.msra.mxu2 %v5972_v47 }
 0x461   :  { %2262 = vmatpush.bf16.msra.mxu3 %v6100_v46 }
 0x462   :  { %2224 = vmatpush.bf16.msrb.mxu0 %v5952_v56 }
 0x463   :  { %2237 = vmatpush.bf16.msra.mxu1 %v6080_v35 }
 0x464   :  { %2250 = vmatpush.bf16.msra.mxu2 %v5956_v19 }
 0x465   :  { %2263 = vmatpush.bf16.msra.mxu3 %v6084_v48 }
 0x466   :  { %2225 = vmatpush.bf16.msrb.mxu0 %v5936_v30 }
 0x467   :  { %2238 = vmatpush.bf16.msra.mxu1 %v6064_v8 }
 0x468   :  { %2251 = vmatpush.bf16.msra.mxu2 %v5940_v57 }
 0x469   :  { %2264 = vmatpush.bf16.msra.mxu3 %v6068_v62 }
 0x46a   :  { %2226 = vmatpush.bf16.msrb.mxu0 %v5920_v32 }
 0x46b   :  { %2239 = vmatpush.bf16.msra.mxu1 %v6048_v49 }
 0x46c   :  { %2252 = vmatpush.bf16.msra.mxu2 %v5924_v53 }
 0x46d   :  { %2265 = vmatpush.bf16.msra.mxu3 %v6052_v41 }
 0x46e   :  { %2227 = vmatpush.bf16.msrb.mxu0 %v5904_v33 }
 0x46f   :  { %2240 = vmatpush.bf16.msra.mxu1 %v6032_v37 }
 0x470   :  { %2253 = vmatpush.bf16.msra.mxu2 %v5908_v40 }
 0x471   :  { %2266 = vmatpush.bf16.msra.mxu3 %v6036_v50  ;;  %2228 = vmatmul.bf16.vlgmr.msrb.gmra.mxu0 %v9073_v5 }
 0x472   :  { %2241 = vmatmul.bf16.vlgmr.msra.gmra.mxu1 %v9075_v10 }
 0x473   :  { %2254 = vmatmul.bf16.vlgmr.msra.gmra.mxu2 %v9073_v5 }
 0x474   :  { %2267 = vmatmul.bf16.vlgmr.msra.gmra.mxu3 %v9075_v10 }
 0x4ce   :  { %v2177_v54 = vpop.f32.mrf.mxu0 }
 0x4cf   :  { %v2190_v36 = vpop.f32.mrf.mxu1 }
 0x4d0   :  { %v2191_v60 = vadd.f32 %v2190_v36, %v2177_v54 }
 0x4d2   :  { %v9086_v29 = vadd.f32 %v2191_v60, %v9065_v6 }
 0x4d6   :  { %v2203_v55 = vpop.f32.mrf.mxu2  ;;  %v2179_v43 = vpop.f32.mrf.mxu0 }
 0x4d7   :  { %v2216_v58 = vpop.f32.mrf.mxu3  ;;  %v2192_v47 = vpop.f32.mrf.mxu1 }
 0x4d8   :  { %v2217_v15 = vadd.f32 %v2216_v58, %v2203_v55 }
 0x4da   :  { %v9089_v44 = vadd.f32 %v2217_v15, %v9067_v4 }
 0x4de   :  { %v2205_v21 = vpop.f32.mrf.mxu2 }
 0x4df   :  { %v2218_v25 = vpop.f32.mrf.mxu3 }
 0x4ee   :  { %v2229_v46 = vpop.f32.mrf.mxu0 }
 0x4ef   :  { %v2242_v5 = vpop.f32.mrf.mxu1 }
 0x4f0   :  { %v2243_v14 = vadd.f32 %v2242_v5, %v2229_v46 }
 0x4f2   :  { %v9092_v10 = vadd.f32 %v2243_v14, %v9069_v12 }
 0x4f6   :  { %v2255_v3 = vpop.f32.mrf.mxu2  ;;  %v2231_v6 = vpop.f32.mrf.mxu0 }
 0x4f7   :  { %v2268_v7 = vpop.f32.mrf.mxu3  ;;  %v2244_v9 = vpop.f32.mrf.mxu1 }
 0x4f8   :  { %v2269_v22 = vadd.f32 %v2268_v7, %v2255_v3 }
 0x4fa   :  { %v9095_v56 = vadd.f32 %v2269_v22, %v9071_v42 }
 0x4fe   :  { %v2257_v35 = vpop.f32.mrf.mxu2 }
 0x4ff   :  { %v2270_v19 = vpop.f32.mrf.mxu3 }
 0x500   :  { %8343 = dma.done.wait [#allocation4 + $0x3], 8192 }
 0x501   :  { %8344 = vsyncadd [#allocation4 + $0x3], 4294959104  ;;  %v6263_v4 = vld [vmem:[#allocation3 + $0x6e0] sm:$0xf]  ;;  %v7678_v39 = vld [vmem:[#allocation3 + $0x6ec] sm:$0xf0] }
 0x502   :  { %v6391_v28 = vld [vmem:[#allocation3 + $0x7e0] sm:$0xf]  ;;  %v6264_v26 = vor.u32 %v7678_v39, %v6263_v4  ;;  %v7710_v48 = vld [vmem:[#allocation3 + $0x7ec] sm:$0xf0]  ;;  %v7676_v13 = vld [vmem:[#allocation3 + $0x6e4] sm:$0xf] }
 0x503   :  { %v6265_v12 = vld [vmem:[#allocation3 + $0x6f0] sm:$0xf0]  ;;  %v6392_v17 = vor.u32 %v7710_v48, %v6391_v28  ;;  %v7708_v38 = vld [vmem:[#allocation3 + $0x7e4] sm:$0xf]  ;;  %v6247_v30 = vld [vmem:[#allocation3 + $0x6c0] sm:$0xf] }
 0x504   :  { %v6268_v11 = vor.u32 %v7676_v13, %v6265_v12  ;;  %v6393_v31 = vld [vmem:[#allocation3 + $0x7f0] sm:$0xf0]  ;;  %2671 = vmatpush.bf16.msra.mxu0 %v6264_v26  ;;  %v7674_v42 = vld [vmem:[#allocation3 + $0x6cc] sm:$0xf0]  ;;  %v6375_v57 = vld [vmem:[#allocation3 + $0x7c0] sm:$0xf] }
 0x505   :  { %v6396_v8 = vor.u32 %v7708_v38, %v6393_v31  ;;  %v7706_v24 = vld [vmem:[#allocation3 + $0x7cc] sm:$0xf0]  ;;  %2684 = vmatpush.bf16.msrb.mxu1 %v6392_v17  ;;  %v6248_v16 = vor.u32 %v7674_v42, %v6247_v30  ;;  %v7672_v62 = vld [vmem:[#allocation3 + $0x6c4] sm:$0xf]  ;;  %v6249_v61 = vld [vmem:[#allocation3 + $0x6d0] sm:$0xf0] }
 0x506   :  { %2697 = vmatpush.bf16.msrb.mxu2 %v6268_v11  ;;  %v6376_v18 = vor.u32 %v7706_v24, %v6375_v57  ;;  %v7704_v0 = vld [vmem:[#allocation3 + $0x7c4] sm:$0xf]  ;;  %v6252_v63 = vor.u32 %v7672_v62, %v6249_v61  ;;  %v6377_v2 = vld [vmem:[#allocation3 + $0x7d0] sm:$0xf0]  ;;  %v6231_v52 = vld [vmem:[#allocation3 + $0x6a0] sm:$0xf] }
 0x507   :  { %2710 = vmatpush.bf16.msrb.mxu3 %v6396_v8  ;;  %v7670_v32 = vld [vmem:[#allocation3 + $0x6ac] sm:$0xf0]  ;;  %v6380_v49 = vor.u32 %v7704_v0, %v6377_v2  ;;  %v6359_v53 = vld [vmem:[#allocation3 + $0x7a0] sm:$0xf]  ;;  %v7668_v27 = vld [vmem:[#allocation3 + $0x6a4] sm:$0xf] }
 0x508   :  { %v7702_v23 = vld [vmem:[#allocation3 + $0x7ac] sm:$0xf0]  ;;  %2672 = vmatpush.bf16.msra.mxu0 %v6248_v16  ;;  %v6232_v34 = vor.u32 %v7670_v32, %v6231_v52  ;;  %v6233_v41 = vld [vmem:[#allocation3 + $0x6b0] sm:$0xf0]  ;;  %v7700_v45 = vld [vmem:[#allocation3 + $0x7a4] sm:$0xf] }
 0x509   :  { %v6361_v1 = vld [vmem:[#allocation3 + $0x7b0] sm:$0xf0]  ;;  %2685 = vmatpush.bf16.msrb.mxu1 %v6376_v18  ;;  %v6360_v20 = vor.u32 %v7702_v23, %v6359_v53  ;;  %v6236_v51 = vor.u32 %v7668_v27, %v6233_v41  ;;  %v6215_v59 = vld [vmem:[#allocation3 + $0x680] sm:$0xf]  ;;  %v7666_v33 = vld [vmem:[#allocation3 + $0x68c] sm:$0xf0] }
 0x50a   :  { %2698 = vmatpush.bf16.msrb.mxu2 %v6252_v63  ;;  %v6343_v37 = vld [vmem:[#allocation3 + $0x780] sm:$0xf]  ;;  %v6364_v40 = vor.u32 %v7700_v45, %v6361_v1  ;;  %v7698_v50 = vld [vmem:[#allocation3 + $0x78c] sm:$0xf0]  ;;  %v7664_v54 = vld [vmem:[#allocation3 + $0x684] sm:$0xf]  ;;  %v6216_v58 = vor.u32 %v7666_v33, %v6215_v59 }
 0x50b   :  { %2711 = vmatpush.bf16.msrb.mxu3 %v6380_v49  ;;  %v6217_v36 = vld [vmem:[#allocation3 + $0x690] sm:$0xf0]  ;;  %v7696_v60 = vld [vmem:[#allocation3 + $0x784] sm:$0xf]  ;;  %v6344_v15 = vor.u32 %v7698_v50, %v6343_v37  ;;  %v6199_v47 = vld [vmem:[#allocation3 + $0x660] sm:$0xf] }
 0x50c   :  { %v6345_v55 = vld [vmem:[#allocation3 + $0x790] sm:$0xf0]  ;;  %2673 = vmatpush.bf16.msra.mxu0 %v6232_v34  ;;  %v6220_v43 = vor.u32 %v7664_v54, %v6217_v36  ;;  %v7662_v21 = vld [vmem:[#allocation3 + $0x66c] sm:$0xf0]  ;;  %v6327_v25 = vld [vmem:[#allocation3 + $0x760] sm:$0xf] }
 0x50d   :  { %2686 = vmatpush.bf16.msrb.mxu1 %v6360_v20  ;;  %v6348_v46 = vor.u32 %v7696_v60, %v6345_v55  ;;  %v7694_v5 = vld [vmem:[#allocation3 + $0x76c] sm:$0xf0]  ;;  %v7660_v14 = vld [vmem:[#allocation3 + $0x664] sm:$0xf]  ;;  %v6201_v3 = vld [vmem:[#allocation3 + $0x670] sm:$0xf0]  ;;  %v6200_v22 = vor.u32 %v7662_v21, %v6199_v47 }
 0x50e   :  { %2699 = vmatpush.bf16.msrb.mxu2 %v6236_v51  ;;  %v7692_v7 = vld [vmem:[#allocation3 + $0x764] sm:$0xf]  ;;  %v6329_v6 = vld [vmem:[#allocation3 + $0x770] sm:$0xf0]  ;;  %v6328_v9 = vor.u32 %v7694_v5, %v6327_v25  ;;  %v6204_v35 = vor.u32 %v7660_v14, %v6201_v3  ;;  %v6183_v19 = vld [vmem:[#allocation3 + $0x640] sm:$0xf] }
 0x50f   :  { %2712 = vmatpush.bf16.msrb.mxu3 %v6364_v40  ;;  %v7658_v4 = vld [vmem:[#allocation3 + $0x64c] sm:$0xf0]  ;;  %v6311_v39 = vld [vmem:[#allocation3 + $0x740] sm:$0xf]  ;;  %v6332_v28 = vor.u32 %v7692_v7, %v6329_v6  ;;  %v7656_v48 = vld [vmem:[#allocation3 + $0x644] sm:$0xf] }
 0x510   :  { %2674 = vmatpush.bf16.msra.mxu0 %v6216_v58  ;;  %v7690_v26 = vld [vmem:[#allocation3 + $0x74c] sm:$0xf0]  ;;  %v6185_v13 = vld [vmem:[#allocation3 + $0x650] sm:$0xf0]  ;;  %v7688_v12 = vld [vmem:[#allocation3 + $0x744] sm:$0xf]  ;;  %v6184_v11 = vor.u32 %v7658_v4, %v6183_v19 }
 0x511   :  { %2687 = vmatpush.bf16.msrb.mxu1 %v6344_v15  ;;  %v6313_v17 = vld [vmem:[#allocation3 + $0x750] sm:$0xf0]  ;;  %v6312_v38 = vor.u32 %v7690_v26, %v6311_v39  ;;  %v6188_v31 = vor.u32 %v7656_v48, %v6185_v13  ;;  %v6167_v30 = vld [vmem:[#allocation3 + $0x620] sm:$0xf]  ;;  %v7654_v8 = vld [vmem:[#allocation3 + $0x62c] sm:$0xf0] }
 0x512   :  { %2700 = vmatpush.bf16.msrb.mxu2 %v6220_v43  ;;  %v6295_v42 = vld [vmem:[#allocation3 + $0x720] sm:$0xf]  ;;  %v6316_v57 = vor.u32 %v7688_v12, %v6313_v17  ;;  %v7686_v24 = vld [vmem:[#allocation3 + $0x72c] sm:$0xf0]  ;;  %v7652_v16 = vld [vmem:[#allocation3 + $0x624] sm:$0xf]  ;;  %v6168_v63 = vor.u32 %v7654_v8, %v6167_v30 }
 0x513   :  { %2713 = vmatpush.bf16.msrb.mxu3 %v6348_v46  ;;  %v6169_v18 = vld [vmem:[#allocation3 + $0x630] sm:$0xf0]  ;;  %v7684_v62 = vld [vmem:[#allocation3 + $0x724] sm:$0xf]  ;;  %v6151_v0 = vld [vmem:[#allocation3 + $0x600] sm:$0xf]  ;;  %v6296_v49 = vor.u32 %v7686_v24, %v6295_v42 }
 0x514   :  { %2675 = vmatpush.bf16.msra.mxu0 %v6200_v22  ;;  %v6297_v61 = vld [vmem:[#allocation3 + $0x730] sm:$0xf0]  ;;  %v7650_v2 = vld [vmem:[#allocation3 + $0x60c] sm:$0xf0]  ;;  %v6279_v52 = vld [vmem:[#allocation3 + $0x700] sm:$0xf]  ;;  %v6172_v53 = vor.u32 %v7652_v16, %v6169_v18 }
 0x515   :  { %2688 = vmatpush.bf16.msrb.mxu1 %v6328_v9  ;;  %v7682_v32 = vld [vmem:[#allocation3 + $0x70c] sm:$0xf0]  ;;  %v7648_v23 = vld [vmem:[#allocation3 + $0x604] sm:$0xf]  ;;  %v6153_v27 = vld [vmem:[#allocation3 + $0x610] sm:$0xf0]  ;;  %v6300_v41 = vor.u32 %v7684_v62, %v6297_v61  ;;  %v6152_v37 = vor.u32 %v7650_v2, %v6151_v0 }
 0x516   :  { %2701 = vmatpush.bf16.msrb.mxu2 %v6204_v35  ;;  %v7680_v34 = vld [vmem:[#allocation3 + $0x704] sm:$0xf]  ;;  %v6281_v45 = vld [vmem:[#allocation3 + $0x710] sm:$0xf0]  ;;  %v6271_v1 = vld [vmem:[#allocation3 + $0x6e8] sm:$0xf]  ;;  %v6280_v54 = vor.u32 %v7682_v32, %v6279_v52  ;;  %v6156_v36 = vor.u32 %v7648_v23, %v6153_v27 }
 0x517   :  { %2714 = vmatpush.bf16.msrb.mxu3 %v6332_v28  ;;  %v7679_v20 = vld [vmem:[#allocation3 + $0x6f4] sm:$0xf0]  ;;  %v6399_v51 = vld [vmem:[#allocation3 + $0x7e8] sm:$0xf]  ;;  %v2278_v33 = vld [vmem:[#allocation2 + $0xc] sm:$0xf]  ;;  %v6284_v58 = vor.u32 %v7680_v34, %v6281_v45 }
 0x518   :  { %2676 = vmatpush.bf16.msra.mxu0 %v6184_v11  ;;  %v7711_v59 = vld [vmem:[#allocation3 + $0x7f4] sm:$0xf0]  ;;  %v7677_v40 = vld [vmem:[#allocation3 + $0x6ec] sm:$0xf]  ;;  %v6273_v50 = vld [vmem:[#allocation3 + $0x6f8] sm:$0xf0]  ;;  %v6272_v15 = vor.u32 %v7679_v20, %v6271_v1 }
 0x519   :  { %2689 = vmatpush.bf16.msrb.mxu1 %v6312_v38  ;;  %2280 = vst [vmem:[#allocation1] ss:$4 sm:$0xff] %v2278_v33  ;;  %v7709_v60 = vld [vmem:[#allocation3 + $0x7ec] sm:$0xf]  ;;  %v6401_v55 = vld [vmem:[#allocation3 + $0x7f8] sm:$0xf0]  ;;  %v6400_v43 = vor.u32 %v7711_v59, %v6399_v51  ;;  %v6276_v47 = vor.u32 %v7677_v40, %v6273_v50 }
 0x51a   :  { %2702 = vmatpush.bf16.msrb.mxu2 %v6188_v31  ;;  %v6255_v21 = vld [vmem:[#allocation3 + $0x6c8] sm:$0xf]  ;;  %v7675_v25 = vld [vmem:[#allocation3 + $0x6d4] sm:$0xf0]  ;;  %v6404_v5 = vor.u32 %v7709_v60, %v6401_v55  ;;  %v7673_v3 = vld [vmem:[#allocation3 + $0x6cc] sm:$0xf] }
 0x51b   :  { %2715 = vmatpush.bf16.msrb.mxu3 %v6316_v57  ;;  %v6383_v46 = vld [vmem:[#allocation3 + $0x7c8] sm:$0xf]  ;;  %v7707_v14 = vld [vmem:[#allocation3 + $0x7d4] sm:$0xf0]  ;;  %v6257_v7 = vld [vmem:[#allocation3 + $0x6d8] sm:$0xf0]  ;;  %v6256_v9 = vor.u32 %v7675_v25, %v6255_v21 }
 0x51c   :  { %2677 = vmatpush.bf16.msra.mxu0 %v6168_v63  ;;  %v7705_v6 = vld [vmem:[#allocation3 + $0x7cc] sm:$0xf]  ;;  %v6385_v22 = vld [vmem:[#allocation3 + $0x7d8] sm:$0xf0]  ;;  %v6239_v35 = vld [vmem:[#allocation3 + $0x6a8] sm:$0xf]  ;;  %v6384_v39 = vor.u32 %v7707_v14, %v6383_v46  ;;  %v6260_v28 = vor.u32 %v7673_v3, %v6257_v7 }
 0x51d   :  { %2690 = vmatpush.bf16.msrb.mxu1 %v6296_v49  ;;  %v7671_v19 = vld [vmem:[#allocation3 + $0x6b4] sm:$0xf0]  ;;  %v6367_v4 = vld [vmem:[#allocation3 + $0x7a8] sm:$0xf]  ;;  %v6388_v13 = vor.u32 %v7705_v6, %v6385_v22  ;;  %v7669_v11 = vld [vmem:[#allocation3 + $0x6ac] sm:$0xf] }
 0x51e   :  { %2703 = vmatpush.bf16.msrb.mxu2 %v6172_v53  ;;  %v7703_v17 = vld [vmem:[#allocation3 + $0x7b4] sm:$0xf0]  ;;  %v6241_v38 = vld [vmem:[#allocation3 + $0x6b8] sm:$0xf0]  ;;  %v7701_v30 = vld [vmem:[#allocation3 + $0x7ac] sm:$0xf]  ;;  %v6240_v42 = vor.u32 %v7671_v19, %v6239_v35 }
 0x51f   :  { %2716 = vmatpush.bf16.msrb.mxu3 %v6300_v41  ;;  %v6369_v8 = vld [vmem:[#allocation3 + $0x7b8] sm:$0xf0]  ;;  %v6368_v57 = vor.u32 %v7703_v17, %v6367_v4  ;;  %v6244_v24 = vor.u32 %v7669_v11, %v6241_v38  ;;  %v6223_v16 = vld [vmem:[#allocation3 + $0x688] sm:$0xf]  ;;  %v7667_v18 = vld [vmem:[#allocation3 + $0x694] sm:$0xf0] }
 0x520   :  { %2678 = vmatpush.bf16.msra.mxu0 %v6152_v37  ;;  %v2281_v26 = vld.sshfl [vmem:[#allocation1] sm:$0xff pattern:$0x73625140]  ;;  %v2282_v48 = vld.sshfl [vmem:[#allocation1 + $0x8] sm:$0xff pattern:$0x73625140]  ;;  %v6372_v61 = vor.u32 %v7701_v30, %v6369_v8  ;;  %v6224_v49 = vor.u32 %v7667_v18, %v6223_v16 }
 0x521   :  { %2691 = vmatpush.bf16.msrb.mxu1 %v6280_v54  ;;  %v9097_v12 = vpack.c.bf16 %v2281_v26, %v2281_v26  ;;  %v9099_v31 = vpack.c.bf16 %v2282_v48, %v2282_v48  ;;  %v6351_v62 = vld [vmem:[#allocation3 + $0x788] sm:$0xf]  ;;  %v7699_v0 = vld [vmem:[#allocation3 + $0x794] sm:$0xf0]  ;;  %v7665_v63 = vld [vmem:[#allocation3 + $0x68c] sm:$0xf] }
 0x522   :  { %2704 = vmatpush.bf16.msrb.mxu2 %v6156_v36  ;;  %v6225_v2 = vld [vmem:[#allocation3 + $0x698] sm:$0xf0]  ;;  %v7697_v52 = vld [vmem:[#allocation3 + $0x78c] sm:$0xf]  ;;  %v6352_v53 = vor.u32 %v7699_v0, %v6351_v62  ;;  %v6207_v27 = vld [vmem:[#allocation3 + $0x668] sm:$0xf] }
 0x523   :  { %2717 = vmatpush.bf16.msrb.mxu3 %v6284_v58  ;;  %2679 = vmatmul.bf16.vlgmr.msra.gmra.mxu0 %v9097_v12  ;;  %v6353_v32 = vld [vmem:[#allocation3 + $0x798] sm:$0xf0]  ;;  %v6228_v23 = vor.u32 %v7665_v63, %v6225_v2  ;;  %v7663_v34 = vld [vmem:[#allocation3 + $0x674] sm:$0xf0]  ;;  %v6335_v41 = vld [vmem:[#allocation3 + $0x768] sm:$0xf] }
 0x524   :  { %2723 = vmatpush.bf16.msrb.mxu0 %v6272_v15  ;;  %2692 = vmatmul.bf16.vlgmr.msrb.gmra.mxu1 %v9099_v31  ;;  %v6356_v45 = vor.u32 %v7697_v52, %v6353_v32  ;;  %v7695_v1 = vld [vmem:[#allocation3 + $0x774] sm:$0xf0]  ;;  %v7661_v20 = vld [vmem:[#allocation3 + $0x66c] sm:$0xf]  ;;  %v6209_v51 = vld [vmem:[#allocation3 + $0x678] sm:$0xf0]  ;;  %v6208_v37 = vor.u32 %v7663_v34, %v6207_v27 }
 0x525   :  { %2736 = vmatpush.bf16.msra.mxu1 %v6400_v43  ;;  %2705 = vmatmul.bf16.vlgmr.msrb.gmra.mxu2 %v9097_v12  ;;  %v7693_v59 = vld [vmem:[#allocation3 + $0x76c] sm:$0xf]  ;;  %v6337_v33 = vld [vmem:[#allocation3 + $0x778] sm:$0xf0]  ;;  %v6336_v40 = vor.u32 %v7695_v1, %v6335_v41  ;;  %v6212_v50 = vor.u32 %v7661_v20, %v6209_v51  ;;  %v6191_v54 = vld [vmem:[#allocation3 + $0x648] sm:$0xf] }
 0x526   :  { %2749 = vmatpush.bf16.msra.mxu2 %v6276_v47  ;;  %2718 = vmatmul.bf16.vlgmr.msrb.gmra.mxu3 %v9099_v31  ;;  %v7659_v36 = vld [vmem:[#allocation3 + $0x654] sm:$0xf0]  ;;  %v6319_v60 = vld [vmem:[#allocation3 + $0x748] sm:$0xf]  ;;  %v6340_v55 = vor.u32 %v7693_v59, %v6337_v33  ;;  %v7657_v15 = vld [vmem:[#allocation3 + $0x64c] sm:$0xf] }
 0x527   :  { %2762 = vmatpush.bf16.msra.mxu3 %v6404_v5  ;;  %v7691_v58 = vld [vmem:[#allocation3 + $0x754] sm:$0xf0]  ;;  %v6193_v43 = vld [vmem:[#allocation3 + $0x658] sm:$0xf0]  ;;  %v7689_v47 = vld [vmem:[#allocation3 + $0x74c] sm:$0xf]  ;;  %v6192_v25 = vor.u32 %v7659_v36, %v6191_v54 }
 0x528   :  { %2724 = vmatpush.bf16.msrb.mxu0 %v6256_v9  ;;  %v6321_v21 = vld [vmem:[#allocation3 + $0x758] sm:$0xf0]  ;;  %v6320_v46 = vor.u32 %v7691_v58, %v6319_v60  ;;  %v6196_v5 = vor.u32 %v7657_v15, %v6193_v43  ;;  %v6175_v14 = vld [vmem:[#allocation3 + $0x628] sm:$0xf]  ;;  %v7655_v3 = vld [vmem:[#allocation3 + $0x634] sm:$0xf0] }
 0x529   :  { %2737 = vmatpush.bf16.msra.mxu1 %v6384_v39  ;;  %v6303_v7 = vld [vmem:[#allocation3 + $0x728] sm:$0xf]  ;;  %v6324_v6 = vor.u32 %v7689_v47, %v6321_v21  ;;  %v7687_v22 = vld [vmem:[#allocation3 + $0x734] sm:$0xf0]  ;;  %v7653_v9 = vld [vmem:[#allocation3 + $0x62c] sm:$0xf]  ;;  %v6176_v39 = vor.u32 %v7655_v3, %v6175_v14 }
 0x52a   :  { %2750 = vmatpush.bf16.msra.mxu2 %v6260_v28  ;;  %v6177_v35 = vld [vmem:[#allocation3 + $0x638] sm:$0xf0]  ;;  %v7685_v19 = vld [vmem:[#allocation3 + $0x72c] sm:$0xf]  ;;  %v6304_v28 = vor.u32 %v7687_v22, %v6303_v7  ;;  %v6159_v48 = vld [vmem:[#allocation3 + $0x608] sm:$0xf] }
 0x52b   :  { %2763 = vmatpush.bf16.msra.mxu3 %v6388_v13  ;;  %v6305_v4 = vld [vmem:[#allocation3 + $0x738] sm:$0xf0]  ;;  %v6180_v26 = vor.u32 %v7653_v9, %v6177_v35  ;;  %v7651_v13 = vld [vmem:[#allocation3 + $0x614] sm:$0xf0]  ;;  %v6287_v17 = vld [vmem:[#allocation3 + $0x708] sm:$0xf] }
 0x52c   :  { %2725 = vmatpush.bf16.msrb.mxu0 %v6240_v42  ;;  %v6308_v11 = vor.u32 %v7685_v19, %v6305_v4  ;;  %v7683_v38 = vld [vmem:[#allocation3 + $0x714] sm:$0xf0]  ;;  %v7649_v30 = vld [vmem:[#allocation3 + $0x60c] sm:$0xf]  ;;  %v6161_v8 = vld [vmem:[#allocation3 + $0x618] sm:$0xf0] }
 0x52d   :  { %2738 = vmatpush.bf16.msra.mxu1 %v6368_v57  ;;  %v7681_v42 = vld [vmem:[#allocation3 + $0x70c] sm:$0xf]  ;;  %v6289_v57 = vld [vmem:[#allocation3 + $0x718] sm:$0xf0]  ;;  %v6288_v16 = vor.u32 %v7683_v38, %v6287_v17  ;;  %v6164_v18 = vor.u32 %v7649_v30, %v6161_v8 }
 0x52e   :  { %2751 = vmatpush.bf16.msra.mxu2 %v6244_v24  ;;  %v6160_v24 = vor.u32 %v7651_v13, %v6159_v48  ;;  %v6292_v62 = vor.u32 %v7681_v42, %v6289_v57 }
 0x52f   :  { %2764 = vmatpush.bf16.msra.mxu3 %v6372_v61 }
 0x530   :  { %2726 = vmatpush.bf16.msrb.mxu0 %v6224_v49 }
 0x531   :  { %2739 = vmatpush.bf16.msra.mxu1 %v6352_v53 }
 0x532   :  { %2752 = vmatpush.bf16.msra.mxu2 %v6228_v23 }
 0x533   :  { %2765 = vmatpush.bf16.msra.mxu3 %v6356_v45 }
 0x534   :  { %2727 = vmatpush.bf16.msrb.mxu0 %v6208_v37 }
 0x535   :  { %2740 = vmatpush.bf16.msra.mxu1 %v6336_v40 }
 0x536   :  { %2753 = vmatpush.bf16.msra.mxu2 %v6212_v50 }
 0x537   :  { %2766 = vmatpush.bf16.msra.mxu3 %v6340_v55 }
 0x538   :  { %2728 = vmatpush.bf16.msrb.mxu0 %v6192_v25 }
 0x539   :  { %2741 = vmatpush.bf16.msra.mxu1 %v6320_v46 }
 0x53a   :  { %2754 = vmatpush.bf16.msra.mxu2 %v6196_v5 }
 0x53b   :  { %2767 = vmatpush.bf16.msra.mxu3 %v6324_v6 }
 0x53c   :  { %2729 = vmatpush.bf16.msrb.mxu0 %v6176_v39 }
 0x53d   :  { %2742 = vmatpush.bf16.msra.mxu1 %v6304_v28 }
 0x53e   :  { %2755 = vmatpush.bf16.msra.mxu2 %v6180_v26 }
 0x53f   :  { %2768 = vmatpush.bf16.msra.mxu3 %v6308_v11 }
 0x540   :  { %2730 = vmatpush.bf16.msrb.mxu0 %v6160_v24 }
 0x541   :  { %2743 = vmatpush.bf16.msra.mxu1 %v6288_v16 }
 0x542   :  { %2756 = vmatpush.bf16.msra.mxu2 %v6164_v18 }
 0x543   :  { %2769 = vmatpush.bf16.msra.mxu3 %v6292_v62  ;;  %2731 = vmatmul.bf16.vlgmr.msrb.gmra.mxu0 %v9097_v12 }
 0x544   :  { %2744 = vmatmul.bf16.vlgmr.msra.gmra.mxu1 %v9099_v31 }
 0x545   :  { %2757 = vmatmul.bf16.vlgmr.msra.gmra.mxu2 %v9097_v12 }
 0x546   :  { %2770 = vmatmul.bf16.vlgmr.msra.gmra.mxu3 %v9099_v31 }
 0x5a0   :  { %v2680_v61 = vpop.f32.mrf.mxu0 }
 0x5a1   :  { %v2693_v0 = vpop.f32.mrf.mxu1 }
 0x5a2   :  { %v2694_v63 = vadd.f32 %v2693_v0, %v2680_v61 }
 0x5a4   :  { %v9110_v2 = vadd.f32 %v2694_v63, %v9086_v29 }
 0x5a8   :  { %v2706_v52 = vpop.f32.mrf.mxu2  ;;  %v2682_v53 = vpop.f32.mrf.mxu0 }
 0x5a9   :  { %v2719_v32 = vpop.f32.mrf.mxu3  ;;  %v2695_v23 = vpop.f32.mrf.mxu1 }
 0x5aa   :  { %v2720_v49 = vadd.f32 %v2719_v32, %v2706_v52 }
 0x5ac   :  { %v9113_v27 = vadd.f32 %v2720_v49, %v9089_v44 }
 0x5b0   :  { %v2708_v34 = vpop.f32.mrf.mxu2 }
 0x5b1   :  { %v2721_v41 = vpop.f32.mrf.mxu3 }
 0x5c0   :  { %v2732_v45 = vpop.f32.mrf.mxu0 }
 0x5c1   :  { %v2745_v12 = vpop.f32.mrf.mxu1 }
 0x5c2   :  { %v2746_v1 = vadd.f32 %v2745_v12, %v2732_v45 }
 0x5c4   :  { %v9116_v31 = vadd.f32 %v2746_v1, %v9092_v10 }
 0x5c8   :  { %v2758_v20 = vpop.f32.mrf.mxu2  ;;  %v2734_v29 = vpop.f32.mrf.mxu0 }
 0x5c9   :  { %v2771_v51 = vpop.f32.mrf.mxu3  ;;  %v2747_v33 = vpop.f32.mrf.mxu1 }
 0x5ca   :  { %v2772_v59 = vadd.f32 %v2771_v51, %v2758_v20 }
 0x5cc   :  { %v9119_v37 = vadd.f32 %v2772_v59, %v9095_v56 }
 0x5d0   :  { %v2760_v40 = vpop.f32.mrf.mxu2 }
 0x5d1   :  { %v2773_v50 = vpop.f32.mrf.mxu3 }
 0x5d2   :  { %8345 = dma.done.wait [#allocation4 + $0x4], 8192 }
 0x5d3   :  { %8346 = vsyncadd [#allocation4 + $0x4], 4294959104  ;;  %v6519_v44 = vld [vmem:[#allocation3 + $0x8e0] sm:$0xf]  ;;  %v7742_v54 = vld [vmem:[#allocation3 + $0x8ec] sm:$0xf0] }
 0x5d4   :  { %v6647_v36 = vld [vmem:[#allocation3 + $0x9e0] sm:$0xf]  ;;  %v6520_v60 = vor.u32 %v7742_v54, %v6519_v44  ;;  %v7774_v55 = vld [vmem:[#allocation3 + $0x9ec] sm:$0xf0]  ;;  %v7740_v58 = vld [vmem:[#allocation3 + $0x8e4] sm:$0xf] }
 0x5d5   :  { %v6521_v10 = vld [vmem:[#allocation3 + $0x8f0] sm:$0xf0]  ;;  %v6648_v15 = vor.u32 %v7774_v55, %v6647_v36  ;;  %v7772_v47 = vld [vmem:[#allocation3 + $0x9e4] sm:$0xf]  ;;  %v6503_v25 = vld [vmem:[#allocation3 + $0x8c0] sm:$0xf] }
 0x5d6   :  { %v6524_v43 = vor.u32 %v7740_v58, %v6521_v10  ;;  %v6649_v21 = vld [vmem:[#allocation3 + $0x9f0] sm:$0xf0]  ;;  %3174 = vmatpush.bf16.msra.mxu0 %v6520_v60  ;;  %v7738_v56 = vld [vmem:[#allocation3 + $0x8cc] sm:$0xf0]  ;;  %v6631_v5 = vld [vmem:[#allocation3 + $0x9c0] sm:$0xf] }
 0x5d7   :  { %v6652_v46 = vor.u32 %v7772_v47, %v6649_v21  ;;  %v7770_v14 = vld [vmem:[#allocation3 + $0x9cc] sm:$0xf0]  ;;  %3187 = vmatpush.bf16.msrb.mxu1 %v6648_v15  ;;  %v6504_v3 = vor.u32 %v7738_v56, %v6503_v25  ;;  %v7736_v6 = vld [vmem:[#allocation3 + $0x8c4] sm:$0xf]  ;;  %v6505_v22 = vld [vmem:[#allocation3 + $0x8d0] sm:$0xf0] }
 0x5d8   :  { %3200 = vmatpush.bf16.msrb.mxu2 %v6524_v43  ;;  %v6632_v7 = vor.u32 %v7770_v14, %v6631_v5  ;;  %v7768_v9 = vld [vmem:[#allocation3 + $0x9c4] sm:$0xf]  ;;  %v6508_v35 = vor.u32 %v7736_v6, %v6505_v22  ;;  %v6633_v19 = vld [vmem:[#allocation3 + $0x9d0] sm:$0xf0]  ;;  %v6487_v4 = vld [vmem:[#allocation3 + $0x8a0] sm:$0xf] }
 0x5d9   :  { %3213 = vmatpush.bf16.msrb.mxu3 %v6652_v46  ;;  %v7734_v39 = vld [vmem:[#allocation3 + $0x8ac] sm:$0xf0]  ;;  %v6636_v28 = vor.u32 %v7768_v9, %v6633_v19  ;;  %v6615_v26 = vld [vmem:[#allocation3 + $0x9a0] sm:$0xf]  ;;  %v7732_v13 = vld [vmem:[#allocation3 + $0x8a4] sm:$0xf] }
 0x5da   :  { %v7766_v48 = vld [vmem:[#allocation3 + $0x9ac] sm:$0xf0]  ;;  %3175 = vmatpush.bf16.msra.mxu0 %v6504_v3  ;;  %v6488_v17 = vor.u32 %v7734_v39, %v6487_v4  ;;  %v6489_v11 = vld [vmem:[#allocation3 + $0x8b0] sm:$0xf0]  ;;  %v7764_v38 = vld [vmem:[#allocation3 + $0x9a4] sm:$0xf] }
 0x5db   :  { %v6617_v30 = vld [vmem:[#allocation3 + $0x9b0] sm:$0xf0]  ;;  %3188 = vmatpush.bf16.msrb.mxu1 %v6632_v7  ;;  %v6616_v8 = vor.u32 %v7766_v48, %v6615_v26  ;;  %v6492_v42 = vor.u32 %v7732_v13, %v6489_v11  ;;  %v6471_v57 = vld [vmem:[#allocation3 + $0x880] sm:$0xf]  ;;  %v7730_v24 = vld [vmem:[#allocation3 + $0x88c] sm:$0xf0] }
 0x5dc   :  { %3201 = vmatpush.bf16.msrb.mxu2 %v6508_v35  ;;  %v6599_v16 = vld [vmem:[#allocation3 + $0x980] sm:$0xf]  ;;  %v6620_v18 = vor.u32 %v7764_v38, %v6617_v30  ;;  %v7762_v62 = vld [vmem:[#allocation3 + $0x98c] sm:$0xf0]  ;;  %v7728_v61 = vld [vmem:[#allocation3 + $0x884] sm:$0xf]  ;;  %v6472_v32 = vor.u32 %v7730_v24, %v6471_v57 }
 0x5dd   :  { %3214 = vmatpush.bf16.msrb.mxu3 %v6636_v28  ;;  %v6473_v0 = vld [vmem:[#allocation3 + $0x890] sm:$0xf0]  ;;  %v7760_v63 = vld [vmem:[#allocation3 + $0x984] sm:$0xf]  ;;  %v6600_v49 = vor.u32 %v7762_v62, %v6599_v16  ;;  %v6455_v23 = vld [vmem:[#allocation3 + $0x860] sm:$0xf] }
 0x5de   :  { %v6601_v52 = vld [vmem:[#allocation3 + $0x990] sm:$0xf0]  ;;  %3176 = vmatpush.bf16.msra.mxu0 %v6488_v17  ;;  %v6476_v53 = vor.u32 %v7728_v61, %v6473_v0  ;;  %v7726_v34 = vld [vmem:[#allocation3 + $0x86c] sm:$0xf0]  ;;  %v6583_v41 = vld [vmem:[#allocation3 + $0x960] sm:$0xf] }
 0x5df   :  { %3189 = vmatpush.bf16.msrb.mxu1 %v6616_v8  ;;  %v6604_v45 = vor.u32 %v7760_v63, %v6601_v52  ;;  %v7758_v12 = vld [vmem:[#allocation3 + $0x96c] sm:$0xf0]  ;;  %v7724_v1 = vld [vmem:[#allocation3 + $0x864] sm:$0xf]  ;;  %v6457_v20 = vld [vmem:[#allocation3 + $0x870] sm:$0xf0]  ;;  %v6456_v59 = vor.u32 %v7726_v34, %v6455_v23 }
 0x5e0   :  { %3202 = vmatpush.bf16.msrb.mxu2 %v6492_v42  ;;  %v7756_v51 = vld [vmem:[#allocation3 + $0x964] sm:$0xf]  ;;  %v6585_v29 = vld [vmem:[#allocation3 + $0x970] sm:$0xf0]  ;;  %v6584_v33 = vor.u32 %v7758_v12, %v6583_v41  ;;  %v6460_v40 = vor.u32 %v7724_v1, %v6457_v20  ;;  %v6439_v50 = vld [vmem:[#allocation3 + $0x840] sm:$0xf] }
 0x5e1   :  { %3215 = vmatpush.bf16.msrb.mxu3 %v6620_v18  ;;  %v7722_v44 = vld [vmem:[#allocation3 + $0x84c] sm:$0xf0]  ;;  %v6567_v54 = vld [vmem:[#allocation3 + $0x940] sm:$0xf]  ;;  %v6588_v36 = vor.u32 %v7756_v51, %v6585_v29  ;;  %v7720_v55 = vld [vmem:[#allocation3 + $0x844] sm:$0xf] }
 0x5e2   :  { %3177 = vmatpush.bf16.msra.mxu0 %v6472_v32  ;;  %v7754_v60 = vld [vmem:[#allocation3 + $0x94c] sm:$0xf0]  ;;  %v6441_v58 = vld [vmem:[#allocation3 + $0x850] sm:$0xf0]  ;;  %v7752_v10 = vld [vmem:[#allocation3 + $0x944] sm:$0xf]  ;;  %v6440_v43 = vor.u32 %v7722_v44, %v6439_v50 }
 0x5e3   :  { %3190 = vmatpush.bf16.msrb.mxu1 %v6600_v49  ;;  %v6569_v15 = vld [vmem:[#allocation3 + $0x950] sm:$0xf0]  ;;  %v6568_v47 = vor.u32 %v7754_v60, %v6567_v54  ;;  %v6444_v21 = vor.u32 %v7720_v55, %v6441_v58  ;;  %v6423_v25 = vld [vmem:[#allocation3 + $0x820] sm:$0xf]  ;;  %v7718_v46 = vld [vmem:[#allocation3 + $0x82c] sm:$0xf0] }
 0x5e4   :  { %3203 = vmatpush.bf16.msrb.mxu2 %v6476_v53  ;;  %v6551_v56 = vld [vmem:[#allocation3 + $0x920] sm:$0xf]  ;;  %v6572_v5 = vor.u32 %v7752_v10, %v6569_v15  ;;  %v7750_v14 = vld [vmem:[#allocation3 + $0x92c] sm:$0xf0]  ;;  %v7716_v3 = vld [vmem:[#allocation3 + $0x824] sm:$0xf]  ;;  %v6424_v35 = vor.u32 %v7718_v46, %v6423_v25 }
 0x5e5   :  { %3216 = vmatpush.bf16.msrb.mxu3 %v6604_v45  ;;  %v6425_v7 = vld [vmem:[#allocation3 + $0x830] sm:$0xf0]  ;;  %v7748_v6 = vld [vmem:[#allocation3 + $0x924] sm:$0xf]  ;;  %v6407_v9 = vld [vmem:[#allocation3 + $0x800] sm:$0xf]  ;;  %v6552_v28 = vor.u32 %v7750_v14, %v6551_v56 }
 0x5e6   :  { %3178 = vmatpush.bf16.msra.mxu0 %v6456_v59  ;;  %v6553_v22 = vld [vmem:[#allocation3 + $0x930] sm:$0xf0]  ;;  %v7714_v19 = vld [vmem:[#allocation3 + $0x80c] sm:$0xf0]  ;;  %v6535_v4 = vld [vmem:[#allocation3 + $0x900] sm:$0xf]  ;;  %v6428_v26 = vor.u32 %v7716_v3, %v6425_v7 }
 0x5e7   :  { %3191 = vmatpush.bf16.msrb.mxu1 %v6584_v33  ;;  %v7746_v39 = vld [vmem:[#allocation3 + $0x90c] sm:$0xf0]  ;;  %v7712_v48 = vld [vmem:[#allocation3 + $0x804] sm:$0xf]  ;;  %v6409_v13 = vld [vmem:[#allocation3 + $0x810] sm:$0xf0]  ;;  %v6556_v11 = vor.u32 %v7748_v6, %v6553_v22  ;;  %v6408_v16 = vor.u32 %v7714_v19, %v6407_v9 }
 0x5e8   :  { %3204 = vmatpush.bf16.msrb.mxu2 %v6460_v40  ;;  %v7744_v17 = vld [vmem:[#allocation3 + $0x904] sm:$0xf]  ;;  %v6537_v38 = vld [vmem:[#allocation3 + $0x910] sm:$0xf0]  ;;  %v6527_v30 = vld [vmem:[#allocation3 + $0x8e8] sm:$0xf]  ;;  %v6536_v61 = vor.u32 %v7746_v39, %v6535_v4  ;;  %v6412_v0 = vor.u32 %v7712_v48, %v6409_v13 }
 0x5e9   :  { %3217 = vmatpush.bf16.msrb.mxu3 %v6588_v36  ;;  %v7743_v8 = vld [vmem:[#allocation3 + $0x8f4] sm:$0xf0]  ;;  %v6655_v42 = vld [vmem:[#allocation3 + $0x9e8] sm:$0xf]  ;;  %v2781_v24 = vld [vmem:[#allocation2 + $0x10] sm:$0xf]  ;;  %v6540_v32 = vor.u32 %v7744_v17, %v6537_v38 }
 0x5ea   :  { %3179 = vmatpush.bf16.msra.mxu0 %v6440_v43  ;;  %v7775_v57 = vld [vmem:[#allocation3 + $0x9f4] sm:$0xf0]  ;;  %v7741_v18 = vld [vmem:[#allocation3 + $0x8ec] sm:$0xf]  ;;  %v6529_v62 = vld [vmem:[#allocation3 + $0x8f8] sm:$0xf0]  ;;  %v6528_v49 = vor.u32 %v7743_v8, %v6527_v30 }
 0x5eb   :  { %3192 = vmatpush.bf16.msrb.mxu1 %v6568_v47  ;;  %2783 = vst [vmem:[#allocation1] ss:$4 sm:$0xff] %v2781_v24  ;;  %v7773_v63 = vld [vmem:[#allocation3 + $0x9ec] sm:$0xf]  ;;  %v6657_v52 = vld [vmem:[#allocation3 + $0x9f8] sm:$0xf0]  ;;  %v6656_v53 = vor.u32 %v7775_v57, %v6655_v42  ;;  %v6532_v23 = vor.u32 %v7741_v18, %v6529_v62 }
 0x5ec   :  { %3205 = vmatpush.bf16.msrb.mxu2 %v6444_v21  ;;  %v6511_v34 = vld [vmem:[#allocation3 + $0x8c8] sm:$0xf]  ;;  %v7739_v41 = vld [vmem:[#allocation3 + $0x8d4] sm:$0xf0]  ;;  %v6660_v12 = vor.u32 %v7773_v63, %v6657_v52  ;;  %v7737_v20 = vld [vmem:[#allocation3 + $0x8cc] sm:$0xf] }
 0x5ed   :  { %3218 = vmatpush.bf16.msrb.mxu3 %v6572_v5  ;;  %v6639_v45 = vld [vmem:[#allocation3 + $0x9c8] sm:$0xf]  ;;  %v7771_v1 = vld [vmem:[#allocation3 + $0x9d4] sm:$0xf0]  ;;  %v6513_v51 = vld [vmem:[#allocation3 + $0x8d8] sm:$0xf0]  ;;  %v6512_v33 = vor.u32 %v7739_v41, %v6511_v34 }
 0x5ee   :  { %3180 = vmatpush.bf16.msra.mxu0 %v6424_v35  ;;  %v7769_v29 = vld [vmem:[#allocation3 + $0x9cc] sm:$0xf]  ;;  %v6641_v59 = vld [vmem:[#allocation3 + $0x9d8] sm:$0xf0]  ;;  %v6495_v40 = vld [vmem:[#allocation3 + $0x8a8] sm:$0xf]  ;;  %v6640_v54 = vor.u32 %v7771_v1, %v6639_v45  ;;  %v6516_v36 = vor.u32 %v7737_v20, %v6513_v51 }
 0x5ef   :  { %3193 = vmatpush.bf16.msrb.mxu1 %v6552_v28  ;;  %v7735_v50 = vld [vmem:[#allocation3 + $0x8b4] sm:$0xf0]  ;;  %v6623_v44 = vld [vmem:[#allocation3 + $0x9a8] sm:$0xf]  ;;  %v6644_v58 = vor.u32 %v7769_v29, %v6641_v59  ;;  %v7733_v43 = vld [vmem:[#allocation3 + $0x8ac] sm:$0xf] }
 0x5f0   :  { %3206 = vmatpush.bf16.msrb.mxu2 %v6428_v26  ;;  %v7767_v15 = vld [vmem:[#allocation3 + $0x9b4] sm:$0xf0]  ;;  %v6497_v47 = vld [vmem:[#allocation3 + $0x8b8] sm:$0xf0]  ;;  %v7765_v25 = vld [vmem:[#allocation3 + $0x9ac] sm:$0xf]  ;;  %v6496_v56 = vor.u32 %v7735_v50, %v6495_v40 }
 0x5f1   :  { %3219 = vmatpush.bf16.msrb.mxu3 %v6556_v11  ;;  %v6625_v46 = vld [vmem:[#allocation3 + $0x9b8] sm:$0xf0]  ;;  %v6624_v5 = vor.u32 %v7767_v15, %v6623_v44  ;;  %v6500_v14 = vor.u32 %v7733_v43, %v6497_v47  ;;  %v6479_v3 = vld [vmem:[#allocation3 + $0x888] sm:$0xf]  ;;  %v7731_v7 = vld [vmem:[#allocation3 + $0x894] sm:$0xf0] }
 0x5f2   :  { %3181 = vmatpush.bf16.msra.mxu0 %v6408_v16  ;;  %v2784_v60 = vld.sshfl [vmem:[#allocation1] sm:$0xff pattern:$0x73625140]  ;;  %v2785_v55 = vld.sshfl [vmem:[#allocation1 + $0x8] sm:$0xff pattern:$0x73625140]  ;;  %v6628_v22 = vor.u32 %v7765_v25, %v6625_v46  ;;  %v6480_v28 = vor.u32 %v7731_v7, %v6479_v3 }
 0x5f3   :  { %3194 = vmatpush.bf16.msrb.mxu1 %v6536_v61  ;;  %v9121_v10 = vpack.c.bf16 %v2784_v60, %v2784_v60  ;;  %v9123_v21 = vpack.c.bf16 %v2785_v55, %v2785_v55  ;;  %v6607_v6 = vld [vmem:[#allocation3 + $0x988] sm:$0xf]  ;;  %v7763_v9 = vld [vmem:[#allocation3 + $0x994] sm:$0xf0]  ;;  %v7729_v35 = vld [vmem:[#allocation3 + $0x88c] sm:$0xf] }
 0x5f4   :  { %3207 = vmatpush.bf16.msrb.mxu2 %v6412_v0  ;;  %v6481_v19 = vld [vmem:[#allocation3 + $0x898] sm:$0xf0]  ;;  %v7761_v4 = vld [vmem:[#allocation3 + $0x98c] sm:$0xf]  ;;  %v6608_v26 = vor.u32 %v7763_v9, %v6607_v6  ;;  %v6463_v13 = vld [vmem:[#allocation3 + $0x868] sm:$0xf] }
 0x5f5   :  { %3220 = vmatpush.bf16.msrb.mxu3 %v6540_v32  ;;  %3182 = vmatmul.bf16.vlgmr.msra.gmra.mxu0 %v9121_v10  ;;  %v6609_v39 = vld [vmem:[#allocation3 + $0x998] sm:$0xf0]  ;;  %v6484_v48 = vor.u32 %v7729_v35, %v6481_v19  ;;  %v7727_v17 = vld [vmem:[#allocation3 + $0x874] sm:$0xf0]  ;;  %v6591_v11 = vld [vmem:[#allocation3 + $0x968] sm:$0xf] }
 0x5f6   :  { %3226 = vmatpush.bf16.msrb.mxu0 %v6528_v49  ;;  %3195 = vmatmul.bf16.vlgmr.msrb.gmra.mxu1 %v9123_v21  ;;  %v6612_v38 = vor.u32 %v7761_v4, %v6609_v39  ;;  %v7759_v30 = vld [vmem:[#allocation3 + $0x974] sm:$0xf0]  ;;  %v7725_v8 = vld [vmem:[#allocation3 + $0x86c] sm:$0xf]  ;;  %v6465_v42 = vld [vmem:[#allocation3 + $0x878] sm:$0xf0]  ;;  %v6464_v16 = vor.u32 %v7727_v17, %v6463_v13 }
 0x5f7   :  { %3239 = vmatpush.bf16.msra.mxu1 %v6656_v53  ;;  %3208 = vmatmul.bf16.vlgmr.msrb.gmra.mxu2 %v9121_v10  ;;  %v7757_v57 = vld [vmem:[#allocation3 + $0x96c] sm:$0xf]  ;;  %v6593_v24 = vld [vmem:[#allocation3 + $0x978] sm:$0xf0]  ;;  %v6592_v18 = vor.u32 %v7759_v30, %v6591_v11  ;;  %v6468_v62 = vor.u32 %v7725_v8, %v6465_v42  ;;  %v6447_v61 = vld [vmem:[#allocation3 + $0x848] sm:$0xf] }
 0x5f8   :  { %3252 = vmatpush.bf16.msra.mxu2 %v6532_v23  ;;  %3221 = vmatmul.bf16.vlgmr.msrb.gmra.mxu3 %v9123_v21  ;;  %v7723_v0 = vld [vmem:[#allocation3 + $0x854] sm:$0xf0]  ;;  %v6575_v63 = vld [vmem:[#allocation3 + $0x948] sm:$0xf]  ;;  %v6596_v52 = vor.u32 %v7757_v57, %v6593_v24  ;;  %v7721_v49 = vld [vmem:[#allocation3 + $0x84c] sm:$0xf] }
 0x5f9   :  { %3265 = vmatpush.bf16.msra.mxu3 %v6660_v12  ;;  %v7755_v32 = vld [vmem:[#allocation3 + $0x954] sm:$0xf0]  ;;  %v6449_v53 = vld [vmem:[#allocation3 + $0x858] sm:$0xf0]  ;;  %v7753_v23 = vld [vmem:[#allocation3 + $0x94c] sm:$0xf]  ;;  %v6448_v41 = vor.u32 %v7723_v0, %v6447_v61 }
 0x5fa   :  { %3227 = vmatpush.bf16.msrb.mxu0 %v6512_v33  ;;  %v6577_v34 = vld [vmem:[#allocation3 + $0x958] sm:$0xf0]  ;;  %v6576_v45 = vor.u32 %v7755_v32, %v6575_v63  ;;  %v6452_v12 = vor.u32 %v7721_v49, %v6449_v53  ;;  %v6431_v1 = vld [vmem:[#allocation3 + $0x828] sm:$0xf]  ;;  %v7719_v20 = vld [vmem:[#allocation3 + $0x834] sm:$0xf0] }
 0x5fb   :  { %3240 = vmatpush.bf16.msra.mxu1 %v6640_v54  ;;  %v6559_v51 = vld [vmem:[#allocation3 + $0x928] sm:$0xf]  ;;  %v6580_v29 = vor.u32 %v7753_v23, %v6577_v34  ;;  %v7751_v59 = vld [vmem:[#allocation3 + $0x934] sm:$0xf0]  ;;  %v7717_v33 = vld [vmem:[#allocation3 + $0x82c] sm:$0xf]  ;;  %v6432_v54 = vor.u32 %v7719_v20, %v6431_v1 }
 0x5fc   :  { %3253 = vmatpush.bf16.msra.mxu2 %v6516_v36  ;;  %v6433_v40 = vld [vmem:[#allocation3 + $0x838] sm:$0xf0]  ;;  %v7749_v50 = vld [vmem:[#allocation3 + $0x92c] sm:$0xf]  ;;  %v6560_v36 = vor.u32 %v7751_v59, %v6559_v51  ;;  %v6415_v55 = vld [vmem:[#allocation3 + $0x808] sm:$0xf] }
 0x5fd   :  { %3266 = vmatpush.bf16.msra.mxu3 %v6644_v58  ;;  %v6561_v44 = vld [vmem:[#allocation3 + $0x938] sm:$0xf0]  ;;  %v6436_v60 = vor.u32 %v7717_v33, %v6433_v40  ;;  %v7715_v58 = vld [vmem:[#allocation3 + $0x814] sm:$0xf0]  ;;  %v6543_v15 = vld [vmem:[#allocation3 + $0x908] sm:$0xf] }
 0x5fe   :  { %3228 = vmatpush.bf16.msrb.mxu0 %v6496_v56  ;;  %v6564_v43 = vor.u32 %v7749_v50, %v6561_v44  ;;  %v7747_v47 = vld [vmem:[#allocation3 + $0x914] sm:$0xf0]  ;;  %v7713_v25 = vld [vmem:[#allocation3 + $0x80c] sm:$0xf]  ;;  %v6417_v46 = vld [vmem:[#allocation3 + $0x818] sm:$0xf0] }
 0x5ff   :  { %3241 = vmatpush.bf16.msra.mxu1 %v6624_v5  ;;  %v7745_v56 = vld [vmem:[#allocation3 + $0x90c] sm:$0xf]  ;;  %v6545_v5 = vld [vmem:[#allocation3 + $0x918] sm:$0xf0]  ;;  %v6544_v3 = vor.u32 %v7747_v47, %v6543_v15  ;;  %v6420_v7 = vor.u32 %v7713_v25, %v6417_v46 }
 0x600   :  { %3254 = vmatpush.bf16.msra.mxu2 %v6500_v14  ;;  %v6416_v14 = vor.u32 %v7715_v58, %v6415_v55  ;;  %v6548_v6 = vor.u32 %v7745_v56, %v6545_v5 }
 0x601   :  { %3267 = vmatpush.bf16.msra.mxu3 %v6628_v22 }
 0x602   :  { %3229 = vmatpush.bf16.msrb.mxu0 %v6480_v28 }
 0x603   :  { %3242 = vmatpush.bf16.msra.mxu1 %v6608_v26 }
 0x604   :  { %3255 = vmatpush.bf16.msra.mxu2 %v6484_v48 }
 0x605   :  { %3268 = vmatpush.bf16.msra.mxu3 %v6612_v38 }
 0x606   :  { %3230 = vmatpush.bf16.msrb.mxu0 %v6464_v16 }
 0x607   :  { %3243 = vmatpush.bf16.msra.mxu1 %v6592_v18 }
 0x608   :  { %3256 = vmatpush.bf16.msra.mxu2 %v6468_v62 }
 0x609   :  { %3269 = vmatpush.bf16.msra.mxu3 %v6596_v52 }
 0x60a   :  { %3231 = vmatpush.bf16.msrb.mxu0 %v6448_v41 }
 0x60b   :  { %3244 = vmatpush.bf16.msra.mxu1 %v6576_v45 }
 0x60c   :  { %3257 = vmatpush.bf16.msra.mxu2 %v6452_v12 }
 0x60d   :  { %3270 = vmatpush.bf16.msra.mxu3 %v6580_v29 }
 0x60e   :  { %3232 = vmatpush.bf16.msrb.mxu0 %v6432_v54 }
 0x60f   :  { %3245 = vmatpush.bf16.msra.mxu1 %v6560_v36 }
 0x610   :  { %3258 = vmatpush.bf16.msra.mxu2 %v6436_v60 }
 0x611   :  { %3271 = vmatpush.bf16.msra.mxu3 %v6564_v43 }
 0x612   :  { %3233 = vmatpush.bf16.msrb.mxu0 %v6416_v14 }
 0x613   :  { %3246 = vmatpush.bf16.msra.mxu1 %v6544_v3 }
 0x614   :  { %3259 = vmatpush.bf16.msra.mxu2 %v6420_v7 }
 0x615   :  { %3272 = vmatpush.bf16.msra.mxu3 %v6548_v6  ;;  %3234 = vmatmul.bf16.vlgmr.msrb.gmra.mxu0 %v9121_v10 }
 0x616   :  { %3247 = vmatmul.bf16.vlgmr.msra.gmra.mxu1 %v9123_v21 }
 0x617   :  { %3260 = vmatmul.bf16.vlgmr.msra.gmra.mxu2 %v9121_v10 }
 0x618   :  { %3273 = vmatmul.bf16.vlgmr.msra.gmra.mxu3 %v9123_v21 }
 0x672   :  { %v3183_v22 = vpop.f32.mrf.mxu0 }
 0x673   :  { %v3196_v9 = vpop.f32.mrf.mxu1 }
 0x674   :  { %v3197_v35 = vadd.f32 %v3196_v9, %v3183_v22 }
 0x676   :  { %v9134_v19 = vadd.f32 %v3197_v35, %v9110_v2 }
 0x67a   :  { %v3209_v4 = vpop.f32.mrf.mxu2  ;;  %v3185_v26 = vpop.f32.mrf.mxu0 }
 0x67b   :  { %v3222_v39 = vpop.f32.mrf.mxu3  ;;  %v3198_v48 = vpop.f32.mrf.mxu1 }
 0x67c   :  { %v3223_v28 = vadd.f32 %v3222_v39, %v3209_v4 }
 0x67e   :  { %v9137_v13 = vadd.f32 %v3223_v28, %v9113_v27 }
 0x682   :  { %v3211_v17 = vpop.f32.mrf.mxu2 }
 0x683   :  { %v3224_v11 = vpop.f32.mrf.mxu3 }
 0x692   :  { %v3235_v38 = vpop.f32.mrf.mxu0 }
 0x693   :  { %v3248_v10 = vpop.f32.mrf.mxu1 }
 0x694   :  { %v3249_v30 = vadd.f32 %v3248_v10, %v3235_v38 }
 0x696   :  { %v9140_v21 = vadd.f32 %v3249_v30, %v9116_v31 }
 0x69a   :  { %v3261_v8 = vpop.f32.mrf.mxu2  ;;  %v3237_v2 = vpop.f32.mrf.mxu0 }
 0x69b   :  { %v3274_v42 = vpop.f32.mrf.mxu3  ;;  %v3250_v24 = vpop.f32.mrf.mxu1 }
 0x69c   :  { %v3275_v57 = vadd.f32 %v3274_v42, %v3261_v8 }
 0x69e   :  { %v9143_v16 = vadd.f32 %v3275_v57, %v9119_v37 }
 0x6a2   :  { %v3263_v18 = vpop.f32.mrf.mxu2 }
 0x6a3   :  { %v3276_v62 = vpop.f32.mrf.mxu3 }
 0x6a4   :  { %8347 = dma.done.wait [#allocation4 + $0x5], 8192 }
 0x6a5   :  { %8348 = vsyncadd [#allocation4 + $0x5], 4294959104  ;;  %v6775_v27 = vld [vmem:[#allocation3 + $0xae0] sm:$0xf]  ;;  %v7806_v61 = vld [vmem:[#allocation3 + $0xaec] sm:$0xf0] }
 0x6a6   :  { %v6903_v0 = vld [vmem:[#allocation3 + $0xbe0] sm:$0xf]  ;;  %v6776_v63 = vor.u32 %v7806_v61, %v6775_v27  ;;  %v7838_v52 = vld [vmem:[#allocation3 + $0xbec] sm:$0xf0]  ;;  %v7804_v32 = vld [vmem:[#allocation3 + $0xae4] sm:$0xf] }
 0x6a7   :  { %v6777_v31 = vld [vmem:[#allocation3 + $0xaf0] sm:$0xf0]  ;;  %v6904_v49 = vor.u32 %v7838_v52, %v6903_v0  ;;  %v7836_v23 = vld [vmem:[#allocation3 + $0xbe4] sm:$0xf]  ;;  %v6759_v41 = vld [vmem:[#allocation3 + $0xac0] sm:$0xf] }
 0x6a8   :  { %v6780_v53 = vor.u32 %v7804_v32, %v6777_v31  ;;  %v6905_v34 = vld [vmem:[#allocation3 + $0xbf0] sm:$0xf0]  ;;  %3677 = vmatpush.bf16.msra.mxu0 %v6776_v63  ;;  %v7802_v37 = vld [vmem:[#allocation3 + $0xacc] sm:$0xf0]  ;;  %v6887_v12 = vld [vmem:[#allocation3 + $0xbc0] sm:$0xf] }
 0x6a9   :  { %v6908_v45 = vor.u32 %v7836_v23, %v6905_v34  ;;  %v7834_v1 = vld [vmem:[#allocation3 + $0xbcc] sm:$0xf0]  ;;  %3690 = vmatpush.bf16.msrb.mxu1 %v6904_v49  ;;  %v6760_v20 = vor.u32 %v7802_v37, %v6759_v41  ;;  %v7800_v29 = vld [vmem:[#allocation3 + $0xac4] sm:$0xf]  ;;  %v6761_v59 = vld [vmem:[#allocation3 + $0xad0] sm:$0xf0] }
 0x6aa   :  { %3703 = vmatpush.bf16.msrb.mxu2 %v6780_v53  ;;  %v6888_v51 = vor.u32 %v7834_v1, %v6887_v12  ;;  %v7832_v33 = vld [vmem:[#allocation3 + $0xbc4] sm:$0xf]  ;;  %v6764_v40 = vor.u32 %v7800_v29, %v6761_v59  ;;  %v6889_v50 = vld [vmem:[#allocation3 + $0xbd0] sm:$0xf0]  ;;  %v6743_v44 = vld [vmem:[#allocation3 + $0xaa0] sm:$0xf] }
 0x6ab   :  { %3716 = vmatpush.bf16.msrb.mxu3 %v6908_v45  ;;  %v7798_v54 = vld [vmem:[#allocation3 + $0xaac] sm:$0xf0]  ;;  %v6892_v36 = vor.u32 %v7832_v33, %v6889_v50  ;;  %v6871_v60 = vld [vmem:[#allocation3 + $0xba0] sm:$0xf]  ;;  %v7796_v58 = vld [vmem:[#allocation3 + $0xaa4] sm:$0xf] }
 0x6ac   :  { %v7830_v55 = vld [vmem:[#allocation3 + $0xbac] sm:$0xf0]  ;;  %3678 = vmatpush.bf16.msra.mxu0 %v6760_v20  ;;  %v6744_v15 = vor.u32 %v7798_v54, %v6743_v44  ;;  %v6745_v43 = vld [vmem:[#allocation3 + $0xab0] sm:$0xf0]  ;;  %v7828_v47 = vld [vmem:[#allocation3 + $0xba4] sm:$0xf] }
 0x6ad   :  { %v6873_v25 = vld [vmem:[#allocation3 + $0xbb0] sm:$0xf0]  ;;  %3691 = vmatpush.bf16.msrb.mxu1 %v6888_v51  ;;  %v6872_v46 = vor.u32 %v7830_v55, %v6871_v60  ;;  %v6748_v56 = vor.u32 %v7796_v58, %v6745_v43  ;;  %v6727_v5 = vld [vmem:[#allocation3 + $0xa80] sm:$0xf]  ;;  %v7794_v14 = vld [vmem:[#allocation3 + $0xa8c] sm:$0xf0] }
 0x6ae   :  { %3704 = vmatpush.bf16.msrb.mxu2 %v6764_v40  ;;  %v6855_v3 = vld [vmem:[#allocation3 + $0xb80] sm:$0xf]  ;;  %v6876_v7 = vor.u32 %v7828_v47, %v6873_v25  ;;  %v7826_v6 = vld [vmem:[#allocation3 + $0xb8c] sm:$0xf0]  ;;  %v7792_v22 = vld [vmem:[#allocation3 + $0xa84] sm:$0xf]  ;;  %v6728_v39 = vor.u32 %v7794_v14, %v6727_v5 }
 0x6af   :  { %3717 = vmatpush.bf16.msrb.mxu3 %v6892_v36  ;;  %v6729_v9 = vld [vmem:[#allocation3 + $0xa90] sm:$0xf0]  ;;  %v7824_v35 = vld [vmem:[#allocation3 + $0xb84] sm:$0xf]  ;;  %v6856_v28 = vor.u32 %v7826_v6, %v6855_v3  ;;  %v6711_v48 = vld [vmem:[#allocation3 + $0xa60] sm:$0xf] }
 0x6b0   :  { %v6857_v4 = vld [vmem:[#allocation3 + $0xb90] sm:$0xf0]  ;;  %3679 = vmatpush.bf16.msra.mxu0 %v6744_v15  ;;  %v6732_v26 = vor.u32 %v7792_v22, %v6729_v9  ;;  %v7790_v17 = vld [vmem:[#allocation3 + $0xa6c] sm:$0xf0]  ;;  %v6839_v11 = vld [vmem:[#allocation3 + $0xb60] sm:$0xf] }
 0x6b1   :  { %3692 = vmatpush.bf16.msrb.mxu1 %v6872_v46  ;;  %v6860_v38 = vor.u32 %v7824_v35, %v6857_v4  ;;  %v7822_v10 = vld [vmem:[#allocation3 + $0xb6c] sm:$0xf0]  ;;  %v7788_v30 = vld [vmem:[#allocation3 + $0xa64] sm:$0xf]  ;;  %v6713_v8 = vld [vmem:[#allocation3 + $0xa70] sm:$0xf0]  ;;  %v6712_v57 = vor.u32 %v7790_v17, %v6711_v48 }
 0x6b2   :  { %3705 = vmatpush.bf16.msrb.mxu2 %v6748_v56  ;;  %v7820_v42 = vld [vmem:[#allocation3 + $0xb64] sm:$0xf]  ;;  %v6841_v2 = vld [vmem:[#allocation3 + $0xb70] sm:$0xf0]  ;;  %v6840_v24 = vor.u32 %v7822_v10, %v6839_v11  ;;  %v6716_v18 = vor.u32 %v7788_v30, %v6713_v8  ;;  %v6695_v62 = vld [vmem:[#allocation3 + $0xa40] sm:$0xf] }
 0x6b3   :  { %3718 = vmatpush.bf16.msrb.mxu3 %v6876_v7  ;;  %v7786_v27 = vld [vmem:[#allocation3 + $0xa4c] sm:$0xf0]  ;;  %v6823_v61 = vld [vmem:[#allocation3 + $0xb40] sm:$0xf]  ;;  %v6844_v0 = vor.u32 %v7820_v42, %v6841_v2  ;;  %v7784_v52 = vld [vmem:[#allocation3 + $0xa44] sm:$0xf] }
 0x6b4   :  { %3680 = vmatpush.bf16.msra.mxu0 %v6728_v39  ;;  %v7818_v63 = vld [vmem:[#allocation3 + $0xb4c] sm:$0xf0]  ;;  %v6697_v32 = vld [vmem:[#allocation3 + $0xa50] sm:$0xf0]  ;;  %v7816_v31 = vld [vmem:[#allocation3 + $0xb44] sm:$0xf]  ;;  %v6696_v53 = vor.u32 %v7786_v27, %v6695_v62 }
 0x6b5   :  { %3693 = vmatpush.bf16.msrb.mxu1 %v6856_v28  ;;  %v6825_v49 = vld [vmem:[#allocation3 + $0xb50] sm:$0xf0]  ;;  %v6824_v23 = vor.u32 %v7818_v63, %v6823_v61  ;;  %v6700_v34 = vor.u32 %v7784_v52, %v6697_v32  ;;  %v6679_v41 = vld [vmem:[#allocation3 + $0xa20] sm:$0xf]  ;;  %v7782_v45 = vld [vmem:[#allocation3 + $0xa2c] sm:$0xf0] }
 0x6b6   :  { %3706 = vmatpush.bf16.msrb.mxu2 %v6732_v26  ;;  %v6807_v37 = vld [vmem:[#allocation3 + $0xb20] sm:$0xf]  ;;  %v6828_v12 = vor.u32 %v7816_v31, %v6825_v49  ;;  %v7814_v1 = vld [vmem:[#allocation3 + $0xb2c] sm:$0xf0]  ;;  %v7780_v20 = vld [vmem:[#allocation3 + $0xa24] sm:$0xf]  ;;  %v6680_v40 = vor.u32 %v7782_v45, %v6679_v41 }
 0x6b7   :  { %3719 = vmatpush.bf16.msrb.mxu3 %v6860_v38  ;;  %v6681_v51 = vld [vmem:[#allocation3 + $0xa30] sm:$0xf0]  ;;  %v7812_v29 = vld [vmem:[#allocation3 + $0xb24] sm:$0xf]  ;;  %v6663_v33 = vld [vmem:[#allocation3 + $0xa00] sm:$0xf]  ;;  %v6808_v36 = vor.u32 %v7814_v1, %v6807_v37 }
 0x6b8   :  { %3681 = vmatpush.bf16.msra.mxu0 %v6712_v57  ;;  %v6809_v59 = vld [vmem:[#allocation3 + $0xb30] sm:$0xf0]  ;;  %v7778_v50 = vld [vmem:[#allocation3 + $0xa0c] sm:$0xf0]  ;;  %v6791_v44 = vld [vmem:[#allocation3 + $0xb00] sm:$0xf]  ;;  %v6684_v60 = vor.u32 %v7780_v20, %v6681_v51 }
 0x6b9   :  { %3694 = vmatpush.bf16.msrb.mxu1 %v6840_v24  ;;  %v7810_v54 = vld [vmem:[#allocation3 + $0xb0c] sm:$0xf0]  ;;  %v7776_v55 = vld [vmem:[#allocation3 + $0xa04] sm:$0xf]  ;;  %v6665_v58 = vld [vmem:[#allocation3 + $0xa10] sm:$0xf0]  ;;  %v6812_v43 = vor.u32 %v7812_v29, %v6809_v59  ;;  %v6664_v3 = vor.u32 %v7778_v50, %v6663_v33 }
 0x6ba   :  { %3707 = vmatpush.bf16.msrb.mxu2 %v6716_v18  ;;  %v7808_v15 = vld [vmem:[#allocation3 + $0xb04] sm:$0xf]  ;;  %v6793_v47 = vld [vmem:[#allocation3 + $0xb10] sm:$0xf0]  ;;  %v6783_v25 = vld [vmem:[#allocation3 + $0xae8] sm:$0xf]  ;;  %v6792_v22 = vor.u32 %v7810_v54, %v6791_v44  ;;  %v6668_v9 = vor.u32 %v7776_v55, %v6665_v58 }
 0x6bb   :  { %3720 = vmatpush.bf16.msrb.mxu3 %v6844_v0  ;;  %v7807_v46 = vld [vmem:[#allocation3 + $0xaf4] sm:$0xf0]  ;;  %v6911_v56 = vld [vmem:[#allocation3 + $0xbe8] sm:$0xf]  ;;  %v3284_v14 = vld [vmem:[#allocation2 + $0x14] sm:$0xf]  ;;  %v6796_v39 = vor.u32 %v7808_v15, %v6793_v47 }
 0x6bc   :  { %3682 = vmatpush.bf16.msra.mxu0 %v6696_v53  ;;  %v7839_v5 = vld [vmem:[#allocation3 + $0xbf4] sm:$0xf0]  ;;  %v7805_v7 = vld [vmem:[#allocation3 + $0xaec] sm:$0xf]  ;;  %v6785_v6 = vld [vmem:[#allocation3 + $0xaf8] sm:$0xf0]  ;;  %v6784_v28 = vor.u32 %v7807_v46, %v6783_v25 }
 0x6bd   :  { %3695 = vmatpush.bf16.msrb.mxu1 %v6824_v23  ;;  %3286 = vst [vmem:[#allocation1] ss:$4 sm:$0xff] %v3284_v14  ;;  %v7837_v35 = vld [vmem:[#allocation3 + $0xbec] sm:$0xf]  ;;  %v6913_v4 = vld [vmem:[#allocation3 + $0xbf8] sm:$0xf0]  ;;  %v6912_v26 = vor.u32 %v7839_v5, %v6911_v56  ;;  %v6788_v48 = vor.u32 %v7805_v7, %v6785_v6 }
 0x6be   :  { %3708 = vmatpush.bf16.msrb.mxu2 %v6700_v34  ;;  %v6767_v17 = vld [vmem:[#allocation3 + $0xac8] sm:$0xf]  ;;  %v7803_v11 = vld [vmem:[#allocation3 + $0xad4] sm:$0xf0]  ;;  %v6916_v10 = vor.u32 %v7837_v35, %v6913_v4  ;;  %v7801_v8 = vld [vmem:[#allocation3 + $0xacc] sm:$0xf] }
 0x6bf   :  { %3721 = vmatpush.bf16.msrb.mxu3 %v6828_v12  ;;  %v6895_v38 = vld [vmem:[#allocation3 + $0xbc8] sm:$0xf]  ;;  %v7835_v30 = vld [vmem:[#allocation3 + $0xbd4] sm:$0xf0]  ;;  %v6769_v42 = vld [vmem:[#allocation3 + $0xad8] sm:$0xf0]  ;;  %v6768_v24 = vor.u32 %v7803_v11, %v6767_v17 }
 0x6c0   :  { %3683 = vmatpush.bf16.msra.mxu0 %v6680_v40  ;;  %v7833_v2 = vld [vmem:[#allocation3 + $0xbcc] sm:$0xf]  ;;  %v6897_v57 = vld [vmem:[#allocation3 + $0xbd8] sm:$0xf0]  ;;  %v6751_v18 = vld [vmem:[#allocation3 + $0xaa8] sm:$0xf]  ;;  %v6896_v61 = vor.u32 %v7835_v30, %v6895_v38  ;;  %v6772_v0 = vor.u32 %v7801_v8, %v6769_v42 }
 0x6c1   :  { %3696 = vmatpush.bf16.msrb.mxu1 %v6808_v36  ;;  %v7799_v62 = vld [vmem:[#allocation3 + $0xab4] sm:$0xf0]  ;;  %v6879_v27 = vld [vmem:[#allocation3 + $0xba8] sm:$0xf]  ;;  %v6900_v32 = vor.u32 %v7833_v2, %v6897_v57  ;;  %v7797_v53 = vld [vmem:[#allocation3 + $0xaac] sm:$0xf] }
 0x6c2   :  { %3709 = vmatpush.bf16.msrb.mxu2 %v6684_v60  ;;  %v7831_v49 = vld [vmem:[#allocation3 + $0xbb4] sm:$0xf0]  ;;  %v6753_v23 = vld [vmem:[#allocation3 + $0xab8] sm:$0xf0]  ;;  %v7829_v41 = vld [vmem:[#allocation3 + $0xbac] sm:$0xf]  ;;  %v6752_v37 = vor.u32 %v7799_v62, %v6751_v18 }
 0x6c3   :  { %3722 = vmatpush.bf16.msrb.mxu3 %v6812_v43  ;;  %v6881_v45 = vld [vmem:[#allocation3 + $0xbb8] sm:$0xf0]  ;;  %v6880_v12 = vor.u32 %v7831_v49, %v6879_v27  ;;  %v6756_v1 = vor.u32 %v7797_v53, %v6753_v23  ;;  %v6735_v20 = vld [vmem:[#allocation3 + $0xa88] sm:$0xf]  ;;  %v7795_v51 = vld [vmem:[#allocation3 + $0xa94] sm:$0xf0] }
 0x6c4   :  { %3684 = vmatpush.bf16.msra.mxu0 %v6664_v3  ;;  %v3287_v63 = vld.sshfl [vmem:[#allocation1] sm:$0xff pattern:$0x73625140]  ;;  %v3288_v52 = vld.sshfl [vmem:[#allocation1 + $0x8] sm:$0xff pattern:$0x73625140]  ;;  %v6884_v59 = vor.u32 %v7829_v41, %v6881_v45  ;;  %v6736_v36 = vor.u32 %v7795_v51, %v6735_v20 }
 0x6c5   :  { %3697 = vmatpush.bf16.msrb.mxu1 %v6792_v22  ;;  %v9145_v31 = vpack.c.bf16 %v3287_v63, %v3287_v63  ;;  %v9147_v34 = vpack.c.bf16 %v3288_v52, %v3288_v52  ;;  %v6863_v29 = vld [vmem:[#allocation3 + $0xb88] sm:$0xf]  ;;  %v7827_v33 = vld [vmem:[#allocation3 + $0xb94] sm:$0xf0]  ;;  %v7793_v40 = vld [vmem:[#allocation3 + $0xa8c] sm:$0xf] }
 0x6c6   :  { %3710 = vmatpush.bf16.msrb.mxu2 %v6668_v9  ;;  %v6737_v50 = vld [vmem:[#allocation3 + $0xa98] sm:$0xf0]  ;;  %v7825_v44 = vld [vmem:[#allocation3 + $0xb8c] sm:$0xf]  ;;  %v6864_v60 = vor.u32 %v7827_v33, %v6863_v29  ;;  %v6719_v58 = vld [vmem:[#allocation3 + $0xa68] sm:$0xf] }
 0x6c7   :  { %3723 = vmatpush.bf16.msrb.mxu3 %v6796_v39  ;;  %3685 = vmatmul.bf16.vlgmr.msra.gmra.mxu0 %v9145_v31  ;;  %v6865_v54 = vld [vmem:[#allocation3 + $0xb98] sm:$0xf0]  ;;  %v6740_v55 = vor.u32 %v7793_v40, %v6737_v50  ;;  %v7791_v15 = vld [vmem:[#allocation3 + $0xa74] sm:$0xf0]  ;;  %v6847_v43 = vld [vmem:[#allocation3 + $0xb68] sm:$0xf] }
 0x6c8   :  { %3729 = vmatpush.bf16.msrb.mxu0 %v6784_v28  ;;  %3698 = vmatmul.bf16.vlgmr.msrb.gmra.mxu1 %v9147_v34  ;;  %v6868_v47 = vor.u32 %v7825_v44, %v6865_v54  ;;  %v7823_v25 = vld [vmem:[#allocation3 + $0xb74] sm:$0xf0]  ;;  %v7789_v46 = vld [vmem:[#allocation3 + $0xa6c] sm:$0xf]  ;;  %v6721_v56 = vld [vmem:[#allocation3 + $0xa78] sm:$0xf0]  ;;  %v6720_v3 = vor.u32 %v7791_v15, %v6719_v58 }
 0x6c9   :  { %3742 = vmatpush.bf16.msra.mxu1 %v6912_v26  ;;  %3711 = vmatmul.bf16.vlgmr.msrb.gmra.mxu2 %v9145_v31  ;;  %v7821_v5 = vld [vmem:[#allocation3 + $0xb6c] sm:$0xf]  ;;  %v6849_v14 = vld [vmem:[#allocation3 + $0xb78] sm:$0xf0]  ;;  %v6848_v7 = vor.u32 %v7823_v25, %v6847_v43  ;;  %v6724_v6 = vor.u32 %v7789_v46, %v6721_v56  ;;  %v6703_v22 = vld [vmem:[#allocation3 + $0xa48] sm:$0xf] }
 0x6ca   :  { %3755 = vmatpush.bf16.msra.mxu2 %v6788_v48  ;;  %3724 = vmatmul.bf16.vlgmr.msrb.gmra.mxu3 %v9147_v34  ;;  %v7787_v9 = vld [vmem:[#allocation3 + $0xa54] sm:$0xf0]  ;;  %v6831_v35 = vld [vmem:[#allocation3 + $0xb48] sm:$0xf]  ;;  %v6852_v4 = vor.u32 %v7821_v5, %v6849_v14  ;;  %v7785_v28 = vld [vmem:[#allocation3 + $0xa4c] sm:$0xf] }
 0x6cb   :  { %3768 = vmatpush.bf16.msra.mxu3 %v6916_v10  ;;  %v7819_v39 = vld [vmem:[#allocation3 + $0xb54] sm:$0xf0]  ;;  %v6705_v26 = vld [vmem:[#allocation3 + $0xa58] sm:$0xf0]  ;;  %v7817_v48 = vld [vmem:[#allocation3 + $0xb4c] sm:$0xf]  ;;  %v6704_v11 = vor.u32 %v7787_v9, %v6703_v22 }
 0x6cc   :  { %3730 = vmatpush.bf16.msrb.mxu0 %v6768_v24  ;;  %v6833_v17 = vld [vmem:[#allocation3 + $0xb58] sm:$0xf0]  ;;  %v6832_v38 = vor.u32 %v7819_v39, %v6831_v35  ;;  %v6708_v10 = vor.u32 %v7785_v28, %v6705_v26  ;;  %v6687_v30 = vld [vmem:[#allocation3 + $0xa28] sm:$0xf]  ;;  %v7783_v8 = vld [vmem:[#allocation3 + $0xa34] sm:$0xf0] }
 0x6cd   :  { %3743 = vmatpush.bf16.msra.mxu1 %v6896_v61  ;;  %v6815_v42 = vld [vmem:[#allocation3 + $0xb28] sm:$0xf]  ;;  %v6836_v2 = vor.u32 %v7817_v48, %v6833_v17  ;;  %v7815_v57 = vld [vmem:[#allocation3 + $0xb34] sm:$0xf0]  ;;  %v7781_v24 = vld [vmem:[#allocation3 + $0xa2c] sm:$0xf]  ;;  %v6688_v61 = vor.u32 %v7783_v8, %v6687_v30 }
 0x6ce   :  { %3756 = vmatpush.bf16.msra.mxu2 %v6772_v0  ;;  %v6689_v18 = vld [vmem:[#allocation3 + $0xa38] sm:$0xf0]  ;;  %v7813_v62 = vld [vmem:[#allocation3 + $0xb2c] sm:$0xf]  ;;  %v6816_v0 = vor.u32 %v7815_v57, %v6815_v42  ;;  %v6671_v52 = vld [vmem:[#allocation3 + $0xa08] sm:$0xf] }
 0x6cf   :  { %3769 = vmatpush.bf16.msra.mxu3 %v6900_v32  ;;  %v6817_v27 = vld [vmem:[#allocation3 + $0xb38] sm:$0xf0]  ;;  %v6692_v63 = vor.u32 %v7781_v24, %v6689_v18  ;;  %v7779_v32 = vld [vmem:[#allocation3 + $0xa14] sm:$0xf0]  ;;  %v6799_v49 = vld [vmem:[#allocation3 + $0xb08] sm:$0xf] }
 0x6d0   :  { %3731 = vmatpush.bf16.msrb.mxu0 %v6752_v37  ;;  %v6820_v53 = vor.u32 %v7813_v62, %v6817_v27  ;;  %v7811_v23 = vld [vmem:[#allocation3 + $0xb14] sm:$0xf0]  ;;  %v7777_v41 = vld [vmem:[#allocation3 + $0xa0c] sm:$0xf]  ;;  %v6673_v45 = vld [vmem:[#allocation3 + $0xa18] sm:$0xf0] }
 0x6d1   :  { %3744 = vmatpush.bf16.msra.mxu1 %v6880_v12  ;;  %v7809_v37 = vld [vmem:[#allocation3 + $0xb0c] sm:$0xf]  ;;  %v6801_v12 = vld [vmem:[#allocation3 + $0xb18] sm:$0xf0]  ;;  %v6800_v20 = vor.u32 %v7811_v23, %v6799_v49  ;;  %v6676_v51 = vor.u32 %v7777_v41, %v6673_v45 }
 0x6d2   :  { %3757 = vmatpush.bf16.msra.mxu2 %v6756_v1  ;;  %v6672_v1 = vor.u32 %v7779_v32, %v6671_v52  ;;  %v6804_v29 = vor.u32 %v7809_v37, %v6801_v12 }
 0x6d3   :  { %3770 = vmatpush.bf16.msra.mxu3 %v6884_v59 }
 0x6d4   :  { %3732 = vmatpush.bf16.msrb.mxu0 %v6736_v36 }
 0x6d5   :  { %3745 = vmatpush.bf16.msra.mxu1 %v6864_v60 }
 0x6d6   :  { %3758 = vmatpush.bf16.msra.mxu2 %v6740_v55 }
 0x6d7   :  { %3771 = vmatpush.bf16.msra.mxu3 %v6868_v47 }
 0x6d8   :  { %3733 = vmatpush.bf16.msrb.mxu0 %v6720_v3 }
 0x6d9   :  { %3746 = vmatpush.bf16.msra.mxu1 %v6848_v7 }
 0x6da   :  { %3759 = vmatpush.bf16.msra.mxu2 %v6724_v6 }
 0x6db   :  { %3772 = vmatpush.bf16.msra.mxu3 %v6852_v4 }
 0x6dc   :  { %3734 = vmatpush.bf16.msrb.mxu0 %v6704_v11 }
 0x6dd   :  { %3747 = vmatpush.bf16.msra.mxu1 %v6832_v38 }
 0x6de   :  { %3760 = vmatpush.bf16.msra.mxu2 %v6708_v10 }
 0x6df   :  { %3773 = vmatpush.bf16.msra.mxu3 %v6836_v2 }
 0x6e0   :  { %3735 = vmatpush.bf16.msrb.mxu0 %v6688_v61 }
 0x6e1   :  { %3748 = vmatpush.bf16.msra.mxu1 %v6816_v0 }
 0x6e2   :  { %3761 = vmatpush.bf16.msra.mxu2 %v6692_v63 }
 0x6e3   :  { %3774 = vmatpush.bf16.msra.mxu3 %v6820_v53 }
 0x6e4   :  { %3736 = vmatpush.bf16.msrb.mxu0 %v6672_v1 }
 0x6e5   :  { %3749 = vmatpush.bf16.msra.mxu1 %v6800_v20 }
 0x6e6   :  { %3762 = vmatpush.bf16.msra.mxu2 %v6676_v51 }
 0x6e7   :  { %3775 = vmatpush.bf16.msra.mxu3 %v6804_v29  ;;  %3737 = vmatmul.bf16.vlgmr.msrb.gmra.mxu0 %v9145_v31 }
 0x6e8   :  { %3750 = vmatmul.bf16.vlgmr.msra.gmra.mxu1 %v9147_v34 }
 0x6e9   :  { %3763 = vmatmul.bf16.vlgmr.msra.gmra.mxu2 %v9145_v31 }
 0x6ea   :  { %3776 = vmatmul.bf16.vlgmr.msra.gmra.mxu3 %v9147_v34 }
 0x744   :  { %v3686_v59 = vpop.f32.mrf.mxu0 }
 0x745   :  { %v3699_v33 = vpop.f32.mrf.mxu1 }
 0x746   :  { %v3700_v40 = vadd.f32 %v3699_v33, %v3686_v59 }
 0x748   :  { %v9158_v50 = vadd.f32 %v3700_v40, %v9134_v19 }
 0x74c   :  { %v3712_v44 = vpop.f32.mrf.mxu2  ;;  %v3688_v60 = vpop.f32.mrf.mxu0 }
 0x74d   :  { %v3725_v54 = vpop.f32.mrf.mxu3  ;;  %v3701_v55 = vpop.f32.mrf.mxu1 }
 0x74e   :  { %v3726_v36 = vadd.f32 %v3725_v54, %v3712_v44 }
 0x750   :  { %v9161_v58 = vadd.f32 %v3726_v36, %v9137_v13 }
 0x754   :  { %v3714_v15 = vpop.f32.mrf.mxu2 }
 0x755   :  { %v3727_v43 = vpop.f32.mrf.mxu3 }
 0x764   :  { %v3738_v47 = vpop.f32.mrf.mxu0 }
 0x765   :  { %v3751_v31 = vpop.f32.mrf.mxu1 }
 0x766   :  { %v3752_v25 = vadd.f32 %v3751_v31, %v3738_v47 }
 0x768   :  { %v9164_v34 = vadd.f32 %v3752_v25, %v9140_v21 }
 0x76c   :  { %v3764_v46 = vpop.f32.mrf.mxu2  ;;  %v3740_v19 = vpop.f32.mrf.mxu0 }
 0x76d   :  { %v3777_v56 = vpop.f32.mrf.mxu3  ;;  %v3753_v14 = vpop.f32.mrf.mxu1 }
 0x76e   :  { %v3778_v5 = vadd.f32 %v3777_v56, %v3764_v46 }
 0x770   :  { %v9167_v3 = vadd.f32 %v3778_v5, %v9143_v16 }
 0x774   :  { %v3766_v7 = vpop.f32.mrf.mxu2 }
 0x775   :  { %v3779_v6 = vpop.f32.mrf.mxu3 }
 0x776   :  { %8349 = dma.done.wait [#allocation4 + $0x6], 8192 }
 0x777   :  { %8350 = vsyncadd [#allocation4 + $0x6], 4294959104  ;;  %v7031_v13 = vld [vmem:[#allocation3 + $0xce0] sm:$0xf]  ;;  %v7870_v22 = vld [vmem:[#allocation3 + $0xcec] sm:$0xf0] }
 0x778   :  { %v7159_v9 = vld [vmem:[#allocation3 + $0xde0] sm:$0xf]  ;;  %v7032_v35 = vor.u32 %v7870_v22, %v7031_v13  ;;  %v7902_v4 = vld [vmem:[#allocation3 + $0xdec] sm:$0xf0]  ;;  %v7868_v39 = vld [vmem:[#allocation3 + $0xce4] sm:$0xf] }
 0x779   :  { %v7033_v21 = vld [vmem:[#allocation3 + $0xcf0] sm:$0xf0]  ;;  %v7160_v28 = vor.u32 %v7902_v4, %v7159_v9  ;;  %v7900_v48 = vld [vmem:[#allocation3 + $0xde4] sm:$0xf]  ;;  %v7015_v11 = vld [vmem:[#allocation3 + $0xcc0] sm:$0xf] }
 0x77a   :  { %v7036_v26 = vor.u32 %v7868_v39, %v7033_v21  ;;  %v7161_v17 = vld [vmem:[#allocation3 + $0xdf0] sm:$0xf0]  ;;  %4180 = vmatpush.bf16.msra.mxu0 %v7032_v35  ;;  %v7866_v16 = vld [vmem:[#allocation3 + $0xccc] sm:$0xf0]  ;;  %v7143_v10 = vld [vmem:[#allocation3 + $0xdc0] sm:$0xf] }
 0x77b   :  { %v7164_v38 = vor.u32 %v7900_v48, %v7161_v17  ;;  %v7898_v30 = vld [vmem:[#allocation3 + $0xdcc] sm:$0xf0]  ;;  %4193 = vmatpush.bf16.msrb.mxu1 %v7160_v28  ;;  %v7016_v8 = vor.u32 %v7866_v16, %v7015_v11  ;;  %v7864_v2 = vld [vmem:[#allocation3 + $0xcc4] sm:$0xf]  ;;  %v7017_v57 = vld [vmem:[#allocation3 + $0xcd0] sm:$0xf0] }
 0x77c   :  { %4206 = vmatpush.bf16.msrb.mxu2 %v7036_v26  ;;  %v7144_v42 = vor.u32 %v7898_v30, %v7143_v10  ;;  %v7896_v24 = vld [vmem:[#allocation3 + $0xdc4] sm:$0xf]  ;;  %v7020_v18 = vor.u32 %v7864_v2, %v7017_v57  ;;  %v7145_v62 = vld [vmem:[#allocation3 + $0xdd0] sm:$0xf0]  ;;  %v6999_v27 = vld [vmem:[#allocation3 + $0xca0] sm:$0xf] }
 0x77d   :  { %4219 = vmatpush.bf16.msrb.mxu3 %v7164_v38  ;;  %v7862_v61 = vld [vmem:[#allocation3 + $0xcac] sm:$0xf0]  ;;  %v7148_v0 = vor.u32 %v7896_v24, %v7145_v62  ;;  %v7127_v63 = vld [vmem:[#allocation3 + $0xda0] sm:$0xf]  ;;  %v7860_v32 = vld [vmem:[#allocation3 + $0xca4] sm:$0xf] }
 0x77e   :  { %v7894_v52 = vld [vmem:[#allocation3 + $0xdac] sm:$0xf0]  ;;  %4181 = vmatpush.bf16.msra.mxu0 %v7016_v8  ;;  %v7000_v49 = vor.u32 %v7862_v61, %v6999_v27  ;;  %v7001_v53 = vld [vmem:[#allocation3 + $0xcb0] sm:$0xf0]  ;;  %v7892_v23 = vld [vmem:[#allocation3 + $0xda4] sm:$0xf] }
 0x77f   :  { %v7129_v41 = vld [vmem:[#allocation3 + $0xdb0] sm:$0xf0]  ;;  %4194 = vmatpush.bf16.msrb.mxu1 %v7144_v42  ;;  %v7128_v45 = vor.u32 %v7894_v52, %v7127_v63  ;;  %v7004_v37 = vor.u32 %v7860_v32, %v7001_v53  ;;  %v6983_v12 = vld [vmem:[#allocation3 + $0xc80] sm:$0xf]  ;;  %v7858_v1 = vld [vmem:[#allocation3 + $0xc8c] sm:$0xf0] }
 0x780   :  { %4207 = vmatpush.bf16.msrb.mxu2 %v7020_v18  ;;  %v7111_v20 = vld [vmem:[#allocation3 + $0xd80] sm:$0xf]  ;;  %v7132_v51 = vor.u32 %v7892_v23, %v7129_v41  ;;  %v7890_v29 = vld [vmem:[#allocation3 + $0xd8c] sm:$0xf0]  ;;  %v7856_v59 = vld [vmem:[#allocation3 + $0xc84] sm:$0xf]  ;;  %v6984_v54 = vor.u32 %v7858_v1, %v6983_v12 }
 0x781   :  { %4220 = vmatpush.bf16.msrb.mxu3 %v7148_v0  ;;  %v6985_v33 = vld [vmem:[#allocation3 + $0xc90] sm:$0xf0]  ;;  %v7888_v40 = vld [vmem:[#allocation3 + $0xd84] sm:$0xf]  ;;  %v7112_v36 = vor.u32 %v7890_v29, %v7111_v20  ;;  %v6967_v55 = vld [vmem:[#allocation3 + $0xc60] sm:$0xf] }
 0x782   :  { %v7113_v44 = vld [vmem:[#allocation3 + $0xd90] sm:$0xf0]  ;;  %4182 = vmatpush.bf16.msra.mxu0 %v7000_v49  ;;  %v6988_v60 = vor.u32 %v7856_v59, %v6985_v33  ;;  %v7854_v15 = vld [vmem:[#allocation3 + $0xc6c] sm:$0xf0]  ;;  %v7095_v43 = vld [vmem:[#allocation3 + $0xd60] sm:$0xf] }
 0x783   :  { %4195 = vmatpush.bf16.msrb.mxu1 %v7128_v45  ;;  %v7116_v47 = vor.u32 %v7888_v40, %v7113_v44  ;;  %v7886_v31 = vld [vmem:[#allocation3 + $0xd6c] sm:$0xf0]  ;;  %v7852_v25 = vld [vmem:[#allocation3 + $0xc64] sm:$0xf]  ;;  %v6969_v46 = vld [vmem:[#allocation3 + $0xc70] sm:$0xf0]  ;;  %v6968_v5 = vor.u32 %v7854_v15, %v6967_v55 }
 0x784   :  { %4208 = vmatpush.bf16.msrb.mxu2 %v7004_v37  ;;  %v7884_v56 = vld [vmem:[#allocation3 + $0xd64] sm:$0xf]  ;;  %v7097_v19 = vld [vmem:[#allocation3 + $0xd70] sm:$0xf0]  ;;  %v7096_v14 = vor.u32 %v7886_v31, %v7095_v43  ;;  %v6972_v7 = vor.u32 %v7852_v25, %v6969_v46  ;;  %v6951_v6 = vld [vmem:[#allocation3 + $0xc40] sm:$0xf] }
 0x785   :  { %4221 = vmatpush.bf16.msrb.mxu3 %v7132_v51  ;;  %v7850_v13 = vld [vmem:[#allocation3 + $0xc4c] sm:$0xf0]  ;;  %v7079_v22 = vld [vmem:[#allocation3 + $0xd40] sm:$0xf]  ;;  %v7100_v9 = vor.u32 %v7884_v56, %v7097_v19  ;;  %v7848_v4 = vld [vmem:[#allocation3 + $0xc44] sm:$0xf] }
 0x786   :  { %4183 = vmatpush.bf16.msra.mxu0 %v6984_v54  ;;  %v7882_v35 = vld [vmem:[#allocation3 + $0xd4c] sm:$0xf0]  ;;  %v6953_v39 = vld [vmem:[#allocation3 + $0xc50] sm:$0xf0]  ;;  %v7880_v21 = vld [vmem:[#allocation3 + $0xd44] sm:$0xf]  ;;  %v6952_v26 = vor.u32 %v7850_v13, %v6951_v6 }
 0x787   :  { %4196 = vmatpush.bf16.msrb.mxu1 %v7112_v36  ;;  %v7081_v28 = vld [vmem:[#allocation3 + $0xd50] sm:$0xf0]  ;;  %v7080_v48 = vor.u32 %v7882_v35, %v7079_v22  ;;  %v6956_v17 = vor.u32 %v7848_v4, %v6953_v39  ;;  %v6935_v11 = vld [vmem:[#allocation3 + $0xc20] sm:$0xf]  ;;  %v7846_v38 = vld [vmem:[#allocation3 + $0xc2c] sm:$0xf0] }
 0x788   :  { %4209 = vmatpush.bf16.msrb.mxu2 %v6988_v60  ;;  %v7063_v16 = vld [vmem:[#allocation3 + $0xd20] sm:$0xf]  ;;  %v7084_v10 = vor.u32 %v7880_v21, %v7081_v28  ;;  %v7878_v30 = vld [vmem:[#allocation3 + $0xd2c] sm:$0xf0]  ;;  %v7844_v8 = vld [vmem:[#allocation3 + $0xc24] sm:$0xf]  ;;  %v6936_v18 = vor.u32 %v7846_v38, %v6935_v11 }
 0x789   :  { %4222 = vmatpush.bf16.msrb.mxu3 %v7116_v47  ;;  %v6937_v42 = vld [vmem:[#allocation3 + $0xc30] sm:$0xf0]  ;;  %v7876_v2 = vld [vmem:[#allocation3 + $0xd24] sm:$0xf]  ;;  %v6919_v24 = vld [vmem:[#allocation3 + $0xc00] sm:$0xf]  ;;  %v7064_v0 = vor.u32 %v7878_v30, %v7063_v16 }
 0x78a   :  { %4184 = vmatpush.bf16.msra.mxu0 %v6968_v5  ;;  %v7065_v57 = vld [vmem:[#allocation3 + $0xd30] sm:$0xf0]  ;;  %v7842_v62 = vld [vmem:[#allocation3 + $0xc0c] sm:$0xf0]  ;;  %v7047_v27 = vld [vmem:[#allocation3 + $0xd00] sm:$0xf]  ;;  %v6940_v63 = vor.u32 %v7844_v8, %v6937_v42 }
 0x78b   :  { %4197 = vmatpush.bf16.msrb.mxu1 %v7096_v14  ;;  %v7874_v61 = vld [vmem:[#allocation3 + $0xd0c] sm:$0xf0]  ;;  %v7840_v52 = vld [vmem:[#allocation3 + $0xc04] sm:$0xf]  ;;  %v6921_v32 = vld [vmem:[#allocation3 + $0xc10] sm:$0xf0]  ;;  %v7068_v53 = vor.u32 %v7876_v2, %v7065_v57  ;;  %v6920_v20 = vor.u32 %v7842_v62, %v6919_v24 }
 0x78c   :  { %4210 = vmatpush.bf16.msrb.mxu2 %v6972_v7  ;;  %v7872_v49 = vld [vmem:[#allocation3 + $0xd04] sm:$0xf]  ;;  %v7049_v23 = vld [vmem:[#allocation3 + $0xd10] sm:$0xf0]  ;;  %v7039_v41 = vld [vmem:[#allocation3 + $0xce8] sm:$0xf]  ;;  %v7048_v59 = vor.u32 %v7874_v61, %v7047_v27  ;;  %v6924_v33 = vor.u32 %v7840_v52, %v6921_v32 }
 0x78d   :  { %4223 = vmatpush.bf16.msrb.mxu3 %v7100_v9  ;;  %v7871_v45 = vld [vmem:[#allocation3 + $0xcf4] sm:$0xf0]  ;;  %v7167_v37 = vld [vmem:[#allocation3 + $0xde8] sm:$0xf]  ;;  %v7869_v51 = vld [vmem:[#allocation3 + $0xcec] sm:$0xf]  ;;  %v7052_v54 = vor.u32 %v7872_v49, %v7049_v23 }
 0x78e   :  { %4185 = vmatpush.bf16.msra.mxu0 %v6952_v26  ;;  %v7903_v12 = vld [vmem:[#allocation3 + $0xdf4] sm:$0xf0]  ;;  %v7041_v29 = vld [vmem:[#allocation3 + $0xcf8] sm:$0xf0]  ;;  %v7901_v40 = vld [vmem:[#allocation3 + $0xdec] sm:$0xf]  ;;  %v7040_v36 = vor.u32 %v7871_v45, %v7039_v41 }
 0x78f   :  { %4198 = vmatpush.bf16.msrb.mxu1 %v7080_v48  ;;  %v3787_v1 = vld [vmem:[#allocation2 + $0x18] sm:$0xf]  ;;  %v7169_v44 = vld [vmem:[#allocation3 + $0xdf8] sm:$0xf0]  ;;  %v7168_v60 = vor.u32 %v7903_v12, %v7167_v37  ;;  %v7044_v55 = vor.u32 %v7869_v51, %v7041_v29  ;;  %v7023_v15 = vld [vmem:[#allocation3 + $0xcc8] sm:$0xf] }
 0x790   :  { %4211 = vmatpush.bf16.msrb.mxu2 %v6956_v17  ;;  %3789 = vst [vmem:[#allocation1] ss:$4 sm:$0xff] %v3787_v1  ;;  %v7867_v43 = vld [vmem:[#allocation3 + $0xcd4] sm:$0xf0]  ;;  %v7151_v47 = vld [vmem:[#allocation3 + $0xdc8] sm:$0xf]  ;;  %v7172_v31 = vor.u32 %v7901_v40, %v7169_v44 }
 0x791   :  { %4224 = vmatpush.bf16.msrb.mxu3 %v7084_v10  ;;  %v7899_v25 = vld [vmem:[#allocation3 + $0xdd4] sm:$0xf0]  ;;  %v7865_v46 = vld [vmem:[#allocation3 + $0xccc] sm:$0xf]  ;;  %v7025_v56 = vld [vmem:[#allocation3 + $0xcd8] sm:$0xf0]  ;;  %v7024_v14 = vor.u32 %v7867_v43, %v7023_v15 }
 0x792   :  { %4186 = vmatpush.bf16.msra.mxu0 %v6936_v18  ;;  %v7897_v19 = vld [vmem:[#allocation3 + $0xdcc] sm:$0xf]  ;;  %v7153_v5 = vld [vmem:[#allocation3 + $0xdd8] sm:$0xf0]  ;;  %v7007_v7 = vld [vmem:[#allocation3 + $0xca8] sm:$0xf]  ;;  %v7152_v22 = vor.u32 %v7899_v25, %v7151_v47  ;;  %v7028_v9 = vor.u32 %v7865_v46, %v7025_v56 }
 0x793   :  { %4199 = vmatpush.bf16.msrb.mxu1 %v7064_v0  ;;  %v7863_v6 = vld [vmem:[#allocation3 + $0xcb4] sm:$0xf0]  ;;  %v7135_v13 = vld [vmem:[#allocation3 + $0xda8] sm:$0xf]  ;;  %v7156_v39 = vor.u32 %v7897_v19, %v7153_v5  ;;  %v7861_v26 = vld [vmem:[#allocation3 + $0xcac] sm:$0xf] }
 0x794   :  { %4212 = vmatpush.bf16.msrb.mxu2 %v6940_v63  ;;  %v7895_v28 = vld [vmem:[#allocation3 + $0xdb4] sm:$0xf0]  ;;  %v7009_v48 = vld [vmem:[#allocation3 + $0xcb8] sm:$0xf0]  ;;  %v7893_v11 = vld [vmem:[#allocation3 + $0xdac] sm:$0xf]  ;;  %v7008_v16 = vor.u32 %v7863_v6, %v7007_v7 }
 0x795   :  { %4225 = vmatpush.bf16.msrb.mxu3 %v7068_v53  ;;  %v7137_v38 = vld [vmem:[#allocation3 + $0xdb8] sm:$0xf0]  ;;  %v7136_v10 = vor.u32 %v7895_v28, %v7135_v13  ;;  %v7012_v30 = vor.u32 %v7861_v26, %v7009_v48  ;;  %v6991_v8 = vld [vmem:[#allocation3 + $0xc88] sm:$0xf]  ;;  %v7859_v42 = vld [vmem:[#allocation3 + $0xc94] sm:$0xf0] }
 0x796   :  { %4187 = vmatpush.bf16.msra.mxu0 %v6920_v20  ;;  %v7119_v2 = vld [vmem:[#allocation3 + $0xd88] sm:$0xf]  ;;  %v7140_v57 = vor.u32 %v7893_v11, %v7137_v38  ;;  %v7891_v24 = vld [vmem:[#allocation3 + $0xd94] sm:$0xf0]  ;;  %v7857_v18 = vld [vmem:[#allocation3 + $0xc8c] sm:$0xf]  ;;  %v6992_v0 = vor.u32 %v7859_v42, %v6991_v8 }
 0x797   :  { %4200 = vmatpush.bf16.msrb.mxu1 %v7048_v59  ;;  %v3790_v35 = vld.sshfl [vmem:[#allocation1] sm:$0xff pattern:$0x73625140]  ;;  %v3791_v4 = vld.sshfl [vmem:[#allocation1 + $0x8] sm:$0xff pattern:$0x73625140]  ;;  %v7120_v63 = vor.u32 %v7891_v24, %v7119_v2 }
 0x798   :  { %4213 = vmatpush.bf16.msrb.mxu2 %v6924_v33  ;;  %v9169_v21 = vpack.c.bf16 %v3790_v35, %v3790_v35  ;;  %v9171_v17 = vpack.c.bf16 %v3791_v4, %v3791_v4  ;;  %v6993_v62 = vld [vmem:[#allocation3 + $0xc98] sm:$0xf0]  ;;  %v7889_v27 = vld [vmem:[#allocation3 + $0xd8c] sm:$0xf]  ;;  %v6975_v32 = vld [vmem:[#allocation3 + $0xc68] sm:$0xf] }
 0x799   :  { %4226 = vmatpush.bf16.msrb.mxu3 %v7052_v54  ;;  %v7121_v61 = vld [vmem:[#allocation3 + $0xd98] sm:$0xf0]  ;;  %v6996_v52 = vor.u32 %v7857_v18, %v6993_v62  ;;  %v7855_v49 = vld [vmem:[#allocation3 + $0xc74] sm:$0xf0]  ;;  %v7103_v53 = vld [vmem:[#allocation3 + $0xd68] sm:$0xf] }
 0x79a   :  { %4232 = vmatpush.bf16.msrb.mxu0 %v7040_v36  ;;  %4201 = vmatmul.bf16.vlgmr.msrb.gmra.mxu1 %v9171_v17  ;;  %v7124_v23 = vor.u32 %v7889_v27, %v7121_v61  ;;  %v7887_v41 = vld [vmem:[#allocation3 + $0xd74] sm:$0xf0]  ;;  %v7853_v45 = vld [vmem:[#allocation3 + $0xc6c] sm:$0xf]  ;;  %v6977_v37 = vld [vmem:[#allocation3 + $0xc78] sm:$0xf0]  ;;  %v6976_v20 = vor.u32 %v7855_v49, %v6975_v32 }
 0x79b   :  { %4245 = vmatpush.bf16.msra.mxu1 %v7168_v60  ;;  %4214 = vmatmul.bf16.vlgmr.msrb.gmra.mxu2 %v9169_v21  ;;  %v7885_v12 = vld [vmem:[#allocation3 + $0xd6c] sm:$0xf]  ;;  %v7105_v1 = vld [vmem:[#allocation3 + $0xd78] sm:$0xf0]  ;;  %v7104_v51 = vor.u32 %v7887_v41, %v7103_v53  ;;  %v6980_v29 = vor.u32 %v7853_v45, %v6977_v37  ;;  %v6959_v59 = vld [vmem:[#allocation3 + $0xc48] sm:$0xf] }
 0x79c   :  { %4258 = vmatpush.bf16.msra.mxu2 %v7044_v55  ;;  %4188 = vmatmul.bf16.vlgmr.msra.gmra.mxu0 %v9169_v21  ;;  %v7851_v33 = vld [vmem:[#allocation3 + $0xc54] sm:$0xf0]  ;;  %v7087_v40 = vld [vmem:[#allocation3 + $0xd48] sm:$0xf]  ;;  %v7108_v44 = vor.u32 %v7885_v12, %v7105_v1  ;;  %v7849_v36 = vld [vmem:[#allocation3 + $0xc4c] sm:$0xf] }
 0x79d   :  { %4271 = vmatpush.bf16.msra.mxu3 %v7172_v31  ;;  %v7883_v54 = vld [vmem:[#allocation3 + $0xd54] sm:$0xf0]  ;;  %v6961_v60 = vld [vmem:[#allocation3 + $0xc58] sm:$0xf0]  ;;  %v7881_v55 = vld [vmem:[#allocation3 + $0xd4c] sm:$0xf]  ;;  %v6960_v43 = vor.u32 %v7851_v33, %v6959_v59 }
 0x79e   :  { %4233 = vmatpush.bf16.msrb.mxu0 %v7024_v14  ;;  %4227 = vmatmul.bf16.vlgmr.msrb.gmra.mxu3 %v9171_v17  ;;  %v7089_v15 = vld [vmem:[#allocation3 + $0xd58] sm:$0xf0]  ;;  %v7088_v47 = vor.u32 %v7883_v54, %v7087_v40  ;;  %v6964_v31 = vor.u32 %v7849_v36, %v6961_v60  ;;  %v6943_v25 = vld [vmem:[#allocation3 + $0xc28] sm:$0xf]  ;;  %v7847_v46 = vld [vmem:[#allocation3 + $0xc34] sm:$0xf0] }
 0x79f   :  { %4246 = vmatpush.bf16.msra.mxu1 %v7152_v22  ;;  %v7071_v56 = vld [vmem:[#allocation3 + $0xd28] sm:$0xf]  ;;  %v7092_v19 = vor.u32 %v7881_v55, %v7089_v15  ;;  %v7879_v5 = vld [vmem:[#allocation3 + $0xd34] sm:$0xf0]  ;;  %v7845_v14 = vld [vmem:[#allocation3 + $0xc2c] sm:$0xf]  ;;  %v6944_v22 = vor.u32 %v7847_v46, %v6943_v25 }
 0x7a0   :  { %4259 = vmatpush.bf16.msra.mxu2 %v7028_v9  ;;  %v6945_v7 = vld [vmem:[#allocation3 + $0xc38] sm:$0xf0]  ;;  %v7877_v6 = vld [vmem:[#allocation3 + $0xd2c] sm:$0xf]  ;;  %v7072_v9 = vor.u32 %v7879_v5, %v7071_v56  ;;  %v6927_v4 = vld [vmem:[#allocation3 + $0xc08] sm:$0xf] }
 0x7a1   :  { %4272 = vmatpush.bf16.msra.mxu3 %v7156_v39  ;;  %v7073_v13 = vld [vmem:[#allocation3 + $0xd38] sm:$0xf0]  ;;  %v6948_v35 = vor.u32 %v7845_v14, %v6945_v7  ;;  %v7843_v39 = vld [vmem:[#allocation3 + $0xc14] sm:$0xf0]  ;;  %v7055_v28 = vld [vmem:[#allocation3 + $0xd08] sm:$0xf] }
 0x7a2   :  { %4234 = vmatpush.bf16.msrb.mxu0 %v7008_v16  ;;  %v7076_v26 = vor.u32 %v7877_v6, %v7073_v13  ;;  %v7875_v48 = vld [vmem:[#allocation3 + $0xd14] sm:$0xf0]  ;;  %v7841_v11 = vld [vmem:[#allocation3 + $0xc0c] sm:$0xf]  ;;  %v6929_v38 = vld [vmem:[#allocation3 + $0xc18] sm:$0xf0] }
 0x7a3   :  { %4247 = vmatpush.bf16.msra.mxu1 %v7136_v10  ;;  %v7873_v16 = vld [vmem:[#allocation3 + $0xd0c] sm:$0xf]  ;;  %v7057_v10 = vld [vmem:[#allocation3 + $0xd18] sm:$0xf0]  ;;  %v7056_v8 = vor.u32 %v7875_v48, %v7055_v28  ;;  %v6932_v42 = vor.u32 %v7841_v11, %v6929_v38 }
 0x7a4   :  { %4260 = vmatpush.bf16.msra.mxu2 %v7012_v30  ;;  %v6928_v30 = vor.u32 %v7843_v39, %v6927_v4  ;;  %v7060_v2 = vor.u32 %v7873_v16, %v7057_v10 }
 0x7a5   :  { %4273 = vmatpush.bf16.msra.mxu3 %v7140_v57 }
 0x7a6   :  { %4235 = vmatpush.bf16.msrb.mxu0 %v6992_v0 }
 0x7a7   :  { %4248 = vmatpush.bf16.msra.mxu1 %v7120_v63 }
 0x7a8   :  { %4261 = vmatpush.bf16.msra.mxu2 %v6996_v52 }
 0x7a9   :  { %4274 = vmatpush.bf16.msra.mxu3 %v7124_v23 }
 0x7aa   :  { %4236 = vmatpush.bf16.msrb.mxu0 %v6976_v20 }
 0x7ab   :  { %4249 = vmatpush.bf16.msra.mxu1 %v7104_v51 }
 0x7ac   :  { %4262 = vmatpush.bf16.msra.mxu2 %v6980_v29 }
 0x7ad   :  { %4275 = vmatpush.bf16.msra.mxu3 %v7108_v44 }
 0x7ae   :  { %4237 = vmatpush.bf16.msrb.mxu0 %v6960_v43 }
 0x7af   :  { %4250 = vmatpush.bf16.msra.mxu1 %v7088_v47 }
 0x7b0   :  { %4263 = vmatpush.bf16.msra.mxu2 %v6964_v31 }
 0x7b1   :  { %4276 = vmatpush.bf16.msra.mxu3 %v7092_v19 }
 0x7b2   :  { %4238 = vmatpush.bf16.msrb.mxu0 %v6944_v22 }
 0x7b3   :  { %4251 = vmatpush.bf16.msra.mxu1 %v7072_v9 }
 0x7b4   :  { %4264 = vmatpush.bf16.msra.mxu2 %v6948_v35 }
 0x7b5   :  { %4277 = vmatpush.bf16.msra.mxu3 %v7076_v26 }
 0x7b6   :  { %4239 = vmatpush.bf16.msrb.mxu0 %v6928_v30 }
 0x7b7   :  { %4252 = vmatpush.bf16.msra.mxu1 %v7056_v8 }
 0x7b8   :  { %4265 = vmatpush.bf16.msra.mxu2 %v6932_v42 }
 0x7b9   :  { %4278 = vmatpush.bf16.msra.mxu3 %v7060_v2  ;;  %4240 = vmatmul.bf16.vlgmr.msrb.gmra.mxu0 %v9169_v21 }
 0x7ba   :  { %4253 = vmatmul.bf16.vlgmr.msra.gmra.mxu1 %v9171_v17 }
 0x7bb   :  { %4266 = vmatmul.bf16.vlgmr.msra.gmra.mxu2 %v9169_v21 }
 0x7bc   :  { %4279 = vmatmul.bf16.vlgmr.msra.gmra.mxu3 %v9171_v17 }
 0x817   :  { %v4202_v24 = vpop.f32.mrf.mxu1 }
 0x819   :  { %v4189_v57 = vpop.f32.mrf.mxu0 }
 0x81a   :  { %v4203_v18 = vadd.f32 %v4202_v24, %v4189_v57 }
 0x81c   :  { %v9182_v62 = vadd.f32 %v4203_v18, %v9158_v50 }
 0x81e   :  { %9749 = vst [vmem:[#allocation74_spill] sm:$0xff] %v9182_v62  ;;  %v4215_v27 = vpop.f32.mrf.mxu2 }
 0x81f   :  { %v4204_v52 = vpop.f32.mrf.mxu1 }
 0x821   :  { %v4228_v61 = vpop.f32.mrf.mxu3  ;;  %v4191_v63 = vpop.f32.mrf.mxu0 }
 0x822   :  { %v4229_v0 = vadd.f32 %v4228_v61, %v4215_v27 }
 0x824   :  { %v9185_v32 = vadd.f32 %v4229_v0, %v9161_v58 }
 0x826   :  { %9750 = vst [vmem:[#allocation136_spill] sm:$0xff] %v9185_v32  ;;  %v4217_v49 = vpop.f32.mrf.mxu2 }
 0x829   :  { %v4230_v53 = vpop.f32.mrf.mxu3 }
 0x836   :  { %v4241_v23 = vpop.f32.mrf.mxu0 }
 0x837   :  { %v4254_v21 = vpop.f32.mrf.mxu1 }
 0x838   :  { %v4255_v41 = vadd.f32 %v4254_v21, %v4241_v23 }
 0x83a   :  { %v9188_v17 = vadd.f32 %v4255_v41, %v9164_v34 }
 0x83c   :  { %9751 = vst [vmem:[#allocation133_spill] sm:$0xff] %v9188_v17 }
 0x83e   :  { %v4267_v45 = vpop.f32.mrf.mxu2  ;;  %v4243_v50 = vpop.f32.mrf.mxu0 }
 0x83f   :  { %v4280_v37 = vpop.f32.mrf.mxu3  ;;  %v4256_v1 = vpop.f32.mrf.mxu1 }
 0x840   :  { %v4281_v12 = vadd.f32 %v4280_v37, %v4267_v45 }
 0x842   :  { %v9191_v20 = vadd.f32 %v4281_v12, %v9167_v3 }
 0x844   :  { %9752 = vst [vmem:[#allocation126_spill] sm:$0xff] %v9191_v20 }
 0x846   :  { %v4269_v51 = vpop.f32.mrf.mxu2 }
 0x847   :  { %v4282_v29 = vpop.f32.mrf.mxu3 }
 0x848   :  { %8351 = dma.done.wait [#allocation4 + $0x7], 8192 }
 0x849   :  { %8352 = vsyncadd [#allocation4 + $0x7], 4294959104  ;;  %v7287_v58 = vld [vmem:[#allocation3 + $0xee0] sm:$0xf]  ;;  %v7934_v59 = vld [vmem:[#allocation3 + $0xeec] sm:$0xf0] }
 0x84a   :  { %v7415_v33 = vld [vmem:[#allocation3 + $0xfe0] sm:$0xf]  ;;  %v7288_v40 = vor.u32 %v7934_v59, %v7287_v58  ;;  %v7966_v44 = vld [vmem:[#allocation3 + $0xfec] sm:$0xf0]  ;;  %v7932_v54 = vld [vmem:[#allocation3 + $0xee4] sm:$0xf] }
 0x84b   :  { %v7289_v34 = vld [vmem:[#allocation3 + $0xef0] sm:$0xf0]  ;;  %v7416_v36 = vor.u32 %v7966_v44, %v7415_v33  ;;  %v7964_v55 = vld [vmem:[#allocation3 + $0xfe4] sm:$0xf]  ;;  %v7271_v43 = vld [vmem:[#allocation3 + $0xec0] sm:$0xf] }
 0x84c   :  { %v7292_v60 = vor.u32 %v7932_v54, %v7289_v34  ;;  %v7417_v15 = vld [vmem:[#allocation3 + $0xff0] sm:$0xf0]  ;;  %4683 = vmatpush.bf16.msra.mxu0 %v7288_v40  ;;  %v7930_v3 = vld [vmem:[#allocation3 + $0xecc] sm:$0xf0]  ;;  %v7399_v31 = vld [vmem:[#allocation3 + $0xfc0] sm:$0xf] }
 0x84d   :  { %v7420_v47 = vor.u32 %v7964_v55, %v7417_v15  ;;  %v7962_v25 = vld [vmem:[#allocation3 + $0xfcc] sm:$0xf0]  ;;  %4696 = vmatpush.bf16.msrb.mxu1 %v7416_v36  ;;  %v7272_v46 = vor.u32 %v7930_v3, %v7271_v43  ;;  %v7928_v19 = vld [vmem:[#allocation3 + $0xec4] sm:$0xf]  ;;  %v7273_v5 = vld [vmem:[#allocation3 + $0xed0] sm:$0xf0] }
 0x84e   :  { %4709 = vmatpush.bf16.msrb.mxu2 %v7292_v60  ;;  %v7400_v56 = vor.u32 %v7962_v25, %v7399_v31  ;;  %v7960_v14 = vld [vmem:[#allocation3 + $0xfc4] sm:$0xf]  ;;  %v7276_v7 = vor.u32 %v7928_v19, %v7273_v5  ;;  %v7401_v6 = vld [vmem:[#allocation3 + $0xfd0] sm:$0xf0]  ;;  %v7255_v13 = vld [vmem:[#allocation3 + $0xea0] sm:$0xf] }
 0x84f   :  { %4722 = vmatpush.bf16.msrb.mxu3 %v7420_v47  ;;  %v7926_v22 = vld [vmem:[#allocation3 + $0xeac] sm:$0xf0]  ;;  %v7404_v9 = vor.u32 %v7960_v14, %v7401_v6  ;;  %v7383_v35 = vld [vmem:[#allocation3 + $0xfa0] sm:$0xf]  ;;  %v7924_v39 = vld [vmem:[#allocation3 + $0xea4] sm:$0xf] }
 0x850   :  { %v7958_v4 = vld [vmem:[#allocation3 + $0xfac] sm:$0xf0]  ;;  %4684 = vmatpush.bf16.msra.mxu0 %v7272_v46  ;;  %v7256_v28 = vor.u32 %v7926_v22, %v7255_v13  ;;  %v7257_v26 = vld [vmem:[#allocation3 + $0xeb0] sm:$0xf0]  ;;  %v7956_v48 = vld [vmem:[#allocation3 + $0xfa4] sm:$0xf] }
 0x851   :  { %v7385_v11 = vld [vmem:[#allocation3 + $0xfb0] sm:$0xf0]  ;;  %4697 = vmatpush.bf16.msrb.mxu1 %v7400_v56  ;;  %v7384_v38 = vor.u32 %v7958_v4, %v7383_v35  ;;  %v7260_v16 = vor.u32 %v7924_v39, %v7257_v26  ;;  %v7239_v10 = vld [vmem:[#allocation3 + $0xe80] sm:$0xf]  ;;  %v7922_v30 = vld [vmem:[#allocation3 + $0xe8c] sm:$0xf0] }
 0x852   :  { %4710 = vmatpush.bf16.msrb.mxu2 %v7276_v7  ;;  %v7367_v8 = vld [vmem:[#allocation3 + $0xf80] sm:$0xf]  ;;  %v7388_v42 = vor.u32 %v7956_v48, %v7385_v11  ;;  %v7954_v2 = vld [vmem:[#allocation3 + $0xf8c] sm:$0xf0]  ;;  %v7920_v57 = vld [vmem:[#allocation3 + $0xe84] sm:$0xf]  ;;  %v7240_v61 = vor.u32 %v7922_v30, %v7239_v10 }
 0x853   :  { %4723 = vmatpush.bf16.msrb.mxu3 %v7404_v9  ;;  %v7241_v24 = vld [vmem:[#allocation3 + $0xe90] sm:$0xf0]  ;;  %v7952_v18 = vld [vmem:[#allocation3 + $0xf84] sm:$0xf]  ;;  %v7368_v0 = vor.u32 %v7954_v2, %v7367_v8  ;;  %v7223_v52 = vld [vmem:[#allocation3 + $0xe60] sm:$0xf] }
 0x854   :  { %v7369_v27 = vld [vmem:[#allocation3 + $0xf90] sm:$0xf0]  ;;  %4685 = vmatpush.bf16.msra.mxu0 %v7256_v28  ;;  %v7244_v63 = vor.u32 %v7920_v57, %v7241_v24  ;;  %v7918_v49 = vld [vmem:[#allocation3 + $0xe6c] sm:$0xf0]  ;;  %v7351_v53 = vld [vmem:[#allocation3 + $0xf60] sm:$0xf] }
 0x855   :  { %4698 = vmatpush.bf16.msrb.mxu1 %v7384_v38  ;;  %v7372_v23 = vor.u32 %v7952_v18, %v7369_v27  ;;  %v7950_v21 = vld [vmem:[#allocation3 + $0xf6c] sm:$0xf0]  ;;  %v7916_v41 = vld [vmem:[#allocation3 + $0xe64] sm:$0xf]  ;;  %v7225_v45 = vld [vmem:[#allocation3 + $0xe70] sm:$0xf0]  ;;  %v7224_v12 = vor.u32 %v7918_v49, %v7223_v52 }
 0x856   :  { %4711 = vmatpush.bf16.msrb.mxu2 %v7260_v16  ;;  %v7948_v37 = vld [vmem:[#allocation3 + $0xf64] sm:$0xf]  ;;  %v7353_v50 = vld [vmem:[#allocation3 + $0xf70] sm:$0xf0]  ;;  %v7352_v1 = vor.u32 %v7950_v21, %v7351_v53  ;;  %v7228_v51 = vor.u32 %v7916_v41, %v7225_v45  ;;  %v7207_v29 = vld [vmem:[#allocation3 + $0xe40] sm:$0xf] }
 0x857   :  { %4724 = vmatpush.bf16.msrb.mxu3 %v7388_v42  ;;  %v7914_v58 = vld [vmem:[#allocation3 + $0xe4c] sm:$0xf0]  ;;  %v7335_v59 = vld [vmem:[#allocation3 + $0xf40] sm:$0xf]  ;;  %v7356_v33 = vor.u32 %v7948_v37, %v7353_v50  ;;  %v7912_v44 = vld [vmem:[#allocation3 + $0xe44] sm:$0xf] }
 0x858   :  { %4686 = vmatpush.bf16.msra.mxu0 %v7240_v61  ;;  %v7946_v40 = vld [vmem:[#allocation3 + $0xf4c] sm:$0xf0]  ;;  %v7209_v54 = vld [vmem:[#allocation3 + $0xe50] sm:$0xf0]  ;;  %v7944_v34 = vld [vmem:[#allocation3 + $0xf44] sm:$0xf]  ;;  %v7208_v60 = vor.u32 %v7914_v58, %v7207_v29 }
 0x859   :  { %4699 = vmatpush.bf16.msrb.mxu1 %v7368_v0  ;;  %v7337_v36 = vld [vmem:[#allocation3 + $0xf50] sm:$0xf0]  ;;  %v7336_v55 = vor.u32 %v7946_v40, %v7335_v59  ;;  %v7212_v15 = vor.u32 %v7912_v44, %v7209_v54  ;;  %v7191_v43 = vld [vmem:[#allocation3 + $0xe20] sm:$0xf]  ;;  %v7910_v47 = vld [vmem:[#allocation3 + $0xe2c] sm:$0xf0] }
 0x85a   :  { %4712 = vmatpush.bf16.msrb.mxu2 %v7244_v63  ;;  %v7319_v3 = vld [vmem:[#allocation3 + $0xf20] sm:$0xf]  ;;  %v7340_v31 = vor.u32 %v7944_v34, %v7337_v36  ;;  %v7942_v25 = vld [vmem:[#allocation3 + $0xf2c] sm:$0xf0]  ;;  %v7908_v46 = vld [vmem:[#allocation3 + $0xe24] sm:$0xf]  ;;  %v7192_v14 = vor.u32 %v7910_v47, %v7191_v43 }
 0x85b   :  { %4725 = vmatpush.bf16.msrb.mxu3 %v7372_v23  ;;  %v7193_v56 = vld [vmem:[#allocation3 + $0xe30] sm:$0xf0]  ;;  %v7940_v19 = vld [vmem:[#allocation3 + $0xf24] sm:$0xf]  ;;  %v7175_v7 = vld [vmem:[#allocation3 + $0xe00] sm:$0xf]  ;;  %v7320_v13 = vor.u32 %v7942_v25, %v7319_v3 }
 0x85c   :  { %4687 = vmatpush.bf16.msra.mxu0 %v7224_v12  ;;  %v7321_v5 = vld [vmem:[#allocation3 + $0xf30] sm:$0xf0]  ;;  %v7906_v6 = vld [vmem:[#allocation3 + $0xe0c] sm:$0xf0]  ;;  %v7196_v22 = vor.u32 %v7908_v46, %v7193_v56  ;;  %v7303_v9 = vld [vmem:[#allocation3 + $0xf00] sm:$0xf] }
 0x85d   :  { %4700 = vmatpush.bf16.msrb.mxu1 %v7352_v1  ;;  %v7938_v35 = vld [vmem:[#allocation3 + $0xf0c] sm:$0xf0]  ;;  %v7904_v4 = vld [vmem:[#allocation3 + $0xe04] sm:$0xf]  ;;  %v7324_v39 = vor.u32 %v7940_v19, %v7321_v5  ;;  %v7177_v28 = vld [vmem:[#allocation3 + $0xe10] sm:$0xf0]  ;;  %v7176_v10 = vor.u32 %v7906_v6, %v7175_v7 }
 0x85e   :  { %4713 = vmatpush.bf16.msrb.mxu2 %v7228_v51  ;;  %v7936_v26 = vld [vmem:[#allocation3 + $0xf04] sm:$0xf]  ;;  %v7305_v48 = vld [vmem:[#allocation3 + $0xf10] sm:$0xf0]  ;;  %v7295_v11 = vld [vmem:[#allocation3 + $0xee8] sm:$0xf]  ;;  %v7304_v2 = vor.u32 %v7938_v35, %v7303_v9  ;;  %v7180_v57 = vor.u32 %v7904_v4, %v7177_v28 }
 0x85f   :  { %4726 = vmatpush.bf16.msrb.mxu3 %v7356_v33  ;;  %v7935_v38 = vld [vmem:[#allocation3 + $0xef4] sm:$0xf0]  ;;  %v7423_v16 = vld [vmem:[#allocation3 + $0xfe8] sm:$0xf]  ;;  %v7933_v8 = vld [vmem:[#allocation3 + $0xeec] sm:$0xf]  ;;  %v7308_v27 = vor.u32 %v7936_v26, %v7305_v48 }
 0x860   :  { %4688 = vmatpush.bf16.msra.mxu0 %v7208_v60  ;;  %v7967_v30 = vld [vmem:[#allocation3 + $0xff4] sm:$0xf0]  ;;  %v7297_v42 = vld [vmem:[#allocation3 + $0xef8] sm:$0xf0]  ;;  %v7965_v24 = vld [vmem:[#allocation3 + $0xfec] sm:$0xf]  ;;  %v7296_v61 = vor.u32 %v7935_v38, %v7295_v11 }
 0x861   :  { %4701 = vmatpush.bf16.msrb.mxu1 %v7336_v55  ;;  %v7425_v18 = vld [vmem:[#allocation3 + $0xff8] sm:$0xf0]  ;;  %v7424_v0 = vor.u32 %v7967_v30, %v7423_v16  ;;  %v7300_v63 = vor.u32 %v7933_v8, %v7297_v42  ;;  %v7279_v52 = vld [vmem:[#allocation3 + $0xec8] sm:$0xf]  ;;  %v7931_v49 = vld [vmem:[#allocation3 + $0xed4] sm:$0xf0] }
 0x862   :  { %4714 = vmatpush.bf16.msrb.mxu2 %v7212_v15  ;;  %v7407_v53 = vld [vmem:[#allocation3 + $0xfc8] sm:$0xf]  ;;  %v7428_v23 = vor.u32 %v7965_v24, %v7425_v18  ;;  %v7963_v21 = vld [vmem:[#allocation3 + $0xfd4] sm:$0xf0]  ;;  %v7929_v41 = vld [vmem:[#allocation3 + $0xecc] sm:$0xf]  ;;  %v7280_v12 = vor.u32 %v7931_v49, %v7279_v52 }
 0x863   :  { %4727 = vmatpush.bf16.msrb.mxu3 %v7340_v31  ;;  %v7281_v45 = vld [vmem:[#allocation3 + $0xed8] sm:$0xf0]  ;;  %v7961_v37 = vld [vmem:[#allocation3 + $0xfcc] sm:$0xf]  ;;  %v7263_v1 = vld [vmem:[#allocation3 + $0xea8] sm:$0xf]  ;;  %v7408_v29 = vor.u32 %v7963_v21, %v7407_v53 }
 0x864   :  { %4689 = vmatpush.bf16.msra.mxu0 %v7192_v14  ;;  %v7409_v50 = vld [vmem:[#allocation3 + $0xfd8] sm:$0xf0]  ;;  %v7927_v51 = vld [vmem:[#allocation3 + $0xeb4] sm:$0xf0]  ;;  %v7284_v58 = vor.u32 %v7929_v41, %v7281_v45  ;;  %v7391_v59 = vld [vmem:[#allocation3 + $0xfa8] sm:$0xf] }
 0x865   :  { %4702 = vmatpush.bf16.msrb.mxu1 %v7320_v13  ;;  %v7959_v33 = vld [vmem:[#allocation3 + $0xfb4] sm:$0xf0]  ;;  %v4290_v40 = vld [vmem:[#allocation2 + $0x1c] sm:$0xf]  ;;  %v7412_v44 = vor.u32 %v7961_v37, %v7409_v50  ;;  %v7925_v54 = vld [vmem:[#allocation3 + $0xeac] sm:$0xf]  ;;  %v7264_v55 = vor.u32 %v7927_v51, %v7263_v1 }
 0x866   :  { %4715 = vmatpush.bf16.msrb.mxu2 %v7196_v22  ;;  %v7265_v34 = vld [vmem:[#allocation3 + $0xeb8] sm:$0xf0]  ;;  %4292 = vst [vmem:[#allocation1] ss:$4 sm:$0xff] %v4290_v40  ;;  %v7957_v36 = vld [vmem:[#allocation3 + $0xfac] sm:$0xf]  ;;  %v7392_v15 = vor.u32 %v7959_v33, %v7391_v59 }
 0x867   :  { %4728 = vmatpush.bf16.msrb.mxu3 %v7324_v39  ;;  %v7393_v60 = vld [vmem:[#allocation3 + $0xfb8] sm:$0xf0]  ;;  %v7268_v43 = vor.u32 %v7925_v54, %v7265_v34  ;;  %v7247_v47 = vld [vmem:[#allocation3 + $0xe88] sm:$0xf]  ;;  %v7923_v3 = vld [vmem:[#allocation3 + $0xe94] sm:$0xf0] }
 0x868   :  { %4690 = vmatpush.bf16.msra.mxu0 %v7176_v10  ;;  %v7375_v31 = vld [vmem:[#allocation3 + $0xf88] sm:$0xf]  ;;  %v7396_v25 = vor.u32 %v7957_v36, %v7393_v60  ;;  %v7955_v46 = vld [vmem:[#allocation3 + $0xf94] sm:$0xf0]  ;;  %v7921_v56 = vld [vmem:[#allocation3 + $0xe8c] sm:$0xf]  ;;  %v7248_v7 = vor.u32 %v7923_v3, %v7247_v47 }
 0x869   :  { %4703 = vmatpush.bf16.msrb.mxu1 %v7304_v2  ;;  %v7249_v19 = vld [vmem:[#allocation3 + $0xe98] sm:$0xf0]  ;;  %v7953_v5 = vld [vmem:[#allocation3 + $0xf8c] sm:$0xf]  ;;  %v7231_v6 = vld [vmem:[#allocation3 + $0xe68] sm:$0xf]  ;;  %v7376_v9 = vor.u32 %v7955_v46, %v7375_v31 }
 0x86a   :  { %4716 = vmatpush.bf16.msrb.mxu2 %v7180_v57  ;;  %v7377_v14 = vld [vmem:[#allocation3 + $0xf98] sm:$0xf0]  ;;  %v7919_v13 = vld [vmem:[#allocation3 + $0xe74] sm:$0xf0]  ;;  %v7359_v22 = vld [vmem:[#allocation3 + $0xf68] sm:$0xf]  ;;  %v7252_v35 = vor.u32 %v7921_v56, %v7249_v19 }
 0x86b   :  { %4729 = vmatpush.bf16.msrb.mxu3 %v7308_v27  ;;  %v7380_v28 = vor.u32 %v7953_v5, %v7377_v14  ;;  %v7951_v26 = vld [vmem:[#allocation3 + $0xf74] sm:$0xf0]  ;;  %v7917_v48 = vld [vmem:[#allocation3 + $0xe6c] sm:$0xf]  ;;  %v7233_v11 = vld [vmem:[#allocation3 + $0xe78] sm:$0xf0]  ;;  %v7232_v8 = vor.u32 %v7919_v13, %v7231_v6 }
 0x86c   :  { %4735 = vmatpush.bf16.msrb.mxu0 %v7296_v61  ;;  %v7949_v10 = vld [vmem:[#allocation3 + $0xf6c] sm:$0xf]  ;;  %v7361_v30 = vld [vmem:[#allocation3 + $0xf78] sm:$0xf0]  ;;  %v7360_v42 = vor.u32 %v7951_v26, %v7359_v22  ;;  %v7236_v2 = vor.u32 %v7917_v48, %v7233_v11  ;;  %v7215_v57 = vld [vmem:[#allocation3 + $0xe48] sm:$0xf] }
 0x86d   :  { %4748 = vmatpush.bf16.msra.mxu1 %v7424_v0  ;;  %v4293_v4 = vld.sshfl [vmem:[#allocation1] sm:$0xff pattern:$0x73625140]  ;;  %v4294_v39 = vld.sshfl [vmem:[#allocation1 + $0x8] sm:$0xff pattern:$0x73625140]  ;;  %v7364_v27 = vor.u32 %v7949_v10, %v7361_v30 }
 0x86e   :  { %4761 = vmatpush.bf16.msra.mxu2 %v7300_v63  ;;  %v9193_v38 = vpack.c.bf16 %v4293_v4, %v4293_v4  ;;  %v9195_v16 = vpack.c.bf16 %v4294_v39, %v4294_v39  ;;  %v7915_v24 = vld [vmem:[#allocation3 + $0xe54] sm:$0xf0]  ;;  %v7343_v18 = vld [vmem:[#allocation3 + $0xf48] sm:$0xf]  ;;  %v7913_v0 = vld [vmem:[#allocation3 + $0xe4c] sm:$0xf] }
 0x86f   :  { %4774 = vmatpush.bf16.msra.mxu3 %v7428_v23  ;;  %v7947_v61 = vld [vmem:[#allocation3 + $0xf54] sm:$0xf0]  ;;  %v7217_v63 = vld [vmem:[#allocation3 + $0xe58] sm:$0xf0]  ;;  %v7945_v52 = vld [vmem:[#allocation3 + $0xf4c] sm:$0xf]  ;;  %v7216_v53 = vor.u32 %v7915_v24, %v7215_v57 }
 0x870   :  { %4736 = vmatpush.bf16.msrb.mxu0 %v7280_v12  ;;  %4704 = vmatmul.bf16.vlgmr.msrb.gmra.mxu1 %v9195_v16  ;;  %v7345_v49 = vld [vmem:[#allocation3 + $0xf58] sm:$0xf0]  ;;  %v7344_v23 = vor.u32 %v7947_v61, %v7343_v18  ;;  %v7220_v21 = vor.u32 %v7913_v0, %v7217_v63  ;;  %v7199_v41 = vld [vmem:[#allocation3 + $0xe28] sm:$0xf]  ;;  %v7911_v45 = vld [vmem:[#allocation3 + $0xe34] sm:$0xf0] }
 0x871   :  { %4749 = vmatpush.bf16.msra.mxu1 %v7408_v29  ;;  %4691 = vmatmul.bf16.vlgmr.msra.gmra.mxu0 %v9193_v38  ;;  %v7327_v37 = vld [vmem:[#allocation3 + $0xf28] sm:$0xf]  ;;  %v7348_v50 = vor.u32 %v7945_v52, %v7345_v49  ;;  %v7943_v12 = vld [vmem:[#allocation3 + $0xf34] sm:$0xf0]  ;;  %v7909_v1 = vld [vmem:[#allocation3 + $0xe2c] sm:$0xf]  ;;  %v7200_v59 = vor.u32 %v7911_v45, %v7199_v41 }
 0x872   :  { %4762 = vmatpush.bf16.msra.mxu2 %v7284_v58  ;;  %4730 = vmatmul.bf16.vlgmr.msrb.gmra.mxu3 %v9195_v16  ;;  %v7201_v51 = vld [vmem:[#allocation3 + $0xe38] sm:$0xf0]  ;;  %v7941_v29 = vld [vmem:[#allocation3 + $0xf2c] sm:$0xf]  ;;  %v7328_v33 = vor.u32 %v7943_v12, %v7327_v37  ;;  %v7907_v54 = vld [vmem:[#allocation3 + $0xe14] sm:$0xf0] }
 0x873   :  { %4775 = vmatpush.bf16.msra.mxu3 %v7412_v44  ;;  %4717 = vmatmul.bf16.vlgmr.msrb.gmra.mxu2 %v9193_v38  ;;  %v7329_v58 = vld [vmem:[#allocation3 + $0xf38] sm:$0xf0]  ;;  %v7204_v40 = vor.u32 %v7909_v1, %v7201_v51  ;;  %v7183_v44 = vld [vmem:[#allocation3 + $0xe08] sm:$0xf]  ;;  %v7939_v60 = vld [vmem:[#allocation3 + $0xf14] sm:$0xf0] }
 0x874   :  { %4737 = vmatpush.bf16.msrb.mxu0 %v7264_v55  ;;  %v7311_v34 = vld [vmem:[#allocation3 + $0xf08] sm:$0xf]  ;;  %v7332_v36 = vor.u32 %v7941_v29, %v7329_v58  ;;  %v7905_v55 = vld [vmem:[#allocation3 + $0xe0c] sm:$0xf]  ;;  %v7313_v47 = vld [vmem:[#allocation3 + $0xf18] sm:$0xf0]  ;;  %v7184_v3 = vor.u32 %v7907_v54, %v7183_v44 }
 0x875   :  { %4750 = vmatpush.bf16.msra.mxu1 %v7392_v15  ;;  %v7185_v15 = vld [vmem:[#allocation3 + $0xe18] sm:$0xf0]  ;;  %v7312_v31 = vor.u32 %v7939_v60, %v7311_v34  ;;  %v9201_v56 = vld [vmem:[#allocation9 + $0x1e0] sm:$0xff]  ;;  %v9203_v19 = vld [vmem:[#allocation9 + $0x1e8] sm:$0xff]  ;;  %s8372_s16 = smov [#allocation14]   ;;  %s5258_s20 = sshll.u32 %s9558_s10, 4  ;;  %s5259_s20 = int_to_ptr.hbm [resolvable:$true] %s5258_s20 }
 0x876   :  { %4763 = vmatpush.bf16.msra.mxu2 %v7268_v43  ;;  %v7937_v43 = vld [vmem:[#allocation3 + $0xf0c] sm:$0xf]  ;;  %v9205_v5 = vld [vmem:[#allocation9 + $0x1f0] sm:$0xff]  ;;  %v9207_v14 = vld [vmem:[#allocation9 + $0x1f8] sm:$0xff]  ;;  %s5256_s17 = sshll.u32 %s8372_s16, 4  ;;  %s5257_s17 = int_to_ptr.vmem [resolvable:$true] %s5256_s17 }
 0x877   :  { %4776 = vmatpush.bf16.msra.mxu3 %v7396_v25  ;;  %v7188_v25 = vor.u32 %v7905_v55, %v7185_v15  ;;  %v7316_v46 = vor.u32 %v7937_v43, %v7313_v47  ;;  %v9212_v6 = vld [vmem:[#allocation9 + $0x1c8] sm:$0xff]  ;;  %v9214_v13 = vld [vmem:[#allocation9 + $0x1d0] sm:$0xff]  ;;  %v9218_v22 = vld [vmem:[#allocation9 + $0x1d8] sm:$0xff] }
 0x878   :  { %4738 = vmatpush.bf16.msrb.mxu0 %v7248_v7  ;;  %v9209_v7 = vld [vmem:[#allocation9 + $0x1c0] sm:$0xff]  ;;  %v9226_v4 = vld [vmem:[#allocation9 + $0x1b0] sm:$0xff]  ;;  %v9230_v39 = vld [vmem:[#allocation9 + $0x1b8] sm:$0xff] }
 0x879   :  { %4751 = vmatpush.bf16.msra.mxu1 %v7376_v9  ;;  %v9220_v9 = vld [vmem:[#allocation9 + $0x1a0] sm:$0xff]  ;;  %v9236_v26 = vld [vmem:[#allocation9 + $0x188] sm:$0xff]  ;;  %v9238_v48 = vld [vmem:[#allocation9 + $0x190] sm:$0xff] }
 0x87a   :  { %4764 = vmatpush.bf16.msra.mxu2 %v7252_v35  ;;  %v9224_v35 = vld [vmem:[#allocation9 + $0x1a8] sm:$0xff]  ;;  %v9242_v11 = vld [vmem:[#allocation9 + $0x198] sm:$0xff]  ;;  %v9246_v10 = vld [vmem:[#allocation9 + $0x160] sm:$0xff] }
 0x87b   :  { %4777 = vmatpush.bf16.msra.mxu3 %v7380_v28  ;;  %v9232_v28 = vld [vmem:[#allocation9 + $0x180] sm:$0xff]  ;;  %v9250_v30 = vld [vmem:[#allocation9 + $0x168] sm:$0xff]  ;;  %v9264_v24 = vld [vmem:[#allocation9 + $0x150] sm:$0xff] }
 0x87c   :  { %4739 = vmatpush.bf16.msrb.mxu0 %v7232_v8  ;;  %v9252_v8 = vld [vmem:[#allocation9 + $0x170] sm:$0xff]  ;;  %v9262_v57 = vld [vmem:[#allocation9 + $0x148] sm:$0xff]  ;;  %v9268_v18 = vld [vmem:[#allocation9 + $0x158] sm:$0xff] }
 0x87d   :  { %4752 = vmatpush.bf16.msra.mxu1 %v7360_v42  ;;  %v9256_v42 = vld [vmem:[#allocation9 + $0x178] sm:$0xff]  ;;  %v9274_v61 = vld [vmem:[#allocation9 + $0x128] sm:$0xff]  ;;  %v9278_v0 = vld [vmem:[#allocation9 + $0x130] sm:$0xff] }
 0x87e   :  { %4765 = vmatpush.bf16.msra.mxu2 %v7236_v2  ;;  %v9258_v2 = vld [vmem:[#allocation9 + $0x140] sm:$0xff]  ;;  %v9280_v63 = vld [vmem:[#allocation9 + $0x138] sm:$0xff]  ;;  %v9286_v49 = vld [vmem:[#allocation9 + $0x108] sm:$0xff] }
 0x87f   :  { %4778 = vmatpush.bf16.msra.mxu3 %v7364_v27  ;;  %v9270_v27 = vld [vmem:[#allocation9 + $0x120] sm:$0xff]  ;;  %v9300_v41 = vld [vmem:[#allocation9 + $0xe8] sm:$0xff]  ;;  %v9302_v45 = vld [vmem:[#allocation9 + $0xf0] sm:$0xff] }
 0x880   :  { %4740 = vmatpush.bf16.msrb.mxu0 %v7216_v53  ;;  %v9284_v52 = vld [vmem:[#allocation9 + $0x100] sm:$0xff]  ;;  %v9290_v53 = vld [vmem:[#allocation9 + $0x110] sm:$0xff]  ;;  %v9318_v1 = vld [vmem:[#allocation9 + $0xd8] sm:$0xff] }
 0x881   :  { %4753 = vmatpush.bf16.msra.mxu1 %v7344_v23  ;;  %v9292_v23 = vld [vmem:[#allocation9 + $0x118] sm:$0xff]  ;;  %v9308_v37 = vld [vmem:[#allocation9 + $0xc0] sm:$0xff]  ;;  %v9314_v12 = vld [vmem:[#allocation9 + $0xd0] sm:$0xff] }
 0x882   :  { %4766 = vmatpush.bf16.msra.mxu2 %v7220_v21  ;;  %v9296_v21 = vld [vmem:[#allocation9 + $0xe0] sm:$0xff]  ;;  %v9324_v29 = vld [vmem:[#allocation9 + $0xa8] sm:$0xff]  ;;  %v9330_v58 = vld [vmem:[#allocation9 + $0xb8] sm:$0xff] }
 0x883   :  { %4779 = vmatpush.bf16.msra.mxu3 %v7348_v50  ;;  %v9312_v50 = vld [vmem:[#allocation9 + $0xc8] sm:$0xff]  ;;  %v9320_v51 = vld [vmem:[#allocation9 + $0xa0] sm:$0xff]  ;;  %v9342_v44 = vld [vmem:[#allocation9 + $0x98] sm:$0xff] }
 0x884   :  { %4741 = vmatpush.bf16.msrb.mxu0 %v7200_v59  ;;  %v9332_v59 = vld [vmem:[#allocation9 + $0x80] sm:$0xff]  ;;  %v9348_v34 = vld [vmem:[#allocation9 + $0x68] sm:$0xff]  ;;  %v9354_v60 = vld [vmem:[#allocation9 + $0x78] sm:$0xff] }
 0x885   :  { %4754 = vmatpush.bf16.msra.mxu1 %v7328_v33  ;;  %v9336_v33 = vld [vmem:[#allocation9 + $0x88] sm:$0xff]  ;;  %v9344_v54 = vld [vmem:[#allocation9 + $0x60] sm:$0xff]  ;;  %v9362_v43 = vld [vmem:[#allocation9 + $0x50] sm:$0xff] }
 0x886   :  { %4767 = vmatpush.bf16.msra.mxu2 %v7204_v40  ;;  %v9338_v40 = vld [vmem:[#allocation9 + $0x90] sm:$0xff]  ;;  %v9356_v55 = vld [vmem:[#allocation9 + $0x40] sm:$0xff]  ;;  %v9360_v15 = vld [vmem:[#allocation9 + $0x48] sm:$0xff] }
 0x887   :  { %4780 = vmatpush.bf16.msra.mxu3 %v7332_v36  ;;  %v9350_v36 = vld [vmem:[#allocation9 + $0x70] sm:$0xff]  ;;  %v9366_v47 = vld [vmem:[#allocation9 + $0x58] sm:$0xff]  ;;  %v9380_v17 = vld [vmem:[#allocation9] sm:$0xff] }
 0x888   :  { %4742 = vmatpush.bf16.msrb.mxu0 %v7184_v3  ;;  %v9368_v3 = vld [vmem:[#allocation9 + $0x20] sm:$0xff]  ;;  %v9384_v20 = vld [vmem:[#allocation9 + $0x8] sm:$0xff]  ;;  %v9386_v32 = vld [vmem:[#allocation9 + $0x10] sm:$0xff] }
 0x889   :  { %4755 = vmatpush.bf16.msra.mxu1 %v7312_v31  ;;  %9753 = vst [vmem:[#allocation130_spill] sm:$0xff] %v9368_v3  ;;  %v9372_v31 = vld [vmem:[#allocation9 + $0x28] sm:$0xff]  ;;  %v9390_v62 = vld [vmem:[#allocation9 + $0x18] sm:$0xff] }
 0x88a   :  { %4768 = vmatpush.bf16.msra.mxu2 %v7188_v25  ;;  %v9374_v25 = vld [vmem:[#allocation9 + $0x30] sm:$0xff] }
 0x88b   :  { %4781 = vmatpush.bf16.msra.mxu3 %v7316_v46  ;;  %4743 = vmatmul.bf16.vlgmr.msrb.gmra.mxu0 %v9193_v38  ;;  %v9378_v46 = vld [vmem:[#allocation9 + $0x38] sm:$0xff] }
 0x88c   :  { %4869 = vmatpush.msra.mxu0 %v9201_v56  ;;  %4756 = vmatmul.bf16.vlgmr.msra.gmra.mxu1 %v9195_v16 }
 0x88d   :  { %4889 = vmatpush.msrb.mxu1 %v9203_v19  ;;  %4769 = vmatmul.bf16.vlgmr.msra.gmra.mxu2 %v9193_v38  ;;  %v9326_v38 = vld [vmem:[#allocation9 + $0xb0] sm:$0xff] }
 0x88e   :  { %4909 = vmatpush.msrb.mxu2 %v9205_v5  ;;  %4870 = vmatpush.msra.mxu0 %v9209_v7 }
 0x88f   :  { %4929 = vmatpush.msrb.mxu3 %v9207_v14  ;;  %4890 = vmatpush.msrb.mxu1 %v9212_v6 }
 0x890   :  { %4910 = vmatpush.msrb.mxu2 %v9214_v13  ;;  %4871 = vmatpush.msra.mxu0 %v9220_v9 }
 0x891   :  { %4930 = vmatpush.msrb.mxu3 %v9218_v22  ;;  %4891 = vmatpush.msrb.mxu1 %v9224_v35 }
 0x892   :  { %4911 = vmatpush.msrb.mxu2 %v9226_v4  ;;  %4872 = vmatpush.msra.mxu0 %v9232_v28 }
 0x893   :  { %4931 = vmatpush.msrb.mxu3 %v9230_v39  ;;  %4892 = vmatpush.msrb.mxu1 %v9236_v26 }
 0x894   :  { %4912 = vmatpush.msrb.mxu2 %v9238_v48  ;;  %4873 = vmatpush.msra.mxu0 %v9246_v10 }
 0x895   :  { %4932 = vmatpush.msrb.mxu3 %v9242_v11  ;;  %4893 = vmatpush.msrb.mxu1 %v9250_v30 }
 0x896   :  { %4913 = vmatpush.msrb.mxu2 %v9252_v8  ;;  %4874 = vmatpush.msra.mxu0 %v9258_v2 }
 0x897   :  { %4933 = vmatpush.msrb.mxu3 %v9256_v42  ;;  %4894 = vmatpush.msrb.mxu1 %v9262_v57 }
 0x898   :  { %4914 = vmatpush.msrb.mxu2 %v9264_v24  ;;  %4875 = vmatpush.msra.mxu0 %v9270_v27 }
 0x899   :  { %4934 = vmatpush.msrb.mxu3 %v9268_v18  ;;  %4895 = vmatpush.msrb.mxu1 %v9274_v61 }
 0x89a   :  { %4782 = vmatmul.bf16.vlgmr.msra.gmra.mxu3 %v9195_v16  ;;  %4915 = vmatpush.msrb.mxu2 %v9278_v0  ;;  %v9306_v16 = vld [vmem:[#allocation9 + $0xf8] sm:$0xff] }
 0x89b   :  { %4935 = vmatpush.msrb.mxu3 %v9280_v63  ;;  %4876 = vmatpush.msra.mxu0 %v9284_v52 }
 0x89c   :  { %4896 = vmatpush.msrb.mxu1 %v9286_v49  ;;  %4916 = vmatpush.msrb.mxu2 %v9290_v53 }
 0x89d   :  { %4936 = vmatpush.msrb.mxu3 %v9292_v23  ;;  %4877 = vmatpush.msra.mxu0 %v9296_v21 }
 0x89e   :  { %4897 = vmatpush.msrb.mxu1 %v9300_v41  ;;  %4917 = vmatpush.msrb.mxu2 %v9302_v45 }
 0x89f   :  { %4937 = vmatpush.msrb.mxu3 %v9306_v16  ;;  %4878 = vmatpush.msra.mxu0 %v9308_v37 }
 0x8a0   :  { %4898 = vmatpush.msrb.mxu1 %v9312_v50  ;;  %4918 = vmatpush.msrb.mxu2 %v9314_v12 }
 0x8a1   :  { %4938 = vmatpush.msrb.mxu3 %v9318_v1  ;;  %4879 = vmatpush.msra.mxu0 %v9320_v51 }
 0x8a2   :  { %4899 = vmatpush.msrb.mxu1 %v9324_v29  ;;  %4919 = vmatpush.msrb.mxu2 %v9326_v38 }
 0x8a3   :  { %4939 = vmatpush.msrb.mxu3 %v9330_v58  ;;  %4880 = vmatpush.msra.mxu0 %v9332_v59 }
 0x8a4   :  { %4900 = vmatpush.msrb.mxu1 %v9336_v33  ;;  %4920 = vmatpush.msrb.mxu2 %v9338_v40 }
 0x8a5   :  { %4940 = vmatpush.msrb.mxu3 %v9342_v44  ;;  %4881 = vmatpush.msra.mxu0 %v9344_v54 }
 0x8a6   :  { %4901 = vmatpush.msrb.mxu1 %v9348_v34  ;;  %4921 = vmatpush.msrb.mxu2 %v9350_v36 }
 0x8a7   :  { %4941 = vmatpush.msrb.mxu3 %v9354_v60  ;;  %4882 = vmatpush.msra.mxu0 %v9356_v55 }
 0x8a8   :  { %4902 = vmatpush.msrb.mxu1 %v9360_v15  ;;  %4922 = vmatpush.msrb.mxu2 %v9362_v43 }
 0x8a9   :  { %4942 = vmatpush.msrb.mxu3 %v9366_v47  ;;  %4883 = vmatpush.msra.mxu0 %v9368_v3  ;;  %v8371_v3 = vmov 0.0  }
 0x8aa   :  { %4903 = vmatpush.msrb.mxu1 %v9372_v31  ;;  %4923 = vmatpush.msrb.mxu2 %v9374_v25 }
 0x8ab   :  { %4943 = vmatpush.msrb.mxu3 %v9378_v46  ;;  %4884 = vmatpush.msra.mxu0 %v9380_v17 }
 0x8ac   :  { %4904 = vmatpush.msrb.mxu1 %v9384_v20  ;;  %4924 = vmatpush.msrb.mxu2 %v9386_v32 }
 0x8ad   :  { %4944 = vmatpush.msrb.mxu3 %v9390_v62  ;;  %4885 = vmatmul.f32.vlgmr.msra.gmra.mxu0 %v8371_v3 }
 0x8ae   :  { %4905 = vmatmul.f32.vlgmr.msrb.gmra.mxu1 %v8371_v3  ;;  %4925 = vmatmul.f32.vlgmr.msrb.gmra.mxu2 %v8371_v3 }
 0x8af   :  { %4945 = vmatmul.f32.vlgmr.msrb.gmra.mxu3 %v8371_v3  ;;  %5016 = vmatpush.msrb.mxu0 %v9201_v56  ;;  %v9754_v56 = vld [vmem:[#allocation130_spill] sm:$0xff] }
 0x8b0   :  { %5036 = vmatpush.msra.mxu1 %v9203_v19  ;;  %5056 = vmatpush.msra.mxu2 %v9205_v5 }
 0x8b1   :  { %5076 = vmatpush.msra.mxu3 %v9207_v14  ;;  %5017 = vmatpush.msrb.mxu0 %v9209_v7 }
 0x8b2   :  { %5037 = vmatpush.msra.mxu1 %v9212_v6  ;;  %5057 = vmatpush.msra.mxu2 %v9214_v13 }
 0x8b3   :  { %5077 = vmatpush.msra.mxu3 %v9218_v22  ;;  %5018 = vmatpush.msrb.mxu0 %v9220_v9 }
 0x8b4   :  { %5038 = vmatpush.msra.mxu1 %v9224_v35  ;;  %5058 = vmatpush.msra.mxu2 %v9226_v4 }
 0x8b5   :  { %5078 = vmatpush.msra.mxu3 %v9230_v39  ;;  %5019 = vmatpush.msrb.mxu0 %v9232_v28 }
 0x8b6   :  { %5039 = vmatpush.msra.mxu1 %v9236_v26  ;;  %5059 = vmatpush.msra.mxu2 %v9238_v48 }
 0x8b7   :  { %5079 = vmatpush.msra.mxu3 %v9242_v11  ;;  %5020 = vmatpush.msrb.mxu0 %v9246_v10  ;;  %v4791_v11 = vld [vmem:[#allocation11] sm:$0xf]  ;;  %v9755_v10 = vld [vmem:[#allocation74_spill] sm:$0xff] }
 0x8b8   :  { %5040 = vmatpush.msra.mxu1 %v9250_v30  ;;  %5060 = vmatpush.msra.mxu2 %v9252_v8  ;;  %v4793_v30 = vperm.slane %v4791_v11, 0  ;;  %v9756_v8 = vld [vmem:[#allocation136_spill] sm:$0xff] }
 0x8b9   :  { %5080 = vmatpush.msra.mxu3 %v9256_v42  ;;  %5021 = vmatpush.msrb.mxu0 %v9258_v2  ;;  %v4794_v2 = vperm.slane %v4791_v11, 1 }
 0x8ba   :  { %5041 = vmatpush.msra.mxu1 %v9262_v57  ;;  %5061 = vmatpush.msra.mxu2 %v9264_v24 }
 0x8bb   :  { %5081 = vmatpush.msra.mxu3 %v9268_v18  ;;  %5022 = vmatpush.msrb.mxu0 %v9270_v27 }
 0x8bc   :  { %5042 = vmatpush.msra.mxu1 %v9274_v61  ;;  %5062 = vmatpush.msra.mxu2 %v9278_v0 }
 0x8bd   :  { %5082 = vmatpush.msra.mxu3 %v9280_v63  ;;  %5023 = vmatpush.msrb.mxu0 %v9284_v52 }
 0x8be   :  { %5043 = vmatpush.msra.mxu1 %v9286_v49  ;;  %5063 = vmatpush.msra.mxu2 %v9290_v53  ;;  %v9757_v49 = vld [vmem:[#allocation126_spill] sm:$0xff] }
 0x8bf   :  { %5083 = vmatpush.msra.mxu3 %v9292_v23  ;;  %5024 = vmatpush.msrb.mxu0 %v9296_v21  ;;  %v4796_v21 = vperm.slane %v4791_v11, 3 }
 0x8c0   :  { %5044 = vmatpush.msra.mxu1 %v9300_v41  ;;  %5064 = vmatpush.msra.mxu2 %v9302_v45 }
 0x8c1   :  { %5084 = vmatpush.msra.mxu3 %v9306_v16  ;;  %5025 = vmatpush.msrb.mxu0 %v9308_v37 }
 0x8c2   :  { %5045 = vmatpush.msra.mxu1 %v9312_v50  ;;  %5065 = vmatpush.msra.mxu2 %v9314_v12 }
 0x8c3   :  { %5085 = vmatpush.msra.mxu3 %v9318_v1  ;;  %5026 = vmatpush.msrb.mxu0 %v9320_v51 }
 0x8c4   :  { %5046 = vmatpush.msra.mxu1 %v9324_v29  ;;  %5066 = vmatpush.msra.mxu2 %v9326_v38 }
 0x8c5   :  { %5086 = vmatpush.msra.mxu3 %v9330_v58  ;;  %5027 = vmatpush.msrb.mxu0 %v9332_v59  ;;  %v9758_v58 = vld [vmem:[#allocation133_spill] sm:$0xff] }
 0x8c6   :  { %5047 = vmatpush.msra.mxu1 %v9336_v33  ;;  %5067 = vmatpush.msra.mxu2 %v9338_v40  ;;  %v4795_v33 = vperm.slane %v4791_v11, 2 }
 0x8c7   :  { %5087 = vmatpush.msra.mxu3 %v9342_v44  ;;  %5028 = vmatpush.msrb.mxu0 %v9344_v54 }
 0x8c8   :  { %5048 = vmatpush.msra.mxu1 %v9348_v34  ;;  %5068 = vmatpush.msra.mxu2 %v9350_v36 }
 0x8c9   :  { %5088 = vmatpush.msra.mxu3 %v9354_v60  ;;  %5029 = vmatpush.msrb.mxu0 %v9356_v55 }
 0x8ca   :  { %5049 = vmatpush.msra.mxu1 %v9360_v15  ;;  %5069 = vmatpush.msra.mxu2 %v9362_v43 }
 0x8cb   :  { %5089 = vmatpush.msra.mxu3 %v9366_v47  ;;  %5030 = vmatpush.msrb.mxu0 %v9754_v56 }
 0x8cc   :  { %5050 = vmatpush.msra.mxu1 %v9372_v31  ;;  %5070 = vmatpush.msra.mxu2 %v9374_v25 }
 0x8cd   :  { %5090 = vmatpush.msra.mxu3 %v9378_v46  ;;  %5031 = vmatpush.msrb.mxu0 %v9380_v17 }
 0x8ce   :  { %5051 = vmatpush.msra.mxu1 %v9384_v20  ;;  %5071 = vmatpush.msra.mxu2 %v9386_v32 }
 0x8cf   :  { %5091 = vmatpush.msra.mxu3 %v9390_v62 }
 0x8ed   :  { %v4705_v19 = vpop.f32.mrf.mxu1 }
 0x8ee   :  { %v4692_v5 = vpop.f32.mrf.mxu0 }
 0x8ef   :  { %v4706_v48 = vadd.f32 %v4705_v19, %v4692_v5 }
 0x8f1   :  { %v4787_v62 = vadd.f32 %v4706_v48, %v9755_v10 }
 0x8f3   :  { %v9463_v18 = vadd.f32 %v4793_v30, %v4787_v62 }
 0x8f5   :  { %v4707_v14 = vpop.f32.mrf.mxu1  ;;  %v4731_v7 = vpop.f32.mrf.mxu3 }
 0x8f6   :  { %v4718_v6 = vpop.f32.mrf.mxu2  ;;  %v4694_v13 = vpop.f32.mrf.mxu0 }
 0x8f7   :  { %v4732_v20 = vadd.f32 %v4731_v7, %v4718_v6 }
 0x8f9   :  { %v4788_v42 = vadd.f32 %v4732_v20, %v9756_v8 }
 0x8fb   :  { %v9465_v61 = vadd.f32 %v4794_v2, %v4788_v42 }
 0x8fd   :  { %v4733_v22 = vpop.f32.mrf.mxu3 }
 0x8fe   :  { %v4720_v9 = vpop.f32.mrf.mxu2 }
 0x908   :  { %v4744_v35 = vpop.f32.mrf.mxu0 }
 0x909   :  { %v4757_v4 = vpop.f32.mrf.mxu1 }
 0x90a   :  { %v4758_v50 = vadd.f32 %v4757_v4, %v4744_v35 }
 0x90c   :  { %v4789_v59 = vadd.f32 %v4758_v50, %v9758_v58  ;;  %v5187_v50 = vld [vmem:[%s9554_s6 + $0x40] sm:$0xff]  ;;  %v5185_v58 = vld [vmem:[%s9554_s6 + $0x30] sm:$0xff] }
 0x90e   :  { %v9474_v44 = vadd.f32 %v4795_v33, %v4789_v59  ;;  %v5184_v59 = vld [vmem:[%s9554_s6 + $0x28] sm:$0xff]  ;;  %v5183_v33 = vld [vmem:[%s9554_s6 + $0x20] sm:$0xff] }
 0x910   :  { %v4746_v39 = vpop.f32.mrf.mxu0  ;;  %v4770_v17 = vpop.f32.mrf.mxu2 }
 0x911   :  { %v4759_v28 = vpop.f32.mrf.mxu1 }
 0x918   :  { %v4772_v57 = vpop.f32.mrf.mxu2 }
 0x91d   :  { %v4783_v26 = vpop.f32.mrf.mxu3 }
 0x91e   :  { %v4784_v24 = vadd.f32 %v4783_v26, %v4770_v17 }
 0x920   :  { %v4790_v53 = vadd.f32 %v4784_v24, %v9757_v49  ;;  %v5190_v49 = vld [vmem:[%s9554_s6 + $0x58] sm:$0xff] }
 0x922   :  { %v9470_v45 = vadd.f32 %v4796_v21, %v4790_v53  ;;  %v5189_v53 = vld [vmem:[%s9554_s6 + $0x50] sm:$0xff] }
 0x925   :  { %v4785_v32 = vpop.f32.mrf.mxu3 }
 0x92a   :  { %v4886_v27 = vpop.f32.mrf.mxu0 }
 0x92b   :  { %v4949_v0 = vadd.f32 %v4886_v27, %v9463_v18  ;;  %v4906_v63 = vpop.f32.mrf.mxu1  ;;  %v5194_v27 = vld [vmem:[%s9554_s6 + $0x78] sm:$0xff] }
 0x92c   :  { %v4950_v52 = vadd.f32 %v4906_v63, %v9465_v61  ;;  %5199 = vmatpush.msra.mxu0 %v5194_v27  ;;  %v5192_v63 = vld [vmem:[%s9554_s6 + $0x68] sm:$0xff] }
 0x92d   :  { %v7429_v23 = vmul.f32 -1.442695, %v4949_v0  ;;  %v5193_v0 = vld [vmem:[%s9554_s6 + $0x70] sm:$0xff] }
 0x92e   :  { %v7430_v41 = vmul.f32 -1.442695, %v4950_v52  ;;  %5200 = vmatpush.msra.mxu0 %v5193_v0  ;;  %v5191_v52 = vld [vmem:[%s9554_s6 + $0x60] sm:$0xff] }
 0x92f   :  { %7987 = vpow2.f32 %v7429_v23 }
 0x930   :  { %7989 = vpow2.f32 %v7430_v41  ;;  %5201 = vmatpush.msra.mxu0 %v5192_v63  ;;  %v5188_v41 = vld [vmem:[%s9554_s6 + $0x48] sm:$0xff] }
 0x931   :  { %v4926_v40 = vpop.f32.mrf.mxu2 }
 0x932   :  { %v4946_v16 = vpop.f32.mrf.mxu3  ;;  %v4951_v36 = vadd.f32 %v4926_v40, %v9474_v44  ;;  %5202 = vmatpush.msra.mxu0 %v5191_v52 }
 0x933   :  { %v4952_v37 = vadd.f32 %v4946_v16, %v9470_v45 }
 0x934   :  { %5203 = vmatpush.msra.mxu0 %v5190_v49 }
 0x935   :  { %v7988_v12 = vpop.eup %7987  ;;  %v7431_v1 = vmul.f32 -1.442695, %v4952_v37 }
 0x936   :  { %v7990_v51 = vpop.eup %7989  ;;  %v4956_v29 = vadd.f32 1.0, %v7988_v12  ;;  %5204 = vmatpush.msra.mxu0 %v5189_v53 }
 0x937   :  { %v4975_v38 = vadd.f32 1.0, %v7990_v51  ;;  %7991 = vpow2.f32 %v7431_v1  ;;  %v5186_v51 = vld [vmem:[%s9554_s6 + $0x38] sm:$0xff] }
 0x938   :  { %7993 = vrcp.f32 %v4956_v29  ;;  %v4968_v31 = vand.u32 2147483648, %v4956_v29  ;;  %v4966_v56 = vand.u32 2147483647, %v4956_v29  ;;  %vm4962_vm7 = vweird.f32 %v4956_v29  ;;  %5205 = vmatpush.msra.mxu0 %v5188_v41 }
 0x939   :  { %7995 = vrcp.f32 %v4975_v38  ;;  %v4987_v25 = vand.u32 2147483648, %v4975_v38  ;;  %v4985_v5 = vand.u32 2147483647, %v4975_v38  ;;  %vm4981_vm8 = vweird.f32 %v4975_v38 }
 0x93a   :  { %v4969_v6 = vor.u32 1.1754944e-38, %v4968_v31  ;;  %vm4967_vm10 = vcmp.eq.f32.partialorder %v4966_v56, 8.507059e+37  ;;  %5206 = vmatpush.msra.mxu0 %v5187_v50 }
 0x93b   :  { %v4988_v22 = vor.u32 1.1754944e-38, %v4987_v25  ;;  %vm4986_vm12 = vcmp.eq.f32.partialorder %v4985_v5, 8.507059e+37  ;;  %v5223_v25 = vld [vmem:[%s9556_s8 + $0x18] sm:$0xff] }
 0x93c   :  { %5207 = vmatpush.msra.mxu0 %v5186_v51  ;;  %5241 = vmatpush.msrb.mxu1 %v5223_v25  ;;  %v5221_v51 = vld [vmem:[%s9556_s8 + $0x8] sm:$0xff] }
 0x93d   :  { %v7992_v54 = vpop.eup %7991 }
 0x93e   :  { %v7994_v34 = vpop.eup %7993  ;;  %v4995_v60 = vadd.f32 1.0, %v7992_v54  ;;  %5208 = vmatpush.msra.mxu0 %v5185_v58  ;;  %v5182_v54 = vld [vmem:[%s9554_s6 + $0x18] sm:$0xff] }
 0x93f   :  { %v7996_v55 = vpop.eup %7995  ;;  %v4958_v15 = vmul.f32 %v7994_v34, %v4956_v29  ;;  %vm4963_vm5 = vweird.f32 %v7994_v34 }
 0x940   :  { %v4977_v43 = vmul.f32 %v7996_v55, %v4975_v38  ;;  %7997 = vrcp.f32 %v4995_v60  ;;  %vm4982_vm6 = vweird.f32 %v7996_v55  ;;  %vm4964_vm9 = vmor %vm4962_vm7, %vm4963_vm5  ;;  %v5007_v62 = vand.u32 2147483648, %v4995_v60  ;;  %5209 = vmatpush.msra.mxu0 %v5184_v59 }
 0x941   :  { %v4959_v47 = vsub.f32 1.0, %v4958_v15  ;;  %7999 = vtanh.f32 %v4951_v36  ;;  %vm4983_vm11 = vmor %vm4981_vm8, %vm4982_vm6  ;;  %vm5001_vm14 = vweird.f32 %v4995_v60  ;;  %v5005_v30 = vand.u32 2147483647, %v4995_v60  ;;  %v5181_v36 = vld [vmem:[%s9554_s6 + $0x10] sm:$0xff] }
 0x942   :  { %v4978_v3 = vsub.f32 1.0, %v4977_v43  ;;  %v5008_v42 = vor.u32 1.1754944e-38, %v5007_v62  ;;  %5210 = vmatpush.msra.mxu0 %v5183_v33  ;;  %v5180_v43 = vld [vmem:[%s9554_s6 + $0x8] sm:$0xff] }
 0x943   :  { %v4960_v46 = vmul.f32 %v7994_v34, %v4959_v47  ;;  %vm5006_vm0 = vcmp.eq.f32.partialorder %v5005_v30, 8.507059e+37 }
 0x944   :  { %v4979_v19 = vmul.f32 %v7996_v55, %v4978_v3  ;;  %5211 = vmatpush.msra.mxu0 %v5182_v54  ;;  %v5179_v3 = vld [vmem:[%s9554_s6] sm:$0xff] }
 0x945   :  { %v4961_v14 = vadd.f32 %v7994_v34, %v4960_v46  ;;  %v5222_v46 = vld [vmem:[%s9556_s8 + $0x10] sm:$0xff] }
 0x946   :  { %v7998_v7 = vpop.eup %7997  ;;  %v4980_v13 = vadd.f32 %v7996_v55, %v4979_v19  ;;  %5212 = vmatpush.msra.mxu0 %v5181_v36  ;;  %5242 = vmatpush.msrb.mxu1 %v5222_v46 }
 0x947   :  { %v4965_v9 = vsel %vm4964_vm9, %v7994_v34, %v4961_v14  ;;  %v4997_v35 = vmul.f32 %v7998_v7, %v4995_v60  ;;  %v8000_v4 = vpop.eup %7999  ;;  %vm5002_vm13 = vweird.f32 %v7998_v7 }
 0x948   :  { %v4970_v39 = vsel %vm4967_vm10, %v4969_v6, %v4965_v9  ;;  %v4984_v28 = vsel %vm4983_vm11, %v7996_v55, %v4980_v13  ;;  %vm5003_vm15 = vmor %vm5001_vm14, %vm5002_vm13  ;;  %5213 = vmatpush.msra.mxu0 %v5180_v43  ;;  %5243 = vmatpush.msrb.mxu1 %v5221_v51  ;;  %vm5225_vm13 = vcmask 261120   ;;  %vm5249_vm14 = vcmask 0  }
 0x949   :  { %v4989_v26 = vsel %vm4986_vm12, %v4988_v22, %v4984_v28  ;;  %v5012_v17 = vmul.f32 %v8000_v4, %v4970_v39  ;;  %v4998_v48 = vsub.f32 1.0, %v4997_v35 }
 0x94a   :  { %v5011_v20 = vmul.f32 0.0, %v4989_v26  ;;  %5214 = vmatpush.msra.mxu0 %v5179_v3 }
 0x94b   :  { %v4999_v11 = vmul.f32 %v7998_v7, %v4998_v48 }
 0x94c   :  { %v9477_v32 = vadd.f32 %v5012_v17, %v5011_v20 }
 0x94d   :  { %v5000_v10 = vadd.f32 %v7998_v7, %v4999_v11 }
 0x94e   :  { %8001 = vtanh.f32 %v9477_v32  ;;  %v5171_v62 = vrot.slane %v9477_v32, 7 }
 0x94f   :  { %v5004_v8 = vsel %vm5003_vm15, %v7998_v7, %v5000_v10 }
 0x950   :  { %v5009_v57 = vsel %vm5006_vm0, %v5008_v42, %v5004_v8 }
 0x954   :  { %v8002_v2 = vpop.eup %8001 }
 0x955   :  { %v5015_v24 = vmul.f32 %v8002_v2, %v5009_v57 }
 0x957   :  { %5032 = vmatmul.f32.vlgmr.msrb.gmra.mxu0 %v5015_v24  ;;  %5052 = vmatmul.f32.vlgmr.msra.gmra.mxu1 %v5015_v24 }
 0x958   :  { %5072 = vmatmul.f32.vlgmr.msra.gmra.mxu2 %v5015_v24  ;;  %5092 = vmatmul.f32.vlgmr.msra.gmra.mxu3 %v5015_v24 }
 0x9d4   :  { %v5033_v23 = vpop.f32.mrf.mxu0  ;;  %v5053_v21 = vpop.f32.mrf.mxu1 }
 0x9d5   :  { %v5100_v16 = vrot.slane %v5033_v23, 7  ;;  %v5101_v37 = vrot.slane %v5053_v21, 7 }
 0x9d7   :  { %v5108_v12 = vadd.f32 %v5100_v16, %v9463_v18  ;;  %v5109_v1 = vadd.f32 %v5101_v37, %v9465_v61 }
 0x9d9   :  { %v7432_v29 = vmul.f32 -1.442695, %v5108_v12  ;;  %v7433_v38 = vmul.f32 -1.442695, %v5109_v1 }
 0x9db   :  { %8003 = vpow2.f32 %v7432_v29  ;;  %v5093_v18 = vpop.f32.mrf.mxu3  ;;  %v5073_v47 = vpop.f32.mrf.mxu2  ;;  %v5220_v29 = vld [vmem:[%s9556_s8] sm:$0xff] }
 0x9dc   :  { %8005 = vpow2.f32 %v7433_v38  ;;  %v5103_v61 = vrot.slane %v5093_v18, 7  ;;  %v5102_v31 = vrot.slane %v5073_v47, 7  ;;  %5244 = vmatpush.msrb.mxu1 %v5220_v29  ;;  %v5195_v38 = vld [vmem:[#allocation12] sm:$0x1] }
 0x9de   :  { %v5111_v40 = vadd.f32 %v5103_v61, %v9470_v45  ;;  %v5110_v14 = vadd.f32 %v5102_v31, %v9474_v44  ;;  %v5224_v61 = vld [vmem:[#allocation5] sm:$0x1] }
 0x9e0   :  { %v7434_v34 = vmul.f32 -1.442695, %v5111_v40 }
 0x9e1   :  { %v8004_v60 = vpop.eup %8003 }
 0x9e2   :  { %v8006_v55 = vpop.eup %8005  ;;  %v5115_v15 = vadd.f32 1.0, %v8004_v60  ;;  %8007 = vpow2.f32 %v7434_v34 }
 0x9e3   :  { %v5134_v45 = vadd.f32 1.0, %v8006_v55 }
 0x9e4   :  { %8009 = vrcp.f32 %v5115_v15  ;;  %v5127_v35 = vand.u32 2147483648, %v5115_v15  ;;  %v5125_v28 = vand.u32 2147483647, %v5115_v15  ;;  %vm5121_vm3 = vweird.f32 %v5115_v15 }
 0x9e5   :  { %8011 = vrcp.f32 %v5134_v45  ;;  %v5146_v4 = vand.u32 2147483648, %v5134_v45  ;;  %v5144_v17 = vand.u32 2147483647, %v5134_v45  ;;  %vm5140_vm4 = vweird.f32 %v5134_v45 }
 0x9e6   :  { %v5128_v44 = vor.u32 1.1754944e-38, %v5127_v35  ;;  %vm5126_vm6 = vcmp.eq.f32.partialorder %v5125_v28, 8.507059e+37 }
 0x9e7   :  { %v5147_v30 = vor.u32 1.1754944e-38, %v5146_v4  ;;  %vm5145_vm8 = vcmp.eq.f32.partialorder %v5144_v17, 8.507059e+37 }
 0x9e8   :  { %v8008_v56 = vpop.eup %8007 }
 0x9e9   :  { %v5154_v19 = vadd.f32 1.0, %v8008_v56 }
 0x9ea   :  { %v8010_v5 = vpop.eup %8009 }
 0x9eb   :  { %v8012_v7 = vpop.eup %8011  ;;  %v5117_v6 = vmul.f32 %v8010_v5, %v5115_v15  ;;  %8013 = vrcp.f32 %v5154_v19  ;;  %vm5122_vm1 = vweird.f32 %v8010_v5  ;;  %v5166_v23 = vand.u32 2147483648, %v5154_v19 }
 0x9ec   :  { %v5136_v13 = vmul.f32 %v8012_v7, %v5134_v45  ;;  %8015 = vtanh.f32 %v5110_v14  ;;  %vm5141_vm2 = vweird.f32 %v8012_v7  ;;  %vm5123_vm5 = vmor %vm5121_vm3, %vm5122_vm1  ;;  %vm5160_vm10 = vweird.f32 %v5154_v19 }
 0x9ed   :  { %v5118_v22 = vsub.f32 1.0, %v5117_v6  ;;  %vm5142_vm7 = vmor %vm5140_vm4, %vm5141_vm2  ;;  %v5164_v32 = vand.u32 2147483647, %v5154_v19  ;;  %v5167_v41 = vor.u32 1.1754944e-38, %v5166_v23 }
 0x9ee   :  { %v5137_v9 = vsub.f32 1.0, %v5136_v13 }
 0x9ef   :  { %v5119_v39 = vmul.f32 %v8010_v5, %v5118_v22  ;;  %vm5165_vm12 = vcmp.eq.f32.partialorder %v5164_v32, 8.507059e+37 }
 0x9f0   :  { %v5138_v26 = vmul.f32 %v8012_v7, %v5137_v9 }
 0x9f1   :  { %v8014_v48 = vpop.eup %8013  ;;  %v5120_v20 = vadd.f32 %v8010_v5, %v5119_v39 }
 0x9f2   :  { %v5139_v11 = vadd.f32 %v8012_v7, %v5138_v26  ;;  %v5156_v10 = vmul.f32 %v8014_v48, %v5154_v19  ;;  %v8016_v42 = vpop.eup %8015  ;;  %vm5161_vm9 = vweird.f32 %v8014_v48 }
 0x9f3   :  { %v5124_v8 = vsel %vm5123_vm5, %v8010_v5, %v5120_v20  ;;  %vm5162_vm11 = vmor %vm5160_vm10, %vm5161_vm9 }
 0x9f4   :  { %v5129_v2 = vsel %vm5126_vm6, %v5128_v44, %v5124_v8  ;;  %v5143_v57 = vsel %vm5142_vm7, %v8012_v7, %v5139_v11  ;;  %v5157_v24 = vsub.f32 1.0, %v5156_v10 }
 0x9f5   :  { %v5148_v27 = vsel %vm5145_vm8, %v5147_v30, %v5143_v57  ;;  %v5174_v0 = vmul.f32 %v8016_v42, %v5129_v2 }
 0x9f6   :  { %v5173_v63 = vmul.f32 %v5171_v62, %v5148_v27  ;;  %v5158_v52 = vmul.f32 %v8014_v48, %v5157_v24 }
 0x9f8   :  { %v5175_v49 = vadd.f32 %v5174_v0, %v5173_v63  ;;  %v5159_v53 = vadd.f32 %v8014_v48, %v5158_v52 }
 0x9fa   :  { %8017 = vtanh.f32 %v5175_v49  ;;  %v5163_v21 = vsel %vm5162_vm11, %v8014_v48, %v5159_v53 }
 0x9fb   :  { %v5168_v37 = vsel %vm5165_vm12, %v5167_v41, %v5163_v21 }
 0xa00   :  { %v8018_v16 = vpop.eup %8017 }
 0xa01   :  { %v5177_v50 = vmul.f32 %v8018_v16, %v5168_v37 }
 0xa03   :  { %v5178_v12 = vmax.f32 %v5177_v50, 0.0 }
 0xa05   :  { %v5197_v1 = vrot.slane %v5178_v12, 1 }
 0xa07   :  { %5215 = vmatmul.f32.vlgmr.msra.gmra.mxu0 %v5197_v1 }
 0xa84   :  { %v5216_v58 = vpop.f32.mrf.mxu0 }
 0xa85   :  { %v5217_v59 = vadd.f32 %v5216_v58, %v5195_v38 }
 0xa87   :  { %v5219_v18 = vmax.f32 %v5217_v59, 0.0 }
 0xa89   :  { %7435 = vmatmul.msk.f32.vlgmr.msrb.gmra.mxu1 %vm5225_vm13, %v5219_v18 }
 0xb06   :  { %v5246_v33 = vpop.f32.mrf.mxu1 }
 0xb07   :  { %v5247_v40 = vadd.f32 %v5246_v33, %v5224_v61 }
 0xb09   :  { %5250 = vst.msk [vmem:[#allocation14] sm:$0x1] %vm5249_vm14, %v5247_v40 }
 0xb0a   :  { %5261 = dma.vmem_to_hbm [thread:$0]  %s5257_s17, 16, %s5259_s20, [#allocation8]  }
 0xb0b   :  { %8353 = dma.done.wait [#allocation8], 16  }
 0xb0c   :  { %8354 = vsyncadd [#allocation8], 4294967280 }
 0xb0d   :  { %5266 = vsyncpa [#allocation7], 1 }
 0xb0e   :  { %5267 = vsyncpa [#allocation10], 1 }
 0xb0f   :  { %5268 = vsyncpa [#allocation13], 1 }
 0xb10   :  { %5269 = vsyncpa [#allocation8], 1 }
 0xb11   :  { %5270 = vsyncmov [#allocation4] }
 0xb14   :  { %s5271_s8 = vpop.sfrf %5270 }
 0xb15   :  { %p7436_p0 = scmp.ne.s32.totalorder %s5271_s8, 0 }
 0xb17   :  { %5275 = shalt.err (%p7436_p0)  }
 0xb18   :  { %5277 = vsyncmov [#allocation4 + $0x1] }
 0xb1b   :  { %s5278_s21 = vpop.sfrf %5277 }
 0xb1c   :  { %p7437_p1 = scmp.ne.s32.totalorder %s5278_s21, 0 }
 0xb1e   :  { %5282 = shalt.err (%p7437_p1)  }
 0xb1f   :  { %5284 = vsyncmov [#allocation4 + $0x2] }
 0xb22   :  { %s5285_s10 = vpop.sfrf %5284 }
 0xb23   :  { %p7438_p2 = scmp.ne.s32.totalorder %s5285_s10, 0 }
 0xb25   :  { %5289 = shalt.err (%p7438_p2)  }
 0xb26   :  { %5291 = vsyncmov [#allocation4 + $0x3] }
 0xb29   :  { %s5292_s22 = vpop.sfrf %5291 }
 0xb2a   :  { %p7439_p3 = scmp.ne.s32.totalorder %s5292_s22, 0 }
 0xb2c   :  { %5296 = shalt.err (%p7439_p3)  }
 0xb2d   :  { %5298 = vsyncmov [#allocation4 + $0x4] }
 0xb30   :  { %s5299_s23 = vpop.sfrf %5298 }
 0xb31   :  { %p7440_p4 = scmp.ne.s32.totalorder %s5299_s23, 0 }
 0xb33   :  { %5303 = shalt.err (%p7440_p4)  }
 0xb34   :  { %5305 = vsyncmov [#allocation4 + $0x5] }
 0xb37   :  { %s5306_s9 = vpop.sfrf %5305 }
 0xb38   :  { %p7441_p5 = scmp.ne.s32.totalorder %s5306_s9, 0 }
 0xb3a   :  { %5310 = shalt.err (%p7441_p5)  }
 0xb3b   :  { %5312 = vsyncmov [#allocation4 + $0x6] }
 0xb3e   :  { %s5313_s25 = vpop.sfrf %5312 }
 0xb3f   :  { %p7442_p6 = scmp.ne.s32.totalorder %s5313_s25, 0 }
 0xb41   :  { %5317 = shalt.err (%p7442_p6)  }
 0xb42   :  { %5319 = vsyncmov [#allocation4 + $0x7] }
 0xb45   :  { %s5320_s1 = vpop.sfrf %5319 }
 0xb46   :  { %p7443_p7 = scmp.ne.s32.totalorder %s5320_s1, 0 }
 0xb48   :  { %5324 = shalt.err (%p7443_p7)  }

</bundles_post_ra>
